<compile_context>
chip_gen: v5e
topology: v5e:2x2
jax: 0.10.0
libtpu: 0.0.40
codegen_flags: <defaults>
</compile_context>

<pallas_src>
import math
import functools

import numpy as np
import jax
import jax.numpy as jnp
from jax.experimental import pallas as pl
from jax.experimental.pallas import tpu as pltpu


# Degree-9 odd minimax coefficients for sin on [-pi/2, pi/2] (SLEEF sinf).
_SIN_C3 = -0.166666597127914428710938
_SIN_C5 = 0.00833307858556509017944336
_SIN_C7 = -0.0001981069071916863322258
_SIN_C9 = 2.6083159809786593541503e-06


def _sin_bounded(t):
    """sin(t) for moderate |t| (normalize=True path: |t| <~ scale + pi/2).

    Fold with k = round(t/pi), r = t - k*pi in [-pi/2, pi/2], then a degree-9 odd
    polynomial and a (-1)^k sign flip.  ~1e-6 absolute accuracy for |k| up to a few
    hundred (single-constant reduction error ~|k|*8.7e-8) -- far cheaper on the VPU
    than the generic full-range jnp.sin expansion.
    """
    k = jnp.floor(t * np.float32(1.0 / math.pi) + np.float32(0.5))   # round(t / pi)
    r = t - k * np.float32(math.pi)                                  # r in [-pi/2, pi/2]
    s = r * r
    p = np.float32(_SIN_C9)
    p = p * s + np.float32(_SIN_C7)
    p = p * s + np.float32(_SIN_C5)
    p = p * s + np.float32(_SIN_C3)
    sin_r = r + r * (s * p)
    odd = (k.astype(jnp.int32) & 1) == 1                             # parity of k
    return jnp.where(odd, -sin_r, sin_r)


def _sine_expand_kernel(yx_ref, out_ref, *, npf, neg2logt_over_npf, use_fast_sin):
    # yx_ref:  (1, 2, THW)  row 0 = y cumulative embedding, row 1 = x cumulative embedding
    # out_ref: (1, 2*npf, THW)
    #
    # Per-channel constants rebuilt in-register each grid step (a handful of vregs --
    # cheaper than two extra DMA'd / double-buffered VMEM operands).
    ch = jax.lax.broadcasted_iota(jnp.int32, (npf, 1), 0).astype(jnp.float32)
    half = jnp.floor(ch * 0.5)
    inv_dim = jnp.exp(half * np.float32(neg2logt_over_npf))     # 1 / dim_t[c]  (npf, 1)
    phase = (ch - 2.0 * half) * np.float32(math.pi / 2.0)       # 0 (sin) / pi/2 (cos)

    yx = yx_ref[0]                                              # (2, THW)
    sin_fn = _sin_bounded if use_fast_sin else jnp.sin

    # (1, THW) * (npf, 1) -> (npf, THW): sublane-broadcast of the embed row,
    # lane-broadcast of the per-channel constants; one sin per output element.
    out_ref[0, :npf, :] = sin_fn(yx[0:1, :] * inv_dim + phase).astype(out_ref.dtype)  # pos_y
    out_ref[0, npf:, :] = sin_fn(yx[1:2, :] * inv_dim + phase).astype(out_ref.dtype)  # pos_x


def position_embedding_sine(x, mask, *, num_pos_feats=64, temperature=10000,
                            normalize=False, scale=None, out_dtype=jnp.float32):
    """Pallas implementation of PositionEmbeddingSine.forward.

    x:    (B, C_in, H, W) image tensor (only used for shape consistency, like PyTorch).
    mask: (B, H, W) bool, True at padded positions.
    Returns pos: (B, 2*num_pos_feats, H, W), dtype `out_dtype` (f32 default = PyTorch
    parity; bf16 opt-in halves HBM write traffic).
    """
    if scale is not None and not normalize:
        raise ValueError('normalize should be True if scale is passed')
    if scale is None:
        scale = 2 * math.pi

    B, H, W = mask.shape
    assert x.shape[0] == B and x.shape[2] == H and x.shape[3] == W
    npf = num_pos_feats
    # npf % 8 != 0 is still correct but produces sublane-misaligned (masked) stores.
    C = 2 * npf
    HW = H * W

    # --- tiny O(B*H*W) preprocessing in the wrapper (matches torch.cumsum order) ---
    not_mask = jnp.logical_not(mask).astype(jnp.float32)
    y_embed = jnp.cumsum(not_mask, axis=1)
    x_embed = jnp.cumsum(not_mask, axis=2)
    if normalize:
        eps = 1e-6
        y_embed = y_embed / (y_embed[:, -1:, :] + eps) * scale
        x_embed = x_embed / (x_embed[:, :, -1:] + eps) * scale
    # Single (B, 2, HW) operand: one DMA per grid step, better sublane packing.
    embed = jnp.stack([y_embed.reshape(B, HW), x_embed.reshape(B, HW)], axis=1)

    # --- spatial tiling: lane-dense 128-wide stores, bounded VMEM ---
    # 8192 lanes -> 4 MiB f32 output block (8 MiB double-buffered): fits v5e's 16 MiB
    # scoped default and stays <= the 8 MiB/block guidance for v7x's 64 MiB VMEM, while
    # amortizing the ~0.35 us per-grid-step overhead.
    MAX_TILE = 8192
    thw = HW if HW <= MAX_TILE else MAX_TILE
    S = pl.cdiv(HW, thw)
    # v7x megacore: guarantee >= 2 parallel grid steps so both TensorCores get work.
    if B * S < 2 and HW >= 256:
        thw = ((-(-HW // 2)) + 127) // 128 * 128
        S = pl.cdiv(HW, thw)

    kernel = functools.partial(
        _sine_expand_kernel,
        npf=npf,
        neg2logt_over_npf=-2.0 * math.log(float(temperature)) / npf,
        # normalize=True bounds the sin argument to ~[0, scale + pi/2]; normalize=False
        # keeps jnp.sin's full range reduction (unbounded cumsum arguments).
        use_fast_sin=bool(normalize),
    )

    out_flat = pl.pallas_call(
        kernel,
        out_shape=jax.ShapeDtypeStruct((B, C, HW), out_dtype),
        grid_spec=pltpu.PrefetchScalarGridSpec(
            num_scalar_prefetch=0,
            grid=(B, S),
            in_specs=[
                pl.BlockSpec((1, 2, thw), lambda b, s: (b, 0, s)),   # y/x cumsum tile
            ],
            out_specs=pl.BlockSpec((1, C, thw), lambda b, s: (b, 0, s)),
        ),
        compiler_params=pltpu.CompilerParams(
            dimension_semantics=("parallel", "parallel"),
            vmem_limit_bytes=32 * 1024 * 1024,
        ),
        cost_estimate=pl.CostEstimate(
            flops=2 * B * C * HW,
            transcendentals=B * C * HW,
            bytes_accessed=out_dtype.dtype.itemsize * B * C * HW + 2 * 4 * B * HW
            if hasattr(out_dtype, "dtype") else 4 * B * C * HW + 2 * 4 * B * HW,
        ),
    )(embed)

    # Free reshape (split of the minor dim) restores NCHW exactly like torch's permute.
    return out_flat.reshape(B, C, H, W)


def _reference_position_embedding_sine(mask, *, num_pos_feats=64, temperature=10000,
                                       normalize=False, scale=None):
    """Pure-JAX transcription of the PyTorch forward, for correctness checking."""
    if scale is None:
        scale = 2 * math.pi
    not_mask = jnp.logical_not(mask).astype(jnp.float32)
    y_embed = jnp.cumsum(not_mask, axis=1)
    x_embed = jnp.cumsum(not_mask, axis=2)
    if normalize:
        eps = 1e-6
        y_embed = y_embed / (y_embed[:, -1:, :] + eps) * scale
        x_embed = x_embed / (x_embed[:, :, -1:] + eps) * scale
    dim_t = jnp.arange(num_pos_feats, dtype=jnp.float32)
    dim_t = temperature ** (2 * jnp.floor(dim_t / 2) / num_pos_feats)
    pos_x = x_embed[:, :, :, None] / dim_t
    pos_y = y_embed[:, :, :, None] / dim_t
    B, H, W = mask.shape
    pos_x = jnp.stack((jnp.sin(pos_x[:, :, :, 0::2]),
                       jnp.cos(pos_x[:, :, :, 1::2])), axis=4).reshape(B, H, W, -1)
    pos_y = jnp.stack((jnp.sin(pos_y[:, :, :, 0::2]),
                       jnp.cos(pos_y[:, :, :, 1::2])), axis=4).reshape(B, H, W, -1)
    pos = jnp.concatenate((pos_y, pos_x), axis=3).transpose(0, 3, 1, 2)
    return pos


if __name__ == "__main__":
    key = jax.random.PRNGKey(0)

    B, C_in, H, W = 2, 4, 16, 16
    num_pos_feats = 64

    x = jax.random.normal(key, (B, C_in, H, W), dtype=jnp.float32)

    # Deterministic padding masks: batch 0 fully valid, batch 1 valid in a 12x10 window.
    h_idx = jnp.arange(H)[None, :, None]
    w_idx = jnp.arange(W)[None, None, :]
    valid_h = jnp.array([H, 12])[:, None, None]
    valid_w = jnp.array([W, 10])[:, None, None]
    mask = jnp.logical_not((h_idx < valid_h) & (w_idx < valid_w))   # (B, H, W) bool

    # Default configuration (normalize=False): generic jnp.sin path.
    pos = position_embedding_sine(x, mask, num_pos_feats=num_pos_feats,
                                  temperature=10000, normalize=False)
    pos = jax.block_until_ready(pos)
    ref = _reference_position_embedding_sine(mask, num_pos_feats=num_pos_feats,
                                             temperature=10000, normalize=False)
    assert pos.shape == (B, 2 * num_pos_feats, H, W)
    assert jnp.allclose(pos, ref, atol=1e-4, rtol=1e-4)

    # normalize=True (DETR default usage): bounded-argument fast-sin path.
    pos_n = position_embedding_sine(x, mask, num_pos_feats=num_pos_feats,
                                    temperature=10000, normalize=True)
    pos_n = jax.block_until_ready(pos_n)
    ref_n = _reference_position_embedding_sine(mask, num_pos_feats=num_pos_feats,
                                               temperature=10000, normalize=True)
    assert jnp.allclose(pos_n, ref_n, atol=1e-4, rtol=1e-4)

    print("KERNEL_OK")
</pallas_src>

<mosaic_0001>
module attributes {stable_mosaic.version = 11 : i64} {
  func.func @_sine_expand_kernel(%arg0: i32, %arg1: i32, %arg2: memref<1x2x256xf32, #tpu.memory_space<vmem>>, %arg3: memref<1x128x256xf32, #tpu.memory_space<vmem>>) attributes {dimension_semantics = [#tpu.dimension_semantics<parallel>, #tpu.dimension_semantics<parallel>], iteration_bounds = array<i64: 2, 1>, scalar_prefetch = 0 : i64, scratch_operands = 0 : i64, tpu.core_type = #tpu.core_type<tc>, window_params = [{transform_indices = @transform_0, window_bounds = array<i64: 1, 2, 256>}, {transform_indices = @transform_1, window_bounds = array<i64: 1, 128, 256>}]} {
    %0 = tpu.iota {dimensions = array<i32: 0>} : vector<64x1xi32>
    %1 = arith.sitofp %0 : vector<64x1xi32> to vector<64x1xf32>
    %cst = arith.constant 5.000000e-01 : f32
    %2 = vector.broadcast %cst : f32 to vector<64x1xf32>
    %3 = arith.mulf %1, %2 : vector<64x1xf32>
    %4 = math.floor %3 : vector<64x1xf32>
    %cst_0 = arith.constant -0.287823141 : f32
    %5 = vector.broadcast %cst_0 : f32 to vector<64x1xf32>
    %6 = arith.mulf %4, %5 : vector<64x1xf32>
    %7 = math.exp %6 : vector<64x1xf32>
    %cst_1 = arith.constant 2.000000e+00 : f32
    %8 = vector.broadcast %cst_1 : f32 to vector<64x1xf32>
    %9 = arith.mulf %8, %4 : vector<64x1xf32>
    %10 = arith.subf %1, %9 : vector<64x1xf32>
    %cst_2 = arith.constant 1.57079637 : f32
    %11 = vector.broadcast %cst_2 : f32 to vector<64x1xf32>
    %12 = arith.mulf %10, %11 : vector<64x1xf32>
    %c0 = arith.constant 0 : index
    %c0_3 = arith.constant 0 : index
    %c0_4 = arith.constant 0 : index
    %13 = vector.load %arg2[%c0, %c0_3, %c0_4] : memref<1x2x256xf32, #tpu.memory_space<vmem>>, vector<1x2x256xf32>
    %14 = vector.shape_cast %13 : vector<1x2x256xf32> to vector<2x256xf32>
    %15 = vector.extract_strided_slice %14 {offsets = [0, 0], sizes = [1, 256], strides = [1, 1]} : vector<2x256xf32> to vector<1x256xf32>
    %16 = vector.broadcast %15 : vector<1x256xf32> to vector<64x256xf32>
    %17 = vector.broadcast %7 : vector<64x1xf32> to vector<64x256xf32>
    %18 = arith.mulf %16, %17 : vector<64x256xf32>
    %19 = vector.broadcast %12 : vector<64x1xf32> to vector<64x256xf32>
    %20 = arith.addf %18, %19 : vector<64x256xf32>
    %21 = math.sin %20 : vector<64x256xf32>
    %c0_5 = arith.constant 0 : index
    %c0_6 = arith.constant 0 : index
    %c0_7 = arith.constant 0 : index
    %22 = vector.load %arg3[%c0_5, %c0_6, %c0_7] : memref<1x128x256xf32, #tpu.memory_space<vmem>>, vector<1x64x256xf32>
    %23 = vector.shape_cast %22 : vector<1x64x256xf32> to vector<64x256xf32>
    %24 = vector.shape_cast %21 : vector<64x256xf32> to vector<1x64x256xf32>
    tpu.vector_store %arg3[%c0_5, %c0_6, %c0_7], %24 {strides = array<i32>} : memref<1x128x256xf32, #tpu.memory_space<vmem>>, vector<1x64x256xf32>,
    %25 = vector.extract_strided_slice %14 {offsets = [1, 0], sizes = [1, 256], strides = [1, 1]} : vector<2x256xf32> to vector<1x256xf32>
    %26 = vector.broadcast %25 : vector<1x256xf32> to vector<64x256xf32>
    %27 = vector.broadcast %7 : vector<64x1xf32> to vector<64x256xf32>
    %28 = arith.mulf %26, %27 : vector<64x256xf32>
    %29 = vector.broadcast %12 : vector<64x1xf32> to vector<64x256xf32>
    %30 = arith.addf %28, %29 : vector<64x256xf32>
    %31 = math.sin %30 : vector<64x256xf32>
    %c0_8 = arith.constant 0 : index
    %c64 = arith.constant 64 : index
    %c0_9 = arith.constant 0 : index
    %32 = vector.load %arg3[%c0_8, %c64, %c0_9] : memref<1x128x256xf32, #tpu.memory_space<vmem>>, vector<1x64x256xf32>
    %33 = vector.shape_cast %32 : vector<1x64x256xf32> to vector<64x256xf32>
    %34 = vector.shape_cast %31 : vector<64x256xf32> to vector<1x64x256xf32>
    tpu.vector_store %arg3[%c0_8, %c64, %c0_9], %34 {strides = array<i32>} : memref<1x128x256xf32, #tpu.memory_space<vmem>>, vector<1x64x256xf32>,
    return
  }
  func.func @transform_0(%arg0: i32, %arg1: i32) -> (i32, i32, i32) {
    %c0_i32 = arith.constant 0 : i32
    %c0_i32_0 = arith.constant 0 : i32
    return %arg0, %c0_i32, %arg1 : i32, i32, i32
  }
  func.func @transform_1(%arg0: i32, %arg1: i32) -> (i32, i32, i32) {
    %c0_i32 = arith.constant 0 : i32
    %c0_i32_0 = arith.constant 0 : i32
    return %arg0, %c0_i32, %arg1 : i32, i32, i32
  }
}

</mosaic_0001>

<bundles_post_ra>
// kernel: tpu_custom_call.1
= control target key start
LH: loop header
LB: loop body
LE: loop exit
PB: predicated region body
PF: predicated region fallthrough
CT: control target
= control target key end

     0   :  { %6 = vsyncpa [#allocation3], 0  ;;  %s9897_s0 = inlined_call_operand.hbm [shape: f32[2,2,256], index: 0, kind: input, shape index: {}]   ;;  %s9898_s1 = inlined_call_operand.hbm [shape: f32[2,128,256], index: 1, kind: output, shape index: {}]  }
   0x1   :  { %8 = vsyncpa [#allocation3 + $0x1], 0 }
   0x2   :  { %9 = vsyncpa [#allocation4], 0 }
   0x3   :  { %11 = vsyncpa [#allocation4 + $0x1], 0  ;;  %s5745_s6 = smov 0   ;;  %s5747_s7 = smov 0  }
   0x4   :  { %s5749_s8 = smov 0   ;;  %s5751_s9 = smov 0  }
   0x5   :  { %s5753_s10 = smov 0   ;;  %s5755_s11 = smov 0  }
   0x6 LB: > { %s5411_s12 = sadd.s32 4294967295, %s5724_s11   ;;  %s5412_s13 = sadd.s32 4294967294, %s5724_s11   ;;  %s5724_s11 = sphi %s5755_s11, %s17_s11   ;;  %s5720_s10 = sphi %s5753_s10, %s10050_s10   ;;  %s5716_s9 = sphi %s5751_s9, %s10049_s9   ;;  %s5712_s8 = sphi %s5749_s8, %s10048_s8   ;;  %s5708_s7 = sphi %s5747_s7, %s10047_s7   ;;  %s5704_s6 = sphi %s5745_s6, %s10046_s6  }
   0x7   : > { %s29_s14 = sadd.s32 1, %s5720_s10  ;;  %s38_s15 = sadd.s32 1, %s5712_s8 }
   0x8   : > { %p31_p0 = scmp.ge.s32.totalorder %s29_s14, 2  ;;  %p45_p1 = scmp.ne.s32.totalorder %s5712_s8, %s5708_s7 }
   0x9   : > { %p46_p2 = scmp.eq.s32.totalorder %s5724_s11, 0  ;;  %p51_p3 = scmp.ne.s32.totalorder %s5708_s7, %s5704_s6 }
   0xa   : > { %s10052_s14 = smov (%p31_p0, %s29_s14), 0  ;;  %p52_p5 = scmp.eq.s32.totalorder %s5411_s12, 0 }
   0xb   : > { %p5786_p4 = por %p46_p2, %p45_p1  ;;  %s33_s17 = ssub.s32 %s5720_s10, %s10052_s14 }
   0xc   : > { %p77_p6 = scmp.eq.s32.totalorder %s5411_s12, 1  ;;  %p36_p7 = scmp.eq.s32.totalorder %s33_s17, 0 }
   0xd   : > { %p5792_p8 = por %p52_p5, %p51_p3  ;;  %p83_p10 = scmp.eq.s32.totalorder %s5412_s13, 1 }
   0xe   : > { %p5796_p9 = por %p77_p6, %p45_p1  ;;  %p5414_p12 = scmp.ge.s32.totalorder %s5724_s11, 2 }
   0xf   : > { %s5801_s20 = scalar_select %p36_p7, %s5712_s8, %s38_s15  }
  0x10   : > { %p5803_p11 = por %p83_p10, %p51_p3  ;;  %p5536_p13 = scmp.lt.s32.totalorder %s5724_s11, 2 }
  0x11   : > { %s103_s22 = sand.u32 1, %s5712_s8   ;;  %s5522_s24 = sshll.u32 %s5720_s10, 2 }
  0x12   : > { %s5415_s23 = sshll.u32 %s103_s22, 2  ;;  %s114_s27 = scalar_lea.hbm %s9897_s0, %s5522_s24 }
  0x13   : > { %s107_s28 = scalar_lea.vmem [#allocation2], %s5415_s23  ;;  %s116_s30 = sshll.u32 %s114_s27, 4  ;;  %s117_s30 = int_to_ptr.hbm [resolvable:$true] %s116_s30 }
  0x14   : > { %s118_s29 = sshll.u32 %s107_s28, 4  ;;  %p5529_p0 = pnand %p5536_p13, %p5786_p4  ;;  %s119_s29 = int_to_ptr.vmem [resolvable:$true] %s118_s29 }
  0x15   : > { %p5418_p1 = scmp.ge.s32.totalorder %s5724_s11, 1  ;;  %p123_p2 = scmp.lt.s32.totalorder %s5724_s11, 3 }
  0x16   : > { %s104_s2 = scalar_lea.sflag [#allocation3], %s103_s22 }
  0x17   : > { %5531 = dma.hbm_to_vmem [thread:$0]  (!%p5529_p0), %s117_s30, 64, %s119_s29, %s104_s2  }
  0x18   : > { %p124_p3 = pnand %p5418_p1, %p123_p2 }
  0x1a   : > { %127 = sbr.rel (%p124_p3) target bundleno = 1325 (0x52d), region = 24 }
  0x1f   : > { %s5819_s3 = sand.u32 1, %s5708_s7  }
  0x20   : > { %s5419_s4 = sshll.u32 %s5819_s3, 2  ;;  %s130_s5 = scalar_lea.sflag [#allocation3], %s5819_s3 }
  0x21   : > { %s5823_s12 = scalar_lea.vmem [#allocation2], %s5419_s4 }
  0x22   : > { %5695 = dma.done.wait (%p5792_p8), %s130_s5, 64  }
  0x23   : > { %5697 = vsyncadd (%p5792_p8), %s130_s5, 4294967232  ;;  %v155_v0 = vlaneseq  ;;  %v236_v15 = vld [vmem:[%s5823_s12] sm:$0xf]  ;;  %s5420_s13 = sshll.u32 %s5819_s3, 8  ;;  %s5523_s16 = sshll.u32 %s5716_s9, 8 }
  0x24   : > { %v238_v18 = vperm.slane %v236_v15, 0  ;;  %v239_v19 = vperm.slane %v236_v15, 2  ;;  %s6231_s15 = scalar_lea.vmem [#allocation5], %s5420_s13  ;;  %s5320_s22 = scalar_lea.hbm %s9898_s1, %s5523_s16 }
  0x25   : > { %v156_v1 = vshrl.u32 %v155_v0, 7  ;;  %s5321_s23 = sshll.u32 %s6231_s15, 4  ;;  %s5323_s24 = sshll.u32 %s5320_s22, 4  ;;  %s5322_s23 = int_to_ptr.vmem [resolvable:$true] %s5321_s23  ;;  %s5324_s24 = int_to_ptr.hbm [resolvable:$true] %s5323_s24 }
  0x26   : > { %v5839_v25 = vperm.slane %v238_v18, 0  ;;  %v5841_v26 = vperm.slane %v239_v19, 0  ;;  %v9904_v19 = vmov 2131351028   ;;  %s5307_s9 = scalar_lea.sflag [#allocation4], %s5819_s3  ;;  %s5656_s25 = sshra.s32 %s5324_s24, 4  ;;  %s5657_s25 = int_to_ptr.hbm [resolvable:$true] %s5656_s25 }
  0x27   : > { %v157_v2 = vadd.s32 8, %v156_v1  ;;  %v164_v3 = vcvt.s32.f32 %v156_v1  ;;  %v5830_v16 = vadd.s32 16, %v156_v1  ;;  %v5836_v23 = vadd.s32 24, %v156_v1  ;;  %s5658_s26 = scalar_lea.hbm %s5657_s25, 256  ;;  %s5662_s29 = scalar_lea.hbm %s9898_s1, 512 }
  0x28   : > { %v5861_v35 = vadd.s32 32, %v156_v1  ;;  %v5874_v40 = vadd.s32 40, %v156_v1  ;;  %v5876_v41 = vadd.s32 48, %v156_v1  ;;  %v5878_v42 = vadd.s32 56, %v156_v1  ;;  %p5659_p4 = scmp.ne.s32.totalorder %s5657_s25, %s5658_s26  ;;  %p5663_p7 = scmp.lt.s32.totalorder %s5657_s25, %s9898_s1 }
  0x29   : > { %v165_v4 = vcvt.s32.f32 %v157_v2  ;;  %v172_v5 = vmul.f32 0.5, %v164_v3  ;;  %v166_v24 = vcvt.s32.f32 %v5830_v16  ;;  %v9901_v32 = vcvt.s32.f32 %v5836_v23  ;;  %p5664_p8 = scmp.lt.s32.totalorder %s5662_s29, %s5658_s26 }
  0x2a   : > { %v9900_v45 = vcvt.s32.f32 %v5861_v35  ;;  %v9899_v55 = vcvt.s32.f32 %v5874_v40  ;;  %p5660_p5 = pnand %p5659_p4, %p5796_p9 }
  0x2b   : > { %v173_v6 = vmul.f32 0.5, %v165_v4  ;;  %v180_v7 = vfloor.f32 %v172_v5  ;;  %v5856_v33 = vmul.f32 0.5, %v166_v24  ;;  %v5871_v38 = vmul.f32 0.5, %v9901_v32  ;;  %p5665_p10 = por %p5664_p8, %p5663_p7 }
  0x2c   : > { %v5898_v62 = vmul.f32 0.5, %v9900_v45  ;;  %p5661_p6 = pneg %p5660_p5 }
  0x2d   : > { %v181_v8 = vfloor.f32 %v173_v6  ;;  %v188_v9 = vmul.f32 -0.28782314, %v180_v7  ;;  %v212_v13 = vmul.f32 2.0, %v180_v7  ;;  %v182_v39 = vfloor.f32 %v5856_v33 }
  0x2e   : > { %v9902_v49 = vfloor.f32 %v5871_v38  ;;  %p5666_p13 = pnand %p5665_p10, %p5661_p6 }
  0x2f   : > { %v189_v10 = vmul.f32 -0.28782314, %v181_v8  ;;  %v196_v11 = vmul.f32 1.442695, %v188_v9  ;;  %v213_v14 = vmul.f32 2.0, %v181_v8  ;;  %v220_v17 = vsub.f32 %v164_v3, %v212_v13 }
  0x30   : > { %v190_v50 = vmul.f32 -0.28782314, %v182_v39  ;;  %v5902_v63 = vmul.f32 -0.28782314, %v9902_v49 }
  0x31   : > { %v198_v12 = vmul.f32 1.442695, %v189_v10  ;;  %5595 = vpow2.f32 %v196_v11  ;;  %v221_v21 = vsub.f32 %v165_v4, %v213_v14  ;;  %v5843_v27 = vmul.f32 1.5707964, %v220_v17 }
  0x32   : > { %v5904_v0 = vmul.f32 1.442695, %v190_v50  ;;  %v5908_v4 = vmul.f32 0.5, %v9899_v55  ;;  %v9916_v14 = vmov 683565275  }
  0x33   : > { %5597 = vpow2.f32 %v198_v12  ;;  %v5847_v29 = vmul.f32 1.5707964, %v221_v21  ;;  %v9906_v17 = vmov 2475754826  }
  0x34   : > { %5599 = vpow2.f32 %v5904_v0 }
  0x37   : > { %v5832_v20 = vpop.eup %5595 }
  0x38   : > { %v244_v28 = vmul.f32 %v5832_v20, %v5839_v25  ;;  %v245_v30 = vmul.f32 %v5832_v20, %v5841_v26 }
  0x39   : > { %v5834_v22 = vpop.eup %5597 }
  0x3a   : > { %v246_v31 = vmul.f32 %v5834_v22, %v5839_v25  ;;  %v5859_v34 = vadd.f32 %v244_v28, %v5843_v27  ;;  %v5864_v36 = vadd.f32 %v245_v30, %v5843_v27  ;;  %v9909_v28 = vmov 2102212464  }
  0x3c   : > { %v5867_v37 = vadd.f32 %v246_v31, %v5847_v29  ;;  %v9908_v43 = vand.u32 2147483647, %v5859_v34  ;;  %v279_v44 = vand.u32 2139095040, %v5859_v34  ;;  %v9903_v46 = vand.u32 2147483647, %v5864_v36 }
  0x3d   : > { %v434_v47 = vand.u32 2139095040, %v5864_v36  ;;  %v9914_v31 = vmov 920167782  }
  0x3e   : > { %v589_v48 = vand.u32 2139095040, %v5867_v37  ;;  %v280_v51 = vshrl.u32 %v279_v44, 23  ;;  %v283_v52 = vand.u32 8388607, %v9908_v43  ;;  %v438_v54 = vand.u32 8388607, %v9903_v46 }
  0x3f   : > { %v435_v53 = vshrl.u32 %v434_v47, 23  ;;  %v9922_v43 = vmov 0  }
  0x40   : > { %v5421_v57 = vadd.s32 4294967169, %v280_v51  ;;  %v284_v59 = vor.u32 8388608, %v283_v52  ;;  %v590_v61 = vshrl.u32 %v589_v48, 23  ;;  %v439_v2 = vor.u32 8388608, %v438_v54 }
  0x41   : > { %v5424_v60 = vadd.s32 4294967169, %v435_v53 }
  0x42   : > { %v286_v1 = vadd.s32 1, %v5421_v57  ;;  %v5910_v6 = vshll.u32 %v284_v59, 8  ;;  %v5427_v7 = vadd.s32 4294967169, %v590_v61  ;;  %v5916_v12 = vshll.u32 %v439_v2, 8 }
  0x43   : > { %v441_v3 = vadd.s32 1, %v5424_v60  ;;  %v9912_v57 = vmov 1326507024  }
  0x44   : > { %vm287_vm0 = vcmp.gt.s32.totalorder %v286_v1, 0  ;;  %v325_v47 = vand.u32 65535, %v5910_v6  ;;  %v5924_v48 = vadd.s32 1, %v5427_v7  ;;  %v326_v53 = vshrl.u32 %v5910_v6, 16 }
  0x45   : > { %v288_v5 = vsel %vm287_vm0, %v286_v1, 0  ;;  %vm442_vm1 = vcmp.gt.s32.totalorder %v441_v3, 0 }
  0x46   : > { %v290_v8 = vand.u32 31, %v288_v5  ;;  %v443_v9 = vsel %vm442_vm1, %v441_v3, 0  ;;  %v5912_v10 = vshrl.u32 %v288_v5, 5  ;;  %vm597_vm15 = vcmp.gt.s32.totalorder %v5924_v48, 0 }
  0x47   : > { %v5914_v11 = vand.u32 31, %v443_v9 }
  0x48   : > { %v291_v13 = vsub.s32 32, %v290_v8  ;;  %v293_v15 = vshll.u32 %v9916_v14, %v290_v8  ;;  %v296_v18 = vshll.u32 %v9906_v17, %v290_v8  ;;  %v299_v21 = vshll.u32 %v9904_v19, %v290_v8 }
  0x49   : > { %v302_v30 = vshll.u32 %v9909_v28, %v290_v8  ;;  %v305_v44 = vshll.u32 %v9914_v31, %v290_v8  ;;  %vm308_vm2 = vcmp.lt.s32.totalorder %v5912_v10, 1  ;;  %vm311_vm3 = vcmp.lt.s32.totalorder %v5912_v10, 4 }
  0x4a   : > { %v294_v50 = vshrl.u32 %v9906_v17, %v291_v13  ;;  %v297_v51 = vshrl.u32 %v9904_v19, %v291_v13  ;;  %v300_v52 = vshrl.u32 %v9909_v28, %v291_v13  ;;  %v303_v54 = vshrl.u32 %v9914_v31, %v291_v13 }
  0x4b   : > { %v306_v59 = vshrl.u32 %v9912_v57, %v291_v13  ;;  %v5935_v2 = vsub.s32 32, %v5914_v11  ;;  %v292_v3 = vshrl.u32 %v9916_v14, %v291_v13  ;;  %vm310_vm4 = vcmp.lt.s32.totalorder %v5912_v10, 3 }
  0x4c   : > { %v295_v60 = vor.u32 %v294_v50, %v293_v15  ;;  %v298_v61 = vor.u32 %v297_v51, %v296_v18  ;;  %v301_v1 = vor.u32 %v300_v52, %v299_v21  ;;  %v304_v5 = vor.u32 %v303_v54, %v302_v30 }
  0x4d   : > { %v307_v7 = vor.u32 %v306_v59, %v305_v44  ;;  %vm309_vm5 = vcmp.lt.s32.totalorder %v5912_v10, 2  ;;  %v5944_v15 = vshrl.u32 %v443_v9, 5  ;;  %v448_v21 = vshll.u32 %v9916_v14, %v5914_v11 }
  0x4e   : > { %v316_v8 = vsel %vm308_vm2, %v295_v60, %v298_v61  ;;  %v320_v55 = vsel %vm308_vm2, %v298_v61, %v301_v1  ;;  %v317_v18 = vsel %vm311_vm3, %v304_v5, 920167782  ;;  %v451_v30 = vshll.u32 %v9906_v17, %v5914_v11 }
  0x4f   : > { %v321_v13 = vsel %vm311_vm3, %v307_v7, 1326507024  ;;  %v313_v44 = vsel %vm311_vm3, %v301_v1, 2102212464  ;;  %v318_v50 = vsel %vm310_vm4, %v301_v1, %v317_v18  ;;  %v449_v51 = vshrl.u32 %v9906_v17, %v5935_v2 }
  0x50   : > { %v322_v9 = vsel %vm310_vm4, %v304_v5, %v321_v13  ;;  %v312_v52 = vsel %vm308_vm2, %v292_v3, %v295_v60  ;;  %v319_v54 = vsel %vm309_vm5, %v316_v8, %v318_v50  ;;  %v452_v7 = vshrl.u32 %v9904_v19, %v5935_v2 }
  0x51   : > { %v323_v59 = vsel %vm309_vm5, %v320_v55, %v322_v9  ;;  %v349_v18 = vand.u32 65535, %v319_v54  ;;  %v350_v58 = vshrl.u32 %v319_v54, 16  ;;  %v314_v5 = vsel %vm310_vm4, %v298_v61, %v313_v44 }
  0x52   : > { %v327_v45 = vand.u32 65535, %v323_v59  ;;  %v328_v1 = vshrl.u32 %v323_v59, 16  ;;  %v5972_v13 = vor.u32 %v449_v51, %v448_v21  ;;  %v5974_v56 = vor.u32 %v452_v7, %v451_v30 }
  0x53   : > { %v454_v60 = vshll.u32 %v9904_v19, %v5914_v11  ;;  %v455_v50 = vshrl.u32 %v9909_v28, %v5935_v2  ;;  %v351_v59 = vmul.u32 %v349_v18, %v325_v47  ;;  %v352_v32 = vmul.u32 %v350_v58, %v325_v47 }
  0x54   : > { %v329_v3 = vmul.u32 %v327_v45, %v325_v47  ;;  %v330_v8 = vmul.u32 %v328_v1, %v325_v47  ;;  %v331_v55 = vmul.u32 %v327_v45, %v326_v53  ;;  %v332_v9 = vmul.u32 %v328_v1, %v326_v53 }
  0x55   : > { %v353_v54 = vmul.u32 %v349_v18, %v326_v53  ;;  %v354_v21 = vmul.u32 %v350_v58, %v326_v53  ;;  %v355_v30 = vshll.u32 %v352_v32, 16  ;;  %v356_v51 = vshrl.u32 %v352_v32, 16 }
  0x56   : > { %v333_v49 = vshll.u32 %v330_v8, 16  ;;  %v334_v46 = vshrl.u32 %v330_v8, 16  ;;  %v335_v61 = vshll.u32 %v331_v55, 16  ;;  %v336_v44 = vshrl.u32 %v331_v55, 16 }
  0x57   : > { %v357_v7 = vshll.u32 %v353_v54, 16  ;;  %v358_v17 = vshrl.u32 %v353_v54, 16  ;;  %v457_v45 = vshll.u32 %v9909_v28, %v5914_v11  ;;  %vm359_vm7 = vc.u32 %v351_v59, %v355_v30 }
  0x58   : > { %vm337_vm6 = vc.u32 %v329_v3, %v333_v49  ;;  %v339_v19 = vadd.s32 %v333_v49, %v329_v3  ;;  %v361_v47 = vadd.s32 %v355_v30, %v351_v59  ;;  %v458_v18 = vshrl.u32 %v9914_v31, %v5935_v2 }
  0x59   : > { %v338_v1 = vsel %vm337_vm6, 1, %v9922_v43  ;;  %v360_v58 = vsel %vm359_vm7, 1, %v9922_v43  ;;  %v460_v32 = vshll.u32 %v9914_v31, %v5914_v11  ;;  %v456_v3 = vor.u32 %v455_v50, %v454_v60 }
  0x5a   : > { %v340_v8 = vadd.s32 %v338_v1, %v332_v9  ;;  %vm341_vm8 = vc.u32 %v339_v19, %v335_v61  ;;  %v362_v53 = vadd.s32 %v360_v58, %v354_v21  ;;  %vm363_vm9 = vc.u32 %v361_v47, %v357_v7 }
  0x5b   : > { %v342_v49 = vsel %vm341_vm8, 1, %v9922_v43  ;;  %v364_v54 = vsel %vm363_vm9, 1, %v9922_v43  ;;  %v459_v28 = vor.u32 %v458_v18, %v457_v45  ;;  %v461_v59 = vshrl.u32 %v9912_v57, %v5935_v2 }
  0x5c   : > { %v344_v55 = vadd.s32 %v342_v49, %v340_v8  ;;  %v5992_v30 = vadd.s32 %v361_v47, %v357_v7  ;;  %v366_v19 = vadd.s32 %v364_v54, %v362_v53  ;;  %vm463_vm10 = vcmp.lt.s32.totalorder %v5944_v15, 1 }
  0x5d   : > { %vm465_vm11 = vcmp.lt.s32.totalorder %v5944_v15, 3  ;;  %v462_v9 = vor.u32 %v461_v59, %v460_v32  ;;  %vm464_vm12 = vcmp.lt.s32.totalorder %v5944_v15, 2  ;;  %vm466_vm13 = vcmp.lt.s32.totalorder %v5944_v15, 4 }
  0x5e   : > { %v345_v11 = vadd.s32 %v344_v55, %v334_v46  ;;  %v315_v60 = vsel %vm309_vm5, %v312_v52, %v314_v5  ;;  %v367_v50 = vadd.s32 %v366_v19, %v356_v51  ;;  %v471_v61 = vsel %vm463_vm10, %v5972_v13, %v5974_v56 }
  0x5f   : > { %v472_v21 = vsel %vm466_vm13, %v459_v28, 920167782  ;;  %v475_v45 = vsel %vm463_vm10, %v5974_v56, %v456_v3  ;;  %v480_v10 = vand.u32 65535, %v5916_v12  ;;  %v476_v51 = vsel %vm466_vm13, %v462_v9, 1326507024 }
  0x60   : > { %v6006_v7 = vadd.s32 %v345_v11, %v336_v44  ;;  %v473_v46 = vsel %vm465_vm11, %v456_v3, %v472_v21  ;;  %v368_v52 = vadd.s32 %v367_v50, %v358_v17  ;;  %v481_v1 = vshrl.u32 %v5916_v12, 16 }
  0x61   : > { %v474_v5 = vsel %vm464_vm12, %v471_v61, %v473_v46  ;;  %v369_v44 = vmul.u32 %v5910_v6, %v315_v60  ;;  %v477_v47 = vsel %vm465_vm11, %v459_v28, %v476_v51  ;;  %v214_v17 = vmul.f32 2.0, %v182_v39 }
  0x62   : > { %vm371_vm14 = vc.u32 %v6006_v7, %v5992_v30  ;;  %v504_v18 = vand.u32 65535, %v474_v5  ;;  %v372_v8 = vadd.s32 1, %v368_v52  ;;  %v478_v58 = vsel %vm464_vm12, %v475_v45, %v477_v47 }
  0x63   : > { %v505_v32 = vshrl.u32 %v474_v5, 16  ;;  %v447_v49 = vshrl.u32 %v9916_v14, %v5935_v2  ;;  %v482_v53 = vand.u32 65535, %v478_v58  ;;  %v483_v6 = vshrl.u32 %v478_v58, 16 }
  0x64   : > { %v373_v55 = vsel %vm371_vm14, %v372_v8, %v368_v52  ;;  %v468_v28 = vsel %vm466_vm13, %v456_v3, 2102212464  ;;  %v508_v59 = vmul.u32 %v504_v18, %v481_v1  ;;  %v506_v11 = vmul.u32 %v504_v18, %v480_v10 }
  0x65   : > { %v507_v54 = vmul.u32 %v505_v32, %v480_v10  ;;  %v374_v33 = vadd.s32 %v373_v55, %v369_v44  ;;  %v484_v39 = vmul.u32 %v482_v53, %v480_v10  ;;  %v485_v19 = vmul.u32 %v483_v6, %v480_v10 }
  0x66   : > { %v222_v9 = vsub.f32 %v166_v24, %v214_v17  ;;  %v486_v60 = vmul.u32 %v482_v53, %v481_v1  ;;  %v598_v2 = vsel %vm597_vm15, %v5924_v48, 0  ;;  %v467_v21 = vsel %vm463_vm10, %v447_v49, %v5972_v13 }
  0x67   : > { %v510_v50 = vshll.u32 %v507_v54, 16  ;;  %v375_v61 = vadd.s32 536870912, %v374_v33  ;;  %v487_v46 = vmul.u32 %v483_v6, %v481_v1  ;;  %v488_v3 = vshll.u32 %v485_v19, 16 }
  0x68   : > { %v469_v45 = vsel %vm465_vm11, %v5974_v56, %v468_v28  ;;  %v490_v52 = vshll.u32 %v486_v60, 16  ;;  %v509_v10 = vmul.u32 %v505_v32, %v481_v1  ;;  %v512_v5 = vshll.u32 %v508_v59, 16 }
  0x69   : > { %v6042_v16 = vshrl.u32 %v375_v61, 30  ;;  %vm492_vm0 = vc.u32 %v484_v39, %v488_v3  ;;  %v494_v24 = vadd.s32 %v488_v3, %v484_v39  ;;  %vm514_vm1 = vc.u32 %v506_v11, %v510_v50 }
  0x6a   : > { %v489_v48 = vshrl.u32 %v485_v19, 16  ;;  %v493_v51 = vsel %vm492_vm0, 1, %v9922_v43  ;;  %v515_v44 = vsel %vm514_vm1, 1, %v9922_v43  ;;  %v516_v13 = vadd.s32 %v510_v50, %v506_v11 }
  0x6b   : > { %v377_v47 = vshll.u32 %v6042_v16, 30  ;;  %v495_v18 = vadd.s32 %v493_v51, %v487_v46  ;;  %vm496_vm2 = vc.u32 %v494_v24, %v490_v52  ;;  %v511_v17 = vshrl.u32 %v507_v54, 16 }
  0x6c   : > { %v497_v56 = vsel %vm496_vm2, 1, %v9922_v43  ;;  %v517_v1 = vadd.s32 %v515_v44, %v509_v10  ;;  %vm518_vm3 = vc.u32 %v516_v13, %v512_v5  ;;  %v600_v8 = vand.u32 31, %v598_v2 }
  0x6d   : > { %v6048_v58 = vsub.s32 %v374_v33, %v377_v47  ;;  %v491_v32 = vshrl.u32 %v486_v60, 16  ;;  %v499_v49 = vadd.s32 %v497_v56, %v495_v18  ;;  %v519_v53 = vsel %vm518_vm3, 1, %v9922_v43  ;;  %v6090_v18 = vpop.eup %5599 }
  0x6e   : > { %v6052_v6 = vmul.f32 1.442695, %v5902_v63  ;;  %v513_v55 = vshrl.u32 %v508_v59, 16  ;;  %v521_v28 = vadd.s32 %v519_v53, %v517_v1  ;;  %v9911_v39 = vand.u32 2147483647, %v5867_v37  ;;  %9948 = vst [vmem:[#allocation9_spill] sm:$0xff] %v6090_v18 }
  0x6f   : > { %vm379_vm4 = vcmp.lt.s32.totalorder %v6048_v58, 0  ;;  %v380_v54 = vsub.s32 0, %v6048_v58  ;;  %v500_v19 = vadd.s32 %v499_v49, %v489_v48  ;;  %v6057_v11 = vadd.s32 %v516_v13, %v512_v5 }
  0x70   : > { %v470_v33 = vsel %vm464_vm12, %v467_v21, %v469_v45  ;;  %v522_v60 = vadd.s32 %v521_v28, %v511_v17  ;;  %v601_v50 = vsub.s32 32, %v600_v8  ;;  %v6062_v63 = vmul.f32 1.5707964, %v222_v9 }
  0x71   : > { %vm278_vm5 = vcmp.lt.s32.totalorder %v5859_v34, 0  ;;  %v381_v59 = vsel %vm379_vm4, %v380_v54, %v6048_v58  ;;  %v6066_v61 = vadd.s32 %v500_v19, %v491_v32  ;;  %v370_v46 = vadd.s32 %v5992_v30, %v6006_v7 }
  0x72   : > { %9941 = vst [vmem:[#allocation8_spill] sm:$0xff] %v6062_v63  ;;  %v382_v3 = vclz %v381_v59  ;;  %v523_v52 = vadd.s32 %v522_v60, %v513_v55  ;;  %v593_v0 = vand.u32 8388607, %v9911_v39  ;;  %v400_v15 = vsub.s32 4, %v6042_v16 }
  0x73   : > { %v524_v21 = vmul.u32 %v5916_v12, %v470_v33  ;;  %vm526_vm6 = vc.u32 %v6066_v61, %v6057_v11  ;;  %v6076_v9 = vshrl.u32 %v598_v2, 5  ;;  %v9942_v45 = vand.u32 2147483647, %v5859_v34 }
  0x74   : > { %v5422_v30 = vadd.s32 4294967294, %v382_v3  ;;  %v527_v7 = vadd.s32 1, %v523_v52  ;;  %v9945_v5 = vmov 2102212464   ;;  %v613_v48 = vshrl.u32 %v9914_v31, %v601_v50 }
  0x75   : > { %vm6080_vm7 = vcmp.le.f32.partialorder %v9942_v45, 0.7853982  ;;  %v612_v24 = vshll.u32 %v9945_v5, %v600_v8  ;;  %v603_v51 = vshll.u32 %v9916_v14, %v600_v8  ;;  %v9946_v12 = vmov 2475754826  }
  0x76   : > { %v604_v44 = vshrl.u32 %v9946_v12, %v601_v50  ;;  %v606_v13 = vshll.u32 %v9946_v12, %v600_v8  ;;  %v9947_v2 = vmov 2131351028   ;;  %vm5423_vm8 = vcmp.lt.s32.totalorder %v5422_v30, 0 }
  0x77   : > { %v607_v47 = vshrl.u32 %v9947_v2, %v601_v50  ;;  %v528_v17 = vsel %vm526_vm6, %v527_v7, %v523_v52  ;;  %v609_v56 = vshll.u32 %v9947_v2, %v600_v8  ;;  %v610_v1 = vshrl.u32 %v9945_v5, %v601_v50 }
  0x78   : > { %v385_v32 = vsel %vm5423_vm8, 0, %v5422_v30  ;;  %v529_v49 = vadd.s32 %v528_v17, %v524_v21  ;;  %v615_v53 = vshll.u32 %v9914_v31, %v600_v8  ;;  %v616_v55 = vshrl.u32 %v9912_v57, %v601_v50 }
  0x79   : > { %v386_v28 = vsub.s32 32, %v385_v32  ;;  %v387_v54 = vshll.u32 %v6048_v58, %v385_v32  ;;  %v390_v19 = vsub.s32 4294967266, %v385_v32  ;;  %v614_v33 = vor.u32 %v613_v48, %v612_v24 }
  0x7a   : > { %v401_v60 = vsel %vm278_vm5, %v400_v15, %v6042_v16  ;;  %v530_v59 = vadd.s32 536870912, %v529_v49  ;;  %v605_v3 = vor.u32 %v604_v44, %v603_v51  ;;  %v608_v52 = vor.u32 %v607_v47, %v606_v13 }
  0x7b   : > { %v388_v45 = vshrl.u32 %v370_v46, %v386_v28  ;;  %v391_v7 = vadd.s32 127, %v390_v19  ;;  %v611_v30 = vor.u32 %v610_v1, %v609_v56  ;;  %vm618_vm9 = vcmp.lt.s32.totalorder %v6076_v9, 1 }
  0x7c   : > { %v6101_v8 = vshrl.u32 %v530_v59, 30  ;;  %v617_v21 = vor.u32 %v616_v55, %v615_v53  ;;  %vm620_vm10 = vcmp.lt.s32.totalorder %v6076_v9, 3  ;;  %vm621_vm11 = vcmp.lt.s32.totalorder %v6076_v9, 4 }
  0x7d   : > { %v389_v58 = vor.u32 %v388_v45, %v387_v54  ;;  %v392_v24 = vshll.u32 %v391_v7, 23  ;;  %v594_v48 = vor.u32 8388608, %v593_v0  ;;  %v627_v16 = vsel %vm621_vm11, %v614_v33, 920167782 }
  0x7e   : > { %v247_v46 = vmul.f32 %v5834_v22, %v5841_v26  ;;  %v403_v15 = vsel %vm6080_vm7, 0, %v401_v60  ;;  %v532_v51 = vshll.u32 %v6101_v8, 30  ;;  %vm619_vm12 = vcmp.lt.s32.totalorder %v6076_v9, 2 }
  0x7f   : > { %v393_v44 = vor.u32 4788187, %v392_v24  ;;  %v396_v13 = vcvt.s32.f32 %v389_v58  ;;  %v626_v47 = vsel %vm618_vm9, %v605_v3, %v608_v52  ;;  %v628_v0 = vsel %vm620_vm10, %v611_v30, %v627_v16 }
  0x80   : > { %v6117_v17 = vsub.s32 %v529_v49, %v532_v51  ;;  %v602_v56 = vshrl.u32 %v9916_v14, %v601_v50  ;;  %v630_v1 = vsel %vm618_vm9, %v608_v52, %v611_v30  ;;  %v631_v32 = vsel %vm621_vm11, %v617_v21, 1326507024 }
  0x81   : > { %v394_v53 = vand.u32 2147483647, %v393_v44  ;;  %v420_v55 = vadd.s32 3, %v403_v15  ;;  %v632_v28 = vsel %vm620_vm10, %v614_v33, %v631_v32  ;;  %v6126_v54 = vshll.u32 %v594_v48, 8 }
  0x82   : > { %vm534_vm13 = vcmp.lt.s32.totalorder %v6117_v17, 0  ;;  %v535_v49 = vsub.s32 0, %v6117_v17  ;;  %v629_v50 = vsel %vm619_vm12, %v626_v47, %v628_v0  ;;  %v633_v19 = vsel %vm619_vm12, %v630_v1, %v632_v28 }
  0x83   : > { %v397_v60 = vmul.f32 %v396_v13, %v394_v53  ;;  %v635_v59 = vand.u32 65535, %v6126_v54  ;;  %v636_v45 = vshrl.u32 %v6126_v54, 16  ;;  %v637_v7 = vand.u32 65535, %v633_v19 }
  0x84   : > { %v6137_v33 = vadd.f32 %v247_v46, %v5847_v29  ;;  %v525_v21 = vadd.s32 %v6057_v11, %v6066_v61  ;;  %v536_v58 = vsel %vm534_vm13, %v535_v49, %v6117_v17  ;;  %v638_v24 = vshrl.u32 %v633_v19, 16 }
  0x85   : > { %v398_v48 = vxor.u32 2147483648, %v397_v60  ;;  %v6142_v16 = vand.u32 3, %v420_v55  ;;  %vm433_vm14 = vcmp.lt.s32.totalorder %v5864_v36, 0  ;;  %v537_v15 = vclz %v536_v58 }
  0x86   : > { %v6145_v51 = vmul.u32 %v637_v7, %v636_v45  ;;  %v623_v44 = vsel %vm621_vm11, %v611_v30, 2102212464  ;;  %v639_v13 = vmul.u32 %v637_v7, %v635_v59  ;;  %v640_v46 = vmul.u32 %v638_v24, %v635_v59 }
  0x87   : > { %v660_v47 = vshrl.u32 %v629_v50, 16  ;;  %v399_v11 = vsel %vm278_vm5, %v398_v48, %v397_v60  ;;  %v5425_v61 = vadd.s32 4294967294, %v537_v15  ;;  %v555_v0 = vsub.s32 4, %v6101_v8 }
  0x88   : > { %v622_v1 = vsel %vm618_vm9, %v602_v56, %v605_v3  ;;  %v6157_v32 = vsel %vm6080_vm7, %v5859_v34, %v399_v11  ;;  %v643_v53 = vshll.u32 %v640_v46, 16  ;;  %v645_v30 = vshll.u32 %v6145_v51, 16 }
  0x89   : > { %v659_v55 = vand.u32 65535, %v629_v50  ;;  %v404_v28 = vmul.f32 %v6157_v32, %v6157_v32  ;;  %v9949_v49 = vand.u32 2147483647, %v5864_v36  ;;  %vm5426_vm0 = vcmp.lt.s32.totalorder %v5425_v61, 0 }
  0x8a   : > { %v624_v3 = vsel %vm620_vm10, %v608_v52, %v623_v44  ;;  %v642_v10 = vmul.u32 %v638_v24, %v636_v45  ;;  %v540_v56 = vsel %vm5426_vm0, 0, %v5425_v61  ;;  %vm647_vm1 = vc.u32 %v639_v13, %v643_v53 }
  0x8b   : > { %vm6164_vm15 = vcmp.le.f32.partialorder %v9949_v49, 0.7853982  ;;  %v649_v60 = vadd.s32 %v643_v53, %v639_v13  ;;  %v6170_v7 = vmul.u32 %v660_v47, %v635_v59  ;;  %v405_v50 = vmul.f32 -0.001358992, %v404_v28 }
  0x8c   : > { %v412_v58 = vmul.f32 -0.00019511016, %v404_v28  ;;  %v541_v48 = vsub.s32 32, %v540_v56  ;;  %v542_v15 = vshll.u32 %v6117_v17, %v540_v56  ;;  %v545_v11 = vsub.s32 4294967266, %v540_v56 }
  0x8d   : > { %v648_v49 = vsel %vm647_vm1, 1, %v9922_v43  ;;  %vm651_vm2 = vc.u32 %v649_v60, %v645_v30  ;;  %v6174_v39 = vmul.u32 %v659_v55, %v636_v45  ;;  %v406_v57 = vadd.f32 0.041655596, %v405_v50 }
  0x8e   : > { %v413_v31 = vadd.f32 0.008332121, %v412_v58  ;;  %v543_v52 = vshrl.u32 %v525_v21, %v541_v48  ;;  %v650_v24 = vadd.s32 %v648_v49, %v642_v10  ;;  %vm426_vm3 = vcmp.eq.s32.totalorder %v6142_v16, 2 }
  0x8f   : > { %v546_v44 = vadd.s32 127, %v545_v11  ;;  %v556_v13 = vsel %vm433_vm14, %v555_v0, %v6101_v8  ;;  %v644_v61 = vshrl.u32 %v640_v46, 16  ;;  %v661_v53 = vmul.u32 %v659_v55, %v635_v59 }
  0x90   : > { %v407_v17 = vmul.f32 %v406_v57, %v404_v28  ;;  %v414_v56 = vmul.f32 %v413_v31, %v404_v28  ;;  %v544_v14 = vor.u32 %v543_v52, %v542_v15  ;;  %v652_v30 = vsel %vm651_vm2, 1, %v9922_v43 }
  0x91   : > { %vm423_vm4 = vcmp.eq.s32.totalorder %v6142_v16, 0  ;;  %v547_v60 = vshll.u32 %v546_v44, 23  ;;  %v654_v50 = vadd.s32 %v652_v30, %v650_v24  ;;  %v664_v21 = vmul.u32 %v660_v47, %v636_v45 }
  0x92   : > { %v665_v10 = vshll.u32 %v6170_v7, 16  ;;  %v408_v58 = vadd.f32 -0.4999988, %v407_v17  ;;  %v415_v48 = vadd.f32 -0.16666654, %v414_v56  ;;  %vm422_vm5 = vcmp.lt.s32.totalorder %v6142_v16, 2 }
  0x93   : > { %v6186_v8 = vsel %vm619_vm12, %v622_v1, %v624_v3  ;;  %v667_v31 = vshll.u32 %v6174_v39, 16  ;;  %v548_v57 = vor.u32 4788187, %v547_v60  ;;  %v551_v59 = vcvt.s32.f32 %v544_v14 }
  0x94   : > { %v558_v46 = vsel %vm6164_vm15, 0, %v556_v13  ;;  %vm669_vm6 = vc.u32 %v661_v53, %v665_v10  ;;  %v409_v0 = vmul.f32 %v408_v58, %v404_v28  ;;  %v416_v45 = vmul.f32 %v415_v48, %v404_v28 }
  0x95   : > { %v670_v47 = vsel %vm669_vm6, 1, %v9922_v43  ;;  %v671_v55 = vadd.s32 %v665_v10, %v661_v53  ;;  %v549_v15 = vand.u32 2147483647, %v548_v57  ;;  %v646_v11 = vshrl.u32 %v6145_v51, 16 }
  0x96   : > { %v655_v9 = vadd.s32 %v654_v50, %v644_v61  ;;  %v672_v1 = vadd.s32 %v670_v47, %v664_v21  ;;  %v410_v3 = vadd.f32 1.0, %v409_v0  ;;  %v417_v49 = vadd.f32 1.0, %v416_v45 }
  0x97   : > { %v666_v52 = vshrl.u32 %v6170_v7, 16  ;;  %vm673_vm7 = vc.u32 %v671_v55, %v667_v31  ;;  %v552_v14 = vmul.f32 %v551_v59, %v549_v15  ;;  %v575_v24 = vadd.s32 3, %v558_v46 }
  0x98   : > { %v674_v44 = vsel %vm673_vm7, 1, %v9922_v43  ;;  %v744_v28 = vand.u32 2139095040, %v6137_v33  ;;  %v418_v13 = vmul.f32 %v417_v49, %v6157_v32  ;;  %v427_v53 = vxor.u32 2147483648, %v410_v3 }
  0x99   : > { %v668_v17 = vshrl.u32 %v6174_v39, 16  ;;  %v676_v56 = vadd.s32 %v674_v44, %v672_v1  ;;  %v553_v51 = vxor.u32 2147483648, %v552_v14  ;;  %v6199_v61 = vadd.s32 %v655_v9, %v646_v11 }
  0x9a   : > { %v6201_v30 = vadd.s32 %v671_v55, %v667_v31  ;;  %v745_v7 = vshrl.u32 %v744_v28, 23  ;;  %v424_v60 = vxor.u32 2147483648, %v418_v13  ;;  %v428_v50 = vsel %vm426_vm3, %v427_v53, %v418_v13 }
  0x9b   : > { %v677_v21 = vadd.s32 %v676_v56, %v666_v52  ;;  %v9919_v10 = vand.u32 2147483647, %v6137_v33  ;;  %v248_v32 = vmul.f32 %v6090_v18, %v5839_v25  ;;  %vm419_vm8 = vweird.f32 %v5859_v34 }
  0x9c   : > { %v554_v39 = vsel %vm433_vm14, %v553_v51, %v552_v14  ;;  %v5430_v58 = vadd.s32 4294967169, %v745_v7  ;;  %v425_v48 = vsel %vm423_vm4, %v410_v3, %v424_v60  ;;  %v679_v59 = vmul.u32 %v6126_v54, %v6186_v8 }
  0x9d   : > { %v6216_v31 = vsel %vm6164_vm15, %v5864_v36, %v554_v39  ;;  %v678_v57 = vadd.s32 %v677_v21, %v668_v17  ;;  %v429_v46 = vsel %vm422_vm5, %v425_v48, %v428_v50  ;;  %vm681_vm9 = vc.u32 %v6199_v61, %v6201_v30 }
  0x9e   : > { %v559_v34 = vmul.f32 %v6216_v31, %v6216_v31  ;;  %v751_v0 = vadd.s32 1, %v5430_v58  ;;  %v430_v45 = vsel %vm419_vm8, nan, %v429_v46  ;;  %v6226_v47 = vand.u32 3, %v575_v24 }
  0x9f   : > { %v682_v19 = vadd.s32 1, %v678_v57  ;;  %v748_v55 = vand.u32 8388607, %v9919_v10  ;;  %2756 = vst [vmem:[%s6231_s15] sm:$0xff] %v430_v45  ;;  %5601 = vpow2.f32 %v6052_v6  ;;  %v9952_v16 = vfloor.f32 %v5871_v38 }
  0xa0   : > { %v560_v54 = vmul.f32 -0.001358992, %v559_v34  ;;  %v567_v8 = vmul.f32 -0.00019511016, %v559_v34  ;;  %vm752_vm10 = vcmp.gt.s32.totalorder %v751_v0, 0  ;;  %v6240_v3 = vadd.f32 %v248_v32, %v6062_v63 }
  0xa1   : > { %v6237_v11 = vmul.f32 2.0, %v9952_v16  ;;  %v683_v9 = vsel %vm681_vm9, %v682_v19, %v678_v57  ;;  %v753_v1 = vsel %vm752_vm10, %v751_v0, 0  ;;  %v6244_v24 = vmul.f32 %v6090_v18, %v5841_v26 }
  0xa2   : > { %v561_v49 = vadd.f32 0.041655596, %v560_v54  ;;  %v568_v52 = vadd.f32 0.008332121, %v567_v8  ;;  %v684_v14 = vadd.s32 %v683_v9, %v679_v59  ;;  %vm581_vm11 = vcmp.eq.s32.totalorder %v6226_v47, 2 }
  0xa3   : > { %v749_v44 = vor.u32 8388608, %v748_v55  ;;  %v755_v6 = vand.u32 31, %v753_v1  ;;  %v9918_v53 = vand.u32 2147483647, %v6240_v3  ;;  %vm578_vm12 = vcmp.eq.s32.totalorder %v6226_v47, 0 }
  0xa4   : > { %v562_v28 = vmul.f32 %v561_v49, %v559_v34  ;;  %v569_v38 = vmul.f32 %v568_v52, %v559_v34  ;;  %v685_v13 = vadd.s32 536870912, %v684_v14  ;;  %v6249_v17 = vshrl.u32 %v753_v1, 5 }
  0xa5   : > { %v6251_v56 = vsub.s32 32, %v755_v6  ;;  %v9953_v51 = vmov 683565275   ;;  %v761_v60 = vshll.u32 %v9946_v12, %v755_v6  ;;  %vm577_vm13 = vcmp.lt.s32.totalorder %v6226_v47, 2  ;;  %v6257_v58 = vpop.eup %5601 }
  0xa6   : > { %v758_v7 = vshll.u32 %v9953_v51, %v755_v6  ;;  %v563_v50 = vadd.f32 -0.4999988, %v562_v28  ;;  %v570_v21 = vadd.f32 -0.16666654, %v569_v38  ;;  %v686_v32 = vshrl.u32 %v685_v13, 30  ;;  %9954 = vst [vmem:[#allocation10_spill] sm:$0xff] %v6257_v58 }
  0xa7   : > { %v764_v39 = vshll.u32 %v9947_v2, %v755_v6  ;;  %vm574_vm14 = vweird.f32 %v5864_v36  ;;  %v759_v48 = vshrl.u32 %v9946_v12, %v6251_v56  ;;  %v762_v57 = vshrl.u32 %v9947_v2, %v6251_v56 }
  0xa8   : > { %v765_v59 = vshrl.u32 %v9945_v5, %v6251_v56  ;;  %v767_v46 = vshll.u32 %v9945_v5, %v755_v6  ;;  %v564_v0 = vmul.f32 %v563_v50, %v559_v34  ;;  %v571_v45 = vmul.f32 %v570_v21, %v559_v34 }
  0xa9   : > { %v687_v19 = vshll.u32 %v686_v32, 30  ;;  %v6267_v55 = vshll.u32 %v749_v44, 8  ;;  %v6269_v54 = vor.u32 %v759_v48, %v758_v7  ;;  %v9955_v8 = vmov 920167782  }
  0xaa   : > { %v768_v16 = vshrl.u32 %v9955_v8, %v6251_v56  ;;  %vm773_vm15 = vcmp.lt.s32.totalorder %v6249_v17, 1  ;;  %v899_v9 = vand.u32 2139095040, %v6240_v3  ;;  %v565_v1 = vadd.f32 1.0, %v564_v0 }
  0xab   : > { %v572_v49 = vadd.f32 1.0, %v571_v45  ;;  %vm588_vm0 = vcmp.lt.s32.totalorder %v5867_v37, 0  ;;  %v688_v52 = vsub.s32 %v684_v14, %v687_v19  ;;  %v6276_v28 = vor.u32 %v762_v57, %v761_v60 }
  0xac   : > { %v766_v34 = vor.u32 %v765_v59, %v764_v39  ;;  %v769_v38 = vor.u32 %v768_v16, %v767_v46  ;;  %v770_v44 = vshll.u32 %v9955_v8, %v755_v6  ;;  %v9956_v13 = vmov 1326507024  }
  0xad   : > { %v771_v7 = vshrl.u32 %v9956_v13, %v6251_v56  ;;  %v573_v50 = vmul.f32 %v572_v49, %v6216_v31  ;;  %v582_v21 = vxor.u32 2147483648, %v565_v1  ;;  %vm689_vm1 = vcmp.lt.s32.totalorder %v688_v52, 0 }
  0xae   : > { %v690_v48 = vsub.s32 0, %v688_v52  ;;  %v710_v15 = vsub.s32 4, %v686_v32  ;;  %vm775_vm2 = vcmp.lt.s32.totalorder %v6249_v17, 3  ;;  %vm776_vm3 = vcmp.lt.s32.totalorder %v6249_v17, 4 }
  0xaf   : > { %v900_v14 = vshrl.u32 %v899_v9, 23  ;;  %v579_v60 = vxor.u32 2147483648, %v573_v50  ;;  %v583_v39 = vsel %vm581_vm11, %v582_v21, %v573_v50  ;;  %v772_v6 = vor.u32 %v771_v7, %v770_v44 }
  0xb0   : > { %v691_v57 = vsel %vm689_vm1, %v690_v48, %v688_v52  ;;  %vm774_vm4 = vcmp.lt.s32.totalorder %v6249_v17, 2  ;;  %v781_v31 = vsel %vm773_vm15, %v6269_v54, %v6276_v28  ;;  %v782_v46 = vsel %vm776_vm3, %v769_v38, 920167782 }
  0xb1   : > { %v692_v59 = vclz %v691_v57  ;;  %v580_v0 = vsel %vm578_vm12, %v565_v1, %v579_v60  ;;  %v9957_v45 = vand.u32 2147483647, %v5867_v37  ;;  %v680_v16 = vadd.s32 %v6201_v30, %v6199_v61 }
  0xb2   : > { %v783_v9 = vsel %vm775_vm2, %v766_v34, %v782_v46  ;;  %v584_v49 = vsel %vm577_vm13, %v580_v0, %v583_v39  ;;  %v790_v7 = vand.u32 65535, %v6267_v55  ;;  %v6310_v1 = vand.u32 8388607, %v9918_v53 }
  0xb3   : > { %vm6297_vm5 = vcmp.le.f32.partialorder %v9957_v45, 0.7853982  ;;  %v5428_v44 = vadd.s32 4294967294, %v692_v59  ;;  %v585_v50 = vsel %vm574_vm14, nan, %v584_v49  ;;  %v784_v21 = vsel %vm774_vm4, %v781_v31, %v783_v9 }
  0xb4   : > { %v785_v61 = vsel %vm773_vm15, %v6276_v28, %v766_v34  ;;  %v5433_v30 = vadd.s32 4294967169, %v900_v14  ;;  %v711_v47 = vsel %vm588_vm0, %v710_v15, %v686_v32  ;;  %v786_v48 = vsel %vm776_vm3, %v772_v6, 1326507024  ;;  %2757 = vst [vmem:[%s6231_s15 + $0x8] sm:$0xff] %v585_v50 }
  0xb5   : > { %vm5429_vm6 = vcmp.lt.s32.totalorder %v5428_v44, 0  ;;  %v791_v60 = vshrl.u32 %v6267_v55, 16  ;;  %v787_v39 = vsel %vm775_vm2, %v769_v38, %v786_v48  ;;  %v814_v57 = vand.u32 65535, %v784_v21 }
  0xb6   : > { %v695_v36 = vsel %vm5429_vm6, 0, %v5428_v44  ;;  %v815_v59 = vshrl.u32 %v784_v21, 16  ;;  %v788_v14 = vsel %vm774_vm4, %v785_v61, %v787_v39  ;;  %v713_v15 = vsel %vm6297_vm5, 0, %v711_v47 }
  0xb7   : > { %v696_v31 = vsub.s32 32, %v695_v36  ;;  %v697_v46 = vshll.u32 %v688_v52, %v695_v36  ;;  %v700_v0 = vsub.s32 4294967266, %v695_v36  ;;  %v757_v32 = vshrl.u32 %v9953_v51, %v6251_v56 }
  0xb8   : > { %v792_v6 = vand.u32 65535, %v788_v14  ;;  %v906_v45 = vadd.s32 1, %v5433_v30  ;;  %v778_v38 = vsel %vm776_vm3, %v766_v34, 2102212464  ;;  %v793_v44 = vshrl.u32 %v788_v14, 16 }
  0xb9   : > { %v698_v9 = vshrl.u32 %v680_v16, %v696_v31  ;;  %v701_v49 = vadd.s32 127, %v700_v0  ;;  %v816_v52 = vmul.u32 %v814_v57, %v790_v7  ;;  %v817_v21 = vmul.u32 %v815_v59, %v790_v7 }
  0xba   : > { %v796_v50 = vmul.u32 %v792_v6, %v791_v60  ;;  %v818_v48 = vmul.u32 %v814_v57, %v791_v60  ;;  %v794_v39 = vmul.u32 %v792_v6, %v790_v7  ;;  %v795_v53 = vmul.u32 %v793_v44, %v790_v7 }
  0xbb   : > { %v699_v36 = vor.u32 %v698_v9, %v697_v46  ;;  %v702_v61 = vshll.u32 %v701_v49, 23  ;;  %v777_v56 = vsel %vm773_vm15, %v757_v32, %v6269_v54  ;;  %v797_v47 = vmul.u32 %v793_v44, %v791_v60 }
  0xbc   : > { %v819_v30 = vmul.u32 %v815_v59, %v791_v60  ;;  %v820_v16 = vshll.u32 %v817_v21, 16  ;;  %v798_v10 = vshll.u32 %v795_v53, 16  ;;  %v800_v34 = vshll.u32 %v796_v50, 16 }
  0xbd   : > { %v703_v31 = vor.u32 4788187, %v702_v61  ;;  %v706_v0 = vcvt.s32.f32 %v699_v36  ;;  %v730_v14 = vadd.s32 3, %v713_v15  ;;  %v779_v57 = vsel %vm775_vm2, %v6276_v28, %v778_v38 }
  0xbe   : > { %v822_v46 = vshll.u32 %v818_v48, 16  ;;  %vm824_vm7 = vc.u32 %v816_v52, %v820_v16  ;;  %vm802_vm8 = vc.u32 %v794_v39, %v798_v10  ;;  %v804_v7 = vadd.s32 %v798_v10, %v794_v39 }
  0xbf   : > { %v704_v6 = vand.u32 2147483647, %v703_v31  ;;  %v825_v9 = vsel %vm824_vm7, 1, %v9922_v43  ;;  %v799_v54 = vshrl.u32 %v795_v53, 16  ;;  %v803_v60 = vsel %vm802_vm8, 1, %v9922_v43 }
  0xc0   : > { %v826_v59 = vadd.s32 %v820_v16, %v816_v52  ;;  %v827_v32 = vadd.s32 %v825_v9, %v819_v30  ;;  %v805_v44 = vadd.s32 %v803_v60, %v797_v47  ;;  %vm806_vm9 = vc.u32 %v804_v7, %v800_v34 }
  0xc1   : > { %v707_v49 = vmul.f32 %v706_v0, %v704_v6  ;;  %vm907_vm10 = vcmp.gt.s32.totalorder %v906_v45, 0  ;;  %v807_v15 = vsel %vm806_vm9, 1, %v9922_v43  ;;  %v821_v36 = vshrl.u32 %v817_v21, 16 }
  0xc2   : > { %vm828_vm11 = vc.u32 %v826_v59, %v822_v46  ;;  %v908_v28 = vsel %vm907_vm10, %v906_v45, 0  ;;  %v801_v61 = vshrl.u32 %v796_v50, 16  ;;  %v809_v31 = vadd.s32 %v807_v15, %v805_v44 }
  0xc3   : > { %v708_v38 = vxor.u32 2147483648, %v707_v49  ;;  %v829_v10 = vsel %vm828_vm11, 1, %v9922_v43  ;;  %v780_v53 = vsel %vm774_vm4, %v777_v56, %v779_v57  ;;  %v823_v39 = vshrl.u32 %v818_v48, 16 }
  0xc4   : > { %v831_v52 = vadd.s32 %v829_v10, %v827_v32  ;;  %v910_v30 = vand.u32 31, %v908_v28  ;;  %v810_v16 = vadd.s32 %v809_v31, %v799_v54  ;;  %v6349_v0 = vadd.s32 %v826_v59, %v822_v46 }
  0xc5   : > { %v709_v47 = vsel %vm588_vm0, %v708_v38, %v707_v49  ;;  %v904_v21 = vor.u32 8388608, %v6310_v1  ;;  %v6355_v34 = vshrl.u32 %v908_v28, 5  ;;  %v6357_v48 = vand.u32 3, %v730_v14 }
  0xc6   : > { %v712_v45 = vsel %vm6297_vm5, %v5867_v37, %v709_v47  ;;  %v832_v50 = vadd.s32 %v831_v52, %v821_v36  ;;  %v911_v17 = vsub.s32 32, %v910_v30  ;;  %v6359_v57 = vadd.s32 %v810_v16, %v801_v61 }
  0xc7   : > { %v714_v56 = vmul.f32 %v712_v45, %v712_v45  ;;  %v834_v6 = vmul.u32 %v6267_v55, %v780_v53  ;;  %v913_v46 = vshll.u32 %v9953_v51, %v910_v30  ;;  %v916_v9 = vshll.u32 %v9946_v12, %v910_v30 }
  0xc8   : > { %v833_v7 = vadd.s32 %v832_v50, %v823_v39  ;;  %v914_v1 = vshrl.u32 %v9946_v12, %v911_v17  ;;  %vm836_vm12 = vc.u32 %v6359_v57, %v6349_v0  ;;  %v917_v60 = vshrl.u32 %v9947_v2, %v911_v17 }
  0xc9   : > { %v715_v19 = vmul.f32 -0.001358992, %v714_v56  ;;  %v722_v54 = vmul.f32 -0.00019511016, %v714_v56  ;;  %v919_v59 = vshll.u32 %v9947_v2, %v910_v30  ;;  %v920_v32 = vshrl.u32 %v9945_v5, %v911_v17 }
  0xca   : > { %v837_v14 = vadd.s32 1, %v833_v7  ;;  %vm928_vm13 = vcmp.lt.s32.totalorder %v6355_v34, 1  ;;  %v922_v44 = vshll.u32 %v9945_v5, %v910_v30  ;;  %v923_v15 = vshrl.u32 %v9955_v8, %v911_v17 }
  0xcb   : > { %v716_v55 = vadd.f32 0.041655596, %v715_v19  ;;  %v723_v49 = vadd.f32 0.008332121, %v722_v54  ;;  %v915_v28 = vor.u32 %v914_v1, %v913_v46  ;;  %v925_v38 = vshll.u32 %v9955_v8, %v910_v30 }
  0xcc   : > { %v838_v36 = vsel %vm836_vm12, %v837_v14, %v833_v7  ;;  %v926_v61 = vshrl.u32 %v9956_v13, %v911_v17  ;;  %v6375_v39 = vor.u32 %v917_v60, %v916_v9  ;;  %v921_v52 = vor.u32 %v920_v32, %v919_v59 }
  0xcd   : > { %v717_v31 = vmul.f32 %v716_v55, %v714_v56  ;;  %v724_v10 = vmul.f32 %v723_v49, %v714_v56  ;;  %v839_v53 = vadd.s32 %v838_v36, %v834_v6  ;;  %v924_v47 = vor.u32 %v923_v15, %v922_v44 }
  0xce   : > { %v927_v16 = vor.u32 %v926_v61, %v925_v38  ;;  %vm930_vm14 = vcmp.lt.s32.totalorder %v6355_v34, 3  ;;  %vm931_vm15 = vcmp.lt.s32.totalorder %v6355_v34, 4  ;;  %v9960_v30 = vcvt.s32.f32 %v5836_v23 }
  0xcf   : > { %v718_v50 = vadd.f32 -0.4999988, %v717_v31  ;;  %v725_v19 = vadd.f32 -0.16666654, %v724_v10  ;;  %v840_v54 = vadd.s32 536870912, %v839_v53  ;;  %vm929_vm0 = vcmp.lt.s32.totalorder %v6355_v34, 2 }
  0xd0   : > { %v6382_v7 = vsub.f32 %v9960_v30, %v6237_v11  ;;  %v937_v6 = vsel %vm931_vm15, %v924_v47, 920167782  ;;  %v6387_v46 = vshll.u32 %v904_v21, 8  ;;  %v936_v14 = vsel %vm928_vm13, %v915_v28, %v6375_v39 }
  0xd1   : > { %v719_v1 = vmul.f32 %v718_v50, %v714_v56  ;;  %v726_v9 = vmul.f32 %v725_v19, %v714_v56  ;;  %v6389_v60 = vshrl.u32 %v840_v54, 30  ;;  %v6396_v23 = vadd.f32 %v6244_v24, %v6062_v63 }
  0xd2   : > { %vm732_vm1 = vcmp.lt.s32.totalorder %v6357_v48, 2  ;;  %v938_v11 = vsel %vm930_vm14, %v921_v52, %v937_v6  ;;  %v941_v21 = vsel %vm931_vm15, %v927_v16, 1326507024  ;;  %v940_v55 = vsel %vm928_vm13, %v6375_v39, %v921_v52 }
  0xd3   : > { %v720_v59 = vadd.f32 1.0, %v719_v1  ;;  %v727_v56 = vadd.f32 1.0, %v726_v9  ;;  %v842_v32 = vshll.u32 %v6389_v60, 30  ;;  %vm733_vm2 = vcmp.eq.s32.totalorder %v6357_v48, 0 }
  0xd4   : > { %vm736_vm3 = vcmp.eq.s32.totalorder %v6357_v48, 2  ;;  %v939_v24 = vsel %vm929_vm0, %v936_v14, %v938_v11  ;;  %v942_v49 = vsel %vm930_vm14, %v924_v47, %v941_v21  ;;  %v945_v38 = vand.u32 65535, %v6387_v46 }
  0xd5   : > { %v728_v44 = vmul.f32 %v727_v56, %v712_v45  ;;  %v737_v15 = vxor.u32 2147483648, %v720_v59  ;;  %v843_v36 = vsub.s32 %v839_v53, %v842_v32  ;;  %v912_v61 = vshrl.u32 %v9953_v51, %v911_v17 }
  0xd6   : > { %v943_v31 = vsel %vm929_vm0, %v940_v55, %v942_v49  ;;  %v946_v10 = vshrl.u32 %v6387_v46, 16  ;;  %v970_v16 = vshrl.u32 %v939_v24, 16  ;;  %vm729_vm5 = vweird.f32 %v5867_v37 }
  0xd7   : > { %v734_v50 = vxor.u32 2147483648, %v728_v44  ;;  %v738_v19 = vsel %vm736_vm3, %v737_v15, %v728_v44  ;;  %vm844_vm4 = vcmp.lt.s32.totalorder %v843_v36, 0  ;;  %v845_v54 = vsub.s32 0, %v843_v36 }
  0xd8   : > { %vm743_vm6 = vcmp.lt.s32.totalorder %v6137_v33, 0  ;;  %v947_v45 = vand.u32 65535, %v943_v31  ;;  %v948_v53 = vshrl.u32 %v943_v31, 16  ;;  %v969_v30 = vand.u32 65535, %v939_v24 }
  0xd9   : > { %v735_v47 = vsel %vm733_vm2, %v720_v59, %v734_v50  ;;  %v846_v17 = vsel %vm844_vm4, %v845_v54, %v843_v36  ;;  %v6422_v6 = vmul.u32 %v970_v16, %v945_v38  ;;  %v835_v37 = vadd.s32 %v6349_v0, %v6359_v57 }
  0xda   : > { %v739_v1 = vsel %vm732_vm1, %v735_v47, %v738_v19  ;;  %v847_v9 = vclz %v846_v17  ;;  %v949_v14 = vmul.u32 %v947_v45, %v945_v38  ;;  %v950_v11 = vmul.u32 %v948_v53, %v945_v38 }
  0xdb   : > { %v740_v21 = vsel %vm729_vm5, nan, %v739_v1  ;;  %v932_v56 = vsel %vm928_vm13, %v912_v61, %v915_v28  ;;  %v951_v32 = vmul.u32 %v947_v45, %v946_v10  ;;  %v933_v55 = vsel %vm931_vm15, %v921_v52, 2102212464 }
  0xdc   : > { %v5431_v59 = vadd.s32 4294967294, %v847_v9  ;;  %v952_v24 = vmul.u32 %v948_v53, %v946_v10  ;;  %v953_v49 = vshll.u32 %v950_v11, 16  ;;  %2758 = vst [vmem:[%s6231_s15 + $0x10] sm:$0xff] %v740_v21  ;;  %v865_v48 = vsub.s32 4, %v6389_v60 }
  0xdd   : > { %v955_v44 = vshll.u32 %v951_v32, 16  ;;  %v971_v15 = vmul.u32 %v969_v30, %v945_v38  ;;  %v973_v31 = vmul.u32 %v969_v30, %v946_v10  ;;  %v9961_v50 = vand.u32 2147483647, %v6137_v33 }
  0xde   : > { %vm5432_vm8 = vcmp.lt.s32.totalorder %v5431_v59, 0  ;;  %vm957_vm9 = vc.u32 %v949_v14, %v953_v49  ;;  %v959_v57 = vadd.s32 %v953_v49, %v949_v14  ;;  %v975_v28 = vshll.u32 %v6422_v6, 16 }
  0xdf   : > { %vm6436_vm7 = vcmp.le.f32.partialorder %v9961_v50, 0.7853982  ;;  %v850_v52 = vsel %vm5432_vm8, 0, %v5431_v59  ;;  %v934_v61 = vsel %vm930_vm14, %v6375_v39, %v933_v55  ;;  %v958_v19 = vsel %vm957_vm9, 1, %v9922_v43 }
  0xe0   : > { %v974_v38 = vmul.u32 %v970_v16, %v946_v10  ;;  %v851_v54 = vsub.s32 32, %v850_v52  ;;  %v852_v45 = vshll.u32 %v843_v36, %v850_v52  ;;  %v855_v53 = vsub.s32 4294967266, %v850_v52 }
  0xe1   : > { %v960_v47 = vadd.s32 %v958_v19, %v952_v24  ;;  %v866_v17 = vsel %vm743_vm6, %v865_v48, %v6389_v60  ;;  %v954_v30 = vshrl.u32 %v950_v11, 16  ;;  %vm961_vm10 = vc.u32 %v959_v57, %v955_v44 }
  0xe2   : > { %v977_v1 = vshll.u32 %v973_v31, 16  ;;  %v853_v9 = vshrl.u32 %v835_v37, %v851_v54  ;;  %v856_v14 = vadd.s32 127, %v855_v53  ;;  %v962_v21 = vsel %vm961_vm10, 1, %v9922_v43 }
  0xe3   : > { %vm979_vm11 = vc.u32 %v971_v15, %v975_v28  ;;  %v956_v39 = vshrl.u32 %v951_v32, 16  ;;  %v964_v59 = vadd.s32 %v962_v21, %v960_v47  ;;  %v981_v16 = vadd.s32 %v975_v28, %v971_v15 }
  0xe4   : > { %v980_v10 = vsel %vm979_vm11, 1, %v9922_v43  ;;  %v854_v36 = vor.u32 %v853_v9, %v852_v45  ;;  %v857_v55 = vshll.u32 %v856_v14, 23  ;;  %v1054_v49 = vand.u32 2139095040, %v6396_v23 }
  0xe5   : > { %v982_v24 = vadd.s32 %v980_v10, %v974_v38  ;;  %v965_v50 = vadd.s32 %v964_v59, %v954_v30  ;;  %v976_v60 = vshrl.u32 %v6422_v6, 16  ;;  %vm983_vm12 = vc.u32 %v981_v16, %v977_v1 }
  0xe6   : > { %v9921_v11 = vand.u32 2147483647, %v6396_v23  ;;  %v858_v37 = vor.u32 4788187, %v857_v55  ;;  %v861_v48 = vcvt.s32.f32 %v854_v36  ;;  %v984_v44 = vsel %vm983_vm12, 1, %v9922_v43 }
  0xe7   : > { %v1055_v32 = vshrl.u32 %v1054_v49, 23  ;;  %v868_v57 = vsel %vm6436_vm7, 0, %v866_v17  ;;  %v935_v15 = vsel %vm929_vm0, %v932_v56, %v934_v61  ;;  %v978_v28 = vshrl.u32 %v973_v31, 16 }
  0xe8   : > { %v986_v52 = vadd.s32 %v984_v44, %v982_v24  ;;  %v859_v19 = vand.u32 2147483647, %v858_v37  ;;  %v966_v38 = vadd.s32 %v965_v50, %v956_v39  ;;  %v985_v54 = vadd.s32 %v981_v16, %v977_v1 }
  0xe9   : > { %v5436_v6 = vadd.s32 4294967169, %v1055_v32  ;;  %v9964_v45 = vcvt.s32.f32 %v5876_v41  ;;  %v6463_v47 = vmul.f32 1.5707964, %v6382_v7  ;;  %v250_v30 = vmul.f32 %v6257_v58, %v5839_v25 }
  0xea   : > { %v987_v17 = vadd.s32 %v986_v52, %v976_v60  ;;  %v9966_v34 = vcvt.s32.f32 %v5878_v42  ;;  %v9920_v31 = vfloor.f32 %v5908_v4  ;;  %v862_v61 = vmul.f32 %v861_v48, %v859_v19 }
  0xeb   : > { %v6460_v53 = vmul.f32 0.5, %v9964_v45  ;;  %9965 = vst [vmem:[#allocation11_spill] sm:$0xff] %v6463_v47  ;;  %v1061_v1 = vadd.s32 1, %v5436_v6  ;;  %v9967_v9 = vfloor.f32 %v5898_v62  ;;  %v885_v21 = vadd.s32 3, %v868_v57 }
  0xec   : > { %v6469_v56 = vmul.f32 0.5, %v9966_v34  ;;  %v988_v39 = vadd.s32 %v987_v17, %v978_v28  ;;  %v989_v7 = vmul.u32 %v6387_v46, %v935_v15  ;;  %v863_v59 = vxor.u32 2147483648, %v862_v61 }
  0xed   : > { %v192_v14 = vmul.f32 -0.28782314, %v9967_v9  ;;  %vm991_vm13 = vc.u32 %v966_v38, %v985_v54  ;;  %v1058_v10 = vand.u32 8388607, %v9921_v11  ;;  %vm1062_vm14 = vcmp.gt.s32.totalorder %v1061_v1, 0 }
  0xee   : > { %v6479_v36 = vadd.f32 %v250_v30, %v6463_v47  ;;  %v992_v55 = vadd.s32 1, %v988_v39  ;;  %v1063_v24 = vsel %vm1062_vm14, %v1061_v1, 0  ;;  %v6484_v50 = vmul.f32 -0.28782314, %v9920_v31 }
  0xef   : > { %v864_v46 = vsel %vm743_vm6, %v863_v59, %v862_v61  ;;  %v1065_v60 = vand.u32 31, %v1063_v24  ;;  %v6488_v37 = vmul.f32 1.442695, %v192_v14  ;;  %v6495_v44 = vand.u32 3, %v885_v21 }
  0xf0   : > { %v6493_v48 = vsel %vm6436_vm7, %v6137_v33, %v864_v46  ;;  %v993_v32 = vsel %vm991_vm13, %v992_v55, %v988_v39  ;;  %v1059_v28 = vor.u32 8388608, %v1058_v10  ;;  %v9924_v45 = vand.u32 2147483647, %v6479_v36 }
  0xf1   : > { %v869_v57 = vmul.f32 %v6493_v48, %v6493_v48  ;;  %v994_v15 = vadd.s32 %v993_v32, %v989_v7  ;;  %v6499_v52 = vsub.s32 32, %v1065_v60  ;;  %v1068_v19 = vshll.u32 %v9953_v51, %v1065_v60 }
  0xf2   : > { %v1071_v6 = vshll.u32 %v9946_v12, %v1065_v60  ;;  %v1209_v0 = vand.u32 2139095040, %v6479_v36  ;;  %v1074_v61 = vshll.u32 %v9947_v2, %v1065_v60  ;;  %v1077_v21 = vshll.u32 %v9945_v5, %v1065_v60 }
  0xf3   : > { %v870_v30 = vmul.f32 -0.001358992, %v869_v57  ;;  %v877_v17 = vmul.f32 -0.00019511016, %v869_v57  ;;  %v995_v34 = vadd.s32 536870912, %v994_v15  ;;  %v1069_v1 = vshrl.u32 %v9946_v12, %v6499_v52 }
  0xf4   : > { %v1072_v9 = vshrl.u32 %v9947_v2, %v6499_v52  ;;  %v1075_v14 = vshrl.u32 %v9945_v5, %v6499_v52  ;;  %v1078_v10 = vshrl.u32 %v9955_v8, %v6499_v52  ;;  %vm891_vm15 = vcmp.eq.s32.totalorder %v6495_v44, 2 }
  0xf5   : > { %v871_v39 = vadd.f32 0.041655596, %v870_v30  ;;  %v878_v7 = vadd.f32 0.008332121, %v877_v17  ;;  %v996_v59 = vshrl.u32 %v995_v34, 30  ;;  %v6516_v55 = vadd.s32 %v985_v54, %v966_v38 }
  0xf6   : > { %v6518_v46 = vshrl.u32 %v1063_v24, 5  ;;  %v1080_v32 = vshll.u32 %v9955_v8, %v1065_v60  ;;  %v6521_v31 = vshll.u32 %v1059_v28, 8  ;;  %v1210_v43 = vshrl.u32 %v1209_v0, 23 }
  0xf7   : > { %v872_v49 = vmul.f32 %v871_v39, %v869_v57  ;;  %v879_v16 = vmul.f32 %v878_v7, %v869_v57  ;;  %v997_v11 = vshll.u32 %v996_v59, 30  ;;  %vm888_vm0 = vcmp.eq.s32.totalorder %v6495_v44, 0 }
  0xf8   : > { %v6524_v30 = vor.u32 %v1069_v1, %v1068_v19  ;;  %v6526_v17 = vor.u32 %v1072_v9, %v1071_v6  ;;  %v1079_v34 = vor.u32 %v1078_v10, %v1077_v21  ;;  %v1081_v38 = vshrl.u32 %v9956_v13, %v6499_v52 }
  0xf9   : > { %v873_v54 = vadd.f32 -0.4999988, %v872_v49  ;;  %v880_v24 = vadd.f32 -0.16666654, %v879_v16  ;;  %vm887_vm1 = vcmp.lt.s32.totalorder %v6495_v44, 2  ;;  %vm898_vm2 = vcmp.lt.s32.totalorder %v6240_v3, 0 }
  0xfa   : > { %v998_v60 = vsub.s32 %v994_v15, %v997_v11  ;;  %v1076_v28 = vor.u32 %v1075_v14, %v1074_v61  ;;  %vm884_vm3 = vweird.f32 %v6137_v33  ;;  %v1082_v0 = vor.u32 %v1081_v38, %v1080_v32 }
  0xfb   : > { %vm1083_vm4 = vcmp.lt.s32.totalorder %v6518_v46, 1  ;;  %vm1085_vm5 = vcmp.lt.s32.totalorder %v6518_v46, 3  ;;  %vm1086_vm6 = vcmp.lt.s32.totalorder %v6518_v46, 4  ;;  %v874_v19 = vmul.f32 %v873_v54, %v869_v57 }
  0xfc   : > { %v881_v6 = vmul.f32 %v880_v24, %v869_v57  ;;  %vm999_vm7 = vcmp.lt.s32.totalorder %v998_v60, 0  ;;  %v1000_v49 = vsub.s32 0, %v998_v60  ;;  %v9968_v16 = vand.u32 2147483647, %v6240_v3 }
  0xfd   : > { %vm1084_vm9 = vcmp.lt.s32.totalorder %v6518_v46, 2  ;;  %v1092_v11 = vsel %vm1086_vm6, %v1079_v34, 920167782  ;;  %v5439_v15 = vadd.s32 4294967169, %v1210_v43  ;;  %v6547_v61 = vand.u32 8388607, %v9924_v45 }
  0xfe   : > { %vm6538_vm8 = vcmp.le.f32.partialorder %v9968_v16, 0.7853982  ;;  %v875_v9 = vadd.f32 1.0, %v874_v19  ;;  %v882_v57 = vadd.f32 1.0, %v881_v6  ;;  %v1001_v14 = vsel %vm999_vm7, %v1000_v49, %v998_v60 }
  0xff   : > { %v1091_v21 = vsel %vm1083_vm4, %v6524_v30, %v6526_v17  ;;  %v1002_v39 = vclz %v1001_v14  ;;  %v1020_v7 = vsub.s32 4, %v996_v59  ;;  %v1093_v10 = vsel %vm1085_vm5, %v1076_v28, %v1092_v11 }
 0x100   : > { %v1095_v43 = vsel %vm1083_vm4, %v6526_v17, %v1076_v28  ;;  %v883_v32 = vmul.f32 %v882_v57, %v6493_v48  ;;  %v892_v38 = vxor.u32 2147483648, %v875_v9  ;;  %v1096_v54 = vsel %vm1086_vm6, %v1082_v0, 1326507024 }
 0x101   : > { %v1100_v24 = vand.u32 65535, %v6521_v31  ;;  %v5434_v19 = vadd.s32 4294967294, %v1002_v39  ;;  %v1094_v6 = vsel %vm1084_vm9, %v1091_v21, %v1093_v10  ;;  %v1097_v49 = vsel %vm1085_vm5, %v1079_v34, %v1096_v54 }
 0x102   : > { %v1101_v16 = vshrl.u32 %v6521_v31, 16  ;;  %v889_v11 = vxor.u32 2147483648, %v883_v32  ;;  %v893_v14 = vsel %vm891_vm15, %v892_v38, %v883_v32  ;;  %v1098_v48 = vsel %vm1084_vm9, %v1095_v43, %v1097_v49 }
 0x103   : > { %v1216_v57 = vadd.s32 1, %v5439_v15  ;;  %vm5435_vm10 = vcmp.lt.s32.totalorder %v5434_v19, 0  ;;  %v1021_v0 = vsel %vm898_vm2, %v1020_v7, %v996_v59  ;;  %v1102_v39 = vand.u32 65535, %v1098_v48 }
 0x104   : > { %v1103_v45 = vshrl.u32 %v1098_v48, 16  ;;  %v890_v21 = vsel %vm888_vm0, %v875_v9, %v889_v11  ;;  %v1005_v34 = vsel %vm5435_vm10, 0, %v5434_v19  ;;  %v1124_v10 = vand.u32 65535, %v1094_v6 }
 0x105   : > { %v1125_v54 = vshrl.u32 %v1094_v6, 16  ;;  %v894_v32 = vsel %vm887_vm1, %v890_v21, %v893_v14  ;;  %v1006_v38 = vsub.s32 32, %v1005_v34  ;;  %v1007_v63 = vshll.u32 %v998_v60, %v1005_v34 }
 0x106   : > { %v1010_v43 = vsub.s32 4294967266, %v1005_v34  ;;  %v895_v15 = vsel %vm884_vm3, nan, %v894_v32  ;;  %v1023_v59 = vsel %vm6538_vm8, 0, %v1021_v0  ;;  %v1067_v7 = vshrl.u32 %v9953_v51, %v6499_v52 }
 0x107   : > { %v1088_v9 = vsel %vm1086_vm6, %v1076_v28, 2102212464  ;;  %v1008_v19 = vshrl.u32 %v6516_v55, %v1006_v38  ;;  %v1104_v44 = vmul.u32 %v1102_v39, %v1100_v24  ;;  %v1105_v49 = vmul.u32 %v1103_v45, %v1100_v24  ;;  %2759 = vst [vmem:[%s6231_s15 + $0x18] sm:$0xff] %v895_v15 }
 0x108   : > { %v1011_v6 = vadd.s32 127, %v1010_v43  ;;  %v1106_v60 = vmul.u32 %v1102_v39, %v1101_v16  ;;  %v1126_v11 = vmul.u32 %v1124_v10, %v1100_v24  ;;  %v1127_v14 = vmul.u32 %v1125_v54, %v1100_v24 }
 0x109   : > { %v1128_v33 = vmul.u32 %v1124_v10, %v1101_v16  ;;  %v1009_v48 = vor.u32 %v1008_v19, %v1007_v63  ;;  %v1107_v34 = vmul.u32 %v1103_v45, %v1101_v16  ;;  %v1108_v0 = vshll.u32 %v1105_v49, 16 }
 0x10a   : > { %v1012_v21 = vshll.u32 %v1011_v6, 23  ;;  %v1087_v52 = vsel %vm1083_vm4, %v1067_v7, %v6524_v30  ;;  %v1110_v32 = vshll.u32 %v1106_v60, 16  ;;  %v1129_v28 = vmul.u32 %v1125_v54, %v1101_v16 }
 0x10b   : > { %v1130_v18 = vshll.u32 %v1127_v14, 16  ;;  %v1016_v38 = vcvt.s32.f32 %v1009_v48  ;;  %vm1112_vm11 = vc.u32 %v1104_v44, %v1108_v0  ;;  %v1114_v43 = vadd.s32 %v1108_v0, %v1104_v44 }
 0x10c   : > { %v1013_v55 = vor.u32 4788187, %v1012_v21  ;;  %v1089_v24 = vsel %vm1085_vm5, %v6526_v17, %v1088_v9  ;;  %v1109_v39 = vshrl.u32 %v1105_v49, 16  ;;  %v9971_v63 = vmov 0  }
 0x10d   : > { %v1113_v10 = vsel %vm1112_vm11, 1, %v9971_v63  ;;  %v1132_v45 = vshll.u32 %v1128_v33, 16  ;;  %vm1116_vm12 = vc.u32 %v1114_v43, %v1110_v32  ;;  %vm1134_vm13 = vc.u32 %v1126_v11, %v1130_v18 }
 0x10e   : > { %v1014_v15 = vand.u32 2147483647, %v1013_v55  ;;  %v1115_v19 = vadd.s32 %v1113_v10, %v1107_v34  ;;  %v1111_v30 = vshrl.u32 %v1106_v60, 16  ;;  %v1117_v16 = vsel %vm1116_vm12, 1, %v9971_v63 }
 0x10f   : > { %v1135_v54 = vsel %vm1134_vm13, 1, %v9971_v63  ;;  %v1136_v7 = vadd.s32 %v1130_v18, %v1126_v11  ;;  %vm1217_vm14 = vcmp.gt.s32.totalorder %v1216_v57, 0  ;;  %v1090_v17 = vsel %vm1084_vm9, %v1087_v52, %v1089_v24 }
 0x110   : > { %v1017_v6 = vmul.f32 %v1016_v38, %v1014_v15  ;;  %v1119_v44 = vadd.s32 %v1117_v16, %v1115_v19  ;;  %v1137_v48 = vadd.s32 %v1135_v54, %v1129_v28  ;;  %v1131_v9 = vshrl.u32 %v1127_v14, 16 }
 0x111   : > { %vm1138_vm15 = vc.u32 %v1136_v7, %v1132_v45  ;;  %v1218_v49 = vsel %vm1217_vm14, %v1216_v57, 0  ;;  %v1040_v34 = vadd.s32 3, %v1023_v59  ;;  %v1133_v32 = vshrl.u32 %v1128_v33, 16 }
 0x112   : > { %v1018_v21 = vxor.u32 2147483648, %v1017_v6  ;;  %v1120_v0 = vadd.s32 %v1119_v44, %v1109_v39  ;;  %v1139_v60 = vsel %vm1138_vm15, 1, %v9971_v63  ;;  %v6599_v55 = vadd.s32 %v1136_v7, %v1132_v45 }
 0x113   : > { %v1141_v43 = vadd.s32 %v1139_v60, %v1137_v48  ;;  %v1220_v18 = vand.u32 31, %v1218_v49  ;;  %v9972_v11 = vfloor.f32 %v5898_v62  ;;  %v251_v46 = vmul.f32 %v6257_v58, %v5841_v26 }
 0x114   : > { %v1019_v57 = vsel %vm898_vm2, %v1018_v21, %v1017_v6  ;;  %v6609_v14 = vadd.s32 %v1120_v0, %v1111_v30  ;;  %v1214_v52 = vor.u32 8388608, %v6547_v61  ;;  %v6615_v62 = vand.u32 3, %v1040_v34 }
 0x115   : > { %v6603_v28 = vmul.f32 2.0, %v9972_v11  ;;  %v1022_v59 = vsel %vm6538_vm8, %v6240_v3, %v1019_v57  ;;  %v1142_v33 = vadd.s32 %v1141_v43, %v1131_v9  ;;  %v1221_v38 = vsub.s32 32, %v1220_v18 }
 0x116   : > { %v1024_v24 = vmul.f32 %v1022_v59, %v1022_v59  ;;  %v1144_v39 = vmul.u32 %v6521_v31, %v1090_v17  ;;  %v6618_v10 = vshrl.u32 %v1218_v49, 5  ;;  %vm1146_vm0 = vc.u32 %v6609_v14, %v6599_v55 }
 0x117   : > { %v1143_v45 = vadd.s32 %v1142_v33, %v1133_v32  ;;  %v1223_v15 = vshll.u32 %v9953_v51, %v1220_v18  ;;  %v1224_v1 = vshrl.u32 %v9946_v12, %v1221_v38  ;;  %v1226_v61 = vshll.u32 %v9946_v12, %v1220_v18 }
 0x118   : > { %v1025_v19 = vmul.f32 -0.001358992, %v1024_v24  ;;  %v1032_v30 = vmul.f32 -0.00019511016, %v1024_v24  ;;  %v1227_v16 = vshrl.u32 %v9947_v2, %v1221_v38  ;;  %v1229_v7 = vshll.u32 %v9947_v2, %v1220_v18 }
 0x119   : > { %v1147_v54 = vadd.s32 1, %v1143_v45  ;;  %v1230_v31 = vshrl.u32 %v9945_v5, %v1221_v38  ;;  %v1232_v6 = vshll.u32 %v9945_v5, %v1220_v18  ;;  %v1233_v17 = vshrl.u32 %v9955_v8, %v1221_v38 }
 0x11a   : > { %v1026_v44 = vadd.f32 0.041655596, %v1025_v19  ;;  %v1033_v48 = vadd.f32 0.008332121, %v1032_v30  ;;  %vm1238_vm1 = vcmp.lt.s32.totalorder %v6618_v10, 1  ;;  %v6631_v49 = vor.u32 %v1224_v1, %v1223_v15 }
 0x11b   : > { %v1148_v9 = vsel %vm1146_vm0, %v1147_v54, %v1143_v45  ;;  %v1235_v21 = vshll.u32 %v9955_v8, %v1220_v18  ;;  %v1236_v34 = vshrl.u32 %v9956_v13, %v1221_v38  ;;  %v1228_v43 = vor.u32 %v1227_v16, %v1226_v61 }
 0x11c   : > { %v1027_v0 = vmul.f32 %v1026_v44, %v1024_v24  ;;  %v1034_v60 = vmul.f32 %v1033_v48, %v1024_v24  ;;  %v1149_v32 = vadd.s32 %v1148_v9, %v1144_v39  ;;  %v1231_v11 = vor.u32 %v1230_v31, %v1229_v7 }
 0x11d   : > { %v1234_v57 = vor.u32 %v1233_v17, %v1232_v6  ;;  %v1237_v33 = vor.u32 %v1236_v34, %v1235_v21  ;;  %vm1241_vm2 = vcmp.lt.s32.totalorder %v6618_v10, 4  ;;  %vm1240_vm3 = vcmp.lt.s32.totalorder %v6618_v10, 3 }
 0x11e   : > { %v1028_v19 = vadd.f32 -0.4999988, %v1027_v0  ;;  %v1035_v30 = vadd.f32 -0.16666654, %v1034_v60  ;;  %v1150_v58 = vadd.s32 536870912, %v1149_v32  ;;  %5603 = vpow2.f32 %v6488_v37 }
 0x11f   : > { %vm1239_vm4 = vcmp.lt.s32.totalorder %v6618_v10, 2  ;;  %v1247_v18 = vsel %vm1241_vm2, %v1234_v57, 920167782  ;;  %v6641_v45 = vshll.u32 %v1214_v52, 8  ;;  %v1246_v61 = vsel %vm1238_vm1, %v6631_v49, %v1228_v43 }
 0x120   : > { %v1029_v39 = vmul.f32 %v1028_v19, %v1024_v24  ;;  %v1036_v15 = vmul.f32 %v1035_v30, %v1024_v24  ;;  %v6643_v1 = vshrl.u32 %v1150_v58, 30  ;;  %v6649_v16 = vadd.f32 %v251_v46, %v6463_v47 }
 0x121   : > { %vm1042_vm5 = vcmp.lt.s32.totalorder %v6615_v62, 2  ;;  %v1248_v37 = vsel %vm1240_vm3, %v1231_v11, %v1247_v18  ;;  %v1251_v52 = vsel %vm1241_vm2, %v1237_v33, 1326507024  ;;  %v1250_v24 = vsel %vm1238_vm1, %v1228_v43, %v1231_v11 }
 0x122   : > { %v1030_v54 = vadd.f32 1.0, %v1029_v39  ;;  %v1037_v7 = vadd.f32 1.0, %v1036_v15  ;;  %v1152_v58 = vshll.u32 %v6643_v1, 30  ;;  %vm1043_vm6 = vcmp.eq.s32.totalorder %v6615_v62, 0 }
 0x123   : > { %vm1046_vm7 = vcmp.eq.s32.totalorder %v6615_v62, 2  ;;  %v1249_v46 = vsel %vm1239_vm4, %v1246_v61, %v1248_v37  ;;  %v1252_v31 = vsel %vm1240_vm3, %v1234_v57, %v1251_v52  ;;  %v1255_v17 = vand.u32 65535, %v6641_v45 }
 0x124   : > { %v1038_v6 = vmul.f32 %v1037_v7, %v1022_v59  ;;  %v1047_v44 = vxor.u32 2147483648, %v1030_v54  ;;  %v6665_v48 = vsub.s32 %v1149_v32, %v1152_v58  ;;  %v6668_v9 = vpop.eup %5603  ;;  %v1222_v21 = vshrl.u32 %v9953_v51, %v1221_v38 }
 0x125   : > { %v1253_v34 = vsel %vm1239_vm4, %v1250_v24, %v1252_v31  ;;  %v1256_v0 = vshrl.u32 %v6641_v45, 16  ;;  %v1280_v60 = vshrl.u32 %v1249_v46, 16  ;;  %vm1039_vm9 = vweird.f32 %v6240_v3 }
 0x126   : > { %v1044_v33 = vxor.u32 2147483648, %v1038_v6  ;;  %v1048_v19 = vsel %vm1046_vm7, %v1047_v44, %v1038_v6  ;;  %vm1154_vm8 = vcmp.lt.s32.totalorder %v6665_v48, 0  ;;  %v1155_v59 = vsub.s32 0, %v6665_v48 }
 0x127   : > { %vm1053_vm10 = vcmp.lt.s32.totalorder %v6396_v23, 0  ;;  %v1243_v32 = vsel %vm1241_vm2, %v1231_v11, 2102212464  ;;  %v1257_v38 = vand.u32 65535, %v1253_v34  ;;  %v1258_v57 = vshrl.u32 %v1253_v34, 16 }
 0x128   : > { %v1045_v30 = vsel %vm1043_vm6, %v1030_v54, %v1044_v33  ;;  %v1156_v18 = vsel %vm1154_vm8, %v1155_v59, %v6665_v48  ;;  %v1279_v39 = vand.u32 65535, %v1249_v46  ;;  %v6683_v15 = vmul.u32 %v1280_v60, %v1255_v17 }
 0x129   : > { %v1049_v61 = vsel %vm1042_vm5, %v1045_v30, %v1048_v19  ;;  %v1157_v3 = vclz %v1156_v18  ;;  %v1259_v37 = vmul.u32 %v1257_v38, %v1255_v17  ;;  %v1260_v52 = vmul.u32 %v1258_v57, %v1255_v17 }
 0x12a   : > { %v1050_v7 = vsel %vm1039_vm9, nan, %v1049_v61  ;;  %v1145_v11 = vadd.s32 %v6599_v55, %v6609_v14  ;;  %v1242_v54 = vsel %vm1238_vm1, %v1222_v21, %v6631_v49  ;;  %v1261_v58 = vmul.u32 %v1257_v38, %v1256_v0 }
 0x12b   : > { %v5437_v24 = vadd.s32 4294967294, %v1157_v3  ;;  %v1244_v46 = vsel %vm1240_vm3, %v1228_v43, %v1243_v32  ;;  %v1262_v31 = vmul.u32 %v1258_v57, %v1256_v0  ;;  %v1263_v6 = vshll.u32 %v1260_v52, 16  ;;  %2760 = vst [vmem:[%s6231_s15 + $0x20] sm:$0xff] %v1050_v7 }
 0x12c   : > { %v1175_v62 = vsub.s32 4, %v6643_v1  ;;  %v1265_v44 = vshll.u32 %v1261_v58, 16  ;;  %v1281_v34 = vmul.u32 %v1279_v39, %v1255_v17  ;;  %v1283_v33 = vmul.u32 %v1279_v39, %v1256_v0 }
 0x12d   : > { %v9973_v19 = vand.u32 2147483647, %v6396_v23  ;;  %vm5438_vm12 = vcmp.lt.s32.totalorder %v5437_v24, 0  ;;  %vm1267_vm13 = vc.u32 %v1259_v37, %v1263_v6  ;;  %v1269_v14 = vadd.s32 %v1263_v6, %v1259_v37 }
 0x12e   : > { %v1285_v49 = vshll.u32 %v6683_v15, 16  ;;  %v1160_v43 = vsel %vm5438_vm12, 0, %v5437_v24  ;;  %v1268_v21 = vsel %vm1267_vm13, 1, %v9971_v63  ;;  %v1284_v59 = vmul.u32 %v1280_v60, %v1256_v0 }
 0x12f   : > { %vm6698_vm11 = vcmp.le.f32.partialorder %v9973_v19, 0.7853982  ;;  %v1364_v32 = vand.u32 2139095040, %v6649_v16  ;;  %v1161_v38 = vsub.s32 32, %v1160_v43  ;;  %v1162_v17 = vshll.u32 %v6665_v48, %v1160_v43 }
 0x130   : > { %v1165_v57 = vsub.s32 4294967266, %v1160_v43  ;;  %v1270_v30 = vadd.s32 %v1268_v21, %v1262_v31  ;;  %v1176_v18 = vsel %vm1053_vm10, %v1175_v62, %v6643_v1  ;;  %v1264_v39 = vshrl.u32 %v1260_v52, 16 }
 0x131   : > { %vm1271_vm14 = vc.u32 %v1269_v14, %v1265_v44  ;;  %v1287_v61 = vshll.u32 %v1283_v33, 16  ;;  %v1163_v3 = vshrl.u32 %v1145_v11, %v1161_v38  ;;  %vm1289_vm15 = vc.u32 %v1281_v34, %v1285_v49 }
 0x132   : > { %v1166_v37 = vadd.s32 127, %v1165_v57  ;;  %v1272_v7 = vsel %vm1271_vm14, 1, %v9971_v63  ;;  %v1290_v60 = vsel %vm1289_vm15, 1, %v9971_v63  ;;  %v1291_v24 = vadd.s32 %v1285_v49, %v1281_v34 }
 0x133   : > { %v1274_v0 = vadd.s32 %v1272_v7, %v1270_v30  ;;  %v1365_v6 = vshrl.u32 %v1364_v32, 23  ;;  %v1164_v48 = vor.u32 %v1163_v3, %v1162_v17  ;;  %v1266_v31 = vshrl.u32 %v1261_v58, 16 }
 0x134   : > { %v1167_v19 = vshll.u32 %v1166_v37, 23  ;;  %v1292_v43 = vadd.s32 %v1290_v60, %v1284_v59  ;;  %v1286_v1 = vshrl.u32 %v6683_v15, 16  ;;  %vm1293_vm0 = vc.u32 %v1291_v24, %v1287_v61 }
 0x135   : > { %v1275_v21 = vadd.s32 %v1274_v0, %v1264_v39  ;;  %v5442_v52 = vadd.s32 4294967169, %v1365_v6  ;;  %v1171_v11 = vcvt.s32.f32 %v1164_v48  ;;  %v1294_v44 = vsel %vm1293_vm0, 1, %v9971_v63 }
 0x136   : > { %v1168_v62 = vor.u32 4788187, %v1167_v19  ;;  %v9931_v14 = vand.u32 2147483647, %v6649_v16  ;;  %v1178_v38 = vsel %vm6698_vm11, 0, %v1176_v18  ;;  %v1288_v34 = vshrl.u32 %v1283_v33, 16 }
 0x137   : > { %v1296_v49 = vadd.s32 %v1294_v44, %v1292_v43  ;;  %v1371_v32 = vadd.s32 1, %v5442_v52  ;;  %v9976_v58 = vfloor.f32 %v6460_v53  ;;  %v6718_v57 = vadd.s32 %v1275_v21, %v1266_v31 }
 0x138   : > { %v1169_v17 = vand.u32 2147483647, %v1168_v62  ;;  %v6720_v15 = vadd.s32 %v1291_v24, %v1287_v61  ;;  %v9977_v30 = vcvt.s32.f32 %v5861_v35  ;;  %v1245_v3 = vsel %vm1239_vm4, %v1242_v54, %v1244_v46 }
 0x139   : > { %v194_v59 = vmul.f32 -0.28782314, %v9976_v58  ;;  %v1297_v37 = vadd.s32 %v1296_v49, %v1286_v1  ;;  %vm1372_vm1 = vcmp.gt.s32.totalorder %v1371_v32, 0  ;;  %v1195_v18 = vadd.s32 3, %v1178_v38 }
 0x13a   : > { %v224_v39 = vsub.f32 %v9977_v30, %v6603_v28  ;;  %v1172_v33 = vmul.f32 %v1171_v11, %v1169_v17  ;;  %v1368_v7 = vand.u32 8388607, %v9931_v14  ;;  %v1373_v0 = vsel %vm1372_vm1, %v1371_v32, 0 }
 0x13b   : > { %v9978_v60 = vfloor.f32 %v6469_v56  ;;  %v6734_v61 = vmul.f32 1.442695, %v6484_v50  ;;  %v1298_v35 = vadd.s32 %v1297_v37, %v1288_v34  ;;  %v1375_v28 = vand.u32 31, %v1373_v0 }
 0x13c   : > { %v6736_v24 = vmul.f32 1.442695, %v194_v59  ;;  %v1173_v10 = vxor.u32 2147483648, %v1172_v33  ;;  %v1299_v54 = vmul.u32 %v6641_v45, %v1245_v3  ;;  %vm1301_vm2 = vc.u32 %v6718_v57, %v6720_v15 }
 0x13d   : > { %v6731_v6 = vmul.f32 -0.28782314, %v9978_v60  ;;  %v9979_v46 = vfloor.f32 %v5908_v4  ;;  %v6745_v19 = vmul.f32 1.5707964, %v224_v39  ;;  %v1302_v31 = vadd.s32 1, %v1298_v35 }
 0x13e   : > { %v1376_v43 = vsub.s32 32, %v1375_v28  ;;  %v252_v50 = vmul.f32 %v6668_v9, %v5839_v25  ;;  %v1174_v21 = vsel %vm1053_vm10, %v1173_v10, %v1172_v33  ;;  %v6751_v1 = vand.u32 3, %v1195_v18 }
 0x13f   : > { %v6743_v48 = vmul.f32 2.0, %v9979_v46  ;;  %9980 = vst [vmem:[#allocation12_spill] sm:$0xff] %v6745_v19  ;;  %v1369_v45 = vor.u32 8388608, %v1368_v7  ;;  %v6756_v52 = vsel %vm6698_vm11, %v6396_v23, %v1174_v21  ;;  %v1303_v4 = vsel %vm1301_vm2, %v1302_v31, %v1298_v35 }
 0x140   : > { %v6758_v62 = vshrl.u32 %v1373_v0, 5  ;;  %v1381_v11 = vshll.u32 %v9946_v12, %v1375_v28  ;;  %v1179_v44 = vmul.f32 %v6756_v52, %v6756_v52  ;;  %v1304_v38 = vadd.s32 %v1303_v4, %v1299_v54 }
 0x141   : > { %v1384_v34 = vshll.u32 %v9947_v2, %v1375_v28  ;;  %v1387_v49 = vshll.u32 %v9945_v5, %v1375_v28  ;;  %v1382_v32 = vshrl.u32 %v9947_v2, %v1376_v43  ;;  %v1385_v58 = vshrl.u32 %v9945_v5, %v1376_v43 }
 0x142   : > { %v1388_v55 = vshrl.u32 %v9955_v8, %v1376_v43  ;;  %v1390_v59 = vshll.u32 %v9955_v8, %v1375_v28  ;;  %v6770_v17 = vadd.f32 %v252_v50, %v6745_v19  ;;  %v1180_v30 = vmul.f32 -0.001358992, %v1179_v44 }
 0x143   : > { %v1187_v39 = vmul.f32 -0.00019511016, %v1179_v44  ;;  %v1305_v3 = vadd.s32 536870912, %v1304_v38  ;;  %v1378_v37 = vshll.u32 %v9953_v51, %v1375_v28  ;;  %v1379_v33 = vshrl.u32 %v9946_v12, %v1376_v43 }
 0x144   : > { %v1391_v18 = vshrl.u32 %v9956_v13, %v1376_v43  ;;  %v6775_v7 = vshll.u32 %v1369_v45, 8  ;;  %v1181_v0 = vadd.f32 0.041655596, %v1180_v30  ;;  %v1389_v10 = vor.u32 %v1388_v55, %v1387_v49 }
 0x145   : > { %v1188_v60 = vadd.f32 0.008332121, %v1187_v39  ;;  %v6777_v35 = vshrl.u32 %v1305_v3, 30  ;;  %vm1201_vm3 = vcmp.eq.s32.totalorder %v6751_v1, 2  ;;  %v6780_v54 = vor.u32 %v1382_v32, %v1381_v11 }
 0x146   : > { %v6782_v46 = vor.u32 %v1385_v58, %v1384_v34  ;;  %v1392_v31 = vor.u32 %v1391_v18, %v1390_v59  ;;  %vm1396_vm4 = vcmp.lt.s32.totalorder %v6758_v62, 4  ;;  %v1182_v28 = vmul.f32 %v1181_v0, %v1179_v44 }
 0x147   : > { %v1189_v50 = vmul.f32 %v1188_v60, %v1179_v44  ;;  %v1307_v21 = vshll.u32 %v6777_v35, 30  ;;  %vm1393_vm5 = vcmp.lt.s32.totalorder %v6758_v62, 1  ;;  %vm1198_vm6 = vcmp.eq.s32.totalorder %v6751_v1, 0 }
 0x148   : > { %v1380_v45 = vor.u32 %v1379_v33, %v1378_v37  ;;  %vm1395_vm7 = vcmp.lt.s32.totalorder %v6758_v62, 3  ;;  %v6790_v4 = vand.u32 65535, %v6775_v7  ;;  %v1519_v11 = vand.u32 2139095040, %v6770_v17 }
 0x149   : > { %v1183_v34 = vadd.f32 -0.4999988, %v1182_v28  ;;  %v1190_v49 = vadd.f32 -0.16666654, %v1189_v50  ;;  %vm1197_vm8 = vcmp.lt.s32.totalorder %v6751_v1, 2  ;;  %v6794_v32 = vsub.s32 %v1304_v38, %v1307_v21 }
 0x14a   : > { %v1402_v58 = vsel %vm1396_vm4, %v1389_v10, 920167782  ;;  %vm1194_vm9 = vweird.f32 %v6396_v23  ;;  %vm1394_vm10 = vcmp.lt.s32.totalorder %v6758_v62, 2  ;;  %v1405_v55 = vsel %vm1393_vm5, %v6780_v54, %v6782_v46 }
 0x14b   : > { %v1406_v59 = vsel %vm1396_vm4, %v1392_v31, 1326507024  ;;  %v1411_v30 = vshrl.u32 %v6775_v7, 16  ;;  %v1184_v39 = vmul.f32 %v1183_v34, %v1179_v44  ;;  %v1191_v38 = vmul.f32 %v1190_v49, %v1179_v44 }
 0x14c   : > { %vm1309_vm11 = vcmp.lt.s32.totalorder %v6794_v32, 0  ;;  %v1310_v3 = vsub.s32 0, %v6794_v32  ;;  %vm1208_vm12 = vcmp.lt.s32.totalorder %v6479_v36, 0  ;;  %v1377_v37 = vshrl.u32 %v9953_v51, %v1376_v43 }
 0x14d   : > { %v1401_v33 = vsel %vm1393_vm5, %v1380_v45, %v6780_v54  ;;  %v1403_v18 = vsel %vm1395_vm7, %v6782_v46, %v1402_v58  ;;  %v1407_v0 = vsel %vm1395_vm7, %v1389_v10, %v1406_v59  ;;  %v1185_v44 = vadd.f32 1.0, %v1184_v39 }
 0x14e   : > { %v1192_v60 = vadd.f32 1.0, %v1191_v38  ;;  %v1311_v31 = vsel %vm1309_vm11, %v1310_v3, %v6794_v32  ;;  %v1408_v28 = vsel %vm1394_vm10, %v1405_v55, %v1407_v0  ;;  %v1300_v58 = vadd.s32 %v6720_v15, %v6718_v57 }
 0x14f   : > { %v1312_v50 = vclz %v1311_v31  ;;  %v1412_v43 = vand.u32 65535, %v1408_v28  ;;  %v1413_v21 = vshrl.u32 %v1408_v28, 16  ;;  %v1202_v14 = vxor.u32 2147483648, %v1185_v44 }
 0x150   : > { %v1193_v49 = vmul.f32 %v1192_v60, %v6756_v52  ;;  %v1520_v47 = vshrl.u32 %v1519_v11, 23  ;;  %v1397_v59 = vsel %vm1393_vm5, %v1377_v37, %v1380_v45  ;;  %v1404_v39 = vsel %vm1394_vm10, %v1401_v33, %v1403_v18 }
 0x151   : > { %v5440_v10 = vadd.s32 4294967294, %v1312_v50  ;;  %v1415_v55 = vmul.u32 %v1413_v21, %v6790_v4  ;;  %v1330_v52 = vsub.s32 4, %v6777_v35  ;;  %v1416_v0 = vmul.u32 %v1412_v43, %v1411_v30 }
 0x152   : > { %v1199_v38 = vxor.u32 2147483648, %v1193_v49  ;;  %v1203_v3 = vsel %vm1201_vm3, %v1202_v14, %v1193_v49  ;;  %v1414_v57 = vmul.u32 %v1412_v43, %v6790_v4  ;;  %v1434_v11 = vand.u32 65535, %v1404_v39 }
 0x153   : > { %vm5441_vm13 = vcmp.lt.s32.totalorder %v5440_v10, 0  ;;  %v1418_v15 = vshll.u32 %v1415_v55, 16  ;;  %v1417_v33 = vmul.u32 %v1413_v21, %v1411_v30  ;;  %v1435_v18 = vshrl.u32 %v1404_v39, 16 }
 0x154   : > { %v1200_v45 = vsel %vm1198_vm6, %v1185_v44, %v1199_v38  ;;  %v1315_v37 = vsel %vm5441_vm13, 0, %v5440_v10  ;;  %v9981_v43 = vand.u32 2147483647, %v6479_v36  ;;  %v1331_v44 = vsel %vm1208_vm12, %v1330_v52, %v6777_v35 }
 0x155   : > { %v1204_v60 = vsel %vm1197_vm8, %v1200_v45, %v1203_v3  ;;  %v1316_v31 = vsub.s32 32, %v1315_v37  ;;  %v1317_v14 = vshll.u32 %v6794_v32, %v1315_v37  ;;  %v1320_v28 = vsub.s32 4294967266, %v1315_v37 }
 0x156   : > { %v1205_v50 = vsel %vm1194_vm9, nan, %v1204_v60  ;;  %vm6844_vm14 = vcmp.le.f32.partialorder %v9981_v43, 0.7853982  ;;  %v1398_v1 = vsel %vm1396_vm4, %v6782_v46, 2102212464  ;;  %v1420_v21 = vshll.u32 %v1416_v0, 16 }
 0x157   : > { %v1318_v32 = vshrl.u32 %v1300_v58, %v1316_v31  ;;  %v1321_v10 = vadd.s32 127, %v1320_v28  ;;  %vm1422_vm15 = vc.u32 %v1414_v57, %v1418_v15  ;;  %v5445_v23 = vadd.s32 4294967169, %v1520_v47  ;;  %2761 = vst [vmem:[%s6231_s15 + $0x28] sm:$0xff] %v1205_v50 }
 0x158   : > { %v1423_v39 = vsel %vm1422_vm15, 1, %v9971_v63  ;;  %v1424_v38 = vadd.s32 %v1418_v15, %v1414_v57  ;;  %v1436_v3 = vmul.u32 %v1434_v11, %v6790_v4  ;;  %v1437_v45 = vmul.u32 %v1435_v18, %v6790_v4 }
 0x159   : > { %v1319_v37 = vor.u32 %v1318_v32, %v1317_v14  ;;  %v1322_v60 = vshll.u32 %v1321_v10, 23  ;;  %v1425_v35 = vadd.s32 %v1423_v39, %v1417_v33  ;;  %v1438_v52 = vmul.u32 %v1434_v11, %v1411_v30 }
 0x15a   : > { %v1419_v43 = vshrl.u32 %v1415_v55, 16  ;;  %vm1426_vm0 = vc.u32 %v1424_v38, %v1420_v21  ;;  %v1439_v46 = vmul.u32 %v1435_v18, %v1411_v30  ;;  %v1440_v34 = vshll.u32 %v1437_v45, 16 }
 0x15b   : > { %v1323_v58 = vor.u32 4788187, %v1322_v60  ;;  %v1326_v31 = vcvt.s32.f32 %v1319_v37  ;;  %v1427_v47 = vsel %vm1426_vm0, 1, %v9971_v63  ;;  %v1442_v28 = vshll.u32 %v1438_v52, 16 }
 0x15c   : > { %v1399_v57 = vsel %vm1395_vm7, %v6780_v54, %v1398_v1  ;;  %v1429_v15 = vadd.s32 %v1427_v47, %v1425_v35  ;;  %vm1444_vm1 = vc.u32 %v1436_v3, %v1440_v34  ;;  %v1446_v4 = vadd.s32 %v1440_v34, %v1436_v3 }
 0x15d   : > { %v1324_v14 = vand.u32 2147483647, %v1323_v58  ;;  %v1421_v50 = vshrl.u32 %v1416_v0, 16  ;;  %v1445_v11 = vsel %vm1444_vm1, 1, %v9971_v63  ;;  %v1526_v55 = vadd.s32 1, %v5445_v23 }
 0x15e   : > { %v1430_v33 = vadd.s32 %v1429_v15, %v1419_v43  ;;  %v1441_v30 = vshrl.u32 %v1437_v45, 16  ;;  %v1447_v18 = vadd.s32 %v1445_v11, %v1439_v46  ;;  %vm1448_vm2 = vc.u32 %v1446_v4, %v1442_v28 }
 0x15f   : > { %v1327_v21 = vmul.f32 %v1326_v31, %v1324_v14  ;;  %v1333_v32 = vsel %vm6844_vm14, 0, %v1331_v44  ;;  %v1449_v10 = vsel %vm1448_vm2, 1, %v9971_v63  ;;  %vm1527_vm3 = vcmp.gt.s32.totalorder %v1526_v55, 0 }
 0x160   : > { %v1400_v54 = vsel %vm1394_vm10, %v1397_v59, %v1399_v57  ;;  %v1443_v34 = vshrl.u32 %v1438_v52, 16  ;;  %v1451_v1 = vadd.s32 %v1449_v10, %v1447_v18  ;;  %v1528_v0 = vsel %vm1527_vm3, %v1526_v55, 0 }
 0x161   : > { %v1328_v39 = vxor.u32 2147483648, %v1327_v21  ;;  %v6868_v38 = vadd.s32 %v1430_v33, %v1421_v50  ;;  %v6870_v23 = vadd.s32 %v1446_v4, %v1442_v28  ;;  %v1530_v3 = vand.u32 31, %v1528_v0 }
 0x162   : > { %5605 = vpow2.f32 %v6734_v61  ;;  %v9984_v44 = vcvt.s32.f32 %v5874_v40  ;;  %v253_v62 = vmul.f32 %v6668_v9, %v5841_v26  ;;  %v1452_v59 = vadd.s32 %v1451_v1, %v1441_v30 }
 0x163   : > { %v1329_v37 = vsel %vm1208_vm12, %v1328_v39, %v1327_v21  ;;  %v1454_v60 = vmul.u32 %v6775_v7, %v1400_v54  ;;  %v9985_v35 = vand.u32 2147483647, %v6770_v17  ;;  %v6885_v43 = vsub.s32 32, %v1530_v3 }
 0x164   : > { %v6876_v45 = vsub.f32 %v9984_v44, %v6743_v48  ;;  %v6890_v40 = vsel %vm6844_vm14, %v6479_v36, %v1329_v37  ;;  %v1350_v61 = vadd.s32 3, %v1333_v32  ;;  %v1453_v48 = vadd.s32 %v1452_v59, %v1443_v34 }
 0x165   : > { %v1523_v52 = vand.u32 8388607, %v9985_v35  ;;  %v6892_v46 = vshrl.u32 %v1528_v0, 5  ;;  %v1334_v58 = vmul.f32 %v6890_v40, %v6890_v40  ;;  %vm1456_vm4 = vc.u32 %v6868_v38, %v6870_v23 }
 0x166   : > { %v1536_v7 = vshll.u32 %v9946_v12, %v1530_v3  ;;  %v1542_v31 = vshll.u32 %v9945_v5, %v1530_v3  ;;  %v1457_v47 = vadd.s32 1, %v1453_v48  ;;  %v1537_v49 = vshrl.u32 %v9947_v2, %v6885_v43 }
 0x167   : > { %v1543_v28 = vshrl.u32 %v9955_v8, %v6885_v43  ;;  %v1545_v57 = vshll.u32 %v9955_v8, %v1530_v3  ;;  %v1335_v15 = vmul.f32 -0.001358992, %v1334_v58  ;;  %v1342_v4 = vmul.f32 -0.00019511016, %v1334_v58 }
 0x168   : > { %v1539_v14 = vshll.u32 %v9947_v2, %v1530_v3  ;;  %v1540_v50 = vshrl.u32 %v9945_v5, %v6885_v43  ;;  %v6908_v11 = vpop.eup %5605  ;;  %v1458_v55 = vsel %vm1456_vm4, %v1457_v47, %v1453_v48  ;;  %v1533_v33 = vshll.u32 %v9953_v51, %v1530_v3 }
 0x169   : > { %v1534_v30 = vshrl.u32 %v9946_v12, %v6885_v43  ;;  %v1546_v18 = vshrl.u32 %v9956_v13, %v6885_v43  ;;  %v1336_v21 = vadd.f32 0.041655596, %v1335_v15  ;;  %v1343_v32 = vadd.f32 0.008332121, %v1342_v4 }
 0x16a   : > { %v1351_v10 = vand.u32 3, %v1350_v61  ;;  %v1459_v54 = vadd.s32 %v1458_v55, %v1454_v60  ;;  %v1524_v34 = vor.u32 8388608, %v1523_v52  ;;  %v6915_v1 = vor.u32 %v1537_v49, %v1536_v7 }
 0x16b   : > { %v1544_v0 = vor.u32 %v1543_v28, %v1542_v31  ;;  %v1547_v39 = vor.u32 %v1546_v18, %v1545_v57  ;;  %v1337_v44 = vmul.f32 %v1336_v21, %v1334_v58  ;;  %v1344_v59 = vmul.f32 %v1343_v32, %v1334_v58 }
 0x16c   : > { %v1460_v37 = vadd.s32 536870912, %v1459_v54  ;;  %v1541_v35 = vor.u32 %v1540_v50, %v1539_v14  ;;  %v6918_v3 = vadd.f32 %v253_v62, %v6745_v19  ;;  %v1535_v48 = vor.u32 %v1534_v30, %v1533_v33 }
 0x16d   : > { %vm1548_vm5 = vcmp.lt.s32.totalorder %v6892_v46, 1  ;;  %vm1551_vm6 = vcmp.lt.s32.totalorder %v6892_v46, 4  ;;  %v1338_v47 = vadd.f32 -0.4999988, %v1337_v44  ;;  %v1345_v61 = vadd.f32 -0.16666654, %v1344_v59 }
 0x16e   : > { %vm1352_vm7 = vcmp.lt.s32.totalorder %v1351_v10, 2  ;;  %v6922_v60 = vshrl.u32 %v1460_v37, 30  ;;  %vm1550_vm8 = vcmp.lt.s32.totalorder %v6892_v46, 3  ;;  %vm1349_vm9 = vweird.f32 %v6479_v36 }
 0x16f   : > { %vm1549_vm10 = vcmp.lt.s32.totalorder %v6892_v46, 2  ;;  %v1557_v62 = vsel %vm1551_vm6, %v1544_v0, 920167782  ;;  %v1561_v52 = vsel %vm1551_vm6, %v1547_v39, 1326507024  ;;  %v6931_v7 = vshll.u32 %v1524_v34, 8 }
 0x170   : > { %v1339_v31 = vmul.f32 %v1338_v47, %v1334_v58  ;;  %v1346_v49 = vmul.f32 %v1345_v61, %v1334_v58  ;;  %v1462_v28 = vshll.u32 %v6922_v60, 30  ;;  %v1560_v57 = vsel %vm1548_vm5, %v6915_v1, %v1541_v35 }
 0x171   : > { %vm1353_vm11 = vcmp.eq.s32.totalorder %v1351_v10, 0  ;;  %vm1356_vm12 = vcmp.eq.s32.totalorder %v1351_v10, 2  ;;  %v1556_v15 = vsel %vm1548_vm5, %v1535_v48, %v6915_v1  ;;  %v1562_v4 = vsel %vm1550_vm8, %v1544_v0, %v1561_v52 }
 0x172   : > { %v1340_v14 = vadd.f32 1.0, %v1339_v31  ;;  %v1347_v50 = vadd.f32 1.0, %v1346_v49  ;;  %v1463_v55 = vsub.s32 %v1459_v54, %v1462_v28  ;;  %v1558_v58 = vsel %vm1550_vm8, %v1541_v35, %v1557_v62 }
 0x173   : > { %v1563_v33 = vsel %vm1549_vm10, %v1560_v57, %v1562_v4  ;;  %v1565_v30 = vand.u32 65535, %v6931_v7  ;;  %v1566_v18 = vshrl.u32 %v6931_v7, 16  ;;  %v1532_v54 = vshrl.u32 %v9953_v51, %v6885_v43 }
 0x174   : > { %v1348_v32 = vmul.f32 %v1347_v50, %v6890_v40  ;;  %v1357_v34 = vxor.u32 2147483648, %v1340_v14  ;;  %vm1464_vm13 = vcmp.lt.s32.totalorder %v1463_v55, 0  ;;  %v1465_v0 = vsub.s32 0, %v1463_v55 }
 0x175   : > { %v1559_v39 = vsel %vm1549_vm10, %v1556_v15, %v1558_v58  ;;  %v1567_v44 = vand.u32 65535, %v1563_v33  ;;  %v1568_v59 = vshrl.u32 %v1563_v33, 16  ;;  %v1674_v62 = vand.u32 2139095040, %v6918_v3 }
 0x176   : > { %v1354_v37 = vxor.u32 2147483648, %v1348_v32  ;;  %v1358_v47 = vsel %vm1356_vm12, %v1357_v34, %v1348_v32  ;;  %v1466_v61 = vsel %vm1464_vm13, %v1465_v0, %v1463_v55  ;;  %v1455_v43 = vadd.s32 %v6870_v23, %v6868_v38 }
 0x177   : > { %v1467_v52 = vclz %v1466_v61  ;;  %v1569_v31 = vmul.u32 %v1567_v44, %v1565_v30  ;;  %v1570_v40 = vmul.u32 %v1568_v59, %v1565_v30  ;;  %v1571_v49 = vmul.u32 %v1567_v44, %v1566_v18 }
 0x178   : > { %v1355_v28 = vsel %vm1353_vm11, %v1340_v14, %v1354_v37  ;;  %v1589_v57 = vand.u32 65535, %v1559_v39  ;;  %v1590_v15 = vshrl.u32 %v1559_v39, 16  ;;  %v1572_v58 = vmul.u32 %v1568_v59, %v1566_v18 }
 0x179   : > { %v1359_v4 = vsel %vm1352_vm7, %v1355_v28, %v1358_v47  ;;  %v5443_v50 = vadd.s32 4294967294, %v1467_v52  ;;  %v1573_v33 = vshll.u32 %v1570_v40, 16  ;;  %v1552_v34 = vsel %vm1548_vm5, %v1532_v54, %v1535_v48 }
 0x17a   : > { %v1360_v32 = vsel %vm1349_vm9, nan, %v1359_v4  ;;  %v1553_v14 = vsel %vm1551_vm6, %v1541_v35, 2102212464  ;;  %v1575_v0 = vshll.u32 %v1571_v49, 16  ;;  %v1675_v23 = vshrl.u32 %v1674_v62, 23 }
 0x17b   : > { %vm5444_vm14 = vcmp.lt.s32.totalorder %v5443_v50, 0  ;;  %vm1577_vm15 = vc.u32 %v1569_v31, %v1573_v33  ;;  %v1579_v38 = vadd.s32 %v1573_v33, %v1569_v31  ;;  %2762 = vst [vmem:[%s6231_s15 + $0x30] sm:$0xff] %v1360_v32  ;;  %v1592_v44 = vmul.u32 %v1590_v15, %v1565_v30 }
 0x17c   : > { %v1470_v10 = vsel %vm5444_vm14, 0, %v5443_v50  ;;  %v1578_v39 = vsel %vm1577_vm15, 1, %v9971_v63  ;;  %v1593_v59 = vmul.u32 %v1589_v57, %v1566_v18  ;;  %v1485_v48 = vsub.s32 4, %v6922_v60 }
 0x17d   : > { %v1471_v37 = vsub.s32 32, %v1470_v10  ;;  %v1472_v36 = vshll.u32 %v1463_v55, %v1470_v10  ;;  %v1475_v47 = vsub.s32 4294967266, %v1470_v10  ;;  %v1580_v61 = vadd.s32 %v1578_v39, %v1572_v58 }
 0x17e   : > { %v1574_v54 = vshrl.u32 %v1570_v40, 16  ;;  %vm1581_vm0 = vc.u32 %v1579_v38, %v1575_v0  ;;  %v1591_v35 = vmul.u32 %v1589_v57, %v1565_v30  ;;  %v1576_v4 = vshrl.u32 %v1571_v49, 16 }
 0x17f   : > { %v1473_v52 = vshrl.u32 %v1455_v43, %v1471_v37  ;;  %v1476_v28 = vadd.s32 127, %v1475_v47  ;;  %v1582_v62 = vsel %vm1581_vm0, 1, %v9971_v63  ;;  %v1594_v50 = vmul.u32 %v1590_v15, %v1566_v18 }
 0x180   : > { %v1584_v31 = vadd.s32 %v1582_v62, %v1580_v61  ;;  %v1595_v33 = vshll.u32 %v1592_v44, 16  ;;  %v1597_v32 = vshll.u32 %v1593_v59, 16  ;;  %v1554_v55 = vsel %vm1550_vm8, %v6915_v1, %v1553_v14 }
 0x181   : > { %v1474_v21 = vor.u32 %v1473_v52, %v1472_v36  ;;  %v1477_v19 = vshll.u32 %v1476_v28, 23  ;;  %v5448_v58 = vadd.s32 4294967169, %v1675_v23  ;;  %v1596_v40 = vshrl.u32 %v1592_v44, 16 }
 0x182   : > { %v1585_v10 = vadd.s32 %v1584_v31, %v1574_v54  ;;  %vm1599_vm1 = vc.u32 %v1591_v35, %v1595_v33  ;;  %v1601_v30 = vadd.s32 %v1595_v33, %v1591_v35  ;;  %v1555_v1 = vsel %vm1549_vm10, %v1552_v34, %v1554_v55 }
 0x183   : > { %v1478_v43 = vor.u32 4788187, %v1477_v19  ;;  %v1481_v57 = vcvt.s32.f32 %v1474_v21  ;;  %v1600_v49 = vsel %vm1599_vm1, 1, %v9971_v63  ;;  %v1681_v0 = vadd.s32 1, %v5448_v58 }
 0x184   : > { %v6974_v38 = vadd.s32 %v1585_v10, %v1576_v4  ;;  %v1602_v18 = vadd.s32 %v1600_v49, %v1594_v50  ;;  %vm1603_vm2 = vc.u32 %v1601_v30, %v1597_v32  ;;  %v6976_v15 = vadd.s32 %v1601_v30, %v1597_v32 }
 0x185   : > { %v1479_v39 = vand.u32 2147483647, %v1478_v43  ;;  %v1604_v14 = vsel %vm1603_vm2, 1, %v9971_v63  ;;  %vm1682_vm3 = vcmp.gt.s32.totalorder %v1681_v0, 0  ;;  %vm1363_vm4 = vcmp.lt.s32.totalorder %v6649_v16, 0 }
 0x186   : > { %v1598_v19 = vshrl.u32 %v1593_v59, 16  ;;  %v1606_v21 = vadd.s32 %v1604_v14, %v1602_v18  ;;  %v1683_v23 = vsel %vm1682_vm3, %v1681_v0, 0  ;;  %v9986_v44 = vand.u32 2147483647, %v6649_v16 }
 0x187   : > { %v1482_v36 = vmul.f32 %v1481_v57, %v1479_v39  ;;  %v1486_v46 = vsel %vm1363_vm4, %v1485_v48, %v6922_v60  ;;  %v1685_v34 = vand.u32 31, %v1683_v23  ;;  %v1609_v61 = vmul.u32 %v6931_v7, %v1555_v1 }
 0x188   : > { %vm6984_vm5 = vcmp.le.f32.partialorder %v9986_v44, 0.7853982  ;;  %v1607_v47 = vadd.s32 %v1606_v21, %v1596_v40  ;;  %vm1611_vm6 = vc.u32 %v6974_v38, %v6976_v15  ;;  %v9989_v59 = vand.u32 2147483647, %v6918_v3 }
 0x189   : > { %v1483_v35 = vxor.u32 2147483648, %v1482_v36  ;;  %v6996_v52 = vshrl.u32 %v1683_v23, 5  ;;  %v6998_v28 = vsub.s32 32, %v1685_v34  ;;  %v1688_v4 = vshll.u32 %v9953_v51, %v1685_v34 }
 0x18a   : > { %v1678_v54 = vand.u32 8388607, %v9989_v59  ;;  %v1608_v62 = vadd.s32 %v1607_v47, %v1598_v19  ;;  %v1691_v60 = vshll.u32 %v9946_v12, %v1685_v34  ;;  %v1694_v48 = vshll.u32 %v9947_v2, %v1685_v34 }
 0x18b   : > { %v1697_v7 = vshll.u32 %v9945_v5, %v1685_v34  ;;  %v1484_v31 = vsel %vm1363_vm4, %v1483_v35, %v1482_v36  ;;  %v1689_v50 = vshrl.u32 %v9946_v12, %v6998_v28  ;;  %v1692_v33 = vshrl.u32 %v9947_v2, %v6998_v28 }
 0x18c   : > { %v1700_v32 = vshll.u32 %v9955_v8, %v1685_v34  ;;  %v1487_v55 = vsel %vm6984_vm5, %v6649_v16, %v1484_v31  ;;  %v1612_v58 = vadd.s32 1, %v1608_v62  ;;  %v1695_v10 = vshrl.u32 %v9945_v5, %v6998_v28 }
 0x18d   : > { %v1698_v40 = vshrl.u32 %v9955_v8, %v6998_v28  ;;  %v7019_v30 = vmul.f32 1.5707964, %v6876_v45  ;;  %v1488_v43 = vsel %vm6984_vm5, 0, %v1486_v46  ;;  %v1489_v57 = vmul.f32 %v1487_v55, %v1487_v55 }
 0x18e   : > { %v1701_v49 = vshrl.u32 %v9956_v13, %v6998_v28  ;;  %v1613_v0 = vsel %vm1611_vm6, %v1612_v58, %v1608_v62  ;;  %v1679_v18 = vor.u32 8388608, %v1678_v54  ;;  %v7028_v39 = vor.u32 %v1689_v50, %v1688_v4 }
 0x18f   : > { %v1699_v1 = vor.u32 %v1698_v40, %v1697_v7  ;;  %v1490_v14 = vmul.f32 -0.001358992, %v1489_v57  ;;  %v1497_v19 = vmul.f32 -0.00019511016, %v1489_v57  ;;  %v1614_v21 = vadd.s32 %v1613_v0, %v1609_v61 }
 0x190   : > { %v7030_v45 = vor.u32 %v1692_v33, %v1691_v60  ;;  %v7032_v23 = vor.u32 %v1695_v10, %v1694_v48  ;;  %v1702_v44 = vor.u32 %v1701_v49, %v1700_v32  ;;  %vm1703_vm7 = vcmp.lt.s32.totalorder %v6996_v52, 1 }
 0x191   : > { %vm1705_vm8 = vcmp.lt.s32.totalorder %v6996_v52, 3  ;;  %v1491_v37 = vadd.f32 0.041655596, %v1490_v14  ;;  %v1498_v36 = vadd.f32 0.008332121, %v1497_v19  ;;  %v1615_v46 = vadd.s32 536870912, %v1614_v21 }
 0x192   : > { %vm1706_vm9 = vcmp.lt.s32.totalorder %v6996_v52, 4  ;;  %v254_v34 = vmul.f32 %v6908_v11, %v5839_v25  ;;  %v1505_v47 = vadd.s32 3, %v1488_v43  ;;  %vm1704_vm10 = vcmp.lt.s32.totalorder %v6996_v52, 2 }
 0x193   : > { %v1712_v61 = vsel %vm1706_vm9, %v1699_v1, 920167782  ;;  %v1492_v59 = vmul.f32 %v1491_v37, %v1489_v57  ;;  %v1499_v54 = vmul.f32 %v1498_v36, %v1489_v57  ;;  %v7042_v35 = vshrl.u32 %v1615_v46, 30 }
 0x194   : > { %v1711_v4 = vsel %vm1703_vm7, %v7028_v39, %v7030_v45  ;;  %v9990_v62 = vfloor.f32 %v6460_v53  ;;  %v1713_v48 = vsel %vm1705_vm8, %v7032_v23, %v1712_v61  ;;  %v1716_v7 = vsel %vm1706_vm9, %v1702_v44, 1326507024 }
 0x195   : > { %v7057_v31 = vshll.u32 %v1679_v18, 8  ;;  %v1493_v50 = vadd.f32 -0.4999988, %v1492_v59  ;;  %v1500_v33 = vadd.f32 -0.16666654, %v1499_v54  ;;  %v1617_v32 = vshll.u32 %v7042_v35, 30 }
 0x196   : > { %v7050_v60 = vmul.f32 2.0, %v9990_v62  ;;  %v1715_v53 = vsel %vm1703_vm7, %v7030_v45, %v7032_v23  ;;  %v7065_v58 = vadd.f32 %v254_v34, %v7019_v30  ;;  %v1506_v10 = vand.u32 3, %v1505_v47 }
 0x197   : > { %v1714_v40 = vsel %vm1704_vm10, %v1711_v4, %v1713_v48  ;;  %v1717_v43 = vsel %vm1705_vm8, %v1699_v1, %v1716_v7  ;;  %v1494_v49 = vmul.f32 %v1493_v50, %v1489_v57  ;;  %v1501_v0 = vmul.f32 %v1500_v33, %v1489_v57 }
 0x198   : > { %vm1504_vm11 = vweird.f32 %v6649_v16  ;;  %v1618_v18 = vsub.s32 %v1614_v21, %v1617_v32  ;;  %v1718_v14 = vsel %vm1704_vm10, %v1715_v53, %v1717_v43  ;;  %v1720_v19 = vand.u32 65535, %v7057_v31 }
 0x199   : > { %v1721_v44 = vshrl.u32 %v7057_v31, 16  ;;  %v1745_v37 = vshrl.u32 %v1714_v40, 16  ;;  %v1495_v36 = vadd.f32 1.0, %v1494_v49  ;;  %v1502_v46 = vadd.f32 1.0, %v1501_v0 }
 0x19a   : > { %vm1619_vm12 = vcmp.lt.s32.totalorder %v1618_v18, 0  ;;  %v1620_v34 = vsub.s32 0, %v1618_v18  ;;  %vm1508_vm13 = vcmp.eq.s32.totalorder %v1506_v10, 0  ;;  %vm1511_vm14 = vcmp.eq.s32.totalorder %v1506_v10, 2 }
 0x19b   : > { %v1722_v1 = vand.u32 65535, %v1718_v14  ;;  %v1723_v47 = vshrl.u32 %v1718_v14, 16  ;;  %v1503_v57 = vmul.f32 %v1502_v46, %v1487_v55  ;;  %v1512_v61 = vxor.u32 2147483648, %v1495_v36 }
 0x19c   : > { %v1621_v59 = vsel %vm1619_vm12, %v1620_v34, %v1618_v18  ;;  %v1744_v21 = vand.u32 65535, %v1714_v40  ;;  %vm1507_vm15 = vcmp.lt.s32.totalorder %v1506_v10, 2  ;;  %v7078_v33 = vmul.u32 %v1745_v37, %v1720_v19 }
 0x19d   : > { %v1622_v54 = vclz %v1621_v59  ;;  %v1724_v4 = vmul.u32 %v1722_v1, %v1720_v19  ;;  %v1725_v62 = vmul.u32 %v1723_v47, %v1720_v19  ;;  %v7076_v48 = vmul.u32 %v1722_v1, %v1721_v44 }
 0x19e   : > { %v1509_v7 = vxor.u32 2147483648, %v1503_v57  ;;  %v1513_v50 = vsel %vm1511_vm14, %v1512_v61, %v1503_v57  ;;  %vm1518_vm0 = vcmp.lt.s32.totalorder %v6770_v17, 0  ;;  %v1610_v32 = vadd.s32 %v6976_v15, %v6974_v38 }
 0x19f   : > { %v5446_v53 = vadd.s32 4294967294, %v1622_v54  ;;  %v1728_v55 = vshll.u32 %v1725_v62, 16  ;;  %v1829_v43 = vand.u32 2139095040, %v7065_v58  ;;  %v1727_v49 = vmul.u32 %v1723_v47, %v1721_v44 }
 0x1a0   : > { %v1510_v40 = vsel %vm1508_vm13, %v1495_v36, %v1509_v7  ;;  %v1746_v0 = vmul.u32 %v1744_v21, %v1720_v19  ;;  %v7085_v14 = vmul.u32 %v1744_v21, %v1721_v44  ;;  %v1730_v34 = vshll.u32 %v7076_v48, 16 }
 0x1a1   : > { %v1514_v46 = vsel %vm1507_vm15, %v1510_v40, %v1513_v50  ;;  %vm5447_vm1 = vcmp.lt.s32.totalorder %v5446_v53, 0  ;;  %vm1732_vm2 = vc.u32 %v1724_v4, %v1728_v55  ;;  %v1750_v57 = vshll.u32 %v7078_v33, 16 }
 0x1a2   : > { %v1515_v1 = vsel %vm1504_vm11, nan, %v1514_v46  ;;  %v1625_v38 = vsel %vm5447_vm1, 0, %v5446_v53  ;;  %v1733_v15 = vsel %vm1732_vm2, 1, %v9971_v63  ;;  %v9991_v10 = vand.u32 2147483647, %v6770_v17 }
 0x1a3   : > { %v1626_v19 = vsub.s32 32, %v1625_v38  ;;  %v1627_v47 = vshll.u32 %v1618_v18, %v1625_v38  ;;  %v1630_v61 = vsub.s32 4294967266, %v1625_v38  ;;  %v1734_v59 = vadd.s32 %v1728_v55, %v1724_v4  ;;  %2763 = vst [vmem:[%s6231_s15 + $0x38] sm:$0xff] %v1515_v1 }
 0x1a4   : > { %vm7094_vm3 = vcmp.le.f32.partialorder %v9991_v10, 0.7853982  ;;  %v1640_v21 = vsub.s32 4, %v7042_v35  ;;  %v1687_v16 = vshrl.u32 %v9953_v51, %v6998_v28  ;;  %v1735_v54 = vadd.s32 %v1733_v15, %v1727_v49 }
 0x1a5   : > { %v1749_v7 = vmul.u32 %v1745_v37, %v1721_v44  ;;  %v1628_v50 = vshrl.u32 %v1610_v32, %v1626_v19  ;;  %v1631_v53 = vadd.s32 127, %v1630_v61  ;;  %v1729_v40 = vshrl.u32 %v1725_v62, 16 }
 0x1a6   : > { %vm1736_vm4 = vc.u32 %v1734_v59, %v1730_v34  ;;  %v1708_v46 = vsel %vm1706_vm9, %v7032_v23, 2102212464  ;;  %v1752_v4 = vshll.u32 %v7085_v14, 16  ;;  %vm1754_vm5 = vc.u32 %v1746_v0, %v1750_v57 }
 0x1a7   : > { %v1737_v18 = vsel %vm1736_vm4, 1, %v9971_v63  ;;  %v1629_v55 = vor.u32 %v1628_v50, %v1627_v47  ;;  %v1632_v1 = vshll.u32 %v1631_v53, 23  ;;  %v1755_v28 = vsel %vm1754_vm5, 1, %v9971_v63 }
 0x1a8   : > { %v1739_v38 = vadd.s32 %v1737_v18, %v1735_v54  ;;  %v1641_v44 = vsel %vm1518_vm0, %v1640_v21, %v7042_v35  ;;  %v1756_v37 = vadd.s32 %v1750_v57, %v1746_v0  ;;  %v1757_v62 = vadd.s32 %v1755_v28, %v1749_v7 }
 0x1a9   : > { %v1830_v32 = vshrl.u32 %v1829_v43, 23  ;;  %v1633_v49 = vor.u32 4788187, %v1632_v1  ;;  %v1636_v34 = vcvt.s32.f32 %v1629_v55  ;;  %v1731_v23 = vshrl.u32 %v7076_v48, 16 }
 0x1aa   : > { %v1740_v15 = vadd.s32 %v1739_v38, %v1729_v40  ;;  %v1751_v10 = vshrl.u32 %v7078_v33, 16  ;;  %vm1758_vm6 = vc.u32 %v1756_v37, %v1752_v4  ;;  %v9936_v19 = vand.u32 2147483647, %v7065_v58 }
 0x1ab   : > { %v5451_v47 = vadd.s32 4294967169, %v1830_v32  ;;  %v1634_v61 = vand.u32 2147483647, %v1633_v49  ;;  %v1707_v59 = vsel %vm1703_vm7, %v1687_v16, %v7028_v39  ;;  %v1709_v35 = vsel %vm1705_vm8, %v7030_v45, %v1708_v46 }
 0x1ac   : > { %v1759_v43 = vsel %vm1758_vm6, 1, %v9971_v63  ;;  %v1643_v48 = vsel %vm7094_vm3, 0, %v1641_v44  ;;  %v1753_v33 = vshrl.u32 %v7085_v14, 16  ;;  %v9994_v21 = vcvt.s32.f32 %v5876_v41 }
 0x1ad   : > { %v1761_v0 = vadd.s32 %v1759_v43, %v1757_v62  ;;  %v1836_v57 = vadd.s32 1, %v5451_v47  ;;  %v1637_v7 = vmul.f32 %v1636_v34, %v1634_v61  ;;  %v7127_v50 = vadd.s32 %v1740_v15, %v1731_v23 }
 0x1ae   : > { %v226_v54 = vsub.f32 %v9994_v21, %v7050_v60  ;;  %v7129_v39 = vadd.s32 %v1756_v37, %v1752_v4  ;;  %v255_v45 = vmul.f32 %v6908_v11, %v5841_v26  ;;  %v1710_v16 = vsel %vm1704_vm10, %v1707_v59, %v1709_v35 }
 0x1af   : > { %v1762_v53 = vadd.s32 %v1761_v0, %v1751_v10  ;;  %vm1837_vm7 = vcmp.gt.s32.totalorder %v1836_v57, 0  ;;  %v1638_v14 = vxor.u32 2147483648, %v1637_v7  ;;  %v1660_v40 = vadd.s32 3, %v1643_v48 }
 0x1b0   : > { %v1833_v46 = vand.u32 8388607, %v9936_v19  ;;  %v1838_v41 = vsel %vm1837_vm7, %v1836_v57, 0  ;;  %5607 = vpow2.f32 %v6736_v24  ;;  %v9995_v60 = vfloor.f32 %v6469_v56 }
 0x1b1   : > { %v1763_v4 = vadd.s32 %v1762_v53, %v1753_v33  ;;  %v1840_v55 = vand.u32 31, %v1838_v41  ;;  %v7142_v1 = vmul.f32 1.5707964, %v226_v54  ;;  %v1639_v52 = vsel %vm1518_vm0, %v1638_v14, %v1637_v7 }
 0x1b2   : > { %v7140_v18 = vmul.f32 2.0, %v9995_v60  ;;  %v1764_v38 = vmul.u32 %v7057_v31, %v1710_v16  ;;  %vm1766_vm8 = vc.u32 %v7127_v50, %v7129_v39  ;;  %v7150_v28 = vadd.f32 %v255_v45, %v7019_v30 }
 0x1b3   : > { %v7155_v56 = vsel %vm7094_vm3, %v6770_v17, %v1639_v52  ;;  %v1767_v24 = vadd.s32 1, %v1763_v4  ;;  %v1841_v44 = vsub.s32 32, %v1840_v55  ;;  %v7159_v62 = vand.u32 3, %v1660_v40 }
 0x1b4   : > { %v1644_v37 = vmul.f32 %v7155_v56, %v7155_v56  ;;  %v1834_v32 = vor.u32 8388608, %v1833_v46  ;;  %v1843_v31 = vshll.u32 %v9953_v51, %v1840_v55  ;;  %v1846_v23 = vshll.u32 %v9946_v12, %v1840_v55 }
 0x1b5   : > { %v1768_v49 = vsel %vm1766_vm8, %v1767_v24, %v1763_v4  ;;  %v1844_v34 = vshrl.u32 %v9946_v12, %v1841_v44  ;;  %v1847_v15 = vshrl.u32 %v9947_v2, %v1841_v44  ;;  %v1852_v61 = vshll.u32 %v9945_v5, %v1840_v55 }
 0x1b6   : > { %v1645_v36 = vmul.f32 -0.001358992, %v1644_v37  ;;  %v1652_v10 = vmul.f32 -0.00019511016, %v1644_v37  ;;  %v1769_v47 = vadd.s32 %v1768_v49, %v1764_v38  ;;  %v7166_v59 = vpop.eup %5607  ;;  %v7168_v35 = vshrl.u32 %v1838_v41, 5 }
 0x1b7   : > { %v1849_v43 = vshll.u32 %v9947_v2, %v1840_v55  ;;  %v1850_v48 = vshrl.u32 %v9945_v5, %v1841_v44  ;;  %v1984_v33 = vand.u32 2139095040, %v7150_v28  ;;  %v1853_v54 = vshrl.u32 %v9955_v8, %v1841_v44 }
 0x1b8   : > { %v1646_v0 = vadd.f32 0.041655596, %v1645_v36  ;;  %v1653_v57 = vadd.f32 0.008332121, %v1652_v10  ;;  %v1770_v21 = vadd.s32 536870912, %v1769_v47  ;;  %vm1666_vm9 = vcmp.eq.s32.totalorder %v7159_v62, 2 }
 0x1b9   : > { %v1845_v7 = vor.u32 %v1844_v34, %v1843_v31  ;;  %v7175_v45 = vor.u32 %v1847_v15, %v1846_v23  ;;  %v1855_v16 = vshll.u32 %v9955_v8, %v1840_v55  ;;  %v1856_v53 = vshrl.u32 %v9956_v13, %v1841_v44 }
 0x1ba   : > { %v1647_v14 = vmul.f32 %v1646_v0, %v1644_v37  ;;  %v1654_v40 = vmul.f32 %v1653_v57, %v1644_v37  ;;  %v1771_v46 = vshrl.u32 %v1770_v21, 30  ;;  %v1854_v41 = vor.u32 %v1853_v54, %v1852_v61 }
 0x1bb   : > { %vm1663_vm10 = vcmp.eq.s32.totalorder %v7159_v62, 0  ;;  %v1851_v60 = vor.u32 %v1850_v48, %v1849_v43  ;;  %vm1858_vm11 = vcmp.lt.s32.totalorder %v7168_v35, 1  ;;  %vm1861_vm12 = vcmp.lt.s32.totalorder %v7168_v35, 4 }
 0x1bc   : > { %v7182_v4 = vshll.u32 %v1834_v32, 8  ;;  %v1648_v52 = vadd.f32 -0.4999988, %v1647_v14  ;;  %v1655_v38 = vadd.f32 -0.16666654, %v1654_v40  ;;  %vm1662_vm13 = vcmp.lt.s32.totalorder %v7159_v62, 2 }
 0x1bd   : > { %v1772_v55 = vshll.u32 %v1771_v46, 30  ;;  %vm1860_vm14 = vcmp.lt.s32.totalorder %v7168_v35, 3  ;;  %vm1659_vm15 = vweird.f32 %v6770_v17  ;;  %v1857_v24 = vor.u32 %v1856_v53, %v1855_v16 }
 0x1be   : > { %vm1859_vm0 = vcmp.lt.s32.totalorder %v7168_v35, 2  ;;  %v1867_v31 = vsel %vm1861_vm12, %v1854_v41, 920167782  ;;  %v1981_v49 = vand.u32 2147483647, %v7150_v28  ;;  %v1649_v34 = vmul.f32 %v1648_v52, %v1644_v37 }
 0x1bf   : > { %v1656_v32 = vmul.f32 %v1655_v38, %v1644_v37  ;;  %vm1673_vm1 = vcmp.lt.s32.totalorder %v6918_v3, 0  ;;  %v1773_v23 = vsub.s32 %v1769_v47, %v1772_v55  ;;  %v1866_v15 = vsel %vm1858_vm11, %v1845_v7, %v7175_v45 }
 0x1c0   : > { %v1868_v36 = vsel %vm1860_vm14, %v1851_v60, %v1867_v31  ;;  %v1870_v10 = vsel %vm1858_vm11, %v7175_v45, %v1851_v60  ;;  %v1875_v61 = vand.u32 65535, %v7182_v4  ;;  %v1985_v43 = vshrl.u32 %v1984_v33, 23 }
 0x1c1   : > { %v1650_v48 = vadd.f32 1.0, %v1649_v34  ;;  %v1657_v0 = vadd.f32 1.0, %v1656_v32  ;;  %vm1774_vm2 = vcmp.lt.s32.totalorder %v1773_v23, 0  ;;  %v1775_v37 = vsub.s32 0, %v1773_v23 }
 0x1c2   : > { %v9996_v47 = vand.u32 2147483647, %v6918_v3  ;;  %v1842_v21 = vshrl.u32 %v9953_v51, %v1841_v44  ;;  %v1869_v54 = vsel %vm1859_vm0, %v1866_v15, %v1868_v36  ;;  %v1871_v16 = vsel %vm1861_vm12, %v1857_v24, 1326507024 }
 0x1c3   : > { %v1876_v33 = vshrl.u32 %v7182_v4, 16  ;;  %v1658_v53 = vmul.f32 %v1657_v0, %v7155_v56  ;;  %v1667_v14 = vxor.u32 2147483648, %v1650_v48  ;;  %v1776_v40 = vsel %vm1774_vm2, %v1775_v37, %v1773_v23 }
 0x1c4   : > { %vm7203_vm3 = vcmp.le.f32.partialorder %v9996_v47, 0.7853982  ;;  %v1872_v52 = vsel %vm1860_vm14, %v1854_v41, %v1871_v16  ;;  %v1777_v38 = vclz %v1776_v40  ;;  %v1795_v55 = vsub.s32 4, %v1771_v46 }
 0x1c5   : > { %v1873_v44 = vsel %vm1859_vm0, %v1870_v10, %v1872_v52  ;;  %v1900_v31 = vshrl.u32 %v1869_v54, 16  ;;  %v1664_v34 = vxor.u32 2147483648, %v1658_v53  ;;  %v1668_v32 = vsel %vm1666_vm9, %v1667_v14, %v1658_v53 }
 0x1c6   : > { %v1877_v24 = vand.u32 65535, %v1873_v44  ;;  %v1878_v15 = vshrl.u32 %v1873_v44, 16  ;;  %v1765_v56 = vadd.s32 %v7129_v39, %v7127_v50  ;;  %v5449_v36 = vadd.s32 4294967294, %v1777_v38 }
 0x1c7   : > { %v1862_v0 = vsel %vm1858_vm11, %v1842_v21, %v1845_v7  ;;  %v5454_v41 = vadd.s32 4294967169, %v1985_v43  ;;  %v1665_v37 = vsel %vm1663_vm10, %v1650_v48, %v1664_v34  ;;  %v1863_v10 = vsel %vm1861_vm12, %v1851_v60, 2102212464 }
 0x1c8   : > { %v1880_v47 = vmul.u32 %v1878_v15, %v1875_v61  ;;  %v1899_v16 = vand.u32 65535, %v1869_v54  ;;  %v1669_v53 = vsel %vm1662_vm13, %v1665_v37, %v1668_v32  ;;  %vm5450_vm4 = vcmp.lt.s32.totalorder %v5449_v36, 0 }
 0x1c9   : > { %v1796_v50 = vsel %vm1673_vm1, %v1795_v55, %v1771_v46  ;;  %v1881_v39 = vmul.u32 %v1877_v24, %v1876_v33  ;;  %v1670_v7 = vsel %vm1659_vm15, nan, %v1669_v53  ;;  %v1780_v43 = vsel %vm5450_vm4, 0, %v5449_v36 }
 0x1ca   : > { %v1879_v21 = vmul.u32 %v1877_v24, %v1875_v61  ;;  %v1902_v48 = vmul.u32 %v1900_v31, %v1875_v61  ;;  %v1781_v14 = vsub.s32 32, %v1780_v43  ;;  %v1782_v40 = vshll.u32 %v1773_v23, %v1780_v43  ;;  %2764 = vst [vmem:[%s6231_s15 + $0x40] sm:$0xff] %v1670_v7 }
 0x1cb   : > { %v1785_v52 = vsub.s32 4294967266, %v1780_v43  ;;  %v1883_v60 = vshll.u32 %v1880_v47, 16  ;;  %v1798_v62 = vsel %vm7203_vm3, 0, %v1796_v50  ;;  %v1864_v54 = vsel %vm1860_vm14, %v7175_v45, %v1863_v10 }
 0x1cc   : > { %v1882_v46 = vmul.u32 %v1878_v15, %v1876_v33  ;;  %v1903_v38 = vmul.u32 %v1899_v16, %v1876_v33  ;;  %v1783_v55 = vshrl.u32 %v1765_v56, %v1781_v14  ;;  %v1885_v44 = vshll.u32 %v1881_v39, 16 }
 0x1cd   : > { %v1786_v17 = vadd.s32 127, %v1785_v52  ;;  %v1901_v34 = vmul.u32 %v1899_v16, %v1875_v61  ;;  %vm1887_vm5 = vc.u32 %v1879_v21, %v1883_v60  ;;  %v1889_v32 = vadd.s32 %v1883_v60, %v1879_v21 }
 0x1ce   : > { %v1905_v24 = vshll.u32 %v1902_v48, 16  ;;  %v1991_v23 = vadd.s32 1, %v5454_v41  ;;  %v1784_v36 = vor.u32 %v1783_v55, %v1782_v40  ;;  %v1888_v53 = vsel %vm1887_vm5, 1, %v9971_v63 }
 0x1cf   : > { %v1787_v37 = vshll.u32 %v1786_v17, 23  ;;  %v1904_v7 = vmul.u32 %v1900_v31, %v1876_v33  ;;  %v1884_v50 = vshrl.u32 %v1880_v47, 16  ;;  %v1890_v43 = vadd.s32 %v1888_v53, %v1882_v46 }
 0x1d0   : > { %vm1891_vm6 = vc.u32 %v1889_v32, %v1885_v44  ;;  %v1907_v19 = vshll.u32 %v1903_v38, 16  ;;  %v1791_v15 = vcvt.s32.f32 %v1784_v36  ;;  %vm1909_vm7 = vc.u32 %v1901_v34, %v1905_v24 }
 0x1d1   : > { %v1788_v45 = vor.u32 4788187, %v1787_v37  ;;  %v1892_v56 = vsel %vm1891_vm6, 1, %v9971_v63  ;;  %v1886_v10 = vshrl.u32 %v1881_v39, 16  ;;  %v1910_v16 = vsel %vm1909_vm7, 1, %v9971_v63 }
 0x1d2   : > { %v1894_v61 = vadd.s32 %v1892_v56, %v1890_v43  ;;  %v1911_v21 = vadd.s32 %v1905_v24, %v1901_v34  ;;  %v1865_v14 = vsel %vm1859_vm0, %v1862_v0, %v1864_v54  ;;  %v1912_v40 = vadd.s32 %v1910_v16, %v1904_v7 }
 0x1d3   : > { %v1789_v41 = vand.u32 2147483647, %v1788_v45  ;;  %vm1992_vm8 = vcmp.gt.s32.totalorder %v1991_v23, 0  ;;  %v1906_v31 = vshrl.u32 %v1902_v48, 16  ;;  %v256_v55 = vmul.f32 %v7166_v59, %v5839_v25 }
 0x1d4   : > { %v1895_v33 = vadd.s32 %v1894_v61, %v1884_v50  ;;  %vm1913_vm9 = vc.u32 %v1911_v21, %v1907_v19  ;;  %v1993_v47 = vsel %vm1992_vm8, %v1991_v23, 0  ;;  %v7246_v46 = vadd.s32 %v1911_v21, %v1907_v19 }
 0x1d5   : > { %v1792_v52 = vmul.f32 %v1791_v15, %v1789_v41  ;;  %v1914_v60 = vsel %vm1913_vm9, 1, %v9971_v63  ;;  %v1995_v39 = vand.u32 31, %v1993_v47  ;;  %v1908_v44 = vshrl.u32 %v1903_v38, 16 }
 0x1d6   : > { %v7250_v17 = vadd.s32 %v1895_v33, %v1886_v10  ;;  %v1916_v35 = vadd.s32 %v1914_v60, %v1912_v40  ;;  %v7254_v0 = vmul.f32 %v7166_v59, %v5841_v26  ;;  %v1988_v54 = vand.u32 8388607, %v1981_v49 }
 0x1d7   : > { %v1793_v48 = vxor.u32 2147483648, %v1792_v52  ;;  %v7258_v34 = vsub.s32 32, %v1995_v39  ;;  %v1815_v19 = vadd.s32 3, %v1798_v62  ;;  %v1919_v24 = vmul.u32 %v7182_v4, %v1865_v14 }
 0x1d8   : > { %v1917_v32 = vadd.s32 %v1916_v35, %v1906_v31  ;;  %v7261_v23 = vshrl.u32 %v1993_v47, 5  ;;  %vm1921_vm10 = vc.u32 %v7250_v17, %v7246_v46  ;;  %v1998_v36 = vshll.u32 %v9953_v51, %v1995_v39 }
 0x1d9   : > { %v1794_v38 = vsel %vm1673_vm1, %v1793_v48, %v1792_v52  ;;  %v2001_v37 = vshll.u32 %v9946_v12, %v1995_v39  ;;  %v2002_v4 = vshrl.u32 %v9947_v2, %v7258_v34  ;;  %v2007_v7 = vshll.u32 %v9945_v5, %v1995_v39 }
 0x1da   : > { %v1797_v53 = vsel %vm7203_vm3, %v6918_v3, %v1794_v38  ;;  %v1918_v62 = vadd.s32 %v1917_v32, %v1908_v44  ;;  %v2004_v43 = vshll.u32 %v9947_v2, %v1995_v39  ;;  %v2005_v45 = vshrl.u32 %v9945_v5, %v7258_v34 }
 0x1db   : > { %v1799_v50 = vmul.f32 %v1797_v53, %v1797_v53  ;;  %v2008_v15 = vshrl.u32 %v9955_v8, %v7258_v34  ;;  %v1999_v57 = vshrl.u32 %v9946_v12, %v7258_v34  ;;  %v2010_v10 = vshll.u32 %v9955_v8, %v1995_v39 }
 0x1dc   : > { %v1922_v56 = vadd.s32 1, %v1918_v62  ;;  %v2011_v61 = vshrl.u32 %v9956_v13, %v7258_v34  ;;  %v7286_v16 = vadd.f32 %v256_v55, %v7142_v1  ;;  %v1989_v14 = vor.u32 8388608, %v1988_v54 }
 0x1dd   : > { %v1800_v21 = vmul.f32 -0.001358992, %v1799_v50  ;;  %v1807_v41 = vmul.f32 -0.00019511016, %v1799_v50  ;;  %v7291_v33 = vor.u32 %v2002_v4, %v2001_v37  ;;  %v2009_v31 = vor.u32 %v2008_v15, %v2007_v7 }
 0x1de   : > { %v1923_v40 = vsel %vm1921_vm10, %v1922_v56, %v1918_v62  ;;  %v2012_v47 = vor.u32 %v2011_v61, %v2010_v10  ;;  %v2006_v44 = vor.u32 %v2005_v45, %v2004_v43  ;;  %v1816_v35 = vand.u32 3, %v1815_v19 }
 0x1df   : > { %v1801_v52 = vadd.f32 0.041655596, %v1800_v21  ;;  %v1808_v60 = vadd.f32 0.008332121, %v1807_v41  ;;  %v1924_v39 = vadd.s32 %v1923_v40, %v1919_v24  ;;  %v2000_v48 = vor.u32 %v1999_v57, %v1998_v36 }
 0x1e0   : > { %vm2013_vm11 = vcmp.lt.s32.totalorder %v7261_v23, 1  ;;  %vm2016_vm12 = vcmp.lt.s32.totalorder %v7261_v23, 4  ;;  %vm2015_vm13 = vcmp.lt.s32.totalorder %v7261_v23, 3  ;;  %vm2014_vm14 = vcmp.lt.s32.totalorder %v7261_v23, 2 }
 0x1e1   : > { %v1802_v55 = vmul.f32 %v1801_v52, %v1799_v50  ;;  %v1809_v54 = vmul.f32 %v1808_v60, %v1799_v50  ;;  %v1925_v32 = vadd.s32 536870912, %v1924_v39  ;;  %v2022_v38 = vsel %vm2016_vm12, %v2009_v31, 920167782 }
 0x1e2   : > { %v2026_v24 = vsel %vm2016_vm12, %v2012_v47, 1326507024  ;;  %v7301_v37 = vshll.u32 %v1989_v14, 8  ;;  %v2025_v4 = vsel %vm2013_vm11, %v7291_v33, %v2006_v44  ;;  %vm1814_vm15 = vweird.f32 %v6918_v3 }
 0x1e3   : > { %v1803_v19 = vadd.f32 -0.4999988, %v1802_v55  ;;  %v1810_v36 = vadd.f32 -0.16666654, %v1809_v54  ;;  %v7303_v62 = vshrl.u32 %v1925_v32, 30  ;;  %vm1817_vm0 = vcmp.lt.s32.totalorder %v1816_v35, 2 }
 0x1e4   : > { %v2021_v7 = vsel %vm2013_vm11, %v2000_v48, %v7291_v33  ;;  %v2027_v43 = vsel %vm2015_vm13, %v2009_v31, %v2026_v24  ;;  %v2023_v57 = vsel %vm2015_vm13, %v2006_v44, %v2022_v38  ;;  %vm1818_vm1 = vcmp.eq.s32.totalorder %v1816_v35, 0 }
 0x1e5   : > { %v1804_v45 = vmul.f32 %v1803_v19, %v1799_v50  ;;  %v1811_v15 = vmul.f32 %v1810_v36, %v1799_v50  ;;  %v1927_v56 = vshll.u32 %v7303_v62, 30  ;;  %v2028_v10 = vsel %vm2014_vm14, %v2025_v4, %v2027_v43 }
 0x1e6   : > { %v2030_v61 = vand.u32 65535, %v7301_v37  ;;  %v2031_v21 = vshrl.u32 %v7301_v37, 16  ;;  %vm1821_vm2 = vcmp.eq.s32.totalorder %v1816_v35, 2  ;;  %v1997_v50 = vshrl.u32 %v9953_v51, %v7258_v34 }
 0x1e7   : > { %v1805_v41 = vadd.f32 1.0, %v1804_v45  ;;  %v1812_v14 = vadd.f32 1.0, %v1811_v15  ;;  %v1928_v40 = vsub.s32 %v1924_v39, %v1927_v56  ;;  %v2024_v31 = vsel %vm2014_vm14, %v2021_v7, %v2023_v57 }
 0x1e8   : > { %v2032_v47 = vand.u32 65535, %v2028_v10  ;;  %v2033_v52 = vshrl.u32 %v2028_v10, 16  ;;  %v1920_v32 = vadd.s32 %v7246_v46, %v7250_v17  ;;  %v2055_v34 = vshrl.u32 %v2024_v31, 16 }
 0x1e9   : > { %v1813_v60 = vmul.f32 %v1812_v14, %v1797_v53  ;;  %v1822_v55 = vxor.u32 2147483648, %v1805_v41  ;;  %vm1929_vm3 = vcmp.lt.s32.totalorder %v1928_v40, 0  ;;  %v1930_v54 = vsub.s32 0, %v1928_v40 }
 0x1ea   : > { %v2034_v38 = vmul.u32 %v2032_v47, %v2030_v61  ;;  %v2035_v24 = vmul.u32 %v2033_v52, %v2030_v61  ;;  %v7327_v19 = vmul.u32 %v2032_v47, %v2031_v21  ;;  %v2037_v45 = vmul.u32 %v2033_v52, %v2031_v21 }
 0x1eb   : > { %v1819_v39 = vxor.u32 2147483648, %v1813_v60  ;;  %v1823_v36 = vsel %vm1821_vm2, %v1822_v55, %v1813_v60  ;;  %v1931_v4 = vsel %vm1929_vm3, %v1930_v54, %v1928_v40  ;;  %v2017_v56 = vsel %vm2013_vm11, %v1997_v50, %v2000_v48 }
 0x1ec   : > { %v1932_v43 = vclz %v1931_v4  ;;  %v2038_v7 = vshll.u32 %v2035_v24, 16  ;;  %v2040_v15 = vshll.u32 %v7327_v19, 16  ;;  %v2018_v46 = vsel %vm2016_vm12, %v2006_v44, 2102212464 }
 0x1ed   : > { %v1820_v53 = vsel %vm1818_vm1, %v1805_v41, %v1819_v39  ;;  %v2054_v17 = vand.u32 65535, %v2024_v31  ;;  %vm1828_vm5 = vcmp.lt.s32.totalorder %v7065_v58, 0  ;;  %v2057_v52 = vmul.u32 %v2055_v34, %v2030_v61 }
 0x1ee   : > { %v1824_v57 = vsel %vm1817_vm0, %v1820_v53, %v1823_v36  ;;  %v5452_v10 = vadd.s32 4294967294, %v1932_v43  ;;  %vm2042_vm4 = vc.u32 %v2034_v38, %v2038_v7  ;;  %v2044_v14 = vadd.s32 %v2038_v7, %v2034_v38 }
 0x1ef   : > { %v1825_v47 = vsel %vm1814_vm15, nan, %v1824_v57  ;;  %v2043_v41 = vsel %vm2042_vm4, 1, %v9971_v63  ;;  %v2136_v48 = vand.u32 2147483647, %v7286_v16  ;;  %v2039_v50 = vshrl.u32 %v2035_v24, 16 }
 0x1f0   : > { %vm5453_vm6 = vcmp.lt.s32.totalorder %v5452_v10, 0  ;;  %v2045_v60 = vadd.s32 %v2043_v41, %v2037_v45  ;;  %vm2046_vm7 = vc.u32 %v2044_v14, %v2040_v15  ;;  %2765 = vst [vmem:[%s6231_s15 + $0x48] sm:$0xff] %v1825_v47  ;;  %v2056_v31 = vmul.u32 %v2054_v17, %v2030_v61 }
 0x1f1   : > { %v1935_v44 = vsel %vm5453_vm6, 0, %v5452_v10  ;;  %v2047_v35 = vsel %vm2046_vm7, 1, %v9971_v63  ;;  %v2058_v55 = vmul.u32 %v2054_v17, %v2031_v21  ;;  %v2019_v36 = vsel %vm2015_vm13, %v7291_v33, %v2018_v46 }
 0x1f2   : > { %v1936_v54 = vsub.s32 32, %v1935_v44  ;;  %v1937_v3 = vshll.u32 %v1928_v40, %v1935_v44  ;;  %v1940_v38 = vsub.s32 4294967266, %v1935_v44  ;;  %v2049_v39 = vadd.s32 %v2047_v35, %v2045_v60 }
 0x1f3   : > { %v2059_v4 = vmul.u32 %v2055_v34, %v2031_v21  ;;  %v2060_v43 = vshll.u32 %v2057_v52, 16  ;;  %v2139_v24 = vand.u32 2139095040, %v7286_v16  ;;  %v1950_v15 = vsub.s32 4, %v7303_v62 }
 0x1f4   : > { %v1938_v45 = vshrl.u32 %v1920_v32, %v1936_v54  ;;  %v1941_v7 = vadd.s32 127, %v1940_v38  ;;  %v2143_v61 = vand.u32 8388607, %v2136_v48  ;;  %v2041_v53 = vshrl.u32 %v7327_v19, 16 }
 0x1f5   : > { %v2062_v40 = vshll.u32 %v2058_v55, 16  ;;  %vm2064_vm8 = vc.u32 %v2056_v31, %v2060_v43  ;;  %v2066_v17 = vadd.s32 %v2060_v43, %v2056_v31  ;;  %v2050_v14 = vadd.s32 %v2049_v39, %v2039_v50 }
 0x1f6   : > { %v1939_v57 = vor.u32 %v1938_v45, %v1937_v3  ;;  %v1942_v10 = vshll.u32 %v1941_v7, 23  ;;  %v2065_v33 = vsel %vm2064_vm8, 1, %v9971_v63  ;;  %v2061_v21 = vshrl.u32 %v2057_v52, 16 }
 0x1f7   : > { %v2067_v34 = vadd.s32 %v2065_v33, %v2059_v4  ;;  %vm2068_vm9 = vc.u32 %v2066_v17, %v2062_v40  ;;  %v2140_v32 = vshrl.u32 %v2139_v24, 23  ;;  %v1951_v41 = vsel %vm1828_vm5, %v1950_v15, %v7303_v62 }
 0x1f8   : > { %v1943_v46 = vor.u32 4788187, %v1942_v10  ;;  %v1946_v47 = vcvt.s32.f32 %v1939_v57  ;;  %v2069_v19 = vsel %vm2068_vm9, 1, %v9971_v63  ;;  %v9999_v60 = vand.u32 2147483647, %v7065_v58 }
 0x1f9   : > { %v2063_v50 = vshrl.u32 %v2058_v55, 16  ;;  %v2071_v35 = vadd.s32 %v2069_v19, %v2067_v34  ;;  %v5457_v52 = vadd.s32 4294967169, %v2140_v32  ;;  %v2020_v54 = vsel %vm2014_vm14, %v2017_v56, %v2019_v36 }
 0x1fa   : > { %vm7358_vm10 = vcmp.le.f32.partialorder %v9999_v60, 0.7853982  ;;  %v1944_v31 = vand.u32 2147483647, %v1943_v46  ;;  %v7364_v3 = vadd.s32 %v2050_v14, %v2041_v53  ;;  %v7366_v38 = vadd.s32 %v2066_v17, %v2062_v40 }
 0x1fb   : > { %v1953_v62 = vsel %vm7358_vm10, 0, %v1951_v41  ;;  %v2072_v39 = vadd.s32 %v2071_v35, %v2061_v21  ;;  %v2144_v4 = vor.u32 8388608, %v2143_v61  ;;  %v2146_v43 = vadd.s32 1, %v5457_v52 }
 0x1fc   : > { %v210_v24 = vmul.f32 1.442695, %v6731_v6  ;;  %v1947_v45 = vmul.f32 %v1946_v47, %v1944_v31  ;;  %v10002_v55 = vcvt.s32.f32 %v5878_v42  ;;  %v2074_v23 = vmul.u32 %v7301_v37, %v2020_v54 }
 0x1fd   : > { %v2073_v15 = vadd.s32 %v2072_v39, %v2063_v50  ;;  %vm2147_vm11 = vcmp.gt.s32.totalorder %v2146_v43, 0  ;;  %v1970_v36 = vadd.s32 3, %v1953_v62  ;;  %vm2076_vm12 = vc.u32 %v7364_v3, %v7366_v38 }
 0x1fe   : > { %v227_v7 = vsub.f32 %v10002_v55, %v7140_v18  ;;  %v1948_v56 = vxor.u32 2147483648, %v1947_v45  ;;  %v2148_v53 = vsel %vm2147_vm11, %v2146_v43, 0  ;;  %v7379_v61 = vadd.f32 %v7254_v0, %v7142_v1 }
 0x1ff   : > { %v2077_v6 = vadd.s32 1, %v2073_v15  ;;  %v2150_v40 = vand.u32 31, %v2148_v53  ;;  %v7381_v17 = vshll.u32 %v2144_v4, 8  ;;  %5609 = vpow2.f32 %v210_v24 }
 0x200   : > { %v1949_v42 = vsel %vm1828_vm5, %v1948_v56, %v1947_v45  ;;  %v7392_v10 = vmul.f32 1.5707964, %v227_v7  ;;  %v7396_v14 = vand.u32 3, %v1970_v36  ;;  %v7398_v21 = vshrl.u32 %v2148_v53, 5 }
 0x201   : > { %v7388_v18 = vsel %vm7358_vm10, %v7065_v58, %v1949_v42  ;;  %v2078_v37 = vsel %vm2076_vm12, %v2077_v6, %v2073_v15  ;;  %v7390_v57 = vsub.s32 32, %v2150_v40  ;;  %v7401_v34 = vand.u32 65535, %v7381_v17 }
 0x202   : > { %v1954_v0 = vmul.f32 %v7388_v18, %v7388_v18  ;;  %v2079_v33 = vadd.s32 %v2078_v37, %v2074_v23  ;;  %v2291_v32 = vand.u32 2147483647, %v7379_v61  ;;  %v2294_v46 = vand.u32 2139095040, %v7379_v61 }
 0x203   : > { %v2156_v60 = vshll.u32 %v9946_v12, %v2150_v40  ;;  %v2157_v44 = vshrl.u32 %v9947_v2, %v7390_v57  ;;  %v2159_v50 = vshll.u32 %v9947_v2, %v2150_v40  ;;  %v2160_v35 = vshrl.u32 %v9945_v5, %v7390_v57 }
 0x204   : > { %v1955_v47 = vmul.f32 -0.001358992, %v1954_v0  ;;  %v1962_v41 = vmul.f32 -0.00019511016, %v1954_v0  ;;  %v2080_v19 = vadd.s32 536870912, %v2079_v33  ;;  %v2162_v52 = vshll.u32 %v9945_v5, %v2150_v40 }
 0x205   : > { %v2163_v39 = vshrl.u32 %v9955_v8, %v7390_v57  ;;  %v7414_v4 = vpop.eup %5609  ;;  %vm1976_vm13 = vcmp.eq.s32.totalorder %v7396_v14, 2  ;;  %v2153_v43 = vshll.u32 %v9953_v51, %v2150_v40  ;;  %v2154_v24 = vshrl.u32 %v9946_v12, %v7390_v57 }
 0x206   : > { %v1956_v31 = vadd.f32 0.041655596, %v1955_v47  ;;  %v1963_v54 = vadd.f32 0.008332121, %v1962_v41  ;;  %v2081_v62 = vshrl.u32 %v2080_v19, 30  ;;  %v2165_v45 = vshll.u32 %v9955_v8, %v2150_v40 }
 0x207   : > { %v2166_v55 = vshrl.u32 %v9956_v13, %v7390_v57  ;;  %v2295_v56 = vshrl.u32 %v2294_v46, 23  ;;  %vm1973_vm14 = vcmp.eq.s32.totalorder %v7396_v14, 0  ;;  %v7424_v36 = vor.u32 %v2157_v44, %v2156_v60 }
 0x208   : > { %v1957_v7 = vmul.f32 %v1956_v31, %v1954_v0  ;;  %v1964_v15 = vmul.f32 %v1963_v54, %v1954_v0  ;;  %v2082_v23 = vshll.u32 %v2081_v62, 30  ;;  %v7426_v53 = vor.u32 %v2160_v35, %v2159_v50 }
 0x209   : > { %v2164_v6 = vor.u32 %v2163_v39, %v2162_v52  ;;  %v2167_v42 = vor.u32 %v2166_v55, %v2165_v45  ;;  %vm1972_vm15 = vcmp.lt.s32.totalorder %v7396_v14, 2  ;;  %vm1983_vm0 = vcmp.lt.s32.totalorder %v7150_v28, 0 }
 0x20a   : > { %v1958_v37 = vadd.f32 -0.4999988, %v1957_v7  ;;  %v1965_v47 = vadd.f32 -0.16666654, %v1964_v15  ;;  %v2083_v40 = vsub.s32 %v2079_v33, %v2082_v23  ;;  %vm2168_vm1 = vcmp.lt.s32.totalorder %v7398_v21, 1 }
 0x20b   : > { %vm1969_vm2 = vweird.f32 %v7065_v58  ;;  %v7432_v46 = vor.u32 %v2154_v24, %v2153_v43  ;;  %vm2170_vm3 = vcmp.lt.s32.totalorder %v7398_v21, 3  ;;  %vm2171_vm4 = vcmp.lt.s32.totalorder %v7398_v21, 4 }
 0x20c   : > { %v7437_v41 = vshrl.u32 %v7381_v17, 16  ;;  %v1959_v19 = vmul.f32 %v1958_v37, %v1954_v0  ;;  %v1966_v60 = vmul.f32 %v1965_v47, %v1954_v0  ;;  %vm2084_vm5 = vcmp.lt.s32.totalorder %v2083_v40, 0 }
 0x20d   : > { %v2085_v44 = vsub.s32 0, %v2083_v40  ;;  %vm2169_vm6 = vcmp.lt.s32.totalorder %v7398_v21, 2  ;;  %v2177_v33 = vsel %vm2171_vm4, %v2164_v6, 920167782  ;;  %v2180_v50 = vsel %vm2168_vm1, %v7424_v36, %v7426_v53 }
 0x20e   : > { %v2181_v35 = vsel %vm2171_vm4, %v2167_v42, 1326507024  ;;  %v1960_v52 = vadd.f32 1.0, %v1959_v19  ;;  %v1967_v31 = vadd.f32 1.0, %v1966_v60  ;;  %v5460_v39 = vadd.s32 4294967169, %v2295_v56 }
 0x20f   : > { %v2086_v54 = vsel %vm2084_vm5, %v2085_v44, %v2083_v40  ;;  %vm7450_vm7 = vcmp.le.f32.partialorder %v1981_v49, 0.7853982  ;;  %v2105_v24 = vsub.s32 4, %v2081_v62  ;;  %v2176_v45 = vsel %vm2168_vm1, %v7432_v46, %v7424_v36 }
 0x210   : > { %v2087_v43 = vclz %v2086_v54  ;;  %v2182_v55 = vsel %vm2170_vm3, %v2164_v6, %v2181_v35  ;;  %v1968_v7 = vmul.f32 %v1967_v31, %v7388_v18  ;;  %v1977_v15 = vxor.u32 2147483648, %v1960_v52 }
 0x211   : > { %v2178_v49 = vsel %vm2170_vm3, %v7426_v53, %v2177_v33  ;;  %v2183_v23 = vsel %vm2169_vm6, %v2180_v50, %v2182_v55  ;;  %v2075_v56 = vadd.s32 %v7366_v38, %v7364_v3  ;;  %v7472_v18 = vand.u32 8388607, %v2291_v32 }
 0x212   : > { %v5455_v42 = vadd.s32 4294967294, %v2087_v43  ;;  %v2187_v37 = vand.u32 65535, %v2183_v23  ;;  %v2188_v47 = vshrl.u32 %v2183_v23, 16  ;;  %v1974_v19 = vxor.u32 2147483648, %v1968_v7 }
 0x213   : > { %v1978_v6 = vsel %vm1976_vm13, %v1977_v15, %v1968_v7  ;;  %v2301_v60 = vadd.s32 1, %v5460_v39  ;;  %v2106_v44 = vsel %vm1983_vm0, %v2105_v24, %v2081_v62  ;;  %v2179_v33 = vsel %vm2169_vm6, %v2176_v45, %v2178_v49 }
 0x214   : > { %vm5456_vm8 = vcmp.lt.s32.totalorder %v5455_v42, 0  ;;  %v2190_v3 = vmul.u32 %v2188_v47, %v7401_v34  ;;  %v1975_v38 = vsel %vm1973_vm14, %v1960_v52, %v1974_v19  ;;  %v2189_v35 = vmul.u32 %v2187_v37, %v7401_v34 }
 0x215   : > { %v2090_v50 = vsel %vm5456_vm8, 0, %v5455_v42  ;;  %v2191_v31 = vmul.u32 %v2187_v37, %v7437_v41  ;;  %v1979_v54 = vsel %vm1972_vm15, %v1975_v38, %v1978_v6  ;;  %v2152_v45 = vshrl.u32 %v9953_v51, %v7390_v57 }
 0x216   : > { %v2091_v39 = vsub.s32 32, %v2090_v50  ;;  %v2092_v43 = vshll.u32 %v2083_v40, %v2090_v50  ;;  %v2095_v62 = vsub.s32 4294967266, %v2090_v50  ;;  %v1980_v24 = vsel %vm1969_vm2, nan, %v1979_v54 }
 0x217   : > { %v2209_v55 = vand.u32 65535, %v2179_v33  ;;  %v2210_v52 = vshrl.u32 %v2179_v33, 16  ;;  %v2192_v49 = vmul.u32 %v2188_v47, %v7437_v41  ;;  %v2193_v23 = vshll.u32 %v2190_v3, 16  ;;  %2766 = vst [vmem:[%s6231_s15 + $0x50] sm:$0xff] %v1980_v24 }
 0x218   : > { %v2093_v7 = vshrl.u32 %v2075_v56, %v2091_v39  ;;  %v2096_v15 = vadd.s32 127, %v2095_v62  ;;  %v2108_v14 = vsel %vm7450_vm7, 0, %v2106_v44  ;;  %v2173_v40 = vsel %vm2171_vm4, %v7426_v53, 2102212464 }
 0x219   : > { %v2194_v58 = vshrl.u32 %v2190_v3, 16  ;;  %v2195_v42 = vshll.u32 %v2191_v31, 16  ;;  %vm2197_vm9 = vc.u32 %v2189_v35, %v2193_v23  ;;  %v2199_v57 = vadd.s32 %v2193_v23, %v2189_v35 }
 0x21a   : > { %v2094_v37 = vor.u32 %v2093_v7, %v2092_v43  ;;  %v2097_v19 = vshll.u32 %v2096_v15, 23  ;;  %v2198_v56 = vsel %vm2197_vm9, 1, %v9971_v63  ;;  %v2211_v6 = vmul.u32 %v2209_v55, %v7401_v34 }
 0x21b   : > { %v2212_v47 = vmul.u32 %v2210_v52, %v7401_v34  ;;  %v2213_v33 = vmul.u32 %v2209_v55, %v7437_v41  ;;  %v2200_v50 = vadd.s32 %v2198_v56, %v2192_v49  ;;  %vm2201_vm10 = vc.u32 %v2199_v57, %v2195_v42 }
 0x21c   : > { %v2098_v38 = vor.u32 4788187, %v2097_v19  ;;  %v2101_v44 = vcvt.s32.f32 %v2094_v37  ;;  %v2202_v53 = vsel %vm2201_vm10, 1, %v9971_v63  ;;  %v2214_v3 = vmul.u32 %v2210_v52, %v7437_v41 }
 0x21d   : > { %v2215_v54 = vshll.u32 %v2212_v47, 16  ;;  %v2217_v39 = vshll.u32 %v2213_v33, 16  ;;  %v2172_v35 = vsel %vm2168_vm1, %v2152_v45, %v7432_v46  ;;  %v2174_v34 = vsel %vm2170_vm3, %v7424_v36, %v2173_v40 }
 0x21e   : > { %v2099_v43 = vand.u32 2147483647, %v2098_v38  ;;  %v2204_v62 = vadd.s32 %v2202_v53, %v2200_v50  ;;  %v2196_v24 = vshrl.u32 %v2191_v31, 16  ;;  %vm2302_vm12 = vcmp.gt.s32.totalorder %v2301_v60, 0 }
 0x21f   : > { %vm2219_vm11 = vc.u32 %v2211_v6, %v2215_v54  ;;  %v2221_v55 = vadd.s32 %v2215_v54, %v2211_v6  ;;  %v2303_v52 = vsel %vm2302_vm12, %v2301_v60, 0  ;;  %v7511_v49 = vmul.f32 %v7414_v4, %v5839_v25 }
 0x220   : > { %v2102_v7 = vmul.f32 %v2101_v44, %v2099_v43  ;;  %v2205_v15 = vadd.s32 %v2204_v62, %v2194_v58  ;;  %v2220_v41 = vsel %vm2219_vm11, 1, %v9971_v63  ;;  %v2216_v23 = vshrl.u32 %v2212_v47, 16 }
 0x221   : > { %v2222_v46 = vadd.s32 %v2220_v41, %v2214_v3  ;;  %vm2223_vm13 = vc.u32 %v2221_v55, %v2217_v39  ;;  %v2299_v31 = vor.u32 8388608, %v7472_v18  ;;  %v2305_v40 = vand.u32 31, %v2303_v52 }
 0x222   : > { %v2103_v45 = vxor.u32 2147483648, %v2102_v7  ;;  %v2224_v36 = vsel %vm2223_vm13, 1, %v9971_v63  ;;  %v2125_v42 = vadd.s32 3, %v2108_v14  ;;  %v2175_v58 = vsel %vm2169_vm6, %v2172_v35, %v2174_v34 }
 0x223   : > { %v2218_v37 = vshrl.u32 %v2213_v33, 16  ;;  %v2226_v19 = vadd.s32 %v2224_v36, %v2222_v46  ;;  %v7519_v25 = vadd.s32 %v2205_v15, %v2196_v24  ;;  %v7521_v57 = vadd.s32 %v2221_v55, %v2217_v39 }
 0x224   : > { %v2104_v60 = vsel %vm1983_vm0, %v2103_v45, %v2102_v7  ;;  %v7523_v56 = vsub.s32 32, %v2305_v40  ;;  %v7528_v14 = vshrl.u32 %v2303_v52, 5  ;;  %v2308_v21 = vshll.u32 %v9953_v51, %v2305_v40 }
 0x225   : > { %v2107_v18 = vsel %vm7450_vm7, %v7150_v28, %v2104_v60  ;;  %v2227_v6 = vadd.s32 %v2226_v19, %v2216_v23  ;;  %v2311_v38 = vshll.u32 %v9946_v12, %v2305_v40  ;;  %v2314_v53 = vshll.u32 %v9947_v2, %v2305_v40 }
 0x226   : > { %v2109_v47 = vmul.f32 %v2107_v18, %v2107_v18  ;;  %v2309_v33 = vshrl.u32 %v9946_v12, %v7523_v56  ;;  %v2312_v44 = vshrl.u32 %v9947_v2, %v7523_v56  ;;  %v2315_v0 = vshrl.u32 %v9945_v5, %v7523_v56 }
 0x227   : > { %v2228_v50 = vadd.s32 %v2227_v6, %v2218_v37  ;;  %v2317_v3 = vshll.u32 %v9945_v5, %v2305_v40  ;;  %v2229_v43 = vmul.u32 %v7381_v17, %v2175_v58  ;;  %vm2231_vm14 = vc.u32 %v7519_v25, %v7521_v57 }
 0x228   : > { %v2110_v54 = vmul.f32 -0.001358992, %v2109_v47  ;;  %v2117_v39 = vmul.f32 -0.00019511016, %v2109_v47  ;;  %v7543_v34 = vor.u32 %v2309_v33, %v2308_v21  ;;  %v2318_v62 = vshrl.u32 %v9955_v8, %v7523_v56 }
 0x229   : > { %v2232_v35 = vadd.s32 1, %v2228_v50  ;;  %v2320_v24 = vshll.u32 %v9955_v8, %v2305_v40  ;;  %v7548_v15 = vor.u32 %v2312_v44, %v2311_v38  ;;  %v2321_v41 = vshrl.u32 %v9956_v13, %v7523_v56 }
 0x22a   : > { %v2111_v55 = vadd.f32 0.041655596, %v2110_v54  ;;  %v2118_v7 = vadd.f32 0.008332121, %v2117_v39  ;;  %v7552_v17 = vor.u32 %v2315_v0, %v2314_v53  ;;  %v2319_v23 = vor.u32 %v2318_v62, %v2317_v3 }
 0x22b   : > { %v2233_v52 = vsel %vm2231_vm14, %v2232_v35, %v2228_v50  ;;  %vm2323_vm15 = vcmp.lt.s32.totalorder %v7528_v14, 1  ;;  %vm2326_vm0 = vcmp.lt.s32.totalorder %v7528_v14, 4  ;;  %v2126_v58 = vand.u32 3, %v2125_v42 }
 0x22c   : > { %v2112_v46 = vmul.f32 %v2111_v55, %v2109_v47  ;;  %v2119_v45 = vmul.f32 %v2118_v7, %v2109_v47  ;;  %v2234_v36 = vadd.s32 %v2233_v52, %v2229_v43  ;;  %v2322_v40 = vor.u32 %v2321_v41, %v2320_v24 }
 0x22d   : > { %vm2324_vm1 = vcmp.lt.s32.totalorder %v7528_v14, 2  ;;  %vm2325_vm2 = vcmp.lt.s32.totalorder %v7528_v14, 3  ;;  %v2331_v6 = vsel %vm2323_vm15, %v7543_v34, %v7548_v15  ;;  %v2332_v21 = vsel %vm2326_vm0, %v2319_v23, 920167782 }
 0x22e   : > { %v2113_v37 = vadd.f32 -0.4999988, %v2112_v46  ;;  %v2120_v19 = vadd.f32 -0.16666654, %v2119_v45  ;;  %v2235_v60 = vadd.s32 536870912, %v2234_v36  ;;  %v2335_v42 = vsel %vm2323_vm15, %v7548_v15, %v7552_v17 }
 0x22f   : > { %v2336_v33 = vsel %vm2326_vm0, %v2322_v40, 1326507024  ;;  %v7570_v38 = vshll.u32 %v2299_v31, 8  ;;  %v2333_v0 = vsel %vm2325_vm2, %v7552_v17, %v2332_v21  ;;  %v259_v3 = vmul.f32 %v7414_v4, %v5841_v26 }
 0x230   : > { %v2114_v44 = vmul.f32 %v2113_v37, %v2109_v47  ;;  %v2121_v50 = vmul.f32 %v2120_v19, %v2109_v47  ;;  %v7572_v53 = vshrl.u32 %v2235_v60, 30  ;;  %v2334_v54 = vsel %vm2324_vm1, %v2331_v6, %v2333_v0 }
 0x231   : > { %v2337_v39 = vsel %vm2325_vm2, %v2319_v23, %v2336_v33  ;;  %v7585_v31 = vadd.f32 %v7511_v49, %v7392_v10  ;;  %vm2131_vm3 = vcmp.eq.s32.totalorder %v2126_v58, 2  ;;  %v2340_v26 = vand.u32 65535, %v7570_v38 }
 0x232   : > { %v2115_v47 = vadd.f32 1.0, %v2114_v44  ;;  %v2122_v43 = vadd.f32 1.0, %v2121_v50  ;;  %v2237_v35 = vshll.u32 %v7572_v53, 30  ;;  %v2338_v62 = vsel %vm2324_vm1, %v2335_v42, %v2337_v39 }
 0x233   : > { %v2341_v24 = vshrl.u32 %v7570_v38, 16  ;;  %v2365_v52 = vshrl.u32 %v2334_v54, 16  ;;  %vm2127_vm4 = vcmp.lt.s32.totalorder %v2126_v58, 2  ;;  %vm2128_vm5 = vcmp.eq.s32.totalorder %v2126_v58, 0 }
 0x234   : > { %v2123_v55 = vmul.f32 %v2122_v43, %v2107_v18  ;;  %v2132_v7 = vxor.u32 2147483648, %v2115_v47  ;;  %v2238_v41 = vsub.s32 %v2234_v36, %v2237_v35  ;;  %v2342_v49 = vand.u32 65535, %v2338_v62 }
 0x235   : > { %v2343_v23 = vshrl.u32 %v2338_v62, 16  ;;  %vm2124_vm7 = vweird.f32 %v7150_v28  ;;  %v2364_v21 = vand.u32 65535, %v2334_v54  ;;  %v7595_v36 = vmul.u32 %v2365_v52, %v2340_v26 }
 0x236   : > { %v2129_v46 = vxor.u32 2147483648, %v2123_v55  ;;  %v2133_v45 = vsel %vm2131_vm3, %v2132_v7, %v2123_v55  ;;  %vm2239_vm6 = vcmp.lt.s32.totalorder %v2238_v41, 0  ;;  %v2240_v40 = vsub.s32 0, %v2238_v41 }
 0x237   : > { %v2344_v37 = vmul.u32 %v2342_v49, %v2340_v26  ;;  %v2345_v19 = vmul.u32 %v2343_v23, %v2340_v26  ;;  %v7593_v60 = vmul.u32 %v2342_v49, %v2341_v24  ;;  %v2347_v44 = vmul.u32 %v2343_v23, %v2341_v24 }
 0x238   : > { %v2130_v6 = vsel %vm2128_vm5, %v2115_v47, %v2129_v46  ;;  %v2241_v18 = vsel %vm2239_vm6, %v2240_v40, %v2238_v41  ;;  %v7599_v0 = vadd.f32 %v259_v3, %v7392_v10  ;;  %v2230_v28 = vadd.s32 %v7521_v57, %v7519_v25 }
 0x239   : > { %v2134_v42 = vsel %vm2127_vm4, %v2130_v6, %v2133_v45  ;;  %v2242_v33 = vclz %v2241_v18  ;;  %v2348_v50 = vshll.u32 %v2345_v19, 16  ;;  %v2350_v43 = vshll.u32 %v7593_v60, 16 }
 0x23a   : > { %v2135_v39 = vsel %vm2124_vm7, nan, %v2134_v42  ;;  %v2307_v54 = vshrl.u32 %v9953_v51, %v7523_v56  ;;  %v2366_v62 = vmul.u32 %v2364_v21, %v2340_v26  ;;  %v2368_v55 = vmul.u32 %v2364_v21, %v2341_v24 }
 0x23b   : > { %v5458_v47 = vadd.s32 4294967294, %v2242_v33  ;;  %vm2352_vm8 = vc.u32 %v2344_v37, %v2348_v50  ;;  %v2354_v35 = vadd.s32 %v2348_v50, %v2344_v37  ;;  %2767 = vst [vmem:[%s6231_s15 + $0x58] sm:$0xff] %v2135_v39  ;;  %v2370_v3 = vshll.u32 %v7595_v36, 16 }
 0x23c   : > { %v2353_v58 = vsel %vm2352_vm8, 1, %v9971_v63  ;;  %v2328_v25 = vsel %vm2326_vm0, %v7552_v17, 2102212464  ;;  %v2349_v49 = vshrl.u32 %v2345_v19, 16  ;;  %v2369_v23 = vmul.u32 %v2365_v52, %v2341_v24 }
 0x23d   : > { %vm5459_vm9 = vcmp.lt.s32.totalorder %v5458_v47, 0  ;;  %v2355_v57 = vadd.s32 %v2353_v58, %v2347_v44  ;;  %vm2356_vm10 = vc.u32 %v2354_v35, %v2350_v43  ;;  %vm2138_vm11 = vcmp.lt.s32.totalorder %v7286_v16, 0 }
 0x23e   : > { %v2245_v7 = vsel %vm5459_vm9, 0, %v5458_v47  ;;  %v2357_v56 = vsel %vm2356_vm10, 1, %v9971_v63  ;;  %v2327_v26 = vsel %vm2323_vm15, %v2307_v54, %v7543_v34  ;;  %v2372_v6 = vshll.u32 %v2368_v55, 16 }
 0x23f   : > { %v2246_v46 = vsub.s32 32, %v2245_v7  ;;  %v2247_v45 = vshll.u32 %v2238_v41, %v2245_v7  ;;  %v2250_v40 = vsub.s32 4294967266, %v2245_v7  ;;  %v2359_v37 = vadd.s32 %v2357_v56, %v2355_v57 }
 0x240   : > { %vm2374_vm12 = vc.u32 %v2366_v62, %v2370_v3  ;;  %v2260_v21 = vsub.s32 4, %v7572_v53  ;;  %v2329_v24 = vsel %vm2325_vm2, %v7548_v15, %v2328_v25  ;;  %v2376_v41 = vadd.s32 %v2370_v3, %v2366_v62 }
 0x241   : > { %v2248_v17 = vshrl.u32 %v2230_v28, %v2246_v46  ;;  %v2251_v18 = vadd.s32 127, %v2250_v40  ;;  %v2375_v19 = vsel %vm2374_vm12, 1, %v9971_v63  ;;  %v2449_v42 = vand.u32 2139095040, %v7585_v31 }
 0x242   : > { %v2377_v52 = vadd.s32 %v2375_v19, %v2369_v23  ;;  %v2351_v34 = vshrl.u32 %v7593_v60, 16  ;;  %v2360_v50 = vadd.s32 %v2359_v37, %v2349_v49  ;;  %v2371_v39 = vshrl.u32 %v7595_v36, 16 }
 0x243   : > { %v2249_v33 = vor.u32 %v2248_v17, %v2247_v45  ;;  %v2252_v44 = vshll.u32 %v2251_v18, 23  ;;  %vm2378_vm13 = vc.u32 %v2376_v41, %v2372_v6  ;;  %v2446_v28 = vand.u32 2147483647, %v7585_v31 }
 0x244   : > { %v2450_v43 = vshrl.u32 %v2449_v42, 23  ;;  %v2261_v15 = vsel %vm2138_vm11, %v2260_v21, %v7572_v53  ;;  %v2379_v35 = vsel %vm2378_vm13, 1, %v9971_v63  ;;  %vm7632_vm14 = vcmp.le.f32.partialorder %v2136_v48, 0.7853982 }
 0x245   : > { %v2253_v47 = vor.u32 4788187, %v2252_v44  ;;  %v2256_v54 = vcvt.s32.f32 %v2249_v33  ;;  %v2373_v60 = vshrl.u32 %v2368_v55, 16  ;;  %v2381_v36 = vadd.s32 %v2379_v35, %v2377_v52 }
 0x246   : > { %v5463_v62 = vadd.s32 4294967169, %v2450_v43  ;;  %v2330_v25 = vsel %vm2324_vm1, %v2327_v26, %v2329_v24  ;;  %v2361_v57 = vadd.s32 %v2360_v50, %v2351_v34  ;;  %v2380_v7 = vadd.s32 %v2376_v41, %v2372_v6 }
 0x247   : > { %v2254_v3 = vand.u32 2147483647, %v2253_v47  ;;  %v2263_v53 = vsel %vm7632_vm14, 0, %v2261_v15  ;;  %v2382_v49 = vadd.s32 %v2381_v36, %v2371_v39  ;;  %v2453_v56 = vand.u32 8388607, %v2446_v28 }
 0x248   : > { %v2456_v48 = vadd.s32 1, %v5463_v62  ;;  %v2384_v55 = vmul.u32 %v7570_v38, %v2330_v25  ;;  %v2280_v40 = vadd.s32 3, %v2263_v53  ;;  %vm2386_vm0 = vc.u32 %v2361_v57, %v2380_v7 }
 0x249   : > { %v2257_v23 = vmul.f32 %v2256_v54, %v2254_v3  ;;  %v2383_v46 = vadd.s32 %v2382_v49, %v2373_v60  ;;  %v2454_v26 = vor.u32 8388608, %v2453_v56  ;;  %v2604_v17 = vand.u32 2139095040, %v7599_v0 }
 0x24a   : > { %vm2457_vm15 = vcmp.gt.s32.totalorder %v2456_v48, 0  ;;  %v7655_v41 = vand.u32 3, %v2280_v40  ;;  %v2601_v42 = vand.u32 2147483647, %v7599_v0  ;;  %v7658_v33 = vadd.s32 %v2380_v7, %v2361_v57 }
 0x24b   : > { %v2258_v45 = vxor.u32 2147483648, %v2257_v23  ;;  %v2458_v14 = vsel %vm2457_vm15, %v2456_v48, 0  ;;  %v2387_v37 = vadd.s32 1, %v2383_v46  ;;  %v7662_v34 = vshll.u32 %v2454_v26, 8 }
 0x24c   : > { %v2460_v6 = vand.u32 31, %v2458_v14  ;;  %v7660_v44 = vshrl.u32 %v2458_v14, 5  ;;  %v2605_v50 = vshrl.u32 %v2604_v17, 23  ;;  %vm2286_vm1 = vcmp.eq.s32.totalorder %v7655_v41, 2 }
 0x24d   : > { %v2259_v18 = vsel %vm2138_vm11, %v2258_v45, %v2257_v23  ;;  %v2388_v19 = vsel %vm2386_vm0, %v2387_v37, %v2383_v46  ;;  %v7684_v46 = vand.u32 65535, %v7662_v34  ;;  %vm2283_vm2 = vcmp.eq.s32.totalorder %v7655_v41, 0 }
 0x24e   : > { %v7649_v21 = vsel %vm7632_vm14, %v7286_v16, %v2259_v18  ;;  %v7651_v38 = vsub.s32 32, %v2460_v6  ;;  %v2389_v52 = vadd.s32 %v2388_v19, %v2384_v55  ;;  %v2466_v54 = vshll.u32 %v9946_v12, %v2460_v6 }
 0x24f   : > { %v2264_v24 = vmul.f32 %v7649_v21, %v7649_v21  ;;  %v2469_v35 = vshll.u32 %v9947_v2, %v2460_v6  ;;  %v2472_v60 = vshll.u32 %v9945_v5, %v2460_v6  ;;  %v2463_v57 = vshll.u32 %v9953_v51, %v2460_v6 }
 0x250   : > { %v2390_v47 = vadd.s32 536870912, %v2389_v52  ;;  %v2467_v15 = vshrl.u32 %v9947_v2, %v7651_v38  ;;  %v2470_v58 = vshrl.u32 %v9945_v5, %v7651_v38  ;;  %v2473_v25 = vshrl.u32 %v9955_v8, %v7651_v38 }
 0x251   : > { %v2265_v39 = vmul.f32 -0.001358992, %v2264_v24  ;;  %v2272_v43 = vmul.f32 -0.00019511016, %v2264_v24  ;;  %v2464_v7 = vshrl.u32 %v9946_v12, %v7651_v38  ;;  %v2475_v53 = vshll.u32 %v9955_v8, %v2460_v6 }
 0x252   : > { %v7671_v3 = vshrl.u32 %v2390_v47, 30  ;;  %v2476_v49 = vshrl.u32 %v9956_v13, %v7651_v38  ;;  %v7687_v55 = vor.u32 %v2467_v15, %v2466_v54  ;;  %v2471_v45 = vor.u32 %v2470_v58, %v2469_v35 }
 0x253   : > { %v2266_v36 = vadd.f32 0.041655596, %v2265_v39  ;;  %v2273_v62 = vadd.f32 0.008332121, %v2272_v43  ;;  %v2474_v40 = vor.u32 %v2473_v25, %v2472_v60  ;;  %vm2282_vm3 = vcmp.lt.s32.totalorder %v7655_v41, 2 }
 0x254   : > { %v2392_v23 = vshll.u32 %v7671_v3, 30  ;;  %v2477_v14 = vor.u32 %v2476_v49, %v2475_v53  ;;  %vm2478_vm4 = vcmp.lt.s32.totalorder %v7660_v44, 1  ;;  %vm2279_vm5 = vweird.f32 %v7286_v16 }
 0x255   : > { %v2267_v56 = vmul.f32 %v2266_v36, %v2264_v24  ;;  %v2274_v48 = vmul.f32 %v2273_v62, %v2264_v24  ;;  %v2465_v17 = vor.u32 %v2464_v7, %v2463_v57  ;;  %vm2480_vm6 = vcmp.lt.s32.totalorder %v7660_v44, 3 }
 0x256   : > { %v7690_v6 = vsub.s32 %v2389_v52, %v2392_v23  ;;  %vm2481_vm7 = vcmp.lt.s32.totalorder %v7660_v44, 4  ;;  %v5466_v18 = vadd.s32 4294967169, %v2605_v50  ;;  %vm2293_vm9 = vcmp.lt.s32.totalorder %v7379_v61, 0 }
 0x257   : > { %v2268_v37 = vadd.f32 -0.4999988, %v2267_v56  ;;  %v2275_v26 = vadd.f32 -0.16666654, %v2274_v48  ;;  %vm2479_vm10 = vcmp.lt.s32.totalorder %v7660_v44, 2  ;;  %v2490_v47 = vsel %vm2478_vm4, %v7687_v55, %v2471_v45 }
 0x258   : > { %vm2394_vm8 = vcmp.lt.s32.totalorder %v7690_v6, 0  ;;  %v2395_v43 = vsub.s32 0, %v7690_v6  ;;  %v2487_v52 = vsel %vm2481_vm7, %v2474_v40, 920167782  ;;  %v2491_v50 = vsel %vm2481_vm7, %v2477_v14, 1326507024 }
 0x259   : > { %v2269_v19 = vmul.f32 %v2268_v37, %v2264_v24  ;;  %v2276_v39 = vmul.f32 %v2275_v26, %v2264_v24  ;;  %v2496_v35 = vshrl.u32 %v7662_v34, 16  ;;  %v2486_v60 = vsel %vm2478_vm4, %v2465_v17, %v7687_v55 }
 0x25a   : > { %v2396_v15 = vsel %vm2394_vm8, %v2395_v43, %v7690_v6  ;;  %v2492_v36 = vsel %vm2480_vm6, %v2474_v40, %v2491_v50  ;;  %v7714_v62 = vadd.s32 1, %v5466_v18  ;;  %v2488_v7 = vsel %vm2480_vm6, %v2471_v45, %v2487_v52 }
 0x25b   : > { %v2270_v54 = vadd.f32 1.0, %v2269_v19  ;;  %v2277_v24 = vadd.f32 1.0, %v2276_v39  ;;  %v2397_v58 = vclz %v2396_v15  ;;  %v2493_v53 = vsel %vm2479_vm10, %v2490_v47, %v2492_v36 }
 0x25c   : > { %v2497_v56 = vand.u32 65535, %v2493_v53  ;;  %v2498_v48 = vshrl.u32 %v2493_v53, 16  ;;  %v7723_v23 = vand.u32 8388607, %v2601_v42  ;;  %v2462_v37 = vshrl.u32 %v9953_v51, %v7651_v38 }
 0x25d   : > { %v2278_v25 = vmul.f32 %v2277_v24, %v7649_v21  ;;  %v2287_v57 = vxor.u32 2147483648, %v2270_v54  ;;  %v5461_v49 = vadd.s32 4294967294, %v2397_v58  ;;  %v2415_v21 = vsub.s32 4, %v7671_v3 }
 0x25e   : > { %v2483_v26 = vsel %vm2481_vm7, %v2471_v45, 2102212464  ;;  %v2489_v18 = vsel %vm2479_vm10, %v2486_v60, %v2488_v7  ;;  %v2500_v19 = vmul.u32 %v2498_v48, %v7684_v46  ;;  %vm2612_vm12 = vcmp.gt.s32.totalorder %v7714_v62, 0 }
 0x25f   : > { %v2284_v14 = vxor.u32 2147483648, %v2278_v25  ;;  %v2288_v40 = vsel %vm2286_vm1, %v2287_v57, %v2278_v25  ;;  %vm5462_vm11 = vcmp.lt.s32.totalorder %v5461_v49, 0  ;;  %vm7740_vm13 = vcmp.le.f32.partialorder %v2291_v32, 0.7853982 }
 0x260   : > { %v2400_v38 = vsel %vm5462_vm11, 0, %v5461_v49  ;;  %v2499_v45 = vmul.u32 %v2497_v56, %v7684_v46  ;;  %v2501_v52 = vmul.u32 %v2497_v56, %v2496_v35  ;;  %v2416_v32 = vsel %vm2293_vm9, %v2415_v21, %v7671_v3 }
 0x261   : > { %v2285_v39 = vsel %vm2283_vm2, %v2270_v54, %v2284_v14  ;;  %v2401_v50 = vsub.s32 32, %v2400_v38  ;;  %v2402_v24 = vshll.u32 %v7690_v6, %v2400_v38  ;;  %v2405_v15 = vsub.s32 4294967266, %v2400_v38 }
 0x262   : > { %v2289_v47 = vsel %vm2282_vm3, %v2285_v39, %v2288_v40  ;;  %v2519_v58 = vand.u32 65535, %v2489_v18  ;;  %v2520_v60 = vshrl.u32 %v2489_v18, 16  ;;  %v2502_v57 = vmul.u32 %v2498_v48, %v2496_v35 }
 0x263   : > { %v2290_v54 = vsel %vm2279_vm5, nan, %v2289_v47  ;;  %v2403_v36 = vshrl.u32 %v7658_v33, %v2401_v50  ;;  %v2406_v25 = vadd.s32 127, %v2405_v15  ;;  %v2503_v7 = vshll.u32 %v2500_v19, 16 }
 0x264   : > { %2768 = vst [vmem:[%s6231_s15 + $0x60] sm:$0xff] %v2290_v54  ;;  %v2482_v41 = vsel %vm2478_vm4, %v2462_v37, %v2465_v17  ;;  %v2484_v16 = vsel %vm2480_vm6, %v7687_v55, %v2483_v26  ;;  %v2504_v6 = vshrl.u32 %v2500_v19, 16  ;;  %v2505_v53 = vshll.u32 %v2501_v52, 16 }
 0x265   : > { %v2404_v49 = vor.u32 %v2403_v36, %v2402_v24  ;;  %v2407_v56 = vshll.u32 %v2406_v25, 23  ;;  %vm2507_vm14 = vc.u32 %v2499_v45, %v2503_v7  ;;  %v2509_v3 = vadd.s32 %v2503_v7, %v2499_v45 }
 0x266   : > { %v2508_v14 = vsel %vm2507_vm14, 1, %v9971_v63  ;;  %v2521_v33 = vmul.u32 %v2519_v58, %v7684_v46  ;;  %v2522_v48 = vmul.u32 %v2520_v60, %v7684_v46  ;;  %v2523_v40 = vmul.u32 %v2519_v58, %v2496_v35 }
 0x267   : > { %v2408_v21 = vor.u32 4788187, %v2407_v56  ;;  %v2411_v18 = vcvt.s32.f32 %v2404_v49  ;;  %v2510_v17 = vadd.s32 %v2508_v14, %v2502_v57  ;;  %vm2511_vm15 = vc.u32 %v2509_v3, %v2505_v53 }
 0x268   : > { %v2512_v37 = vsel %vm2511_vm15, 1, %v9971_v63  ;;  %v2524_v55 = vmul.u32 %v2520_v60, %v2496_v35  ;;  %v2525_v26 = vshll.u32 %v2522_v48, 16  ;;  %v2527_v19 = vshll.u32 %v2523_v40, 16 }
 0x269   : > { %v2409_v39 = vand.u32 2147483647, %v2408_v21  ;;  %v2418_v38 = vsel %vm7740_vm13, 0, %v2416_v32  ;;  %v2514_v45 = vadd.s32 %v2512_v37, %v2510_v17  ;;  %v2609_v47 = vor.u32 8388608, %v7723_v23 }
 0x26a   : > { %v2485_v46 = vsel %vm2479_vm10, %v2482_v41, %v2484_v16  ;;  %vm2529_vm0 = vc.u32 %v2521_v33, %v2525_v26  ;;  %v2531_v50 = vadd.s32 %v2525_v26, %v2521_v33  ;;  %v2613_v24 = vsel %vm2612_vm12, %v7714_v62, 0 }
 0x26b   : > { %v2412_v15 = vmul.f32 %v2411_v18, %v2409_v39  ;;  %v2506_v35 = vshrl.u32 %v2501_v52, 16  ;;  %v2515_v54 = vadd.s32 %v2514_v45, %v2504_v6  ;;  %v2530_v58 = vsel %vm2529_vm0, 1, %v9971_v63 }
 0x26c   : > { %v2526_v60 = vshrl.u32 %v2522_v48, 16  ;;  %v2532_v36 = vadd.s32 %v2530_v58, %v2524_v55  ;;  %vm2533_vm1 = vc.u32 %v2531_v50, %v2527_v19  ;;  %v2615_v32 = vand.u32 31, %v2613_v24 }
 0x26d   : > { %v2413_v25 = vxor.u32 2147483648, %v2412_v15  ;;  %v2435_v23 = vadd.s32 3, %v2418_v38  ;;  %v2528_v57 = vshrl.u32 %v2523_v40, 16  ;;  %v2534_v44 = vsel %vm2533_vm1, 1, %v9971_v63 }
 0x26e   : > { %v2536_v7 = vadd.s32 %v2534_v44, %v2532_v36  ;;  %v2539_v41 = vmul.u32 %v7662_v34, %v2485_v46  ;;  %v7775_v16 = vshrl.u32 %v2613_v24, 5  ;;  %v7777_v62 = vsub.s32 32, %v2615_v32 }
 0x26f   : > { %v2414_v52 = vsel %vm2293_vm9, %v2413_v25, %v2412_v15  ;;  %v7781_v6 = vadd.s32 %v2515_v54, %v2506_v35  ;;  %v7783_v53 = vadd.s32 %v2531_v50, %v2527_v19  ;;  %v2618_v49 = vshll.u32 %v9953_v51, %v2615_v32 }
 0x270   : > { %v2417_v56 = vsel %vm7740_vm13, %v7379_v61, %v2414_v52  ;;  %v2537_v3 = vadd.s32 %v2536_v7, %v2526_v60  ;;  %v2619_v34 = vshrl.u32 %v9946_v12, %v7777_v62  ;;  %v2621_v14 = vshll.u32 %v9946_v12, %v2615_v32 }
 0x271   : > { %v2419_v33 = vmul.f32 %v2417_v56, %v2417_v56  ;;  %v2622_v48 = vshrl.u32 %v9947_v2, %v7777_v62  ;;  %v2624_v40 = vshll.u32 %v9947_v2, %v2615_v32  ;;  %v2627_v21 = vshll.u32 %v9945_v5, %v2615_v32 }
 0x272   : > { %v2538_v18 = vadd.s32 %v2537_v3, %v2528_v57  ;;  %v2625_v17 = vshrl.u32 %v9945_v5, %v7777_v62  ;;  %v2628_v43 = vshrl.u32 %v9955_v8, %v7777_v62  ;;  %v2630_v37 = vshll.u32 %v9955_v8, %v2615_v32 }
 0x273   : > { %v2420_v55 = vmul.f32 -0.001358992, %v2419_v33  ;;  %v2427_v26 = vmul.f32 -0.00019511016, %v2419_v33  ;;  %vm2541_vm2 = vc.u32 %v7781_v6, %v7783_v53  ;;  %v7803_v19 = vor.u32 %v2619_v34, %v2618_v49 }
 0x274   : > { %v2542_v39 = vadd.s32 1, %v2538_v18  ;;  %v7805_v38 = vor.u32 %v2622_v48, %v2621_v14  ;;  %v2629_v45 = vor.u32 %v2628_v43, %v2627_v21  ;;  %v2631_v46 = vshrl.u32 %v9956_v13, %v7777_v62 }
 0x275   : > { %v2421_v50 = vadd.f32 0.041655596, %v2420_v55  ;;  %v2428_v24 = vadd.f32 0.008332121, %v2427_v26  ;;  %vm2633_vm3 = vcmp.lt.s32.totalorder %v7775_v16, 1  ;;  %vm2636_vm4 = vcmp.lt.s32.totalorder %v7775_v16, 4 }
 0x276   : > { %v2543_v15 = vsel %vm2541_vm2, %v2542_v39, %v2538_v18  ;;  %v2626_v35 = vor.u32 %v2625_v17, %v2624_v40  ;;  %v2632_v54 = vor.u32 %v2631_v46, %v2630_v37  ;;  %v7811_v58 = vshll.u32 %v2609_v47, 8  ;;  %v7837_v17 = vld [vmem:[%s5823_s12] sm:$0xf] }
 0x277   : > { %v2422_v60 = vmul.f32 %v2421_v50, %v2419_v33  ;;  %v2429_v36 = vmul.f32 %v2428_v24, %v2419_v33  ;;  %v2544_v32 = vadd.s32 %v2543_v15, %v2539_v41  ;;  %vm2635_vm5 = vcmp.lt.s32.totalorder %v7775_v16, 3 }
 0x278   : > { %vm2634_vm6 = vcmp.lt.s32.totalorder %v7775_v16, 2  ;;  %v2641_v25 = vsel %vm2633_vm3, %v7803_v19, %v7805_v38  ;;  %v2642_v57 = vsel %vm2636_vm4, %v2629_v45, 920167782  ;;  %v2436_v47 = vand.u32 3, %v2435_v23 }
 0x279   : > { %v2423_v44 = vadd.f32 -0.4999988, %v2422_v60  ;;  %v2430_v7 = vadd.f32 -0.16666654, %v2429_v36  ;;  %v2545_v52 = vadd.s32 536870912, %v2544_v32  ;;  %v2643_v41 = vsel %vm2635_vm5, %v2626_v35, %v2642_v57 }
 0x27a   : > { %v2645_v49 = vsel %vm2633_vm3, %v7805_v38, %v2626_v35  ;;  %v2646_v3 = vsel %vm2636_vm4, %v2632_v54, 1326507024  ;;  %v2650_v34 = vand.u32 65535, %v7811_v58  ;;  %v2644_v23 = vsel %vm2634_vm6, %v2641_v25, %v2643_v41 }
 0x27b   : > { %v2424_v14 = vmul.f32 %v2423_v44, %v2419_v33  ;;  %v2431_v48 = vmul.f32 %v2430_v7, %v2419_v33  ;;  %v7829_v40 = vshrl.u32 %v2545_v52, 30  ;;  %vm2434_vm7 = vweird.f32 %v7379_v61 }
 0x27c   : > { %v2647_v21 = vsel %vm2635_vm5, %v2629_v45, %v2646_v3  ;;  %v2675_v18 = vshrl.u32 %v2644_v23, 16  ;;  %v2772_v43 = vperm.slane %v7837_v17, 1  ;;  %vm2437_vm8 = vcmp.lt.s32.totalorder %v2436_v47, 2 }
 0x27d   : > { %v2425_v37 = vadd.f32 1.0, %v2424_v14  ;;  %v2432_v55 = vadd.f32 1.0, %v2431_v48  ;;  %v2547_v33 = vshll.u32 %v7829_v40, 30  ;;  %vm2441_vm9 = vcmp.eq.s32.totalorder %v2436_v47, 2 }
 0x27e   : > { %v2648_v26 = vsel %vm2634_vm6, %v2645_v49, %v2647_v21  ;;  %v2651_v39 = vshrl.u32 %v7811_v58, 16  ;;  %v2674_v46 = vand.u32 65535, %v2644_v23  ;;  %v7844_v15 = vmul.u32 %v2675_v18, %v2650_v34 }
 0x27f   : > { %v2433_v50 = vmul.f32 %v2432_v55, %v2417_v56  ;;  %v2442_v24 = vxor.u32 2147483648, %v2425_v37  ;;  %v2548_v45 = vsub.s32 %v2544_v32, %v2547_v33  ;;  %vm2438_vm10 = vcmp.eq.s32.totalorder %v2436_v47, 0 }
 0x280   : > { %v2540_v54 = vadd.s32 %v7783_v53, %v7781_v6  ;;  %v2652_v60 = vand.u32 65535, %v2648_v26  ;;  %v2653_v36 = vshrl.u32 %v2648_v26, 16  ;;  %v2676_v49 = vmul.u32 %v2674_v46, %v2650_v34 }
 0x281   : > { %v2439_v25 = vxor.u32 2147483648, %v2433_v50  ;;  %v2443_v57 = vsel %vm2441_vm9, %v2442_v24, %v2433_v50  ;;  %vm2549_vm11 = vcmp.lt.s32.totalorder %v2548_v45, 0  ;;  %v2550_v44 = vsub.s32 0, %v2548_v45 }
 0x282   : > { %v2654_v7 = vmul.u32 %v2652_v60, %v2650_v34  ;;  %v2655_v52 = vmul.u32 %v2653_v36, %v2650_v34  ;;  %v2656_v41 = vmul.u32 %v2652_v60, %v2651_v39  ;;  %v2678_v32 = vmul.u32 %v2674_v46, %v2651_v39 }
 0x283   : > { %v2440_v3 = vsel %vm2438_vm10, %v2425_v37, %v2439_v25  ;;  %v2551_v56 = vsel %vm2549_vm11, %v2550_v44, %v2548_v45  ;;  %v2680_v14 = vshll.u32 %v7844_v15, 16  ;;  %v2657_v6 = vmul.u32 %v2653_v36, %v2651_v39 }
 0x284   : > { %v2444_v48 = vsel %vm2437_vm8, %v2440_v3, %v2443_v57  ;;  %v2552_v23 = vclz %v2551_v56  ;;  %v2658_v53 = vshll.u32 %v2655_v52, 16  ;;  %v2617_v55 = vshrl.u32 %v9953_v51, %v7777_v62 }
 0x285   : > { %v2445_v21 = vsel %vm2434_vm7, nan, %v2444_v48  ;;  %v2638_v34 = vsel %vm2636_vm4, %v2626_v35, 2102212464  ;;  %v2660_v37 = vshll.u32 %v2656_v41, 16  ;;  %v2679_v46 = vmul.u32 %v2675_v18, %v2651_v39 }
 0x286   : > { %v5464_v33 = vadd.s32 4294967294, %v2552_v23  ;;  %vm2662_vm12 = vc.u32 %v2654_v7, %v2658_v53  ;;  %v2664_v26 = vadd.s32 %v2658_v53, %v2654_v7  ;;  %2769 = vst [vmem:[%s6231_s15 + $0x68] sm:$0xff] %v2445_v21  ;;  %v2659_v47 = vshrl.u32 %v2655_v52, 16 }
 0x287   : > { %v2663_v50 = vsel %vm2662_vm12, 1, %v9971_v63  ;;  %v2682_v24 = vshll.u32 %v2678_v32, 16  ;;  %vm2684_vm13 = vc.u32 %v2676_v49, %v2680_v14  ;;  %v2686_v60 = vadd.s32 %v2680_v14, %v2676_v49 }
 0x288   : > { %vm5465_vm14 = vcmp.lt.s32.totalorder %v5464_v33, 0  ;;  %v2665_v61 = vadd.s32 %v2663_v50, %v2657_v6  ;;  %vm2666_vm15 = vc.u32 %v2664_v26, %v2660_v37  ;;  %v2637_v62 = vsel %vm2633_vm3, %v2617_v55, %v7803_v19 }
 0x289   : > { %v2555_v36 = vsel %vm5465_vm14, 0, %v5464_v33  ;;  %v2667_v35 = vsel %vm2666_vm15, 1, %v9971_v63  ;;  %v2685_v25 = vsel %vm2684_vm13, 1, %v9971_v63  ;;  %v2639_v7 = vsel %vm2635_vm5, %v7805_v38, %v2638_v34 }
 0x28a   : > { %v2556_v18 = vsub.s32 32, %v2555_v36  ;;  %v2557_v39 = vshll.u32 %v2548_v45, %v2555_v36  ;;  %v2560_v57 = vsub.s32 4294967266, %v2555_v36  ;;  %v2669_v44 = vadd.s32 %v2667_v35, %v2665_v61 }
 0x28b   : > { %v2661_v52 = vshrl.u32 %v2656_v41, 16  ;;  %v2681_v49 = vshrl.u32 %v7844_v15, 16  ;;  %v2687_v3 = vadd.s32 %v2685_v25, %v2679_v46  ;;  %vm2688_vm0 = vc.u32 %v2686_v60, %v2682_v24 }
 0x28c   : > { %v2558_v56 = vshrl.u32 %v2540_v54, %v2556_v18  ;;  %v2561_v14 = vadd.s32 127, %v2560_v57  ;;  %v2670_v48 = vadd.s32 %v2669_v44, %v2659_v47  ;;  %v2689_v19 = vsel %vm2688_vm0, 1, %v9971_v63 }
 0x28d   : > { %v2773_v23 = vperm.slane %v7837_v17, 3  ;;  %v2683_v53 = vshrl.u32 %v2678_v32, 16  ;;  %v2691_v21 = vadd.s32 %v2689_v19, %v2687_v3  ;;  %v2640_v55 = vsel %vm2634_vm6, %v2637_v62, %v2639_v7 }
 0x28e   : > { %v2559_v6 = vor.u32 %v2558_v56, %v2557_v39  ;;  %v2562_v45 = vshll.u32 %v2561_v14, 23  ;;  %v7871_v38 = vadd.s32 %v2670_v48, %v2661_v52  ;;  %v7873_v41 = vadd.s32 %v2686_v60, %v2682_v24 }
 0x28f   : > { %v7877_v15 = vperm.slane %v2772_v43, 1  ;;  %v2570_v37 = vsub.s32 4, %v7829_v40  ;;  %v2692_v33 = vadd.s32 %v2691_v21, %v2681_v49  ;;  %v7880_v32 = vperm.slane %v2773_v23, 1 }
 0x290   : > { %v2563_v54 = vor.u32 4788187, %v2562_v45  ;;  %v2566_v34 = vcvt.s32.f32 %v2559_v6  ;;  %vm2448_vm1 = vcmp.lt.s32.totalorder %v7585_v31, 0  ;;  %v2694_v16 = vmul.u32 %v7811_v58, %v2640_v55 }
 0x291   : > { %v2693_v46 = vadd.s32 %v2692_v33, %v2683_v53  ;;  %vm2696_vm2 = vc.u32 %v7871_v38, %v7873_v41  ;;  %v2778_v17 = vmul.f32 %v5832_v20, %v7877_v15  ;;  %v2571_v47 = vsel %vm2448_vm1, %v2570_v37, %v7829_v40 }
 0x292   : > { %v2564_v26 = vand.u32 2147483647, %v2563_v54  ;;  %vm2447_vm3 = vcmp.le.f32.partialorder %v2446_v28, 0.7853982  ;;  %v2779_v60 = vmul.f32 %v5832_v20, %v7880_v32  ;;  %vm7909_vm4 = vcmp.le.f32.partialorder %v2601_v42, 0.7853982 }
 0x293   : > { %v2697_v50 = vadd.s32 1, %v2693_v46  ;;  %v2573_v36 = vsel %vm2447_vm3, 0, %v2571_v47  ;;  %v7894_v62 = vadd.f32 %v2778_v17, %v5843_v27  ;;  %vm2603_vm5 = vcmp.lt.s32.totalorder %v7599_v0, 0 }
 0x294   : > { %v2567_v43 = vmul.f32 %v2566_v34, %v2564_v26  ;;  %v2590_v40 = vadd.s32 3, %v2573_v36  ;;  %v7898_v57 = vadd.f32 %v2779_v60, %v5843_v27  ;;  %vm2589_vm8 = vweird.f32 %v7585_v31 }
 0x295   : > { %v2698_v61 = vsel %vm2696_vm2, %v2697_v50, %v2693_v46  ;;  %v2810_v28 = vand.u32 2147483647, %v7894_v62  ;;  %v2813_v7 = vand.u32 2139095040, %v7894_v62  ;;  %v7927_v60 = vmul.f32 %v5834_v22, %v7877_v15 }
 0x296   : > { %v2568_v24 = vxor.u32 2147483648, %v2567_v43  ;;  %v2699_v58 = vadd.s32 %v2698_v61, %v2694_v16  ;;  %v2591_v19 = vand.u32 3, %v2590_v40  ;;  %v2968_v23 = vand.u32 2139095040, %v7898_v57 }
 0x297   : > { %v2817_v49 = vand.u32 8388607, %v2810_v28  ;;  %v2814_v56 = vshrl.u32 %v2813_v7, 23  ;;  %v2965_v33 = vand.u32 2147483647, %v7898_v57 }
 0x298   : > { %v2569_v35 = vsel %vm2448_vm1, %v2568_v24, %v2567_v43  ;;  %v2700_v18 = vadd.s32 536870912, %v2699_v58  ;;  %vm2592_vm7 = vcmp.lt.s32.totalorder %v2591_v19, 2  ;;  %v2969_v16 = vshrl.u32 %v2968_v23, 23 }
 0x299   : > { %v2572_v25 = vsel %vm2447_vm3, %v7585_v31, %v2569_v35  ;;  %v5469_v45 = vadd.s32 4294967169, %v2814_v56  ;;  %v2818_v53 = vor.u32 8388608, %v2817_v49  ;;  %vm2593_vm10 = vcmp.eq.s32.totalorder %v2591_v19, 0 }
 0x29a   : > { %v2574_v39 = vmul.f32 %v2572_v25, %v2572_v25  ;;  %v2701_v44 = vshrl.u32 %v2700_v18, 30  ;;  %vm2596_vm11 = vcmp.eq.s32.totalorder %v2591_v19, 2  ;;  %v2695_v18 = vadd.s32 %v7873_v41, %v7871_v38 }
 0x29b   : > { %v2820_v37 = vadd.s32 1, %v5469_v45  ;;  %v7923_v43 = vshll.u32 %v2818_v53, 8  ;;  %v5472_v7 = vadd.s32 4294967169, %v2969_v16 }
 0x29c   : > { %v2575_v20 = vmul.f32 -0.001358992, %v2574_v39  ;;  %v2582_v52 = vmul.f32 -0.00019511016, %v2574_v39  ;;  %v2702_v3 = vshll.u32 %v2701_v44, 30  ;;  %v2725_v27 = vsub.s32 4, %v2701_v44 }
 0x29d   : > { %vm2821_vm9 = vcmp.gt.s32.totalorder %v2820_v37, 0 }
 0x29e   : > { %v2576_v14 = vadd.f32 0.041655596, %v2575_v20  ;;  %v2583_v48 = vadd.f32 0.008332121, %v2582_v52  ;;  %v7905_v6 = vsub.s32 %v2699_v58, %v2702_v3  ;;  %v7921_v17 = vsel %vm2603_vm5, %v2725_v27, %v2701_v44 }
 0x29f   : > { %v2822_v61 = vsel %vm2821_vm9, %v2820_v37, 0  ;;  %v2728_v44 = vsel %vm7909_vm4, 0, %v7921_v17  ;;  %v7936_v20 = vand.u32 8388607, %v2965_v33  ;;  %v7939_v3 = vand.u32 65535, %v7923_v43 }
 0x2a0   : > { %v2577_v21 = vmul.f32 %v2576_v14, %v2574_v39  ;;  %v2584_v55 = vmul.f32 %v2583_v48, %v2574_v39  ;;  %vm2704_vm6 = vcmp.lt.s32.totalorder %v7905_v6, 0  ;;  %v2705_v34 = vsub.s32 0, %v7905_v6 }
 0x2a1   : > { %v2824_v36 = vand.u32 31, %v2822_v61  ;;  %v7944_v14 = vshrl.u32 %v7923_v43, 16  ;;  %v2823_v17 = vshrl.u32 %v2822_v61, 5 }
 0x2a2   : > { %v2578_v26 = vadd.f32 -0.4999988, %v2577_v21  ;;  %v2585_v46 = vadd.f32 -0.16666654, %v2584_v55  ;;  %v2706_v42 = vsel %vm2704_vm6, %v2705_v34, %v7905_v6  ;;  %v2975_v55 = vadd.s32 1, %v5472_v7 }
 0x2a3   : > { %v2707_v24 = vclz %v2706_v42  ;;  %v2827_v38 = vshll.u32 %v9953_v51, %v2824_v36  ;;  %v2830_v53 = vshll.u32 %v9946_v12, %v2824_v36  ;;  %v2839_v7 = vshll.u32 %v9955_v8, %v2824_v36 }
 0x2a4   : > { %v2579_v47 = vmul.f32 %v2578_v26, %v2574_v39  ;;  %v2586_v50 = vmul.f32 %v2585_v46, %v2574_v39  ;;  %v2825_v39 = vsub.s32 32, %v2824_v36  ;;  %v2833_v26 = vshll.u32 %v9947_v2, %v2824_v36 }
 0x2a5   : > { %v5467_v40 = vadd.s32 4294967294, %v2707_v24  ;;  %vm2976_vm13 = vcmp.gt.s32.totalorder %v2975_v55, 0  ;;  %vm2842_vm14 = vcmp.lt.s32.totalorder %v2823_v17, 1  ;;  %vm2843_vm15 = vcmp.lt.s32.totalorder %v2823_v17, 2 }
 0x2a6   : > { %v2580_v58 = vadd.f32 1.0, %v2579_v47  ;;  %v2587_v35 = vadd.f32 1.0, %v2586_v50  ;;  %v2828_v41 = vshrl.u32 %v9946_v12, %v2825_v39  ;;  %v2831_v21 = vshrl.u32 %v9947_v2, %v2825_v39 }
 0x2a7   : > { %vm5468_vm12 = vcmp.lt.s32.totalorder %v5467_v40, 0  ;;  %v2834_v46 = vshrl.u32 %v9945_v5, %v2825_v39  ;;  %v2826_v19 = vshrl.u32 %v9953_v51, %v2825_v39  ;;  %v2840_v61 = vshrl.u32 %v9956_v13, %v2825_v39 }
 0x2a8   : > { %v2588_v52 = vmul.f32 %v2587_v35, %v2572_v25  ;;  %v2597_v49 = vxor.u32 2147483648, %v2580_v58  ;;  %v2710_v56 = vsel %vm5468_vm12, 0, %v5467_v40  ;;  %v2829_v24 = vor.u32 %v2828_v41, %v2827_v38 }
 0x2a9   : > { %v2711_v27 = vsub.s32 32, %v2710_v56  ;;  %v2712_v45 = vshll.u32 %v7905_v6, %v2710_v56  ;;  %v2715_v25 = vsub.s32 4294967266, %v2710_v56  ;;  %v2836_v6 = vshll.u32 %v9945_v5, %v2824_v36 }
 0x2aa   : > { %v2594_v48 = vxor.u32 2147483648, %v2588_v52  ;;  %v2598_v23 = vsel %vm2596_vm11, %v2597_v49, %v2588_v52  ;;  %v2973_v35 = vor.u32 8388608, %v7936_v20  ;;  %v2835_v52 = vor.u32 %v2834_v46, %v2833_v26 }
 0x2ab   : > { %v2713_v37 = vshrl.u32 %v2695_v18, %v2711_v27  ;;  %v2716_v42 = vadd.s32 127, %v2715_v25  ;;  %v2837_v18 = vshrl.u32 %v9955_v8, %v2825_v39  ;;  %v2841_v38 = vor.u32 %v2840_v61, %v2839_v7 }
 0x2ac   : > { %v2595_v34 = vsel %vm2593_vm10, %v2580_v58, %v2594_v48  ;;  %v2832_v58 = vor.u32 %v2831_v21, %v2830_v53  ;;  %vm2844_vm0 = vcmp.lt.s32.totalorder %v2823_v17, 3  ;;  %vm2845_vm1 = vcmp.lt.s32.totalorder %v2823_v17, 4 }
 0x2ad   : > { %v2599_v16 = vsel %vm2592_vm7, %v2595_v34, %v2598_v23  ;;  %v2714_v50 = vor.u32 %v2713_v37, %v2712_v45  ;;  %v2717_v40 = vshll.u32 %v2716_v42, 23  ;;  %v2838_v56 = vor.u32 %v2837_v18, %v2836_v6 }
 0x2ae   : > { %v2600_v47 = vsel %vm2589_vm8, nan, %v2599_v16  ;;  %v2745_v48 = vadd.s32 3, %v2728_v44  ;;  %v2850_v23 = vsel %vm2842_vm14, %v2829_v24, %v2832_v58  ;;  %v2847_v36 = vsel %vm2845_vm1, %v2835_v52, 2102212464 }
 0x2af   : > { %2770 = vst [vmem:[%s6231_s15 + $0x70] sm:$0xff] %v2600_v47  ;;  %v2718_v49 = vor.u32 4788187, %v2717_v40  ;;  %v2721_v31 = vcvt.s32.f32 %v2714_v50  ;;  %v2851_v27 = vsel %vm2845_vm1, %v2838_v56, 920167782  ;;  %v2854_v25 = vsel %vm2842_vm14, %v2832_v58, %v2835_v52 }
 0x2b0   : > { %v2852_v45 = vsel %vm2844_vm0, %v2835_v52, %v2851_v27  ;;  %v2855_v39 = vsel %vm2845_vm1, %v2841_v38, 1326507024  ;;  %v7969_v37 = vsel %vm2976_vm13, %v2975_v55, 0  ;;  %v2846_v26 = vsel %vm2842_vm14, %v2826_v19, %v2829_v24 }
 0x2b1   : > { %v2719_v41 = vand.u32 2147483647, %v2718_v49  ;;  %v2853_v21 = vsel %vm2843_vm15, %v2850_v23, %v2852_v45  ;;  %v2856_v34 = vsel %vm2844_vm0, %v2838_v56, %v2855_v39  ;;  %v2848_v6 = vsel %vm2844_vm0, %v2832_v58, %v2847_v36 }
 0x2b2   : > { %v2857_v44 = vsel %vm2843_vm15, %v2854_v25, %v2856_v34  ;;  %v2883_v46 = vand.u32 65535, %v2853_v21  ;;  %v2884_v16 = vshrl.u32 %v2853_v21, 16  ;;  %v7974_v40 = vand.u32 3, %v2745_v48 }
 0x2b3   : > { %v2722_v53 = vmul.f32 %v2721_v31, %v2719_v41  ;;  %v2861_v47 = vand.u32 65535, %v2857_v44  ;;  %v2862_v50 = vshrl.u32 %v2857_v44, 16  ;;  %v7988_v49 = vsel %vm2843_vm15, %v2846_v26, %v2848_v6 }
 0x2b4   : > { %v2885_v18 = vmul.u32 %v2883_v46, %v7939_v3  ;;  %v2886_v7 = vmul.u32 %v2884_v16, %v7939_v3  ;;  %v2887_v55 = vmul.u32 %v2883_v46, %v7944_v14  ;;  %v2888_v31 = vmul.u32 %v2884_v16, %v7944_v14 }
 0x2b5   : > { %v2723_v42 = vxor.u32 2147483648, %v2722_v53  ;;  %v2863_v19 = vmul.u32 %v2861_v47, %v7939_v3  ;;  %v2864_v52 = vmul.u32 %v2862_v50, %v7939_v3  ;;  %v2865_v61 = vmul.u32 %v2861_v47, %v7944_v14 }
 0x2b6   : > { %v2889_v56 = vshll.u32 %v2886_v7, 16  ;;  %v2866_v41 = vmul.u32 %v2862_v50, %v7944_v14  ;;  %v2890_v36 = vshrl.u32 %v2886_v7, 16  ;;  %v2891_v3 = vshll.u32 %v2887_v55, 16 }
 0x2b7   : > { %v2724_v24 = vsel %vm2603_vm5, %v2723_v42, %v2722_v53  ;;  %v2867_v48 = vshll.u32 %v2864_v52, 16  ;;  %v2869_v23 = vshll.u32 %v2865_v61, 16  ;;  %v2868_v27 = vshrl.u32 %v2864_v52, 16 }
 0x2b8   : > { %v2727_v58 = vsel %vm7909_vm4, %v7599_v0, %v2724_v24  ;;  %vm2893_vm2 = vc.u32 %v2885_v18, %v2889_v56  ;;  %v2895_v53 = vadd.s32 %v2889_v56, %v2885_v18  ;;  %v2979_v21 = vand.u32 31, %v7969_v37 }
 0x2b9   : > { %v2729_v38 = vmul.f32 %v2727_v58, %v2727_v58  ;;  %vm2871_vm3 = vc.u32 %v2863_v19, %v2867_v48  ;;  %v2873_v54 = vadd.s32 %v2867_v48, %v2863_v19  ;;  %v2894_v39 = vsel %vm2893_vm2, 1, %v9971_v63 }
 0x2ba   : > { %v2872_v17 = vsel %vm2871_vm3, 1, %v9971_v63  ;;  %vm2751_vm5 = vcmp.eq.s32.totalorder %v7974_v40, 2  ;;  %v2870_v44 = vshrl.u32 %v2865_v61, 16  ;;  %v2896_v16 = vadd.s32 %v2894_v39, %v2888_v31 }
 0x2bb   : > { %v2730_v45 = vmul.f32 -0.001358992, %v2729_v38  ;;  %v2737_v25 = vmul.f32 -0.00019511016, %v2729_v38  ;;  %v2874_v14 = vadd.s32 %v2872_v17, %v2866_v41  ;;  %vm2875_vm4 = vc.u32 %v2873_v54, %v2869_v23 }
 0x2bc   : > { %v2876_v46 = vsel %vm2875_vm4, 1, %v9971_v63  ;;  %vm2897_vm6 = vc.u32 %v2895_v53, %v2891_v3  ;;  %v2892_v7 = vshrl.u32 %v2887_v55, 16  ;;  %v2903_v24 = vmul.u32 %v7923_v43, %v7988_v49 }
 0x2bd   : > { %v2731_v34 = vadd.f32 0.041655596, %v2730_v45  ;;  %v2738_v26 = vadd.f32 0.008332121, %v2737_v25  ;;  %v2878_v47 = vadd.s32 %v2876_v46, %v2874_v14  ;;  %v2898_v50 = vsel %vm2897_vm6, 1, %v9971_v63 }
 0x2be   : > { %v2900_v18 = vadd.s32 %v2898_v50, %v2896_v16  ;;  %v8000_v19 = vsub.s32 32, %v2979_v21  ;;  %vm2747_vm7 = vcmp.lt.s32.totalorder %v7974_v40, 2  ;;  %v8003_v41 = vadd.s32 %v2895_v53, %v2891_v3 }
 0x2bf   : > { %v2732_v42 = vmul.f32 %v2731_v34, %v2729_v38  ;;  %v2739_v6 = vmul.f32 %v2738_v26, %v2729_v38  ;;  %v2879_v61 = vadd.s32 %v2878_v47, %v2868_v27  ;;  %v2982_v48 = vshll.u32 %v9953_v51, %v2979_v21 }
 0x2c0   : > { %v2901_v31 = vadd.s32 %v2900_v18, %v2890_v36  ;;  %v2983_v23 = vshrl.u32 %v9946_v12, %v8000_v19  ;;  %v2985_v55 = vshll.u32 %v9946_v12, %v2979_v21  ;;  %v2986_v49 = vshrl.u32 %v9947_v2, %v8000_v19 }
 0x2c1   : > { %v2733_v52 = vadd.f32 -0.4999988, %v2732_v42  ;;  %v2740_v56 = vadd.f32 -0.16666654, %v2739_v6  ;;  %v8009_v43 = vadd.s32 %v2879_v61, %v2870_v44  ;;  %v8014_v27 = vshrl.u32 %v7969_v37, 5 }
 0x2c2   : > { %v2902_v54 = vadd.s32 %v2901_v31, %v2892_v7  ;;  %v2988_v36 = vshll.u32 %v9947_v2, %v2979_v21  ;;  %v2991_v3 = vshll.u32 %v9945_v5, %v2979_v21  ;;  %v8022_v34 = vor.u32 %v2983_v23, %v2982_v48 }
 0x2c3   : > { %v2734_v45 = vmul.f32 %v2733_v52, %v2729_v38  ;;  %v2741_v25 = vmul.f32 %v2740_v56, %v2729_v38  ;;  %vm2905_vm8 = vc.u32 %v8009_v43, %v8003_v41  ;;  %v2989_v38 = vshrl.u32 %v9945_v5, %v8000_v19 }
 0x2c4   : > { %v2906_v53 = vadd.s32 1, %v2902_v54  ;;  %v2992_v26 = vshrl.u32 %v9955_v8, %v8000_v19  ;;  %v2994_v37 = vshll.u32 %v9955_v8, %v2979_v21  ;;  %v8027_v46 = vor.u32 %v2986_v49, %v2985_v55 }
 0x2c5   : > { %v2735_v17 = vadd.f32 1.0, %v2734_v45  ;;  %v2742_v39 = vadd.f32 1.0, %v2741_v25  ;;  %v2995_v16 = vshrl.u32 %v9956_v13, %v8000_v19  ;;  %vm2748_vm9 = vcmp.eq.s32.totalorder %v7974_v40, 0 }
 0x2c6   : > { %v2907_v42 = vsel %vm2905_vm8, %v2906_v53, %v2902_v54  ;;  %v2993_v6 = vor.u32 %v2992_v26, %v2991_v3  ;;  %vm2997_vm10 = vcmp.lt.s32.totalorder %v8014_v27, 1  ;;  %v2990_v21 = vor.u32 %v2989_v38, %v2988_v36 }
 0x2c7   : > { %v2743_v14 = vmul.f32 %v2742_v39, %v2727_v58  ;;  %v2752_v44 = vxor.u32 2147483648, %v2735_v17  ;;  %v2908_v7 = vadd.s32 %v2907_v42, %v2903_v24  ;;  %vm2744_vm11 = vweird.f32 %v7599_v0 }
 0x2c8   : > { %v2996_v58 = vor.u32 %v2995_v16, %v2994_v37  ;;  %vm2999_vm12 = vcmp.lt.s32.totalorder %v8014_v27, 3  ;;  %vm3000_vm13 = vcmp.lt.s32.totalorder %v8014_v27, 4  ;;  %vm2998_vm14 = vcmp.lt.s32.totalorder %v8014_v27, 2 }
 0x2c9   : > { %v2749_v47 = vxor.u32 2147483648, %v2743_v14  ;;  %v2753_v50 = vsel %vm2751_vm5, %v2752_v44, %v2743_v14  ;;  %v2909_v52 = vadd.s32 536870912, %v2908_v7  ;;  %v3005_v56 = vsel %vm2997_vm10, %v8022_v34, %v8027_v46 }
 0x2ca   : > { %v3006_v0 = vsel %vm3000_vm13, %v2993_v6, 920167782  ;;  %v3009_v23 = vsel %vm2997_vm10, %v8027_v46, %v2990_v21  ;;  %v2781_v55 = vmul.f32 %v5834_v22, %v7880_v32  ;;  %v3010_v45 = vsel %vm3000_vm13, %v2996_v58, 1326507024 }
 0x2cb   : > { %v2750_v18 = vsel %vm2748_vm9, %v2735_v17, %v2749_v47  ;;  %v8047_v31 = vshrl.u32 %v2909_v52, 30  ;;  %v3007_v48 = vsel %vm2999_vm12, %v2990_v21, %v3006_v0  ;;  %v8063_v25 = vshll.u32 %v2973_v35, 8 }
 0x2cc   : > { %v2754_v24 = vsel %vm2747_vm7, %v2750_v18, %v2753_v50  ;;  %v3008_v40 = vsel %vm2998_vm14, %v3005_v56, %v3007_v48  ;;  %v8067_v49 = vadd.f32 %v7927_v60, %v5847_v29  ;;  %v3011_v36 = vsel %vm2999_vm12, %v2993_v6, %v3010_v45 }
 0x2cd   : > { %v2755_v61 = vsel %vm2744_vm11, nan, %v2754_v24  ;;  %v2911_v54 = vshll.u32 %v8047_v31, 30  ;;  %v3038_v22 = vand.u32 65535, %v3008_v40  ;;  %v3012_v3 = vsel %vm2998_vm14, %v3009_v23, %v3011_v36 }
 0x2ce   : > { %2771 = vst [vmem:[%s6231_s15 + $0x78] sm:$0xff] %v2755_v61  ;;  %v3014_v17 = vand.u32 65535, %v8063_v25  ;;  %v3015_v39 = vshrl.u32 %v8063_v25, 16  ;;  %v3039_v20 = vshrl.u32 %v3008_v40, 16  ;;  %v3016_v38 = vand.u32 65535, %v3012_v3 }
 0x2cf   : > { %v2912_v35 = vsub.s32 %v2908_v7, %v2911_v54  ;;  %v3017_v53 = vshrl.u32 %v3012_v3, 16  ;;  %v8077_v60 = vadd.f32 %v2781_v55, %v5847_v29  ;;  %v2981_v6 = vshrl.u32 %v9953_v51, %v8000_v19 }
 0x2d0   : > { %v3040_v26 = vmul.u32 %v3038_v22, %v3014_v17  ;;  %v3041_v37 = vmul.u32 %v3039_v20, %v3014_v17  ;;  %v8079_v14 = vmul.u32 %v3038_v22, %v3015_v39  ;;  %v3018_v16 = vmul.u32 %v3016_v38, %v3014_v17 }
 0x2d1   : > { %vm2913_vm15 = vcmp.lt.s32.totalorder %v2912_v35, 0  ;;  %v2914_v44 = vsub.s32 0, %v2912_v35  ;;  %v3019_v42 = vmul.u32 %v3017_v53, %v3014_v17  ;;  %v3020_v47 = vmul.u32 %v3016_v38, %v3015_v39 }
 0x2d2   : > { %v3044_v50 = vshll.u32 %v3041_v37, 16  ;;  %v3123_v7 = vand.u32 2139095040, %v8067_v49  ;;  %v2904_v58 = vadd.s32 %v8003_v41, %v8009_v43  ;;  %v3021_v18 = vmul.u32 %v3017_v53, %v3015_v39 }
 0x2d3   : > { %v2915_v29 = vsel %vm2913_vm15, %v2914_v44, %v2912_v35  ;;  %v3022_v52 = vshll.u32 %v3019_v42, 16  ;;  %vm2812_vm0 = vcmp.lt.s32.totalorder %v7894_v62, 0  ;;  %v3024_v24 = vshll.u32 %v3020_v47, 16 }
 0x2d4   : > { %v2916_v56 = vclz %v2915_v29  ;;  %v3043_v0 = vmul.u32 %v3039_v20, %v3015_v39  ;;  %v3046_v61 = vshll.u32 %v8079_v14, 16  ;;  %v3002_v19 = vsel %vm3000_vm13, %v2990_v21, 2102212464 }
 0x2d5   : > { %vm3026_vm1 = vc.u32 %v3018_v16, %v3022_v52  ;;  %v3028_v48 = vadd.s32 %v3022_v52, %v3018_v16  ;;  %vm3048_vm2 = vc.u32 %v3040_v26, %v3044_v50  ;;  %v3050_v43 = vadd.s32 %v3044_v50, %v3040_v26 }
 0x2d6   : > { %v5470_v23 = vadd.s32 4294967294, %v2916_v56  ;;  %v3027_v55 = vsel %vm3026_vm1, 1, %v9971_v63  ;;  %v3049_v41 = vsel %vm3048_vm2, 1, %v9971_v63  ;;  %v2934_v40 = vsub.s32 4, %v8047_v31 }
 0x2d7   : > { %v3023_v45 = vshrl.u32 %v3019_v42, 16  ;;  %v3029_v54 = vadd.s32 %v3027_v55, %v3021_v18  ;;  %vm3030_vm3 = vc.u32 %v3028_v48, %v3024_v24  ;;  %v3051_v22 = vadd.s32 %v3049_v41, %v3043_v0 }
 0x2d8   : > { %vm5471_vm4 = vcmp.lt.s32.totalorder %v5470_v23, 0  ;;  %v3031_v36 = vsel %vm3030_vm3, 1, %v9971_v63  ;;  %vm3052_vm5 = vc.u32 %v3050_v43, %v3046_v61  ;;  %v3025_v3 = vshrl.u32 %v3020_v47, 16 }
 0x2d9   : > { %v2919_v21 = vsel %vm5471_vm4, 0, %v5470_v23  ;;  %v3033_v17 = vadd.s32 %v3031_v36, %v3029_v54  ;;  %v3053_v39 = vsel %vm3052_vm5, 1, %v9971_v63  ;;  %v3045_v44 = vshrl.u32 %v3041_v37, 16 }
 0x2da   : > { %v2920_v20 = vsub.s32 32, %v2919_v21  ;;  %v2921_v38 = vshll.u32 %v2912_v35, %v2919_v21  ;;  %v2924_v53 = vsub.s32 4294967266, %v2919_v21  ;;  %v3001_v26 = vsel %vm2997_vm10, %v2981_v6, %v8022_v34 }
 0x2db   : > { %v3003_v16 = vsel %vm2999_vm12, %v8027_v46, %v3002_v19  ;;  %v3034_v42 = vadd.s32 %v3033_v17, %v3023_v45  ;;  %v3120_v50 = vand.u32 2147483647, %v8067_v49  ;;  %v3047_v18 = vshrl.u32 %v8079_v14, 16 }
 0x2dc   : > { %v2922_v29 = vshrl.u32 %v2904_v58, %v2920_v20  ;;  %v2925_v47 = vadd.s32 127, %v2924_v53  ;;  %v3055_v52 = vadd.s32 %v3053_v39, %v3051_v22  ;;  %v2935_v35 = vsel %vm2812_vm0, %v2934_v40, %v8047_v31 }
 0x2dd   : > { %v3035_v37 = vadd.s32 %v3034_v42, %v3025_v3  ;;  %v3054_v56 = vadd.s32 %v3050_v43, %v3046_v61  ;;  %v3124_v24 = vshrl.u32 %v3123_v7, 23  ;;  %v3004_v46 = vsel %vm2998_vm14, %v3001_v26, %v3003_v16 }
 0x2de   : > { %v2923_v34 = vor.u32 %v2922_v29, %v2921_v38  ;;  %v2926_v6 = vshll.u32 %v2925_v47, 23  ;;  %v3056_v0 = vadd.s32 %v3055_v52, %v3045_v44  ;;  %vm8110_vm6 = vcmp.le.f32.partialorder %v2810_v28, 0.7853982  ;;  %v10013_v38 = vld [vmem:[#allocation9_spill] sm:$0xff] }
 0x2df   : > { %v5475_v14 = vadd.s32 4294967169, %v3124_v24  ;;  %v2937_v31 = vsel %vm8110_vm6, 0, %v2935_v35  ;;  %v3058_v7 = vmul.u32 %v8063_v25, %v3004_v46  ;;  %vm3060_vm7 = vc.u32 %v3035_v37, %v3054_v56 }
 0x2e0   : > { %v2927_v19 = vor.u32 4788187, %v2926_v6  ;;  %v2930_v48 = vcvt.s32.f32 %v2923_v34  ;;  %v3057_v61 = vadd.s32 %v3056_v0, %v3047_v18  ;;  %v3127_v27 = vand.u32 8388607, %v3120_v50 }
 0x2e1   : > { %v3130_v23 = vadd.s32 1, %v5475_v14  ;;  %v3278_v28 = vand.u32 2139095040, %v8077_v60  ;;  %v2954_v40 = vadd.s32 3, %v2937_v31  ;;  %v3275_v3 = vand.u32 2147483647, %v8077_v60 }
 0x2e2   : > { %v2928_v55 = vand.u32 2147483647, %v2927_v19  ;;  %v3061_v41 = vadd.s32 1, %v3057_v61  ;;  %v3128_v22 = vor.u32 8388608, %v3127_v27  ;;  %v8123_v53 = vmul.f32 %v10013_v38, %v7877_v15 }
 0x2e3   : > { %vm3131_vm8 = vcmp.gt.s32.totalorder %v3130_v23, 0  ;;  %v3279_v17 = vshrl.u32 %v3278_v28, 23  ;;  %v8127_v26 = vand.u32 3, %v2954_v40  ;;  %v8129_v16 = vadd.s32 %v3054_v56, %v3035_v37 }
 0x2e4   : > { %v2931_v43 = vmul.f32 %v2930_v48, %v2928_v55  ;;  %v3062_v45 = vsel %vm3060_vm7, %v3061_v41, %v3057_v61  ;;  %v3132_v54 = vsel %vm3131_vm8, %v3130_v23, 0  ;;  %v8138_v47 = vshll.u32 %v3128_v22, 8 }
 0x2e5   : > { %v3063_v36 = vadd.s32 %v3062_v45, %v3058_v7  ;;  %v3134_v21 = vand.u32 31, %v3132_v54  ;;  %v8142_v18 = vand.u32 8388607, %v3275_v3  ;;  %v8146_v35 = vshrl.u32 %v3132_v54, 5 }
 0x2e6   : > { %v2932_v25 = vxor.u32 2147483648, %v2931_v43  ;;  %v5478_v56 = vadd.s32 4294967169, %v3279_v17  ;;  %vm2960_vm9 = vcmp.eq.s32.totalorder %v8127_v26, 2  ;;  %vm2957_vm11 = vcmp.eq.s32.totalorder %v8127_v26, 0 }
 0x2e7   : > { %v3064_v39 = vadd.s32 536870912, %v3063_v36  ;;  %v3135_v20 = vsub.s32 32, %v3134_v21  ;;  %v3140_v37 = vshll.u32 %v9946_v12, %v3134_v21  ;;  %v3146_v6 = vshll.u32 %v9945_v5, %v3134_v21 }
 0x2e8   : > { %v2933_v44 = vsel %vm2812_vm0, %v2932_v25, %v2931_v43  ;;  %v3143_v14 = vshll.u32 %v9947_v2, %v3134_v21  ;;  %v3137_v31 = vshll.u32 %v9953_v51, %v3134_v21  ;;  %v3149_v7 = vshll.u32 %v9955_v8, %v3134_v21 }
 0x2e9   : > { %v8134_v42 = vsel %vm8110_vm6, %v7894_v62, %v2933_v44  ;;  %v8136_v29 = vshrl.u32 %v3064_v39, 30  ;;  %v3141_v34 = vshrl.u32 %v9947_v2, %v3135_v20  ;;  %v3147_v46 = vshrl.u32 %v9955_v8, %v3135_v20 }
 0x2ea   : > { %v2938_v52 = vmul.f32 %v8134_v42, %v8134_v42  ;;  %v3144_v19 = vshrl.u32 %v9945_v5, %v3135_v20  ;;  %v3138_v61 = vshrl.u32 %v9946_v12, %v3135_v20  ;;  %v3150_v55 = vshrl.u32 %v9956_v13, %v3135_v20 }
 0x2eb   : > { %v3066_v24 = vshll.u32 %v8136_v29, 30  ;;  %v8161_v41 = vadd.s32 1, %v5478_v56  ;;  %v3142_v43 = vor.u32 %v3141_v34, %v3140_v37  ;;  %v3148_v40 = vor.u32 %v3147_v46, %v3146_v6 }
 0x2ec   : > { %v2939_v0 = vmul.f32 -0.001358992, %v2938_v52  ;;  %v2946_v58 = vmul.f32 -0.00019511016, %v2938_v52  ;;  %v3151_v22 = vor.u32 %v3150_v55, %v3149_v7  ;;  %v3139_v25 = vor.u32 %v3138_v61, %v3137_v31 }
 0x2ed   : > { %v8155_v48 = vsub.s32 %v3063_v36, %v3066_v24  ;;  %v3145_v36 = vor.u32 %v3144_v19, %v3143_v14  ;;  %vm3152_vm12 = vcmp.lt.s32.totalorder %v8146_v35, 1  ;;  %vm3155_vm13 = vcmp.lt.s32.totalorder %v8146_v35, 4 }
 0x2ee   : > { %v2940_v27 = vadd.f32 0.041655596, %v2939_v0  ;;  %v2947_v23 = vadd.f32 0.008332121, %v2946_v58  ;;  %vm2956_vm14 = vcmp.lt.s32.totalorder %v8127_v26, 2  ;;  %vm3154_vm15 = vcmp.lt.s32.totalorder %v8146_v35, 3 }
 0x2ef   : > { %vm3068_vm10 = vcmp.lt.s32.totalorder %v8155_v48, 0  ;;  %v3069_v28 = vsub.s32 0, %v8155_v48  ;;  %vm2953_vm0 = vweird.f32 %v7894_v62  ;;  %vm3153_vm1 = vcmp.lt.s32.totalorder %v8146_v35, 2 }
 0x2f0   : > { %v2941_v45 = vmul.f32 %v2940_v27, %v2938_v52  ;;  %v2948_v54 = vmul.f32 %v2947_v23, %v2938_v52  ;;  %v3161_v37 = vsel %vm3155_vm13, %v3148_v40, 920167782  ;;  %v3165_v56 = vsel %vm3155_vm13, %v3151_v22, 1326507024 }
 0x2f1   : > { %v3070_v21 = vsel %vm3068_vm10, %v3069_v28, %v8155_v48  ;;  %v3169_v24 = vand.u32 65535, %v8138_v47  ;;  %vm2967_vm2 = vcmp.lt.s32.totalorder %v7898_v57, 0  ;;  %v3164_v0 = vsel %vm3152_vm12, %v3142_v43, %v3145_v36 }
 0x2f2   : > { %v2942_v17 = vadd.f32 -0.4999988, %v2941_v45  ;;  %v2949_v39 = vadd.f32 -0.16666654, %v2948_v54  ;;  %v3071_v44 = vclz %v3070_v21  ;;  %v3136_v58 = vshrl.u32 %v9953_v51, %v3135_v20 }
 0x2f3   : > { %v3166_v14 = vsel %vm3154_vm15, %v3148_v40, %v3165_v56  ;;  %v3170_v19 = vshrl.u32 %v8138_v47, 16  ;;  %vm3286_vm3 = vcmp.gt.s32.totalorder %v8161_v41, 0  ;;  %v3157_v27 = vsel %vm3155_vm13, %v3145_v36, 2102212464 }
 0x2f4   : > { %v2943_v34 = vmul.f32 %v2942_v17, %v2938_v52  ;;  %v2950_v6 = vmul.f32 %v2949_v39, %v2938_v52  ;;  %v5473_v46 = vadd.s32 4294967294, %v3071_v44  ;;  %v3160_v52 = vsel %vm3152_vm12, %v3139_v25, %v3142_v43 }
 0x2f5   : > { %v3162_v20 = vsel %vm3154_vm15, %v3145_v36, %v3161_v37  ;;  %v3167_v23 = vsel %vm3153_vm1, %v3164_v0, %v3166_v14  ;;  %v3089_v22 = vsub.s32 4, %v8136_v29  ;;  %vm8205_vm5 = vcmp.le.f32.partialorder %v2965_v33, 0.7853982 }
 0x2f6   : > { %v2944_v31 = vadd.f32 1.0, %v2943_v34  ;;  %v2951_v61 = vadd.f32 1.0, %v2950_v6  ;;  %vm5474_vm4 = vcmp.lt.s32.totalorder %v5473_v46, 0  ;;  %v3171_v21 = vand.u32 65535, %v3167_v23 }
 0x2f7   : > { %v3074_v7 = vsel %vm5474_vm4, 0, %v5473_v46  ;;  %v3172_v17 = vshrl.u32 %v3167_v23, 16  ;;  %v3163_v37 = vsel %vm3153_vm1, %v3160_v52, %v3162_v20  ;;  %v3156_v56 = vsel %vm3152_vm12, %v3136_v58, %v3139_v25 }
 0x2f8   : > { %v2952_v55 = vmul.f32 %v2951_v61, %v8134_v42  ;;  %v2961_v28 = vxor.u32 2147483648, %v2944_v31  ;;  %v3075_v40 = vsub.s32 32, %v3074_v7  ;;  %v3076_v45 = vshll.u32 %v8155_v48, %v3074_v7 }
 0x2f9   : > { %v3079_v54 = vsub.s32 4294967266, %v3074_v7  ;;  %v3158_v34 = vsel %vm3154_vm15, %v3142_v43, %v3157_v27  ;;  %v3193_v6 = vand.u32 65535, %v3163_v37  ;;  %v3173_v0 = vmul.u32 %v3171_v21, %v3169_v24 }
 0x2fa   : > { %v2958_v39 = vxor.u32 2147483648, %v2952_v55  ;;  %v2962_v44 = vsel %vm2960_vm9, %v2961_v28, %v2952_v55  ;;  %v3077_v36 = vshrl.u32 %v8129_v16, %v3075_v40  ;;  %v3174_v14 = vmul.u32 %v3172_v17, %v3169_v24 }
 0x2fb   : > { %v3080_v48 = vadd.s32 127, %v3079_v54  ;;  %v3090_v52 = vsel %vm2967_vm2, %v3089_v22, %v8136_v29  ;;  %v3175_v25 = vmul.u32 %v3171_v21, %v3170_v19  ;;  %v8224_v58 = vsel %vm3153_vm1, %v3156_v56, %v3158_v34 }
 0x2fc   : > { %v2959_v16 = vsel %vm2957_vm11, %v2944_v31, %v2958_v39  ;;  %v3078_v46 = vor.u32 %v3077_v36, %v3076_v45  ;;  %v3176_v31 = vmul.u32 %v3172_v17, %v3170_v19  ;;  %v3177_v7 = vshll.u32 %v3174_v14, 16 }
 0x2fd   : > { %v2963_v33 = vsel %vm2956_vm14, %v2959_v16, %v2962_v44  ;;  %v3081_v61 = vshll.u32 %v3080_v48, 23  ;;  %v3179_v23 = vshll.u32 %v3175_v25, 16  ;;  %v3194_v26 = vshrl.u32 %v3163_v37, 16 }
 0x2fe   : > { %v2964_v43 = vsel %vm2953_vm0, nan, %v2963_v33  ;;  %v3085_v20 = vcvt.s32.f32 %v3078_v46  ;;  %vm3181_vm6 = vc.u32 %v3173_v0, %v3177_v7  ;;  %v3183_v55 = vadd.s32 %v3177_v7, %v3173_v0 }
 0x2ff   : > { %v3082_v27 = vor.u32 4788187, %v3081_v61  ;;  %5290 = vst [vmem:[%s6231_s15 + $0x80] sm:$0xff] %v2964_v43  ;;  %v3197_v28 = vmul.u32 %v3193_v6, %v3170_v19  ;;  %v3287_v29 = vsel %vm3286_vm3, %v8161_v41, 0  ;;  %v3182_v40 = vsel %vm3181_vm6, 1, %v9971_v63 }
 0x300   : > { %v3195_v35 = vmul.u32 %v3193_v6, %v3169_v24  ;;  %v3196_v45 = vmul.u32 %v3194_v26, %v3169_v24  ;;  %v3178_v54 = vshrl.u32 %v3174_v14, 16  ;;  %v3184_v22 = vadd.s32 %v3182_v40, %v3176_v31 }
 0x301   : > { %v3083_v62 = vand.u32 2147483647, %v3082_v27  ;;  %vm3185_vm7 = vc.u32 %v3183_v55, %v3179_v23  ;;  %v3198_v21 = vmul.u32 %v3194_v26, %v3170_v19  ;;  %v3201_v36 = vshll.u32 %v3197_v28, 16 }
 0x302   : > { %v3186_v39 = vsel %vm3185_vm7, 1, %v9971_v63  ;;  %v3199_v44 = vshll.u32 %v3196_v45, 16  ;;  %v3092_v37 = vsel %vm8205_vm5, 0, %v3090_v52  ;;  %v3283_v41 = vor.u32 8388608, %v8142_v18 }
 0x303   : > { %v3086_v17 = vmul.f32 %v3085_v20, %v3083_v62  ;;  %v3188_v48 = vadd.s32 %v3186_v39, %v3184_v22  ;;  %v3289_v56 = vand.u32 31, %v3287_v29  ;;  %v3213_v24 = vmul.u32 %v8138_v47, %v8224_v58 }
 0x304   : > { %vm3203_vm8 = vc.u32 %v3195_v35, %v3199_v44  ;;  %v3205_v6 = vadd.s32 %v3199_v44, %v3195_v35  ;;  %v3180_v16 = vshrl.u32 %v3175_v25, 16  ;;  %v3200_v33 = vshrl.u32 %v3196_v45, 16 }
 0x305   : > { %v3087_v34 = vxor.u32 2147483648, %v3086_v17  ;;  %v3189_v19 = vadd.s32 %v3188_v48, %v3178_v54  ;;  %v3204_v46 = vsel %vm3203_vm8, 1, %v9971_v63  ;;  %v8238_v0 = vsub.s32 32, %v3289_v56 }
 0x306   : > { %v3206_v61 = vadd.s32 %v3204_v46, %v3198_v21  ;;  %vm3207_vm9 = vc.u32 %v3205_v6, %v3201_v36  ;;  %v3109_v52 = vadd.s32 3, %v3092_v37  ;;  %v3202_v43 = vshrl.u32 %v3197_v28, 16 }
 0x307   : > { %v3088_v14 = vsel %vm2967_vm2, %v3087_v34, %v3086_v17  ;;  %v3208_v47 = vsel %vm3207_vm9, 1, %v9971_v63  ;;  %v8246_v31 = vshrl.u32 %v3287_v29, 5  ;;  %v3292_v7 = vshll.u32 %v9953_v51, %v3289_v56 }
 0x308   : > { %v3091_v18 = vsel %vm8205_vm5, %v7898_v57, %v3088_v14  ;;  %v3210_v58 = vadd.s32 %v3208_v47, %v3206_v61  ;;  %v8249_v27 = vadd.s32 %v3189_v19, %v3180_v16  ;;  %v8251_v20 = vadd.s32 %v3205_v6, %v3201_v36 }
 0x309   : > { %v3093_v25 = vmul.f32 %v3091_v18, %v3091_v18  ;;  %v3293_v23 = vshrl.u32 %v9946_v12, %v8238_v0  ;;  %v3295_v42 = vshll.u32 %v9946_v12, %v3289_v56  ;;  %v3296_v62 = vshrl.u32 %v9947_v2, %v8238_v0 }
 0x30a   : > { %v3211_v28 = vadd.s32 %v3210_v58, %v3200_v33  ;;  %v3298_v29 = vshll.u32 %v9947_v2, %v3289_v56  ;;  %v3299_v40 = vshrl.u32 %v9945_v5, %v8238_v0  ;;  %v3301_v35 = vshll.u32 %v9945_v5, %v3289_v56 }
 0x30b   : > { %v3094_v26 = vmul.f32 -0.001358992, %v3093_v25  ;;  %v3101_v55 = vmul.f32 -0.00019511016, %v3093_v25  ;;  %v3302_v45 = vshrl.u32 %v9955_v8, %v8238_v0  ;;  %v3304_v17 = vshll.u32 %v9955_v8, %v3289_v56 }
 0x30c   : > { %v3212_v21 = vadd.s32 %v3211_v28, %v3202_v43  ;;  %v3110_v39 = vand.u32 3, %v3109_v52  ;;  %vm3215_vm10 = vc.u32 %v8249_v27, %v8251_v20  ;;  %v8267_v44 = vor.u32 %v3293_v23, %v3292_v7 }
 0x30d   : > { %v3095_v54 = vadd.f32 0.041655596, %v3094_v26  ;;  %v3102_v22 = vadd.f32 0.008332121, %v3101_v55  ;;  %v3305_v36 = vshrl.u32 %v9956_v13, %v8238_v0  ;;  %v8271_v6 = vor.u32 %v3296_v62, %v3295_v42 }
 0x30e   : > { %v3216_v34 = vadd.s32 1, %v3212_v21  ;;  %v8273_v16 = vor.u32 %v3299_v40, %v3298_v29  ;;  %v3303_v19 = vor.u32 %v3302_v45, %v3301_v35  ;;  %vm3307_vm11 = vcmp.lt.s32.totalorder %v8246_v31, 1 }
 0x30f   : > { %v3096_v37 = vmul.f32 %v3095_v54, %v3093_v25  ;;  %v3103_v48 = vmul.f32 %v3102_v22, %v3093_v25  ;;  %v3306_v46 = vor.u32 %v3305_v36, %v3304_v17  ;;  %vm3310_vm12 = vcmp.lt.s32.totalorder %v8246_v31, 4 }
 0x310   : > { %v3217_v33 = vsel %vm3215_vm10, %v3216_v34, %v3212_v21  ;;  %vm3108_vm13 = vweird.f32 %v7898_v57  ;;  %vm3309_vm14 = vcmp.lt.s32.totalorder %v8246_v31, 3  ;;  %v8279_v52 = vshll.u32 %v3283_v41, 8 }
 0x311   : > { %v3097_v56 = vadd.f32 -0.4999988, %v3096_v37  ;;  %v3104_v14 = vadd.f32 -0.16666654, %v3103_v48  ;;  %v3218_v61 = vadd.s32 %v3217_v33, %v3213_v24  ;;  %vm3115_vm15 = vcmp.eq.s32.totalorder %v3110_v39, 2 }
 0x312   : > { %vm3308_vm0 = vcmp.lt.s32.totalorder %v8246_v31, 2  ;;  %v3316_v7 = vsel %vm3310_vm12, %v3303_v19, 920167782  ;;  %v3319_v23 = vsel %vm3307_vm11, %v8271_v6, %v8273_v16  ;;  %v3320_v24 = vsel %vm3310_vm12, %v3306_v46, 1326507024 }
 0x313   : > { %v3098_v43 = vmul.f32 %v3097_v56, %v3093_v25  ;;  %v3105_v47 = vmul.f32 %v3104_v14, %v3093_v25  ;;  %v3219_v58 = vadd.s32 536870912, %v3218_v61  ;;  %v3315_v25 = vsel %vm3307_vm11, %v8267_v44, %v8271_v6 }
 0x314   : > { %v3321_v26 = vsel %vm3309_vm14, %v3303_v19, %v3320_v24  ;;  %v3317_v28 = vsel %vm3309_vm14, %v8273_v16, %v3316_v7  ;;  %v3324_v29 = vand.u32 65535, %v8279_v52  ;;  %v3325_v45 = vshrl.u32 %v8279_v52, 16  ;;  %v10016_v7 = vld [vmem:[#allocation8_spill] sm:$0xff] }
 0x315   : > { %v3099_v42 = vadd.f32 1.0, %v3098_v43  ;;  %v3106_v41 = vadd.f32 1.0, %v3105_v47  ;;  %v8296_v55 = vshrl.u32 %v3219_v58, 30  ;;  %v3322_v62 = vsel %vm3308_vm0, %v3319_v23, %v3321_v26 }
 0x316   : > { %v3326_v54 = vand.u32 65535, %v3322_v62  ;;  %vm3111_vm1 = vcmp.lt.s32.totalorder %v3110_v39, 2  ;;  %vm3112_vm2 = vcmp.eq.s32.totalorder %v3110_v39, 0  ;;  %v3327_v21 = vshrl.u32 %v3322_v62, 16 }
 0x317   : > { %v3107_v40 = vmul.f32 %v3106_v41, %v3091_v18  ;;  %v3116_v35 = vxor.u32 2147483648, %v3099_v42  ;;  %v3221_v22 = vshll.u32 %v8296_v55, 30  ;;  %v3318_v37 = vsel %vm3308_vm0, %v3315_v25, %v3317_v28 }
 0x318   : > { %v8309_v48 = vmul.u32 %v3326_v54, %v3325_v45  ;;  %v3328_v19 = vmul.u32 %v3326_v54, %v3324_v29  ;;  %v3329_v18 = vmul.u32 %v3327_v21, %v3324_v29  ;;  %v3348_v46 = vand.u32 65535, %v3318_v37 }
 0x319   : > { %v3113_v17 = vxor.u32 2147483648, %v3107_v40  ;;  %v3117_v36 = vsel %vm3115_vm15, %v3116_v35, %v3107_v40  ;;  %v3222_v34 = vsub.s32 %v3218_v61, %v3221_v22  ;;  %v3331_v14 = vmul.u32 %v3327_v21, %v3325_v45 }
 0x31a   : > { %v3334_v33 = vshll.u32 %v8309_v48, 16  ;;  %v3332_v58 = vshll.u32 %v3329_v18, 16  ;;  %v8314_v39 = vmul.f32 %v10013_v38, %v7880_v32  ;;  %v8318_v23 = vadd.f32 %v8123_v53, %v10016_v7 }
 0x31b   : > { %v3114_v56 = vsel %vm3112_vm2, %v3099_v42, %v3113_v17  ;;  %vm3223_vm3 = vcmp.lt.s32.totalorder %v3222_v34, 0  ;;  %v3224_v47 = vsub.s32 0, %v3222_v34  ;;  %v3349_v24 = vshrl.u32 %v3318_v37, 16 }
 0x31c   : > { %v3118_v43 = vsel %vm3111_vm1, %v3114_v56, %v3117_v36  ;;  %vm3336_vm4 = vc.u32 %v3328_v19, %v3332_v58  ;;  %v3338_v41 = vadd.s32 %v3332_v58, %v3328_v19  ;;  %v3350_v25 = vmul.u32 %v3348_v46, %v3324_v29 }
 0x31d   : > { %v3119_v61 = vsel %vm3108_vm13, nan, %v3118_v43  ;;  %v3225_v42 = vsel %vm3223_vm3, %v3224_v47, %v3222_v34  ;;  %v3337_v28 = vsel %vm3336_vm4, 1, %v9971_v63  ;;  %v3351_v62 = vmul.u32 %v3349_v24, %v3324_v29 }
 0x31e   : > { %5291 = vst [vmem:[%s6231_s15 + $0x88] sm:$0xff] %v3119_v61  ;;  %v3226_v26 = vclz %v3225_v42  ;;  %v3352_v40 = vmul.u32 %v3348_v46, %v3325_v45  ;;  %vm3122_vm5 = vcmp.lt.s32.totalorder %v8067_v49, 0  ;;  %v3291_v38 = vshrl.u32 %v9953_v51, %v8238_v0 }
 0x31f   : > { %v3339_v53 = vadd.s32 %v3337_v28, %v3331_v14  ;;  %vm3340_vm6 = vc.u32 %v3338_v41, %v3334_v33  ;;  %v3353_v54 = vmul.u32 %v3349_v24, %v3325_v45  ;;  %v3354_v22 = vshll.u32 %v3351_v62, 16 }
 0x320   : > { %v5476_v57 = vadd.s32 4294967294, %v3226_v26  ;;  %v3341_v35 = vsel %vm3340_vm6, 1, %v9971_v63  ;;  %vm8330_vm7 = vcmp.le.f32.partialorder %v3120_v50, 0.7853982  ;;  %v3214_v29 = vadd.s32 %v8251_v20, %v8249_v27 }
 0x321   : > { %v3312_v0 = vsel %vm3310_vm12, %v8273_v16, 2102212464  ;;  %v3333_v17 = vshrl.u32 %v3329_v18, 16  ;;  %v3343_v36 = vadd.s32 %v3341_v35, %v3339_v53  ;;  %v3356_v37 = vshll.u32 %v3352_v40, 16 }
 0x322   : > { %vm5477_vm8 = vcmp.lt.s32.totalorder %v5476_v57, 0  ;;  %vm3358_vm9 = vc.u32 %v3350_v25, %v3354_v22  ;;  %v3360_v45 = vadd.s32 %v3354_v22, %v3350_v25  ;;  %v3244_v46 = vsub.s32 4, %v8296_v55 }
 0x323   : > { %v3229_v19 = vsel %vm5477_vm8, 0, %v5476_v57  ;;  %v3359_v50 = vsel %vm3358_vm9, 1, %v9971_v63  ;;  %v3433_v56 = vand.u32 2139095040, %v8318_v23  ;;  %v3311_v16 = vsel %vm3307_vm11, %v3291_v38, %v8267_v44 }
 0x324   : > { %v3230_v14 = vsub.s32 32, %v3229_v19  ;;  %v3231_v33 = vshll.u32 %v3222_v34, %v3229_v19  ;;  %v3234_v27 = vsub.s32 4294967266, %v3229_v19  ;;  %v3361_v20 = vadd.s32 %v3359_v50, %v3353_v54 }
 0x325   : > { %v3313_v18 = vsel %vm3309_vm14, %v8271_v6, %v3312_v0  ;;  %v3335_v43 = vshrl.u32 %v8309_v48, 16  ;;  %v3344_v47 = vadd.s32 %v3343_v36, %v3333_v17  ;;  %v3355_v24 = vshrl.u32 %v3351_v62, 16 }
 0x326   : > { %v3232_v58 = vshrl.u32 %v3214_v29, %v3230_v14  ;;  %v3235_v61 = vadd.s32 127, %v3234_v27  ;;  %vm3362_vm10 = vc.u32 %v3360_v45, %v3356_v37  ;;  %v3245_v34 = vsel %vm3122_vm5, %v3244_v46, %v8296_v55 }
 0x327   : > { %v3363_v42 = vsel %vm3362_vm10, 1, %v9971_v63  ;;  %v3430_v41 = vand.u32 2147483647, %v8318_v23  ;;  %v3434_v44 = vshrl.u32 %v3433_v56, 23  ;;  %v3357_v28 = vshrl.u32 %v3352_v40, 16 }
 0x328   : > { %v3233_v25 = vor.u32 %v3232_v58, %v3231_v33  ;;  %v3236_v26 = vshll.u32 %v3235_v61, 23  ;;  %v3365_v6 = vadd.s32 %v3363_v42, %v3361_v20  ;;  %v3314_v48 = vsel %vm3308_vm0, %v3311_v16, %v3313_v18 }
 0x329   : > { %v3345_v38 = vadd.s32 %v3344_v47, %v3335_v43  ;;  %v3364_v53 = vadd.s32 %v3360_v45, %v3356_v37  ;;  %v5481_v62 = vadd.s32 4294967169, %v3434_v44  ;;  %v3247_v55 = vsel %vm8330_vm7, 0, %v3245_v34 }
 0x32a   : > { %v3237_v57 = vor.u32 4788187, %v3236_v26  ;;  %v3240_v35 = vcvt.s32.f32 %v3233_v25  ;;  %v3366_v54 = vadd.s32 %v3365_v6, %v3355_v24  ;;  %v8360_v29 = vadd.f32 %v8314_v39, %v10016_v7 }
 0x32b   : > { %v3440_v22 = vadd.s32 1, %v5481_v62  ;;  %v3264_v17 = vadd.s32 3, %v3247_v55  ;;  %v3368_v31 = vmul.u32 %v8279_v52, %v3314_v48  ;;  %vm3370_vm11 = vc.u32 %v3345_v38, %v3364_v53 }
 0x32c   : > { %v3238_v0 = vand.u32 2147483647, %v3237_v57  ;;  %v3367_v40 = vadd.s32 %v3366_v54, %v3357_v28  ;;  %v3437_v45 = vand.u32 8388607, %v3430_v41  ;;  %v3585_v50 = vand.u32 2147483647, %v8360_v29 }
 0x32d   : > { %vm3441_vm12 = vcmp.gt.s32.totalorder %v3440_v22, 0  ;;  %v8366_v39 = vand.u32 3, %v3264_v17  ;;  %v8372_v27 = vadd.s32 %v3364_v53, %v3345_v38  ;;  %v3588_v16 = vand.u32 2139095040, %v8360_v29 }
 0x32e   : > { %v3241_v36 = vmul.f32 %v3240_v35, %v3238_v0  ;;  %v3371_v37 = vadd.s32 1, %v3367_v40  ;;  %v3442_v19 = vsel %vm3441_vm12, %v3440_v22, 0  ;;  %v3438_v20 = vor.u32 8388608, %v3437_v45 }
 0x32f   : > { %v3444_v46 = vand.u32 31, %v3442_v19  ;;  %v8380_v47 = vshrl.u32 %v3442_v19, 5  ;;  %v8384_v58 = vand.u32 8388607, %v3585_v50  ;;  %v3589_v22 = vshrl.u32 %v3588_v16, 23 }
 0x330   : > { %v3242_v56 = vxor.u32 2147483648, %v3241_v36  ;;  %v3372_v14 = vsel %vm3370_vm11, %v3371_v37, %v3367_v40  ;;  %v8403_v35 = vshll.u32 %v3438_v20, 8  ;;  %vm3270_vm13 = vcmp.eq.s32.totalorder %v8366_v39, 2 }
 0x331   : > { %v3373_v7 = vadd.s32 %v3372_v14, %v3368_v31  ;;  %v8368_v33 = vsub.s32 32, %v3444_v46  ;;  %v3447_v24 = vshll.u32 %v9953_v51, %v3444_v46  ;;  %v3450_v34 = vshll.u32 %v9946_v12, %v3444_v46 }
 0x332   : > { %v3243_v52 = vsel %vm3122_vm5, %v3242_v56, %v3241_v36  ;;  %v3456_v42 = vshll.u32 %v9945_v5, %v3444_v46  ;;  %v3453_v48 = vshll.u32 %v9947_v2, %v3444_v46  ;;  %v3459_v62 = vshll.u32 %v9955_v8, %v3444_v46 }
 0x333   : > { %v8378_v18 = vsel %vm8330_vm7, %v8067_v49, %v3243_v52  ;;  %v3374_v43 = vadd.s32 536870912, %v3373_v7  ;;  %v3448_v21 = vshrl.u32 %v9946_v12, %v8368_v33  ;;  %v3451_v25 = vshrl.u32 %v9947_v2, %v8368_v33 }
 0x334   : > { %v3248_v61 = vmul.f32 %v8378_v18, %v8378_v18  ;;  %v3457_v26 = vshrl.u32 %v9955_v8, %v8368_v33  ;;  %v3454_v38 = vshrl.u32 %v9945_v5, %v8368_v33  ;;  %v3460_v57 = vshrl.u32 %v9956_v13, %v8368_v33 }
 0x335   : > { %v3375_v44 = vshrl.u32 %v3374_v43, 30  ;;  %v3593_v0 = vor.u32 8388608, %v8384_v58  ;;  %vm3277_vm14 = vcmp.lt.s32.totalorder %v8077_v60, 0  ;;  %v3449_v17 = vor.u32 %v3448_v21, %v3447_v24 }
 0x336   : > { %v3249_v28 = vmul.f32 -0.001358992, %v3248_v61  ;;  %v3256_v6 = vmul.f32 -0.00019511016, %v3248_v61  ;;  %v8410_v31 = vor.u32 %v3451_v25, %v3450_v34  ;;  %v3458_v36 = vor.u32 %v3457_v26, %v3456_v42 }
 0x337   : > { %v3376_v53 = vshll.u32 %v3375_v44, 30  ;;  %v8412_v19 = vor.u32 %v3454_v38, %v3453_v48  ;;  %vm3465_vm15 = vcmp.lt.s32.totalorder %v8380_v47, 4  ;;  %vm3267_vm0 = vcmp.eq.s32.totalorder %v8366_v39, 0 }
 0x338   : > { %v3250_v55 = vadd.f32 0.041655596, %v3249_v28  ;;  %v3257_v54 = vadd.f32 0.008332121, %v3256_v6  ;;  %v3461_v56 = vor.u32 %v3460_v57, %v3459_v62  ;;  %vm3462_vm2 = vcmp.lt.s32.totalorder %v8380_v47, 1 }
 0x339   : > { %v8408_v40 = vsub.s32 %v3373_v7, %v3376_v53  ;;  %vm3266_vm3 = vcmp.lt.s32.totalorder %v8366_v39, 2  ;;  %vm3464_vm4 = vcmp.lt.s32.totalorder %v8380_v47, 3  ;;  %v5484_v52 = vadd.s32 4294967169, %v3589_v22 }
 0x33a   : > { %v3251_v37 = vmul.f32 %v3250_v55, %v3248_v61  ;;  %v3258_v45 = vmul.f32 %v3257_v54, %v3248_v61  ;;  %vm3263_vm5 = vweird.f32 %v8067_v49  ;;  %v3399_v16 = vsub.s32 4, %v3375_v44 }
 0x33b   : > { %vm3378_vm1 = vcmp.lt.s32.totalorder %v8408_v40, 0  ;;  %v3379_v46 = vsub.s32 0, %v8408_v40  ;;  %vm3463_vm6 = vcmp.lt.s32.totalorder %v8380_v47, 2  ;;  %v3471_v43 = vsel %vm3465_vm15, %v3458_v36, 920167782 }
 0x33c   : > { %v3252_v14 = vadd.f32 -0.4999988, %v3251_v37  ;;  %v3259_v7 = vadd.f32 -0.16666654, %v3258_v45  ;;  %v3474_v21 = vsel %vm3462_vm2, %v8410_v31, %v8412_v19  ;;  %v3470_v25 = vsel %vm3462_vm2, %v3449_v17, %v8410_v31 }
 0x33d   : > { %v3380_v20 = vsel %vm3378_vm1, %v3379_v46, %v8408_v40  ;;  %v3472_v26 = vsel %vm3464_vm4, %v8412_v19, %v3471_v43  ;;  %v3475_v28 = vsel %vm3465_vm15, %v3461_v56, 1326507024  ;;  %v3479_v6 = vand.u32 65535, %v8403_v35 }
 0x33e   : > { %v3253_v24 = vmul.f32 %v3252_v14, %v3248_v61  ;;  %v3260_v34 = vmul.f32 %v3259_v7, %v3248_v61  ;;  %v3381_v42 = vclz %v3380_v20  ;;  %v3476_v53 = vsel %vm3464_vm4, %v3458_v36, %v3475_v28 }
 0x33f   : > { %v3446_v62 = vshrl.u32 %v9953_v51, %v8368_v33  ;;  %v3477_v57 = vsel %vm3463_vm6, %v3474_v21, %v3476_v53  ;;  %v3480_v55 = vshrl.u32 %v8403_v35, 16  ;;  %v3595_v54 = vadd.s32 1, %v5484_v52 }
 0x340   : > { %v3254_v61 = vadd.f32 1.0, %v3253_v24  ;;  %v3261_v48 = vadd.f32 1.0, %v3260_v34  ;;  %v5479_v38 = vadd.s32 4294967294, %v3381_v42  ;;  %v8449_v45 = vsel %vm3277_vm14, %v3399_v16, %v3375_v44 }
 0x341   : > { %v3473_v36 = vsel %vm3463_vm6, %v3470_v25, %v3472_v26  ;;  %v3481_v56 = vand.u32 65535, %v3477_v57  ;;  %v3482_v33 = vshrl.u32 %v3477_v57, 16  ;;  %vm8458_vm8 = vcmp.le.f32.partialorder %v3275_v3, 0.7853982 }
 0x342   : > { %v3262_v22 = vmul.f32 %v3261_v48, %v8378_v18  ;;  %v3271_v37 = vxor.u32 2147483648, %v3254_v61  ;;  %vm5480_vm7 = vcmp.lt.s32.totalorder %v5479_v38, 0  ;;  %v3503_v43 = vand.u32 65535, %v3473_v36 }
 0x343   : > { %v3384_v46 = vsel %vm5480_vm7, 0, %v5479_v38  ;;  %v3484_v16 = vmul.u32 %v3482_v33, %v3479_v6  ;;  %vm3596_vm9 = vcmp.gt.s32.totalorder %v3595_v54, 0  ;;  %v3483_v42 = vmul.u32 %v3481_v56, %v3479_v6 }
 0x344   : > { %v3268_v14 = vxor.u32 2147483648, %v3262_v22  ;;  %v3272_v7 = vsel %vm3270_vm13, %v3271_v37, %v3262_v22  ;;  %v3385_v20 = vsub.s32 32, %v3384_v46  ;;  %v3386_v52 = vshll.u32 %v8408_v40, %v3384_v46 }
 0x345   : > { %v3389_v44 = vsub.s32 4294967266, %v3384_v46  ;;  %v3485_v21 = vmul.u32 %v3481_v56, %v3480_v55  ;;  %v3466_v3 = vsel %vm3462_vm2, %v3446_v62, %v3449_v17  ;;  %v3504_v26 = vshrl.u32 %v3473_v36, 16 }
 0x346   : > { %v3269_v24 = vsel %vm3267_vm0, %v3254_v61, %v3268_v14  ;;  %v3387_v34 = vshrl.u32 %v8372_v27, %v3385_v20  ;;  %v3486_v38 = vmul.u32 %v3482_v33, %v3480_v55  ;;  %v3487_v53 = vshll.u32 %v3484_v16, 16 }
 0x347   : > { %v3273_v40 = vsel %vm3266_vm3, %v3269_v24, %v3272_v7  ;;  %v3390_v25 = vadd.s32 127, %v3389_v44  ;;  %v3467_v27 = vsel %vm3465_vm15, %v8412_v19, 2102212464  ;;  %v3489_v57 = vshll.u32 %v3485_v21, 16 }
 0x348   : > { %v3274_v28 = vsel %vm3263_vm5, nan, %v3273_v40  ;;  %v3388_v48 = vor.u32 %v3387_v34, %v3386_v52  ;;  %v3597_v39 = vsel %vm3596_vm9, %v3595_v54, 0  ;;  %vm3491_vm10 = vc.u32 %v3483_v42, %v3487_v53 }
 0x349   : > { %v3391_v61 = vshll.u32 %v3390_v25, 23  ;;  %5292 = vst [vmem:[%s6231_s15 + $0x90] sm:$0xff] %v3274_v28  ;;  %v3493_v37 = vadd.s32 %v3487_v53, %v3483_v42  ;;  %v3505_v17 = vmul.u32 %v3503_v43, %v3479_v6  ;;  %v3492_v49 = vsel %vm3491_vm10, 1, %v9971_v63 }
 0x34a   : > { %v3395_v22 = vcvt.s32.f32 %v3388_v48  ;;  %v3506_v46 = vmul.u32 %v3504_v26, %v3479_v6  ;;  %v3507_v36 = vmul.u32 %v3503_v43, %v3480_v55  ;;  %v3468_v56 = vsel %vm3464_vm4, %v8410_v31, %v3467_v27 }
 0x34b   : > { %v3392_v62 = vor.u32 4788187, %v3391_v61  ;;  %v3488_v33 = vshrl.u32 %v3484_v16, 16  ;;  %v3494_v14 = vadd.s32 %v3492_v49, %v3486_v38  ;;  %vm3495_vm11 = vc.u32 %v3493_v37, %v3489_v57 }
 0x34c   : > { %v3496_v54 = vsel %vm3495_vm11, 1, %v9971_v63  ;;  %v3508_v7 = vmul.u32 %v3504_v26, %v3480_v55  ;;  %v3509_v20 = vshll.u32 %v3506_v46, 16  ;;  %v3402_v52 = vsel %vm8458_vm8, 0, %v8449_v45 }
 0x34d   : > { %v3393_v19 = vand.u32 2147483647, %v3392_v62  ;;  %v3498_v44 = vadd.s32 %v3496_v54, %v3494_v14  ;;  %v3511_v24 = vshll.u32 %v3507_v36, 16  ;;  %v3599_v6 = vand.u32 31, %v3597_v39 }
 0x34e   : > { %v3469_v34 = vsel %vm3463_vm6, %v3466_v3, %v3468_v56  ;;  %vm3513_vm12 = vc.u32 %v3505_v17, %v3509_v20  ;;  %v3515_v31 = vadd.s32 %v3509_v20, %v3505_v17  ;;  %v3490_v16 = vshrl.u32 %v3485_v21, 16 }
 0x34f   : > { %v3396_v43 = vmul.f32 %v3395_v22, %v3393_v19  ;;  %v3499_v42 = vadd.s32 %v3498_v44, %v3488_v33  ;;  %v3514_v40 = vsel %vm3513_vm12, 1, %v9971_v63  ;;  %v8487_v25 = vsub.s32 32, %v3599_v6 }
 0x350   : > { %v3510_v26 = vshrl.u32 %v3506_v46, 16  ;;  %v3516_v28 = vadd.s32 %v3514_v40, %v3508_v7  ;;  %vm3517_vm13 = vc.u32 %v3515_v31, %v3511_v24  ;;  %v3512_v45 = vshrl.u32 %v3507_v36, 16 }
 0x351   : > { %v3397_v55 = vxor.u32 2147483648, %v3396_v43  ;;  %v3518_v48 = vsel %vm3517_vm13, 1, %v9971_v63  ;;  %v3523_v38 = vmul.u32 %v8403_v35, %v3469_v34  ;;  %v8491_v53 = vshrl.u32 %v3597_v39, 5 }
 0x352   : > { %v8495_v21 = vadd.s32 %v3515_v31, %v3511_v24  ;;  %v3520_v3 = vadd.s32 %v3518_v48, %v3516_v28  ;;  %v3602_v61 = vshll.u32 %v9953_v51, %v3599_v6  ;;  %v8501_v57 = vadd.s32 %v3499_v42, %v3490_v16 }
 0x353   : > { %v3398_v47 = vsel %vm3277_vm14, %v3397_v55, %v3396_v43  ;;  %v3605_v22 = vshll.u32 %v9946_v12, %v3599_v6  ;;  %v3606_v35 = vshrl.u32 %v9947_v2, %v8487_v25  ;;  %v3603_v17 = vshrl.u32 %v9946_v12, %v8487_v25 }
 0x354   : > { %v3401_v27 = vsel %vm8458_vm8, %v8077_v60, %v3398_v47  ;;  %v3521_v37 = vadd.s32 %v3520_v3, %v3510_v26  ;;  %v3608_v62 = vshll.u32 %v9947_v2, %v3599_v6  ;;  %v3609_v49 = vshrl.u32 %v9945_v5, %v8487_v25 }
 0x355   : > { %v3403_v39 = vmul.f32 %v3401_v27, %v3401_v27  ;;  %v3611_v18 = vshll.u32 %v9945_v5, %v3599_v6  ;;  %v3612_v46 = vshrl.u32 %v9955_v8, %v8487_v25  ;;  %v3614_v36 = vshll.u32 %v9955_v8, %v3599_v6 }
 0x356   : > { %v3522_v14 = vadd.s32 %v3521_v37, %v3512_v45  ;;  %v3615_v19 = vshrl.u32 %v9956_v13, %v8487_v25  ;;  %v3419_v54 = vadd.s32 3, %v3402_v52  ;;  %vm3525_vm14 = vc.u32 %v8501_v57, %v8495_v21 }
 0x357   : > { %v3404_v56 = vmul.f32 -0.001358992, %v3403_v39  ;;  %v3411_v33 = vmul.f32 -0.00019511016, %v3403_v39  ;;  %v8519_v7 = vor.u32 %v3606_v35, %v3605_v22  ;;  %v3613_v20 = vor.u32 %v3612_v46, %v3611_v18 }
 0x358   : > { %v3526_v43 = vadd.s32 1, %v3522_v14  ;;  %v8521_v34 = vor.u32 %v3609_v49, %v3608_v62  ;;  %v8523_v31 = vor.u32 %v3603_v17, %v3602_v61  ;;  %v3616_v6 = vor.u32 %v3615_v19, %v3614_v36 }
 0x359   : > { %v3405_v44 = vadd.f32 0.041655596, %v3404_v56  ;;  %v3412_v24 = vadd.f32 0.008332121, %v3411_v33  ;;  %vm3617_vm15 = vcmp.lt.s32.totalorder %v8491_v53, 1  ;;  %vm3620_vm0 = vcmp.lt.s32.totalorder %v8491_v53, 4 }
 0x35a   : > { %v3527_v42 = vsel %vm3525_vm14, %v3526_v43, %v3522_v14  ;;  %v3420_v40 = vand.u32 3, %v3419_v54  ;;  %vm3619_vm1 = vcmp.lt.s32.totalorder %v8491_v53, 3  ;;  %v3626_v26 = vsel %vm3620_vm0, %v3613_v20, 920167782 }
 0x35b   : > { %v3406_v16 = vmul.f32 %v3405_v44, %v3403_v39  ;;  %v3413_v52 = vmul.f32 %v3412_v24, %v3403_v39  ;;  %v3528_v55 = vadd.s32 %v3527_v42, %v3523_v38  ;;  %vm3618_vm2 = vcmp.lt.s32.totalorder %v8491_v53, 2 }
 0x35c   : > { %v3629_v48 = vsel %vm3617_vm15, %v8519_v7, %v8521_v34  ;;  %vm3418_vm3 = vweird.f32 %v8077_v60  ;;  %v3625_v38 = vsel %vm3617_vm15, %v8523_v31, %v8519_v7  ;;  %v3630_v3 = vsel %vm3620_vm0, %v3616_v6, 1326507024 }
 0x35d   : > { %v3407_v28 = vadd.f32 -0.4999988, %v3406_v16  ;;  %v3414_v45 = vadd.f32 -0.16666654, %v3413_v52  ;;  %v3529_v47 = vadd.s32 536870912, %v3528_v55  ;;  %v8544_v61 = vshll.u32 %v3593_v0, 8 }
 0x35e   : > { %v3627_v37 = vsel %vm3619_vm1, %v8521_v34, %v3626_v26  ;;  %v3631_v17 = vsel %vm3619_vm1, %v3613_v20, %v3630_v3  ;;  %vm3421_vm4 = vcmp.lt.s32.totalorder %v3420_v40, 2  ;;  %vm3425_vm5 = vcmp.eq.s32.totalorder %v3420_v40, 2 }
 0x35f   : > { %v3408_v22 = vmul.f32 %v3407_v28, %v3403_v39  ;;  %v3415_v35 = vmul.f32 %v3414_v45, %v3403_v39  ;;  %v8551_v62 = vshrl.u32 %v3529_v47, 30  ;;  %v3632_v49 = vsel %vm3618_vm2, %v3629_v48, %v3631_v17  ;;  %v10021_v48 = vld [vmem:[#allocation10_spill] sm:$0xff] }
 0x360   : > { %v3634_v18 = vand.u32 65535, %v8544_v61  ;;  %v3635_v58 = vshrl.u32 %v8544_v61, 16  ;;  %v3636_v36 = vand.u32 65535, %v3632_v49  ;;  %v3637_v39 = vshrl.u32 %v3632_v49, 16 }
 0x361   : > { %v3409_v0 = vadd.f32 1.0, %v3408_v22  ;;  %v3416_v46 = vadd.f32 1.0, %v3415_v35  ;;  %v3531_v56 = vshll.u32 %v8551_v62, 30  ;;  %v3628_v33 = vsel %vm3618_vm2, %v3625_v38, %v3627_v37 }
 0x362   : > { %v3638_v54 = vmul.u32 %v3636_v36, %v3634_v18  ;;  %v3639_v20 = vmul.u32 %v3637_v39, %v3634_v18  ;;  %vm3422_vm6 = vcmp.eq.s32.totalorder %v3420_v40, 0  ;;  %v8560_v24 = vmul.u32 %v3636_v36, %v3635_v58 }
 0x363   : > { %v3417_v14 = vmul.f32 %v3416_v46, %v3401_v27  ;;  %v3426_v19 = vxor.u32 2147483648, %v3409_v0  ;;  %v3532_v44 = vsub.s32 %v3528_v55, %v3531_v56  ;;  %v3658_v43 = vand.u32 65535, %v3628_v33  ;;  %v10022_v56 = vld [vmem:[#allocation11_spill] sm:$0xff] }
 0x364   : > { %v3641_v52 = vmul.u32 %v3637_v39, %v3635_v58  ;;  %v3642_v42 = vshll.u32 %v3639_v20, 16  ;;  %v3644_v28 = vshll.u32 %v8560_v24, 16  ;;  %v3659_v45 = vshrl.u32 %v3628_v33, 16 }
 0x365   : > { %v3423_v6 = vxor.u32 2147483648, %v3417_v14  ;;  %v3427_v16 = vsel %vm3425_vm5, %v3426_v19, %v3417_v14  ;;  %vm3533_vm7 = vcmp.lt.s32.totalorder %v3532_v44, 0  ;;  %v3534_v26 = vsub.s32 0, %v3532_v44 }
 0x366   : > { %v2784_v27 = vmul.f32 %v10021_v48, %v7877_v15  ;;  %vm3646_vm8 = vc.u32 %v3638_v54, %v3642_v42  ;;  %v3648_v38 = vadd.s32 %v3642_v42, %v3638_v54  ;;  %v3601_v22 = vshrl.u32 %v9953_v51, %v8487_v25 }
 0x367   : > { %v3424_v47 = vsel %vm3422_vm6, %v3409_v0, %v3423_v6  ;;  %v3535_v3 = vsel %vm3533_vm7, %v3534_v26, %v3532_v44  ;;  %v3647_v35 = vsel %vm3646_vm8, 1, %v9971_v63  ;;  %v3660_v36 = vmul.u32 %v3658_v43, %v3634_v18 }
 0x368   : > { %v3428_v55 = vsel %vm3421_vm4, %v3424_v47, %v3427_v16  ;;  %v3536_v17 = vclz %v3535_v3  ;;  %v3649_v49 = vadd.s32 %v3647_v35, %v3641_v52  ;;  %vm3650_vm9 = vc.u32 %v3648_v38, %v3644_v28 }
 0x369   : > { %v3429_v37 = vsel %vm3418_vm3, nan, %v3428_v55  ;;  %v3651_v46 = vsel %vm3650_vm9, 1, %v9971_v63  ;;  %v3661_v0 = vmul.u32 %v3659_v45, %v3634_v18  ;;  %v3662_v39 = vmul.u32 %v3658_v43, %v3635_v58 }
 0x36a   : > { %5293 = vst [vmem:[%s6231_s15 + $0x98] sm:$0xff] %v3429_v37  ;;  %v2785_v40 = vmul.f32 %v10021_v48, %v7880_v32  ;;  %v8576_v33 = vadd.f32 %v2784_v27, %v10022_v56  ;;  %vm3432_vm10 = vcmp.lt.s32.totalorder %v8318_v23, 0  ;;  %v5482_v25 = vadd.s32 4294967294, %v3536_v17 }
 0x36b   : > { %v3524_v60 = vadd.s32 %v8495_v21, %v8501_v57  ;;  %v3643_v14 = vshrl.u32 %v3639_v20, 16  ;;  %v3653_v19 = vadd.s32 %v3651_v46, %v3649_v49  ;;  %v3664_v54 = vshll.u32 %v3661_v0, 16 }
 0x36c   : > { %vm5483_vm11 = vcmp.lt.s32.totalorder %v5482_v25, 0  ;;  %v3621_v18 = vsel %vm3617_vm15, %v3601_v22, %v8523_v31  ;;  %v3663_v43 = vmul.u32 %v3659_v45, %v3635_v58  ;;  %v3666_v6 = vshll.u32 %v3662_v39, 16 }
 0x36d   : > { %v3539_v16 = vsel %vm5483_vm11, 0, %v5482_v25  ;;  %v3554_v52 = vsub.s32 4, %v8551_v62  ;;  %vm3668_vm12 = vc.u32 %v3660_v36, %v3664_v54  ;;  %v3670_v42 = vadd.s32 %v3664_v54, %v3660_v36 }
 0x36e   : > { %v3540_v26 = vsub.s32 32, %v3539_v16  ;;  %v3541_v28 = vshll.u32 %v3532_v44, %v3539_v16  ;;  %v3544_v48 = vsub.s32 4294967266, %v3539_v16  ;;  %v3622_v21 = vsel %vm3620_vm0, %v8521_v34, 2102212464 }
 0x36f   : > { %v3645_v57 = vshrl.u32 %v8560_v24, 16  ;;  %v3654_v20 = vadd.s32 %v3653_v19, %v3643_v14  ;;  %v3665_v27 = vshrl.u32 %v3661_v0, 16  ;;  %v3669_v31 = vsel %vm3668_vm12, 1, %v9971_v63 }
 0x370   : > { %v3542_v58 = vshrl.u32 %v3524_v60, %v3540_v26  ;;  %v3545_v45 = vadd.s32 127, %v3544_v48  ;;  %v3671_v47 = vadd.s32 %v3669_v31, %v3663_v43  ;;  %vm3672_vm13 = vc.u32 %v3670_v42, %v3666_v6 }
 0x371   : > { %v3555_v38 = vsel %vm3432_vm10, %v3554_v52, %v8551_v62  ;;  %v3623_v44 = vsel %vm3619_vm1, %v8519_v7, %v3622_v21  ;;  %v3673_v34 = vsel %vm3672_vm13, 1, %v9971_v63  ;;  %v3743_v24 = vand.u32 2139095040, %v8576_v33 }
 0x372   : > { %v3543_v55 = vor.u32 %v3542_v58, %v3541_v28  ;;  %v3546_v3 = vshll.u32 %v3545_v45, 23  ;;  %v3667_v22 = vshrl.u32 %v3662_v39, 16  ;;  %v3675_v35 = vadd.s32 %v3673_v34, %v3671_v47 }
 0x373   : > { %v3655_v37 = vadd.s32 %v3654_v20, %v3645_v57  ;;  %v3674_v17 = vadd.s32 %v3670_v42, %v3666_v6  ;;  %v3740_v49 = vand.u32 2147483647, %v8576_v33  ;;  %v3744_v46 = vshrl.u32 %v3743_v24, 23 }
 0x374   : > { %v3547_v36 = vor.u32 4788187, %v3546_v3  ;;  %v3550_v0 = vcvt.s32.f32 %v3543_v55  ;;  %v3624_v62 = vsel %vm3618_vm2, %v3621_v18, %v3623_v44  ;;  %v3676_v25 = vadd.s32 %v3675_v35, %v3665_v27 }
 0x375   : > { %vm8603_vm14 = vcmp.le.f32.partialorder %v3430_v41, 0.7853982  ;;  %v5487_v60 = vadd.s32 4294967169, %v3744_v46  ;;  %v8608_v39 = vadd.f32 %v2785_v40, %v10022_v56  ;;  %v3678_v43 = vmul.u32 %v8544_v61, %v3624_v62 }
 0x376   : > { %v3548_v14 = vand.u32 2147483647, %v3547_v36  ;;  %v3557_v19 = vsel %vm8603_vm14, 0, %v3555_v38  ;;  %v3677_v54 = vadd.s32 %v3676_v25, %v3667_v22  ;;  %vm3680_vm15 = vc.u32 %v3655_v37, %v3674_v17 }
 0x377   : > { %v3747_v53 = vand.u32 8388607, %v3740_v49  ;;  %v3750_v18 = vadd.s32 1, %v5487_v60  ;;  %v3574_v52 = vadd.s32 3, %v3557_v19  ;;  %v3898_v48 = vand.u32 2139095040, %v8608_v39 }
 0x378   : > { %v3551_v41 = vmul.f32 %v3550_v0, %v3548_v14  ;;  %v3681_v6 = vadd.s32 1, %v3677_v54  ;;  %v8618_v61 = vmul.f32 %v6668_v9, %v7877_v15  ;;  %v8624_v57 = vmul.f32 %v6668_v9, %v7880_v32 }
 0x379   : > { %vm3751_vm0 = vcmp.gt.s32.totalorder %v3750_v18, 0  ;;  %v3748_v26 = vor.u32 8388608, %v3747_v53  ;;  %v8633_v45 = vand.u32 3, %v3574_v52  ;;  %v8635_v47 = vadd.s32 %v3674_v17, %v3655_v37 }
 0x37a   : > { %v3552_v16 = vxor.u32 2147483648, %v3551_v41  ;;  %v3682_v42 = vsel %vm3680_vm15, %v3681_v6, %v3677_v54  ;;  %v3752_v40 = vsel %vm3751_vm0, %v3750_v18, 0  ;;  %v3895_v38 = vand.u32 2147483647, %v8608_v39 }
 0x37b   : > { %v3683_v56 = vadd.s32 %v3682_v42, %v3678_v43  ;;  %v3754_v28 = vand.u32 31, %v3752_v40  ;;  %v8641_v34 = vshll.u32 %v3748_v26, 8  ;;  %v3899_v24 = vshrl.u32 %v3898_v48, 23 }
 0x37c   : > { %v3553_v21 = vsel %vm3432_vm10, %v3552_v16, %v3551_v41  ;;  %vm3580_vm1 = vcmp.eq.s32.totalorder %v8633_v45, 2  ;;  %v8654_v14 = vshrl.u32 %v3752_v40, 5  ;;  %v8660_v41 = vand.u32 8388607, %v3895_v38 }
 0x37d   : > { %v8629_v20 = vsel %vm8603_vm14, %v8318_v23, %v3553_v21  ;;  %v3684_v27 = vadd.s32 536870912, %v3683_v56  ;;  %v3755_v31 = vsub.s32 32, %v3754_v28  ;;  %v3757_v9 = vshll.u32 %v9953_v51, %v3754_v28 }
 0x37e   : > { %v3558_v58 = vmul.f32 %v8629_v20, %v8629_v20  ;;  %v3760_v22 = vshll.u32 %v9946_v12, %v3754_v28  ;;  %v3763_v35 = vshll.u32 %v9947_v2, %v3754_v28  ;;  %v3766_v17 = vshll.u32 %v9945_v5, %v3754_v28 }
 0x37f   : > { %v8638_v44 = vshrl.u32 %v3684_v27, 30  ;;  %v3758_v37 = vshrl.u32 %v9946_v12, %v3755_v31  ;;  %v3767_v36 = vshrl.u32 %v9955_v8, %v3755_v31  ;;  %v3761_v25 = vshrl.u32 %v9947_v2, %v3755_v31 }
 0x380   : > { %v3559_v55 = vmul.f32 -0.001358992, %v3558_v58  ;;  %v3566_v3 = vmul.f32 -0.00019511016, %v3558_v58  ;;  %v3764_v7 = vshrl.u32 %v9945_v5, %v3755_v31  ;;  %v3769_v19 = vshll.u32 %v9955_v8, %v3754_v28 }
 0x381   : > { %v3686_v46 = vshll.u32 %v8638_v44, 30  ;;  %v3770_v54 = vshrl.u32 %v9956_v13, %v3755_v31  ;;  %v5490_v18 = vadd.s32 4294967169, %v3899_v24  ;;  %vm3577_vm2 = vcmp.eq.s32.totalorder %v8633_v45, 0 }
 0x382   : > { %v3560_v0 = vadd.f32 0.041655596, %v3559_v55  ;;  %v3567_v62 = vadd.f32 0.008332121, %v3566_v3  ;;  %v3759_v16 = vor.u32 %v3758_v37, %v3757_v9  ;;  %v3768_v52 = vor.u32 %v3767_v36, %v3766_v17 }
 0x383   : > { %v8652_v60 = vsub.s32 %v3683_v56, %v3686_v46  ;;  %vm3576_vm4 = vcmp.lt.s32.totalorder %v8633_v45, 2  ;;  %v3762_v56 = vor.u32 %v3761_v25, %v3760_v22  ;;  %v3765_v26 = vor.u32 %v3764_v7, %v3763_v35 }
 0x384   : > { %v3561_v43 = vmul.f32 %v3560_v0, %v3558_v58  ;;  %v3568_v53 = vmul.f32 %v3567_v62, %v3558_v58  ;;  %vm3573_vm5 = vweird.f32 %v8318_v23  ;;  %v3771_v48 = vor.u32 %v3770_v54, %v3769_v19 }
 0x385   : > { %vm3688_vm3 = vcmp.lt.s32.totalorder %v8652_v60, 0  ;;  %v3689_v6 = vsub.s32 0, %v8652_v60  ;;  %vm3772_vm6 = vcmp.lt.s32.totalorder %v8654_v14, 1  ;;  %vm3775_vm7 = vcmp.lt.s32.totalorder %v8654_v14, 4 }
 0x386   : > { %v3562_v42 = vadd.f32 -0.4999988, %v3561_v43  ;;  %v3569_v40 = vadd.f32 -0.16666654, %v3568_v53  ;;  %vm3587_vm8 = vcmp.lt.s32.totalorder %v8360_v29, 0  ;;  %vm3774_vm9 = vcmp.lt.s32.totalorder %v8654_v14, 3 }
 0x387   : > { %v3690_v28 = vsel %vm3688_vm3, %v3689_v6, %v8652_v60  ;;  %vm3773_vm10 = vcmp.lt.s32.totalorder %v8654_v14, 2  ;;  %v3781_v24 = vsel %vm3775_vm7, %v3768_v52, 920167782  ;;  %v3789_v55 = vand.u32 65535, %v8641_v34 }
 0x388   : > { %v3563_v21 = vmul.f32 %v3562_v42, %v3558_v58  ;;  %v3570_v27 = vmul.f32 %v3569_v40, %v3558_v58  ;;  %v3691_v9 = vclz %v3690_v28  ;;  %v3790_v3 = vshrl.u32 %v8641_v34, 16 }
 0x389   : > { %v3780_v58 = vsel %vm3772_vm6, %v3759_v16, %v3762_v56  ;;  %vm8681_vm11 = vcmp.le.f32.partialorder %v3585_v50, 0.7853982  ;;  %v3756_v17 = vshrl.u32 %v9953_v51, %v3755_v31  ;;  %v3782_v36 = vsel %vm3774_vm9, %v3765_v26, %v3781_v24 }
 0x38a   : > { %v3564_v22 = vadd.f32 1.0, %v3563_v21  ;;  %v3571_v35 = vadd.f32 1.0, %v3570_v27  ;;  %v5485_v46 = vadd.s32 4294967294, %v3691_v9  ;;  %v3785_v0 = vsel %vm3775_vm7, %v3771_v48, 1326507024 }
 0x38b   : > { %v3905_v62 = vadd.s32 1, %v5490_v18  ;;  %v3784_v19 = vsel %vm3772_vm6, %v3762_v56, %v3765_v26  ;;  %v3709_v54 = vsub.s32 4, %v8638_v44  ;;  %v3783_v31 = vsel %vm3773_vm10, %v3780_v58, %v3782_v36 }
 0x38c   : > { %v3572_v25 = vmul.f32 %v3571_v35, %v8629_v20  ;;  %v3581_v7 = vxor.u32 2147483648, %v3564_v22  ;;  %vm5486_vm12 = vcmp.lt.s32.totalorder %v5485_v46, 0  ;;  %v3786_v43 = vsel %vm3774_vm9, %v3768_v52, %v3785_v0 }
 0x38d   : > { %v3694_v50 = vsel %vm5486_vm12, 0, %v5485_v46  ;;  %v3777_v40 = vsel %vm3775_vm7, %v3765_v26, 2102212464  ;;  %v3787_v28 = vsel %vm3773_vm10, %v3784_v19, %v3786_v43  ;;  %v3813_v48 = vand.u32 65535, %v3783_v31 }
 0x38e   : > { %v3578_v53 = vxor.u32 2147483648, %v3572_v25  ;;  %v3582_v18 = vsel %vm3580_vm1, %v3581_v7, %v3572_v25  ;;  %v3695_v6 = vsub.s32 32, %v3694_v50  ;;  %v3696_v20 = vshll.u32 %v8652_v60, %v3694_v50 }
 0x38f   : > { %v3699_v42 = vsub.s32 4294967266, %v3694_v50  ;;  %v3791_v27 = vand.u32 65535, %v3787_v28  ;;  %v3792_v9 = vshrl.u32 %v3787_v28, 16  ;;  %v3710_v26 = vsel %vm3587_vm8, %v3709_v54, %v8638_v44 }
 0x390   : > { %v3579_v21 = vsel %vm3577_vm2, %v3564_v22, %v3578_v53  ;;  %v3697_v52 = vshrl.u32 %v8635_v47, %v3695_v6  ;;  %vm3906_vm13 = vcmp.gt.s32.totalorder %v3905_v62, 0  ;;  %v3776_v22 = vsel %vm3772_vm6, %v3756_v17, %v3759_v16 }
 0x391   : > { %v3583_v24 = vsel %vm3576_vm4, %v3579_v21, %v3582_v18  ;;  %v3700_v60 = vadd.s32 127, %v3699_v42  ;;  %v3778_v47 = vsel %vm3774_vm9, %v3762_v56, %v3777_v40  ;;  %v3793_v36 = vmul.u32 %v3791_v27, %v3789_v55 }
 0x392   : > { %v3584_v35 = vsel %vm3573_vm5, nan, %v3583_v24  ;;  %v3698_v46 = vor.u32 %v3697_v52, %v3696_v20  ;;  %v3794_v45 = vmul.u32 %v3792_v9, %v3789_v55  ;;  %v3795_v0 = vmul.u32 %v3791_v27, %v3790_v3 }
 0x393   : > { %v3701_v58 = vshll.u32 %v3700_v60, 23  ;;  %5294 = vst [vmem:[%s6231_s15 + $0xa0] sm:$0xff] %v3584_v35  ;;  %v3712_v25 = vsel %vm8681_vm11, 0, %v3710_v26  ;;  %v3796_v44 = vmul.u32 %v3792_v9, %v3790_v3  ;;  %v3814_v7 = vshrl.u32 %v3783_v31, 16 }
 0x394   : > { %v3817_v19 = vmul.u32 %v3813_v48, %v3790_v3  ;;  %v3705_v50 = vcvt.s32.f32 %v3698_v46  ;;  %v3797_v54 = vshll.u32 %v3794_v45, 16  ;;  %v3799_v43 = vshll.u32 %v3795_v0, 16 }
 0x395   : > { %v3702_v23 = vor.u32 4788187, %v3701_v58  ;;  %v8724_v16 = vsel %vm3773_vm10, %v3776_v22, %v3778_v47  ;;  %v3815_v56 = vmul.u32 %v3813_v48, %v3789_v55  ;;  %v3816_v17 = vmul.u32 %v3814_v7, %v3789_v55 }
 0x396   : > { %v3907_v53 = vsel %vm3906_vm13, %v3905_v62, 0  ;;  %v3798_v6 = vshrl.u32 %v3794_v45, 16  ;;  %vm3801_vm14 = vc.u32 %v3793_v36, %v3797_v54  ;;  %v3803_v20 = vadd.s32 %v3797_v54, %v3793_v36 }
 0x397   : > { %v3703_v18 = vand.u32 2147483647, %v3702_v23  ;;  %v3802_v42 = vsel %vm3801_vm14, 1, %v9971_v63  ;;  %v3818_v31 = vmul.u32 %v3814_v7, %v3790_v3  ;;  %v3819_v40 = vshll.u32 %v3816_v17, 16 }
 0x398   : > { %v3821_v28 = vshll.u32 %v3817_v19, 16  ;;  %v3804_v52 = vadd.s32 %v3802_v42, %v3796_v44  ;;  %vm3805_vm15 = vc.u32 %v3803_v20, %v3799_v43  ;;  %v3909_v27 = vand.u32 31, %v3907_v53 }
 0x399   : > { %v3706_v21 = vmul.f32 %v3705_v50, %v3703_v18  ;;  %v3800_v14 = vshrl.u32 %v3795_v0, 16  ;;  %v3806_v9 = vsel %vm3805_vm15, 1, %v9971_v63  ;;  %vm3823_vm0 = vc.u32 %v3815_v56, %v3819_v40 }
 0x39a   : > { %v3825_v55 = vadd.s32 %v3819_v40, %v3815_v56  ;;  %v3808_v62 = vadd.s32 %v3806_v9, %v3804_v52  ;;  %v3824_v24 = vsel %vm3823_vm0, 1, %v9971_v63  ;;  %v8730_v60 = vsub.s32 32, %v3909_v27 }
 0x39b   : > { %v3707_v48 = vxor.u32 2147483648, %v3706_v21  ;;  %v3820_v26 = vshrl.u32 %v3816_v17, 16  ;;  %v3826_v35 = vadd.s32 %v3824_v24, %v3818_v31  ;;  %v3833_v3 = vmul.u32 %v8641_v34, %v8724_v16 }
 0x39c   : > { %vm3827_vm1 = vc.u32 %v3825_v55, %v3821_v28  ;;  %v3729_v22 = vadd.s32 3, %v3712_v25  ;;  %v3809_v47 = vadd.s32 %v3808_v62, %v3798_v6  ;;  %v3822_v45 = vshrl.u32 %v3817_v19, 16 }
 0x39d   : > { %v3708_v46 = vsel %vm3587_vm8, %v3707_v48, %v3706_v21  ;;  %v3828_v58 = vsel %vm3827_vm1, 1, %v9971_v63  ;;  %v8740_v0 = vadd.s32 %v3825_v55, %v3821_v28  ;;  %v3912_v34 = vshll.u32 %v9953_v51, %v3909_v27 }
 0x39e   : > { %v3711_v36 = vsel %vm8681_vm11, %v8360_v29, %v3708_v46  ;;  %v3830_v44 = vadd.s32 %v3828_v58, %v3826_v35  ;;  %v8742_v23 = vadd.s32 %v3809_v47, %v3800_v14  ;;  %v3913_v50 = vshrl.u32 %v9946_v12, %v8730_v60 }
 0x39f   : > { %v3713_v7 = vmul.f32 %v3711_v36, %v3711_v36  ;;  %v3915_v54 = vshll.u32 %v9946_v12, %v3909_v27  ;;  %v3916_v43 = vshrl.u32 %v9947_v2, %v8730_v60  ;;  %v3921_v37 = vshll.u32 %v9945_v5, %v3909_v27 }
 0x3a0   : > { %v3831_v25 = vadd.s32 %v3830_v44, %v3820_v26  ;;  %v8751_v56 = vshrl.u32 %v3907_v53, 5  ;;  %v3918_v17 = vshll.u32 %v9947_v2, %v3909_v27  ;;  %vm3835_vm2 = vc.u32 %v8742_v23, %v8740_v0  ;;  %v10027_v44 = vld [vmem:[#allocation12_spill] sm:$0xff] }
 0x3a1   : > { %v3714_v19 = vmul.f32 -0.001358992, %v3713_v7  ;;  %v3721_v16 = vmul.f32 -0.00019511016, %v3713_v7  ;;  %v3919_v6 = vshrl.u32 %v9945_v5, %v8730_v60  ;;  %v3922_v20 = vshrl.u32 %v9955_v8, %v8730_v60 }
 0x3a2   : > { %v3832_v18 = vadd.s32 %v3831_v25, %v3822_v45  ;;  %v3924_v40 = vshll.u32 %v9955_v8, %v3909_v27  ;;  %v3925_v53 = vshrl.u32 %v9956_v13, %v8730_v60  ;;  %v8763_v21 = vor.u32 %v3913_v50, %v3912_v34 }
 0x3a3   : > { %v3715_v42 = vadd.f32 0.041655596, %v3714_v19  ;;  %v3722_v31 = vadd.f32 0.008332121, %v3721_v16  ;;  %v8765_v52 = vor.u32 %v3916_v43, %v3915_v54  ;;  %v3923_v14 = vor.u32 %v3922_v20, %v3921_v37 }
 0x3a4   : > { %v3836_v28 = vadd.s32 1, %v3832_v18  ;;  %vm3927_vm3 = vcmp.lt.s32.totalorder %v8751_v56, 1  ;;  %vm3930_vm4 = vcmp.lt.s32.totalorder %v8751_v56, 4  ;;  %v3903_v62 = vor.u32 8388608, %v8660_v41 }
 0x3a5   : > { %v3716_v9 = vmul.f32 %v3715_v42, %v3713_v7  ;;  %v3723_v55 = vmul.f32 %v3722_v31, %v3713_v7  ;;  %v3920_v24 = vor.u32 %v3919_v6, %v3918_v17  ;;  %v3926_v27 = vor.u32 %v3925_v53, %v3924_v40 }
 0x3a6   : > { %v3837_v48 = vsel %vm3835_vm2, %v3836_v28, %v3832_v18  ;;  %vm3929_vm5 = vcmp.lt.s32.totalorder %v8751_v56, 3  ;;  %v3730_v47 = vand.u32 3, %v3729_v22  ;;  %vm3928_vm6 = vcmp.lt.s32.totalorder %v8751_v56, 2 }
 0x3a7   : > { %v3717_v26 = vadd.f32 -0.4999988, %v3716_v9  ;;  %v3724_v35 = vadd.f32 -0.16666654, %v3723_v55  ;;  %v3838_v46 = vadd.s32 %v3837_v48, %v3833_v3  ;;  %v3935_v58 = vsel %vm3927_vm3, %v8763_v21, %v8765_v52 }
 0x3a8   : > { %v3936_v45 = vsel %vm3930_vm4, %v3923_v14, 920167782  ;;  %v8780_v41 = vadd.f32 %v8618_v61, %v10027_v44  ;;  %v3939_v25 = vsel %vm3927_vm3, %v8765_v52, %v3920_v24  ;;  %v3940_v54 = vsel %vm3930_vm4, %v3926_v27, 1326507024 }
 0x3a9   : > { %v3718_v34 = vmul.f32 %v3717_v26, %v3713_v7  ;;  %v3725_v50 = vmul.f32 %v3724_v35, %v3713_v7  ;;  %v3839_v3 = vadd.s32 536870912, %v3838_v46  ;;  %v3937_v22 = vsel %vm3929_vm5, %v3920_v24, %v3936_v45 }
 0x3aa   : > { %v8789_v43 = vshll.u32 %v3903_v62, 8  ;;  %v3938_v61 = vsel %vm3928_vm6, %v3935_v58, %v3937_v22  ;;  %vm3728_vm7 = vweird.f32 %v8360_v29  ;;  %vm3735_vm8 = vcmp.eq.s32.totalorder %v3730_v47, 2 }
 0x3ab   : > { %v3719_v37 = vadd.f32 1.0, %v3718_v34  ;;  %v3726_v19 = vadd.f32 1.0, %v3725_v50  ;;  %v8791_v16 = vshrl.u32 %v3839_v3, 30  ;;  %v3941_v7 = vsel %vm3929_vm5, %v3923_v14, %v3940_v54 }
 0x3ac   : > { %v3944_v17 = vand.u32 65535, %v8789_v43  ;;  %v3968_v42 = vand.u32 65535, %v3938_v61  ;;  %vm3732_vm9 = vcmp.eq.s32.totalorder %v3730_v47, 0  ;;  %v3942_v31 = vsel %vm3928_vm6, %v3939_v25, %v3941_v7 }
 0x3ad   : > { %v3727_v18 = vmul.f32 %v3726_v19, %v3711_v36  ;;  %v3736_v6 = vxor.u32 2147483648, %v3719_v37  ;;  %v3841_v20 = vshll.u32 %v8791_v16, 30  ;;  %v3945_v40 = vshrl.u32 %v8789_v43, 16 }
 0x3ae   : > { %v3969_v53 = vshrl.u32 %v3938_v61, 16  ;;  %vm3731_vm10 = vcmp.lt.s32.totalorder %v3730_v47, 2  ;;  %v3911_v14 = vshrl.u32 %v9953_v51, %v8730_v60  ;;  %v3946_v48 = vand.u32 65535, %v3942_v31 }
 0x3af   : > { %v3733_v28 = vxor.u32 2147483648, %v3727_v18  ;;  %v3737_v9 = vsel %vm3735_vm8, %v3736_v6, %v3727_v18  ;;  %v3842_v55 = vsub.s32 %v3838_v46, %v3841_v20  ;;  %v3947_v36 = vshrl.u32 %v3942_v31, 16 }
 0x3b0   : > { %v3971_v62 = vmul.u32 %v3969_v53, %v3944_v17  ;;  %v3970_v35 = vmul.u32 %v3968_v42, %v3944_v17  ;;  %v3948_v45 = vmul.u32 %v3946_v48, %v3944_v17  ;;  %v3950_v50 = vmul.u32 %v3946_v48, %v3945_v40 }
 0x3b1   : > { %v3734_v27 = vsel %vm3732_vm9, %v3719_v37, %v3733_v28  ;;  %vm3843_vm11 = vcmp.lt.s32.totalorder %v3842_v55, 0  ;;  %v3844_v26 = vsub.s32 0, %v3842_v55  ;;  %v3949_v34 = vmul.u32 %v3947_v36, %v3944_v17 }
 0x3b2   : > { %v3738_v58 = vsel %vm3731_vm10, %v3734_v27, %v3737_v9  ;;  %v3972_v46 = vmul.u32 %v3968_v42, %v3945_v40  ;;  %v3974_v22 = vshll.u32 %v3971_v62, 16  ;;  %vm3742_vm12 = vcmp.lt.s32.totalorder %v8576_v33, 0 }
 0x3b3   : > { %v3739_v47 = vsel %vm3728_vm7, nan, %v3738_v58  ;;  %v3845_v3 = vsel %vm3843_vm11, %v3844_v26, %v3842_v55  ;;  %v3951_v25 = vmul.u32 %v3947_v36, %v3945_v40  ;;  %v3952_v54 = vshll.u32 %v3949_v34, 16 }
 0x3b4   : > { %v3846_v60 = vclz %v3845_v3  ;;  %v3954_v37 = vshll.u32 %v3950_v50, 16  ;;  %5295 = vst [vmem:[%s6231_s15 + $0xa8] sm:$0xff] %v3739_v47  ;;  %v3834_v19 = vadd.s32 %v8740_v0, %v8742_v23  ;;  %v3864_v61 = vsub.s32 4, %v8791_v16 }
 0x3b5   : > { %v3932_v7 = vsel %vm3930_vm4, %v3920_v24, 2102212464  ;;  %v3973_v29 = vmul.u32 %v3969_v53, %v3945_v40  ;;  %vm3956_vm13 = vc.u32 %v3948_v45, %v3952_v54  ;;  %v3958_v18 = vadd.s32 %v3952_v54, %v3948_v45 }
 0x3b6   : > { %v5488_v17 = vadd.s32 4294967294, %v3846_v60  ;;  %vm3978_vm14 = vc.u32 %v3970_v35, %v3974_v22  ;;  %v3957_v6 = vsel %vm3956_vm13, 1, %v9971_v63  ;;  %v3976_v20 = vshll.u32 %v3972_v46, 16 }
 0x3b7   : > { %v3979_v42 = vsel %vm3978_vm14, 1, %v9971_v63  ;;  %v3980_v31 = vadd.s32 %v3974_v22, %v3970_v35  ;;  %v3953_v28 = vshrl.u32 %v3949_v34, 16  ;;  %v3959_v9 = vadd.s32 %v3957_v6, %v3951_v25 }
 0x3b8   : > { %vm5489_vm15 = vcmp.lt.s32.totalorder %v5488_v17, 0  ;;  %vm3960_vm0 = vc.u32 %v3958_v18, %v3954_v37  ;;  %v3955_v23 = vshrl.u32 %v3950_v50, 16  ;;  %v3981_v24 = vadd.s32 %v3979_v42, %v3973_v29 }
 0x3b9   : > { %v3849_v0 = vsel %vm5489_vm15, 0, %v5488_v17  ;;  %v3961_v48 = vsel %vm3960_vm0, 1, %v9971_v63  ;;  %v3931_v26 = vsel %vm3927_vm3, %v3911_v14, %v8763_v21  ;;  %v3933_v35 = vsel %vm3929_vm5, %v8765_v52, %v3932_v7 }
 0x3ba   : > { %v3850_v40 = vsub.s32 32, %v3849_v0  ;;  %v3851_v53 = vshll.u32 %v3842_v55, %v3849_v0  ;;  %v3854_v36 = vsub.s32 4294967266, %v3849_v0  ;;  %v3963_v27 = vadd.s32 %v3961_v48, %v3959_v9 }
 0x3bb   : > { %v3975_v58 = vshrl.u32 %v3971_v62, 16  ;;  %vm3982_vm1 = vc.u32 %v3980_v31, %v3976_v20  ;;  %v3865_v55 = vsel %vm3742_vm12, %v3864_v61, %v8791_v16  ;;  %v3977_v3 = vshrl.u32 %v3972_v46, 16 }
 0x3bc   : > { %v3852_v45 = vshrl.u32 %v3834_v19, %v3850_v40  ;;  %v3855_v34 = vadd.s32 127, %v3854_v36  ;;  %v3964_v50 = vadd.s32 %v3963_v27, %v3953_v28  ;;  %v3983_v47 = vsel %vm3982_vm1, 1, %v9971_v63 }
 0x3bd   : > { %v3985_v22 = vadd.s32 %v3983_v47, %v3981_v24  ;;  %v4053_v60 = vand.u32 2139095040, %v8780_v41  ;;  %v3984_v54 = vadd.s32 %v3980_v31, %v3976_v20  ;;  %v3934_v52 = vsel %vm3928_vm6, %v3931_v26, %v3933_v35 }
 0x3be   : > { %v3853_v21 = vor.u32 %v3852_v45, %v3851_v53  ;;  %v3856_v14 = vshll.u32 %v3855_v34, 23  ;;  %v3965_v25 = vadd.s32 %v3964_v50, %v3955_v23  ;;  %vm8832_vm2 = vcmp.le.f32.partialorder %v3740_v49, 0.7853982 }
 0x3bf   : > { %v3986_v62 = vadd.s32 %v3985_v22, %v3975_v58  ;;  %v4054_v37 = vshrl.u32 %v4053_v60, 23  ;;  %v3867_v61 = vsel %vm8832_vm2, 0, %v3865_v55  ;;  %v4050_v29 = vand.u32 2147483647, %v8780_v41 }
 0x3c0   : > { %v3857_v16 = vor.u32 4788187, %v3856_v14  ;;  %v3860_v46 = vcvt.s32.f32 %v3853_v21  ;;  %v8841_v56 = vadd.f32 %v8624_v57, %v10027_v44  ;;  %v3988_v6 = vmul.u32 %v8789_v43, %v3934_v52 }
 0x3c1   : > { %v3987_v7 = vadd.s32 %v3986_v62, %v3977_v3  ;;  %v5493_v17 = vadd.s32 4294967169, %v4054_v37  ;;  %vm3990_vm3 = vc.u32 %v3965_v25, %v3984_v54  ;;  %v3884_v31 = vadd.s32 3, %v3867_v61 }
 0x3c2   : > { %v3858_v18 = vand.u32 2147483647, %v3857_v16  ;;  %v4057_v9 = vand.u32 8388607, %v4050_v29  ;;  %v4208_v24 = vand.u32 2139095040, %v8841_v56  ;;  %v8856_v36 = vadd.s32 %v3984_v54, %v3965_v25 }
 0x3c3   : > { %v3991_v49 = vadd.s32 1, %v3987_v7  ;;  %v4060_v20 = vadd.s32 1, %v5493_v17  ;;  %v8849_v43 = vand.u32 3, %v3884_v31  ;;  %v4205_v26 = vand.u32 2147483647, %v8841_v56 }
 0x3c4   : > { %v3861_v42 = vmul.f32 %v3860_v46, %v3858_v18  ;;  %v4058_v45 = vor.u32 8388608, %v4057_v9  ;;  %v4209_v34 = vshrl.u32 %v4208_v24, 23  ;;  %vm3897_vm8 = vcmp.lt.s32.totalorder %v8608_v39, 0 }
 0x3c5   : > { %v3992_v28 = vsel %vm3990_vm3, %v3991_v49, %v3987_v7  ;;  %vm4061_vm4 = vcmp.gt.s32.totalorder %v4060_v20, 0  ;;  %vm3890_vm5 = vcmp.eq.s32.totalorder %v8849_v43, 2  ;;  %vm3887_vm7 = vcmp.eq.s32.totalorder %v8849_v43, 0 }
 0x3c6   : > { %v3862_v0 = vxor.u32 2147483648, %v3861_v42  ;;  %v3993_v23 = vadd.s32 %v3992_v28, %v3988_v6  ;;  %v4062_v48 = vsel %vm4061_vm4, %v4060_v20, 0  ;;  %v8882_v46 = vshll.u32 %v4058_v45, 8 }
 0x3c7   : > { %v4064_v57 = vand.u32 31, %v4062_v48  ;;  %v8865_v50 = vshrl.u32 %v4062_v48, 5  ;;  %vm3886_vm11 = vcmp.lt.s32.totalorder %v8849_v43, 2  ;;  %vm3883_vm13 = vweird.f32 %v8576_v33 }
 0x3c8   : > { %v3863_v44 = vsel %vm3742_vm12, %v3862_v0, %v3861_v42  ;;  %v3994_v40 = vadd.s32 536870912, %v3993_v23  ;;  %v5496_v24 = vadd.s32 4294967169, %v4209_v34  ;;  %vm8949_vm0 = vcmp.le.f32.partialorder %v3895_v38, 0.7853982 }
 0x3c9   : > { %v8854_v53 = vsel %vm8832_vm2, %v8576_v33, %v3863_v44  ;;  %v8858_v27 = vsub.s32 32, %v4064_v57  ;;  %v4067_v47 = vshll.u32 %v9953_v51, %v4064_v57  ;;  %v4076_v3 = vshll.u32 %v9945_v5, %v4064_v57 }
 0x3ca   : > { %v3868_v35 = vmul.f32 %v8854_v53, %v8854_v53  ;;  %v8863_v58 = vshrl.u32 %v3994_v40, 30  ;;  %v4070_v14 = vshll.u32 %v9946_v12, %v4064_v57  ;;  %v4073_v54 = vshll.u32 %v9947_v2, %v4064_v57 }
 0x3cb   : > { %v4068_v55 = vshrl.u32 %v9946_v12, %v8858_v27  ;;  %v4071_v25 = vshrl.u32 %v9947_v2, %v8858_v27  ;;  %v4074_v52 = vshrl.u32 %v9945_v5, %v8858_v27  ;;  %v4077_v62 = vshrl.u32 %v9955_v8, %v8858_v27 }
 0x3cc   : > { %v3869_v22 = vmul.f32 -0.001358992, %v3868_v35  ;;  %v3876_v60 = vmul.f32 -0.00019511016, %v3868_v35  ;;  %v3996_v21 = vshll.u32 %v8863_v58, 30  ;;  %v4079_v17 = vshll.u32 %v9955_v8, %v4064_v57 }
 0x3cd   : > { %v8885_v61 = vor.u32 %v4068_v55, %v4067_v47  ;;  %v4078_v7 = vor.u32 %v4077_v62, %v4076_v3  ;;  %v4080_v18 = vshrl.u32 %v9956_v13, %v8858_v27  ;;  %v8894_v42 = vor.u32 %v4071_v25, %v4070_v14 }
 0x3ce   : > { %v3870_v37 = vadd.f32 0.041655596, %v3869_v22  ;;  %v3877_v19 = vadd.f32 0.008332121, %v3876_v60  ;;  %v8880_v16 = vsub.s32 %v3993_v23, %v3996_v21  ;;  %v4075_v31 = vor.u32 %v4074_v52, %v4073_v54 }
 0x3cf   : > { %vm4082_vm9 = vcmp.lt.s32.totalorder %v8865_v50, 1  ;;  %vm4084_vm10 = vcmp.lt.s32.totalorder %v8865_v50, 3  ;;  %vm4085_vm12 = vcmp.lt.s32.totalorder %v8865_v50, 4  ;;  %v4081_v48 = vor.u32 %v4080_v18, %v4079_v17 }
 0x3d0   : > { %v3871_v6 = vmul.f32 %v3870_v37, %v3868_v35  ;;  %v3878_v49 = vmul.f32 %v3877_v19, %v3868_v35  ;;  %vm3998_vm6 = vcmp.lt.s32.totalorder %v8880_v16, 0  ;;  %v3999_v20 = vsub.s32 0, %v8880_v16 }
 0x3d1   : > { %v8904_v57 = vand.u32 8388607, %v4205_v26  ;;  %v4091_v45 = vsel %vm4085_vm12, %v4078_v7, 920167782  ;;  %v4099_v47 = vand.u32 65535, %v8882_v46  ;;  %vm4083_vm14 = vcmp.lt.s32.totalorder %v8865_v50, 2 }
 0x3d2   : > { %v3872_v28 = vadd.f32 -0.4999988, %v3871_v6  ;;  %v3879_v9 = vadd.f32 -0.16666654, %v3878_v49  ;;  %v4000_v0 = vsel %vm3998_vm6, %v3999_v20, %v8880_v16  ;;  %v4090_v3 = vsel %vm4082_vm9, %v8885_v61, %v8894_v42 }
 0x3d3   : > { %v4001_v23 = vclz %v4000_v0  ;;  %v4092_v34 = vsel %vm4084_vm10, %v4075_v31, %v4091_v45  ;;  %v4100_v21 = vshrl.u32 %v8882_v46, 16  ;;  %v4094_v14 = vsel %vm4082_vm9, %v8894_v42, %v4075_v31 }
 0x3d4   : > { %v3873_v44 = vmul.f32 %v3872_v28, %v3868_v35  ;;  %v3880_v40 = vmul.f32 %v3879_v9, %v3868_v35  ;;  %v4019_v35 = vsub.s32 4, %v8863_v58  ;;  %v4095_v25 = vsel %vm4085_vm12, %v4081_v48, 1326507024 }
 0x3d5   : > { %v5491_v55 = vadd.s32 4294967294, %v4001_v23  ;;  %v8923_v54 = vadd.s32 1, %v5496_v24  ;;  %v4093_v19 = vsel %vm4083_vm14, %v4090_v3, %v4092_v34  ;;  %v4096_v49 = vsel %vm4084_vm10, %v4078_v7, %v4095_v25 }
 0x3d6   : > { %v3874_v22 = vadd.f32 1.0, %v3873_v44  ;;  %v3881_v60 = vadd.f32 1.0, %v3880_v40  ;;  %v4066_v9 = vshrl.u32 %v9953_v51, %v8858_v27  ;;  %v4123_v48 = vand.u32 65535, %v4093_v19 }
 0x3d7   : > { %vm5492_vm15 = vcmp.lt.s32.totalorder %v5491_v55, 0  ;;  %v4124_v40 = vshrl.u32 %v4093_v19, 16  ;;  %vm4216_vm4 = vcmp.gt.s32.totalorder %v8923_v54, 0  ;;  %v4213_v27 = vor.u32 8388608, %v8904_v57 }
 0x3d8   : > { %v3882_v52 = vmul.f32 %v3881_v60, %v8854_v53  ;;  %v3891_v62 = vxor.u32 2147483648, %v3874_v22  ;;  %v4004_v37 = vsel %vm5492_vm15, 0, %v5491_v55  ;;  %v8936_v53 = vsel %vm3897_vm8, %v4019_v35, %v8863_v58 }
 0x3d9   : > { %v4005_v17 = vsub.s32 32, %v4004_v37  ;;  %v4006_v18 = vshll.u32 %v8880_v16, %v4004_v37  ;;  %v4009_v6 = vsub.s32 4294967266, %v4004_v37  ;;  %v4097_v16 = vsel %vm4083_vm14, %v4094_v14, %v4096_v49 }
 0x3da   : > { %v3888_v20 = vxor.u32 2147483648, %v3882_v52  ;;  %v3892_v28 = vsel %vm3890_vm5, %v3891_v62, %v3882_v52  ;;  %v4101_v24 = vand.u32 65535, %v4097_v16  ;;  %v4102_v44 = vshrl.u32 %v4097_v16, 16 }
 0x3db   : > { %v4007_v0 = vshrl.u32 %v8856_v36, %v4005_v17  ;;  %v4010_v23 = vadd.s32 127, %v4009_v6  ;;  %v4087_v55 = vsel %vm4085_vm12, %v4075_v31, 2102212464  ;;  %v4086_v38 = vsel %vm4082_vm9, %v4066_v9, %v8885_v61 }
 0x3dc   : > { %v3889_v7 = vsel %vm3887_vm7, %v3874_v22, %v3888_v20  ;;  %v4103_v34 = vmul.u32 %v4101_v24, %v4099_v47  ;;  %v4104_v22 = vmul.u32 %v4102_v44, %v4099_v47  ;;  %v4105_v60 = vmul.u32 %v4101_v24, %v4100_v21 }
 0x3dd   : > { %v3893_v58 = vsel %vm3886_vm11, %v3889_v7, %v3892_v28  ;;  %v4008_v36 = vor.u32 %v4007_v0, %v4006_v18  ;;  %v4011_v45 = vshll.u32 %v4010_v23, 23  ;;  %v4126_v14 = vmul.u32 %v4124_v40, %v4099_v47 }
 0x3de   : > { %v3894_v3 = vsel %vm3883_vm13, nan, %v3893_v58  ;;  %v4106_v25 = vmul.u32 %v4102_v44, %v4100_v21  ;;  %v4107_v52 = vshll.u32 %v4104_v22, 16  ;;  %v4109_v62 = vshll.u32 %v4105_v60, 16 }
 0x3df   : > { %v4012_v35 = vor.u32 4788187, %v4011_v45  ;;  %v4015_v43 = vcvt.s32.f32 %v4008_v36  ;;  %5296 = vst [vmem:[%s6231_s15 + $0xb0] sm:$0xff] %v3894_v3  ;;  %v4125_v37 = vmul.u32 %v4123_v48, %v4099_v47  ;;  %v4088_v33 = vsel %vm4084_vm10, %v8894_v42, %v4087_v55 }
 0x3e0   : > { %v4127_v31 = vmul.u32 %v4123_v48, %v4100_v21  ;;  %v4129_v17 = vshll.u32 %v4126_v14, 16  ;;  %v4108_v18 = vshrl.u32 %v4104_v22, 16  ;;  %vm4111_vm1 = vc.u32 %v4103_v34, %v4107_v52 }
 0x3e1   : > { %v4013_v19 = vand.u32 2147483647, %v4012_v35  ;;  %v4113_v6 = vadd.s32 %v4107_v52, %v4103_v34  ;;  %v4128_v49 = vmul.u32 %v4124_v40, %v4100_v21  ;;  %v4110_v28 = vshrl.u32 %v4105_v60, 16 }
 0x3e2   : > { %v4112_v61 = vsel %vm4111_vm1, 1, %v9971_v63  ;;  %v4131_v9 = vshll.u32 %v4127_v31, 16  ;;  %vm4133_vm3 = vc.u32 %v4125_v37, %v4129_v17  ;;  %v4135_v47 = vadd.s32 %v4129_v17, %v4125_v37 }
 0x3e3   : > { %v4016_v20 = vmul.f32 %v4015_v43, %v4013_v19  ;;  %v4114_v0 = vadd.s32 %v4112_v61, %v4106_v25  ;;  %vm4115_vm2 = vc.u32 %v4113_v6, %v4109_v62  ;;  %v4134_v42 = vsel %vm4133_vm3, 1, %v9971_v63 }
 0x3e4   : > { %v4116_v16 = vsel %vm4115_vm2, 1, %v9971_v63  ;;  %v4130_v7 = vshrl.u32 %v4126_v14, 16  ;;  %v4136_v24 = vadd.s32 %v4134_v42, %v4128_v49  ;;  %vm4137_vm5 = vc.u32 %v4135_v47, %v4131_v9 }
 0x3e5   : > { %v4017_v23 = vxor.u32 2147483648, %v4016_v20  ;;  %v4118_v48 = vadd.s32 %v4116_v16, %v4114_v0  ;;  %v4022_v44 = vsel %vm8949_vm0, 0, %v8936_v53  ;;  %v4138_v40 = vsel %vm4137_vm5, 1, %v9971_v63 }
 0x3e6   : > { %v4217_v58 = vsel %vm4216_vm4, %v8923_v54, 0  ;;  %v4132_v55 = vshrl.u32 %v4127_v31, 16  ;;  %v4140_v3 = vadd.s32 %v4138_v40, %v4136_v24  ;;  %v4089_v22 = vsel %vm4083_vm14, %v4086_v38, %v4088_v33 }
 0x3e7   : > { %v4018_v21 = vsel %vm3897_vm8, %v4017_v23, %v4016_v20  ;;  %v4119_v45 = vadd.s32 %v4118_v48, %v4108_v18  ;;  %v8980_v60 = vadd.s32 %v4135_v47, %v4131_v9  ;;  %v4219_v35 = vand.u32 31, %v4217_v58 }
 0x3e8   : > { %v4021_v36 = vsel %vm8949_vm0, %v8608_v39, %v4018_v21  ;;  %v8984_v53 = vmul.f32 %v6908_v11, %v7877_v15  ;;  %v4141_v54 = vadd.s32 %v4140_v3, %v4130_v7  ;;  %v4039_v52 = vadd.s32 3, %v4022_v44 }
 0x3e9   : > { %v4023_v34 = vmul.f32 %v4021_v36, %v4021_v36  ;;  %v8986_v43 = vadd.s32 %v4119_v45, %v4110_v28  ;;  %v4220_v62 = vsub.s32 32, %v4219_v35  ;;  %v4143_v50 = vmul.u32 %v8882_v46, %v4089_v22 }
 0x3ea   : > { %v4142_v37 = vadd.s32 %v4141_v54, %v4132_v55  ;;  %v8990_v38 = vshrl.u32 %v4217_v58, 5  ;;  %v4222_v19 = vshll.u32 %v9953_v51, %v4219_v35  ;;  %v4225_v57 = vshll.u32 %v9946_v12, %v4219_v35 }
 0x3eb   : > { %v4024_v14 = vmul.f32 -0.001358992, %v4023_v34  ;;  %v4031_v25 = vmul.f32 -0.00019511016, %v4023_v34  ;;  %vm4145_vm6 = vc.u32 %v8986_v43, %v8980_v60  ;;  %v4223_v17 = vshrl.u32 %v9946_v12, %v4220_v62 }
 0x3ec   : > { %v4146_v18 = vadd.s32 1, %v4142_v37  ;;  %v4226_v6 = vshrl.u32 %v9947_v2, %v4220_v62  ;;  %v4228_v49 = vshll.u32 %v9947_v2, %v4219_v35  ;;  %v4229_v28 = vshrl.u32 %v9945_v5, %v4220_v62 }
 0x3ed   : > { %v4025_v33 = vadd.f32 0.041655596, %v4024_v14  ;;  %v4032_v31 = vadd.f32 0.008332121, %v4031_v25  ;;  %v4231_v61 = vshll.u32 %v9945_v5, %v4219_v35  ;;  %v4040_v9 = vand.u32 3, %v4039_v52 }
 0x3ee   : > { %v4147_v0 = vsel %vm4145_vm6, %v4146_v18, %v4142_v37  ;;  %v4232_v47 = vshrl.u32 %v9955_v8, %v4220_v62  ;;  %vm4237_vm7 = vcmp.lt.s32.totalorder %v8990_v38, 1  ;;  %v4224_v48 = vor.u32 %v4223_v17, %v4222_v19 }
 0x3ef   : > { %v4026_v20 = vmul.f32 %v4025_v33, %v4023_v34  ;;  %v4033_v46 = vmul.f32 %v4032_v31, %v4023_v34  ;;  %v4148_v42 = vadd.s32 %v4147_v0, %v4143_v50  ;;  %vm4038_vm8 = vweird.f32 %v8608_v39 }
 0x3f0   : > { %v4227_v7 = vor.u32 %v4226_v6, %v4225_v57  ;;  %v4233_v24 = vor.u32 %v4232_v47, %v4231_v61  ;;  %v4234_v21 = vshll.u32 %v9955_v8, %v4219_v35  ;;  %v4235_v44 = vshrl.u32 %v9956_v13, %v4220_v62 }
 0x3f1   : > { %v4027_v23 = vadd.f32 -0.4999988, %v4026_v20  ;;  %v4034_v16 = vadd.f32 -0.16666654, %v4033_v46  ;;  %v4149_v45 = vadd.s32 536870912, %v4148_v42  ;;  %v4230_v55 = vor.u32 %v4229_v28, %v4228_v49 }
 0x3f2   : > { %vm4045_vm9 = vcmp.eq.s32.totalorder %v4040_v9, 2  ;;  %v4236_v3 = vor.u32 %v4235_v44, %v4234_v21  ;;  %vm4240_vm10 = vcmp.lt.s32.totalorder %v8990_v38, 4  ;;  %v9007_v22 = vshll.u32 %v4213_v27, 8 }
 0x3f3   : > { %v4028_v40 = vmul.f32 %v4027_v23, %v4023_v34  ;;  %v4035_v58 = vmul.f32 %v4034_v16, %v4023_v34  ;;  %v9009_v25 = vshrl.u32 %v4149_v45, 30  ;;  %vm4239_vm11 = vcmp.lt.s32.totalorder %v8990_v38, 3 }
 0x3f4   : > { %vm4238_vm12 = vcmp.lt.s32.totalorder %v8990_v38, 2  ;;  %v4245_v35 = vsel %vm4237_vm7, %v4224_v48, %v4227_v7  ;;  %v4246_v34 = vsel %vm4240_vm10, %v4233_v24, 920167782  ;;  %v4250_v52 = vsel %vm4240_vm10, %v4236_v3, 1326507024 }
 0x3f5   : > { %v4029_v54 = vadd.f32 1.0, %v4028_v40  ;;  %v4036_v14 = vadd.f32 1.0, %v4035_v58  ;;  %v4151_v50 = vshll.u32 %v9009_v25, 30  ;;  %v4249_v19 = vsel %vm4237_vm7, %v4227_v7, %v4230_v55 }
 0x3f6   : > { %vm4041_vm13 = vcmp.lt.s32.totalorder %v4040_v9, 2  ;;  %vm4042_vm14 = vcmp.eq.s32.totalorder %v4040_v9, 0  ;;  %v4247_v33 = vsel %vm4239_vm11, %v4230_v55, %v4246_v34  ;;  %v4251_v31 = vsel %vm4239_vm11, %v4233_v24, %v4250_v52 }
 0x3f7   : > { %v4037_v37 = vmul.f32 %v4036_v14, %v4021_v36  ;;  %v4046_v27 = vxor.u32 2147483648, %v4029_v54  ;;  %v4152_v57 = vsub.s32 %v4148_v42, %v4151_v50  ;;  %v4255_v36 = vshrl.u32 %v9007_v22, 16 }
 0x3f8   : > { %v4221_v6 = vshrl.u32 %v9953_v51, %v4220_v62  ;;  %v4248_v49 = vsel %vm4238_vm12, %v4245_v35, %v4247_v33  ;;  %v4252_v20 = vsel %vm4238_vm12, %v4249_v19, %v4251_v31  ;;  %v4254_v46 = vand.u32 65535, %v9007_v22 }
 0x3f9   : > { %v4043_v17 = vxor.u32 2147483648, %v4037_v37  ;;  %v4047_v18 = vsel %vm4045_vm9, %v4046_v27, %v4037_v37  ;;  %vm4153_vm15 = vcmp.lt.s32.totalorder %v4152_v57, 0  ;;  %v4154_v61 = vsub.s32 0, %v4152_v57 }
 0x3fa   : > { %v4256_v0 = vand.u32 65535, %v4252_v20  ;;  %v4242_v23 = vsel %vm4240_vm10, %v4230_v55, 2102212464  ;;  %v4257_v16 = vshrl.u32 %v4252_v20, 16  ;;  %v4279_v62 = vshrl.u32 %v4248_v49, 16 }
 0x3fb   : > { %v4044_v28 = vsel %vm4042_vm14, %v4029_v54, %v4043_v17  ;;  %v4155_v24 = vsel %vm4153_vm15, %v4154_v61, %v4152_v57  ;;  %v4278_v44 = vand.u32 65535, %v4248_v49  ;;  %v9043_v40 = vmul.f32 %v6908_v11, %v7880_v32 }
 0x3fc   : > { %v4048_v47 = vsel %vm4041_vm13, %v4044_v28, %v4047_v18  ;;  %v9039_v21 = vmul.u32 %v4256_v0, %v4255_v36  ;;  %v4156_v58 = vclz %v4155_v24  ;;  %v4258_v45 = vmul.u32 %v4256_v0, %v4254_v46 }
 0x3fd   : > { %v4049_v42 = vsel %vm4038_vm8, nan, %v4048_v47  ;;  %v4259_v9 = vmul.u32 %v4257_v16, %v4254_v46  ;;  %v9048_v55 = vadd.f32 %v8984_v53, %v7019_v30  ;;  %v4144_v39 = vadd.s32 %v8980_v60, %v8986_v43 }
 0x3fe   : > { %5297 = vst [vmem:[%s6231_s15 + $0xb8] sm:$0xff] %v4049_v42  ;;  %v4241_v3 = vsel %vm4237_vm7, %v4221_v6, %v4224_v48  ;;  %v4281_v54 = vmul.u32 %v4279_v62, %v4254_v46  ;;  %v5494_v14 = vadd.s32 4294967294, %v4156_v58  ;;  %v4243_v11 = vsel %vm4239_vm11, %v4227_v7, %v4242_v23 }
 0x3ff   : > { %v4261_v35 = vmul.u32 %v4257_v16, %v4255_v36  ;;  %v4262_v34 = vshll.u32 %v4259_v9, 16  ;;  %vm4052_vm0 = vcmp.lt.s32.totalorder %v8780_v41, 0  ;;  %v4174_v52 = vsub.s32 4, %v9009_v25 }
 0x400   : > { %v4264_v53 = vshll.u32 %v9039_v21, 16  ;;  %v4280_v37 = vmul.u32 %v4278_v44, %v4254_v46  ;;  %v4282_v27 = vmul.u32 %v4278_v44, %v4255_v36  ;;  %vm5495_vm1 = vcmp.lt.s32.totalorder %v5494_v14, 0 }
 0x401   : > { %vm4266_vm2 = vc.u32 %v4258_v45, %v4262_v34  ;;  %v4268_v60 = vadd.s32 %v4262_v34, %v4258_v45  ;;  %v4284_v43 = vshll.u32 %v4281_v54, 16  ;;  %v4159_v48 = vsel %vm5495_vm1, 0, %v5494_v14 }
 0x402   : > { %v4267_v50 = vsel %vm4266_vm2, 1, %v9971_v63  ;;  %v4283_v19 = vmul.u32 %v4279_v62, %v4255_v36  ;;  %v4360_v7 = vand.u32 2147483647, %v9048_v55  ;;  %v4160_v33 = vsub.s32 32, %v4159_v48 }
 0x403   : > { %v4161_v31 = vshll.u32 %v4152_v57, %v4159_v48  ;;  %v4164_v17 = vsub.s32 4294967266, %v4159_v48  ;;  %v4269_v18 = vadd.s32 %v4267_v50, %v4261_v35  ;;  %v4263_v6 = vshrl.u32 %v4259_v9, 16 }
 0x404   : > { %v4265_v49 = vshrl.u32 %v9039_v21, 16  ;;  %vm4270_vm3 = vc.u32 %v4268_v60, %v4264_v53  ;;  %v4286_v20 = vshll.u32 %v4282_v27, 16  ;;  %v4162_v46 = vshrl.u32 %v4144_v39, %v4160_v33 }
 0x405   : > { %v4165_v28 = vadd.s32 127, %v4164_v17  ;;  %v4271_v61 = vsel %vm4270_vm3, 1, %v9971_v63  ;;  %vm4288_vm4 = vc.u32 %v4280_v37, %v4284_v43  ;;  %v4290_v36 = vadd.s32 %v4284_v43, %v4280_v37 }
 0x406   : > { %v4273_v0 = vadd.s32 %v4271_v61, %v4269_v18  ;;  %v4289_v47 = vsel %vm4288_vm4, 1, %v9971_v63  ;;  %v4363_v23 = vand.u32 2139095040, %v9048_v55  ;;  %v4163_v16 = vor.u32 %v4162_v46, %v4161_v31 }
 0x407   : > { %v4166_v57 = vshll.u32 %v4165_v28, 23  ;;  %v4285_v62 = vshrl.u32 %v4281_v54, 16  ;;  %v4291_v42 = vadd.s32 %v4289_v47, %v4283_v19  ;;  %vm4292_vm5 = vc.u32 %v4290_v36, %v4286_v20 }
 0x408   : > { %v4274_v24 = vadd.s32 %v4273_v0, %v4263_v6  ;;  %v4364_v21 = vshrl.u32 %v4363_v23, 23  ;;  %v4367_v44 = vand.u32 8388607, %v4360_v7  ;;  %v4170_v45 = vcvt.s32.f32 %v4163_v16 }
 0x409   : > { %v4167_v58 = vor.u32 4788187, %v4166_v57  ;;  %v4175_v9 = vsel %vm4052_vm0, %v4174_v52, %v9009_v25  ;;  %v4293_v39 = vsel %vm4292_vm5, 1, %v9971_v63  ;;  %vm9073_vm6 = vcmp.le.f32.partialorder %v4050_v29, 0.7853982 }
 0x40a   : > { %v4287_v54 = vshrl.u32 %v4282_v27, 16  ;;  %v4295_v35 = vadd.s32 %v4293_v39, %v4291_v42  ;;  %v5499_v34 = vadd.s32 4294967169, %v4364_v21  ;;  %v4244_v37 = vsel %vm4238_vm12, %v4241_v3, %v4243_v11 }
 0x40b   : > { %v4168_v53 = vand.u32 2147483647, %v4167_v58  ;;  %v9079_v60 = vadd.s32 %v4274_v24, %v4265_v49  ;;  %v9081_v43 = vadd.s32 %v4290_v36, %v4286_v20  ;;  %v4177_v25 = vsel %vm9073_vm6, 0, %v4175_v9 }
 0x40c   : > { %v4296_v52 = vadd.s32 %v4295_v35, %v4285_v62  ;;  %v4368_v48 = vor.u32 8388608, %v4367_v44  ;;  %v4370_v29 = vadd.s32 1, %v5499_v34  ;;  %v4298_v27 = vmul.u32 %v9007_v22, %v4244_v37 }
 0x40d   : > { %v4171_v50 = vmul.f32 %v4170_v45, %v4168_v53  ;;  %v4194_v31 = vadd.s32 3, %v4177_v25  ;;  %vm4300_vm8 = vc.u32 %v9079_v60, %v9081_v43  ;;  %v9090_v3 = vadd.f32 %v9043_v40, %v7019_v30 }
 0x40e   : > { %v4297_v19 = vadd.s32 %v4296_v52, %v4287_v54  ;;  %vm4371_vm7 = vcmp.gt.s32.totalorder %v4370_v29, 0  ;;  %v9092_v18 = vshll.u32 %v4368_v48, 8  ;;  %vm4207_vm12 = vcmp.lt.s32.totalorder %v8841_v56, 0 }
 0x40f   : > { %v4172_v33 = vxor.u32 2147483648, %v4171_v50  ;;  %v4372_v38 = vsel %vm4371_vm7, %v4370_v29, 0  ;;  %v9105_v30 = vand.u32 3, %v4194_v31  ;;  %v4515_v0 = vand.u32 2147483647, %v9090_v3 }
 0x410   : > { %v4301_v11 = vadd.s32 1, %v4297_v19  ;;  %v4374_v17 = vand.u32 31, %v4372_v38  ;;  %v9107_v28 = vshrl.u32 %v4372_v38, 5  ;;  %v9110_v61 = vand.u32 65535, %v9092_v18 }
 0x411   : > { %v4173_v6 = vsel %vm4052_vm0, %v4172_v33, %v4171_v50  ;;  %v4518_v47 = vand.u32 2139095040, %v9090_v3  ;;  %vm4200_vm9 = vcmp.eq.s32.totalorder %v9105_v30, 2  ;;  %vm4197_vm10 = vcmp.eq.s32.totalorder %v9105_v30, 0 }
 0x412   : > { %v9099_v22 = vsel %vm9073_vm6, %v8780_v41, %v4173_v6  ;;  %v4302_v49 = vsel %vm4300_vm8, %v4301_v11, %v4297_v19  ;;  %v9101_v20 = vsub.s32 32, %v4374_v17  ;;  %v4380_v57 = vshll.u32 %v9946_v12, %v4374_v17 }
 0x413   : > { %v4178_v46 = vmul.f32 %v9099_v22, %v9099_v22  ;;  %v4303_v40 = vadd.s32 %v4302_v49, %v4298_v27  ;;  %v4383_v42 = vshll.u32 %v9947_v2, %v4374_v17  ;;  %v4386_v21 = vshll.u32 %v9945_v5, %v4374_v17 }
 0x414   : > { %v4381_v62 = vshrl.u32 %v9947_v2, %v9101_v20  ;;  %v4384_v24 = vshrl.u32 %v9945_v5, %v9101_v20  ;;  %v4387_v9 = vshrl.u32 %v9955_v8, %v9101_v20  ;;  %v4377_v39 = vshll.u32 %v9953_v51, %v4374_v17 }
 0x415   : > { %v4179_v36 = vmul.f32 -0.001358992, %v4178_v46  ;;  %v4186_v23 = vmul.f32 -0.00019511016, %v4178_v46  ;;  %v4304_v16 = vadd.s32 536870912, %v4303_v40  ;;  %v4378_v14 = vshrl.u32 %v9946_v12, %v9101_v20 }
 0x416   : > { %v4389_v54 = vshll.u32 %v9955_v8, %v4374_v17  ;;  %v4390_v35 = vshrl.u32 %v9956_v13, %v9101_v20  ;;  %v4519_v25 = vshrl.u32 %v4518_v47, 23  ;;  %v9131_v52 = vor.u32 %v4381_v62, %v4380_v57 }
 0x417   : > { %v4180_v44 = vadd.f32 0.041655596, %v4179_v36  ;;  %v4187_v58 = vadd.f32 0.008332121, %v4186_v23  ;;  %v4305_v45 = vshrl.u32 %v4304_v16, 30  ;;  %v9133_v48 = vor.u32 %v4384_v24, %v4383_v42 }
 0x418   : > { %v4388_v29 = vor.u32 %v4387_v9, %v4386_v21  ;;  %v4391_v50 = vor.u32 %v4390_v35, %v4389_v54  ;;  %vm4196_vm11 = vcmp.lt.s32.totalorder %v9105_v30, 2  ;;  %vm4392_vm13 = vcmp.lt.s32.totalorder %v9107_v28, 1 }
 0x419   : > { %v4181_v34 = vmul.f32 %v4180_v44, %v4178_v46  ;;  %v4188_v53 = vmul.f32 %v4187_v58, %v4178_v46  ;;  %v4306_v37 = vshll.u32 %v4305_v45, 30  ;;  %vm4193_vm14 = vweird.f32 %v8780_v41 }
 0x41a   : > { %v9139_v31 = vor.u32 %v4378_v14, %v4377_v39  ;;  %vm4394_vm15 = vcmp.lt.s32.totalorder %v9107_v28, 3  ;;  %vm4395_vm0 = vcmp.lt.s32.totalorder %v9107_v28, 4  ;;  %v9144_v38 = vshrl.u32 %v9092_v18, 16 }
 0x41b   : > { %v4182_v19 = vadd.f32 -0.4999988, %v4181_v34  ;;  %v4189_v27 = vadd.f32 -0.16666654, %v4188_v53  ;;  %v4307_v33 = vsub.s32 %v4303_v40, %v4306_v37  ;;  %vm4393_vm2 = vcmp.lt.s32.totalorder %v9107_v28, 2 }
 0x41c   : > { %v4401_v49 = vsel %vm4395_vm0, %v4388_v29, 920167782  ;;  %v4404_v40 = vsel %vm4392_vm13, %v9131_v52, %v9133_v48  ;;  %v4405_v47 = vsel %vm4395_vm0, %v4391_v50, 1326507024  ;;  %v5502_v57 = vadd.s32 4294967169, %v4519_v25 }
 0x41d   : > { %v4183_v11 = vmul.f32 %v4182_v19, %v4178_v46  ;;  %v4190_v17 = vmul.f32 %v4189_v27, %v4178_v46  ;;  %vm4308_vm1 = vcmp.lt.s32.totalorder %v4307_v33, 0  ;;  %v4309_v6 = vsub.s32 0, %v4307_v33 }
 0x41e   : > { %vm9157_vm3 = vcmp.le.f32.partialorder %v4205_v26, 0.7853982  ;;  %v4329_v42 = vsub.s32 4, %v4305_v45  ;;  %v4400_v24 = vsel %vm4392_vm13, %v9139_v31, %v9131_v52  ;;  %v4406_v21 = vsel %vm4394_vm15, %v4388_v29, %v4405_v47 }
 0x41f   : > { %v4184_v36 = vadd.f32 1.0, %v4183_v11  ;;  %v4191_v23 = vadd.f32 1.0, %v4190_v17  ;;  %v4310_v16 = vsel %vm4308_vm1, %v4309_v6, %v4307_v33  ;;  %v4402_v26 = vsel %vm4394_vm15, %v9133_v48, %v4401_v49 }
 0x420   : > { %v4311_v62 = vclz %v4310_v16  ;;  %v4407_v9 = vsel %vm4393_vm2, %v4404_v40, %v4406_v21  ;;  %v4299_v39 = vadd.s32 %v9081_v43, %v9079_v60  ;;  %v4525_v37 = vadd.s32 1, %v5502_v57 }
 0x421   : > { %v4192_v44 = vmul.f32 %v4191_v23, %v9099_v22  ;;  %v4201_v58 = vxor.u32 2147483648, %v4184_v36  ;;  %v4411_v54 = vand.u32 65535, %v4407_v9  ;;  %v4412_v35 = vshrl.u32 %v4407_v9, 16 }
 0x422   : > { %v5497_v14 = vadd.s32 4294967294, %v4311_v62  ;;  %v9179_v22 = vand.u32 8388607, %v4515_v0  ;;  %v4330_v25 = vsel %vm4207_vm12, %v4329_v42, %v4305_v45  ;;  %v4403_v29 = vsel %vm4393_vm2, %v4400_v24, %v4402_v26 }
 0x423   : > { %v4198_v34 = vxor.u32 2147483648, %v4192_v44  ;;  %v4202_v53 = vsel %vm4200_vm9, %v4201_v58, %v4192_v44  ;;  %v4414_v60 = vmul.u32 %v4412_v35, %v9110_v61  ;;  %v4413_v19 = vmul.u32 %v4411_v54, %v9110_v61 }
 0x424   : > { %vm5498_vm4 = vcmp.lt.s32.totalorder %v5497_v14, 0  ;;  %v4415_v27 = vmul.u32 %v4411_v54, %v9144_v38  ;;  %v4376_v40 = vshrl.u32 %v9953_v51, %v9101_v20  ;;  %v4433_v47 = vand.u32 65535, %v4403_v29 }
 0x425   : > { %v4199_v43 = vsel %vm4197_vm10, %v4184_v36, %v4198_v34  ;;  %v4314_v50 = vsel %vm5498_vm4, 0, %v5497_v14  ;;  %v4434_v36 = vshrl.u32 %v4403_v29, 16  ;;  %v4416_v57 = vmul.u32 %v4412_v35, %v9144_v38 }
 0x426   : > { %v4203_v11 = vsel %vm4196_vm11, %v4199_v43, %v4202_v53  ;;  %v4315_v17 = vsub.s32 32, %v4314_v50  ;;  %v4316_v6 = vshll.u32 %v4307_v33, %v4314_v50  ;;  %v4319_v45 = vsub.s32 4294967266, %v4314_v50 }
 0x427   : > { %v4204_v49 = vsel %vm4193_vm14, nan, %v4203_v11  ;;  %v4417_v62 = vshll.u32 %v4414_v60, 16  ;;  %v4332_v30 = vsel %vm9157_vm3, 0, %v4330_v25  ;;  %v4397_v33 = vsel %vm4395_vm0, %v9133_v48, 2102212464 }
 0x428   : > { %v4317_v23 = vshrl.u32 %v4299_v39, %v4315_v17  ;;  %v4320_v16 = vadd.s32 127, %v4319_v45  ;;  %5298 = vst [vmem:[%s6231_s15 + $0xc0] sm:$0xff] %v4204_v49  ;;  %v4418_v41 = vshrl.u32 %v4414_v60, 16  ;;  %v4419_v42 = vshll.u32 %v4415_v27, 16 }
 0x429   : > { %vm4421_vm5 = vc.u32 %v4413_v19, %v4417_v62  ;;  %v4423_v20 = vadd.s32 %v4417_v62, %v4413_v19  ;;  %v4435_v58 = vmul.u32 %v4433_v47, %v9110_v61  ;;  %v4436_v26 = vmul.u32 %v4434_v36, %v9110_v61 }
 0x42a   : > { %v4318_v24 = vor.u32 %v4317_v23, %v4316_v6  ;;  %v4321_v21 = vshll.u32 %v4320_v16, 23  ;;  %v4422_v44 = vsel %vm4421_vm5, 1, %v9971_v63  ;;  %v4437_v9 = vmul.u32 %v4433_v47, %v9144_v38 }
 0x42b   : > { %v4424_v54 = vadd.s32 %v4422_v44, %v4416_v57  ;;  %vm4425_vm6 = vc.u32 %v4423_v20, %v4419_v42  ;;  %v4438_v35 = vmul.u32 %v4434_v36, %v9144_v38  ;;  %v4439_v34 = vshll.u32 %v4436_v26, 16 }
 0x42c   : > { %v4322_v39 = vor.u32 4788187, %v4321_v21  ;;  %v4325_v14 = vcvt.s32.f32 %v4318_v24  ;;  %v4426_v48 = vsel %vm4425_vm6, 1, %v9971_v63  ;;  %v4441_v53 = vshll.u32 %v4437_v9, 16 }
 0x42d   : > { %v4396_v29 = vsel %vm4392_vm13, %v4376_v40, %v9139_v31  ;;  %v4398_v61 = vsel %vm4394_vm15, %v9131_v52, %v4397_v33  ;;  %v4428_v60 = vadd.s32 %v4426_v48, %v4424_v54  ;;  %v4420_v43 = vshrl.u32 %v4415_v27, 16 }
 0x42e   : > { %v4323_v25 = vand.u32 2147483647, %v4322_v39  ;;  %vm4443_vm7 = vc.u32 %v4435_v58, %v4439_v34  ;;  %v4445_v50 = vadd.s32 %v4439_v34, %v4435_v58  ;;  %vm4526_vm8 = vcmp.gt.s32.totalorder %v4525_v37, 0 }
 0x42f   : > { %v4429_v11 = vadd.s32 %v4428_v60, %v4418_v41  ;;  %v4444_v38 = vsel %vm4443_vm7, 1, %v9971_v63  ;;  %v4527_v17 = vsel %vm4526_vm8, %v4525_v37, 0  ;;  %v9218_v6 = vmul.f32 %v7166_v59, %v7877_v15 }
 0x430   : > { %v4326_v19 = vmul.f32 %v4325_v14, %v4323_v25  ;;  %v4440_v45 = vshrl.u32 %v4436_v26, 16  ;;  %v4446_v31 = vadd.s32 %v4444_v38, %v4438_v35  ;;  %vm4447_vm9 = vc.u32 %v4445_v50, %v4441_v53 }
 0x431   : > { %v4448_v52 = vsel %vm4447_vm9, 1, %v9971_v63  ;;  %v4523_v27 = vor.u32 8388608, %v9179_v22  ;;  %v4529_v40 = vand.u32 31, %v4527_v17  ;;  %v4349_v47 = vadd.s32 3, %v4332_v30 }
 0x432   : > { %v4327_v49 = vxor.u32 2147483648, %v4326_v19  ;;  %v4399_v36 = vsel %vm4393_vm2, %v4396_v29, %v4398_v61  ;;  %v4442_v23 = vshrl.u32 %v4437_v9, 16  ;;  %v4450_v16 = vadd.s32 %v4448_v52, %v4446_v31 }
 0x433   : > { %v9226_v57 = vadd.s32 %v4429_v11, %v4420_v43  ;;  %v9228_v62 = vadd.s32 %v4445_v50, %v4441_v53  ;;  %v9230_v33 = vsub.s32 32, %v4529_v40  ;;  %v9235_v30 = vshrl.u32 %v4527_v17, 5 }
 0x434   : > { %v4328_v37 = vsel %vm4207_vm12, %v4327_v49, %v4326_v19  ;;  %v4451_v41 = vadd.s32 %v4450_v16, %v4440_v45  ;;  %v4532_v28 = vshll.u32 %v9953_v51, %v4529_v40  ;;  %v4535_v21 = vshll.u32 %v9946_v12, %v4529_v40 }
 0x435   : > { %v4331_v22 = vsel %vm9157_vm3, %v8841_v56, %v4328_v37  ;;  %v4533_v24 = vshrl.u32 %v9946_v12, %v9230_v33  ;;  %v4536_v20 = vshrl.u32 %v9947_v2, %v9230_v33  ;;  %v4538_v58 = vshll.u32 %v9947_v2, %v4529_v40 }
 0x436   : > { %v4333_v42 = vmul.f32 %v4331_v22, %v4331_v22  ;;  %v4452_v44 = vadd.s32 %v4451_v41, %v4442_v23  ;;  %v4539_v46 = vshrl.u32 %v9945_v5, %v9230_v33  ;;  %v4541_v26 = vshll.u32 %v9945_v5, %v4529_v40 }
 0x437   : > { %v4453_v14 = vmul.u32 %v9092_v18, %v4399_v36  ;;  %vm4455_vm10 = vc.u32 %v9226_v57, %v9228_v62  ;;  %v9250_v48 = vor.u32 %v4533_v24, %v4532_v28  ;;  %v4542_v35 = vshrl.u32 %v9955_v8, %v9230_v33 }
 0x438   : > { %v4334_v9 = vmul.f32 -0.001358992, %v4333_v42  ;;  %v4341_v39 = vmul.f32 -0.00019511016, %v4333_v42  ;;  %v4456_v54 = vadd.s32 1, %v4452_v44  ;;  %v4544_v34 = vshll.u32 %v9955_v8, %v4529_v40 }
 0x439   : > { %v9255_v29 = vor.u32 %v4536_v20, %v4535_v21  ;;  %v4545_v61 = vshrl.u32 %v9956_v13, %v9230_v33  ;;  %v9259_v18 = vor.u32 %v4539_v46, %v4538_v58  ;;  %v4543_v43 = vor.u32 %v4542_v35, %v4541_v26 }
 0x43a   : > { %v4335_v53 = vadd.f32 0.041655596, %v4334_v9  ;;  %v4342_v25 = vadd.f32 0.008332121, %v4341_v39  ;;  %v4457_v60 = vsel %vm4455_vm10, %v4456_v54, %v4452_v44  ;;  %vm4547_vm11 = vcmp.lt.s32.totalorder %v9235_v30, 1 }
 0x43b   : > { %v4458_v11 = vadd.s32 %v4457_v60, %v4453_v14  ;;  %vm4550_vm12 = vcmp.lt.s32.totalorder %v9235_v30, 4  ;;  %v4350_v38 = vand.u32 3, %v4349_v47  ;;  %v4546_v17 = vor.u32 %v4545_v61, %v4544_v34 }
 0x43c   : > { %v4336_v50 = vmul.f32 %v4335_v53, %v4333_v42  ;;  %v4343_v19 = vmul.f32 %v4342_v25, %v4333_v42  ;;  %vm4548_vm13 = vcmp.lt.s32.totalorder %v9235_v30, 2  ;;  %vm4549_vm14 = vcmp.lt.s32.totalorder %v9235_v30, 3 }
 0x43d   : > { %v4459_v49 = vadd.s32 536870912, %v4458_v11  ;;  %v4555_v52 = vsel %vm4547_vm11, %v9250_v48, %v9255_v29  ;;  %v4556_v40 = vsel %vm4550_vm12, %v4543_v43, 920167782  ;;  %v4559_v47 = vsel %vm4547_vm11, %v9255_v29, %v9259_v18 }
 0x43e   : > { %v4337_v45 = vadd.f32 -0.4999988, %v4336_v50  ;;  %v4344_v31 = vadd.f32 -0.16666654, %v4343_v19  ;;  %v4560_v36 = vsel %vm4550_vm12, %v4546_v17, 1326507024  ;;  %v4557_v28 = vsel %vm4549_vm14, %v9259_v18, %v4556_v40 }
 0x43f   : > { %v9277_v23 = vshll.u32 %v4523_v27, 8  ;;  %v9279_v41 = vshrl.u32 %v4459_v49, 30  ;;  %v2791_v24 = vmul.f32 %v7166_v59, %v7880_v32  ;;  %v4558_v21 = vsel %vm4548_vm13, %v4555_v52, %v4557_v28 }
 0x440   : > { %v4338_v16 = vmul.f32 %v4337_v45, %v4333_v42  ;;  %v4345_v37 = vmul.f32 %v4344_v31, %v4333_v42  ;;  %v4561_v20 = vsel %vm4549_vm14, %v4543_v43, %v4560_v36  ;;  %v9292_v27 = vadd.f32 %v9218_v6, %v7142_v1 }
 0x441   : > { %v4461_v58 = vshll.u32 %v9279_v41, 30  ;;  %vm4355_vm15 = vcmp.eq.s32.totalorder %v4350_v38, 2  ;;  %v4562_v46 = vsel %vm4548_vm13, %v4559_v47, %v4561_v20  ;;  %v4564_v59 = vand.u32 65535, %v9277_v23 }
 0x442   : > { %v4339_v42 = vadd.f32 1.0, %v4338_v16  ;;  %v4346_v44 = vadd.f32 1.0, %v4345_v37  ;;  %v4565_v26 = vshrl.u32 %v9277_v23, 16  ;;  %v4589_v54 = vshrl.u32 %v4558_v21, 16 }
 0x443   : > { %v4462_v14 = vsub.s32 %v4458_v11, %v4461_v58  ;;  %vm4351_vm0 = vcmp.lt.s32.totalorder %v4350_v38, 2  ;;  %vm4352_vm1 = vcmp.eq.s32.totalorder %v4350_v38, 0  ;;  %v4566_v6 = vand.u32 65535, %v4562_v46 }
 0x444   : > { %v4347_v9 = vmul.f32 %v4346_v44, %v4331_v22  ;;  %v4356_v39 = vxor.u32 2147483648, %v4339_v42  ;;  %v4567_v35 = vshrl.u32 %v4562_v46, 16  ;;  %vm4348_vm3 = vweird.f32 %v8841_v56 }
 0x445   : > { %vm4463_vm2 = vcmp.lt.s32.totalorder %v4462_v14, 0  ;;  %v4464_v25 = vsub.s32 0, %v4462_v14  ;;  %v4568_v61 = vmul.u32 %v4566_v6, %v4564_v59  ;;  %v9300_v43 = vmul.u32 %v4566_v6, %v4565_v26 }
 0x446   : > { %v4353_v34 = vxor.u32 2147483648, %v4347_v9  ;;  %v4357_v53 = vsel %vm4355_vm15, %v4356_v39, %v4347_v9  ;;  %v4569_v60 = vmul.u32 %v4567_v35, %v4564_v59  ;;  %v4588_v19 = vand.u32 65535, %v4558_v21 }
 0x447   : > { %v4465_v22 = vsel %vm4463_vm2, %v4464_v25, %v4462_v14  ;;  %v9302_v11 = vmul.u32 %v4589_v54, %v4564_v59  ;;  %v4571_v31 = vmul.u32 %v4567_v35, %v4565_v26  ;;  %v9306_v52 = vadd.f32 %v2791_v24, %v7142_v1 }
 0x448   : > { %v4354_v50 = vsel %vm4352_vm1, %v4339_v42, %v4353_v34  ;;  %v4466_v45 = vclz %v4465_v22  ;;  %v4572_v49 = vshll.u32 %v4569_v60, 16  ;;  %v4454_v56 = vadd.s32 %v9228_v62, %v9226_v57 }
 0x449   : > { %v4358_v17 = vsel %vm4351_vm0, %v4354_v50, %v4357_v53  ;;  %v4574_v47 = vshll.u32 %v9300_v43, 16  ;;  %v4531_v16 = vshrl.u32 %v9953_v51, %v9230_v33  ;;  %v4590_v28 = vmul.u32 %v4588_v19, %v4564_v59 }
 0x44a   : > { %v4359_v40 = vsel %vm4348_vm3, nan, %v4358_v17  ;;  %v5500_v36 = vadd.s32 4294967294, %v4466_v45  ;;  %vm4576_vm4 = vc.u32 %v4568_v61, %v4572_v49  ;;  %v4578_v37 = vadd.s32 %v4572_v49, %v4568_v61 }
 0x44b   : > { %5299 = vst [vmem:[%s6231_s15 + $0xc8] sm:$0xff] %v4359_v40  ;;  %v4577_v38 = vsel %vm4576_vm4, 1, %v9971_v63  ;;  %v4592_v21 = vmul.u32 %v4588_v19, %v4565_v26  ;;  %v4594_v1 = vshll.u32 %v9302_v11, 16  ;;  %v4552_v57 = vsel %vm4550_vm12, %v9259_v18, 2102212464 }
 0x44c   : > { %vm5501_vm5 = vcmp.lt.s32.totalorder %v5500_v36, 0  ;;  %v4579_v62 = vadd.s32 %v4577_v38, %v4571_v31  ;;  %vm4580_vm6 = vc.u32 %v4578_v37, %v4574_v47  ;;  %v4573_v20 = vshrl.u32 %v4569_v60, 16 }
 0x44d   : > { %v4469_v24 = vsel %vm5501_vm5, 0, %v5500_v36  ;;  %v4581_v33 = vsel %vm4580_vm6, 1, %v9971_v63  ;;  %v4593_v42 = vmul.u32 %v4589_v54, %v4565_v26  ;;  %vm4362_vm7 = vcmp.lt.s32.totalorder %v9048_v55, 0 }
 0x44e   : > { %v4470_v44 = vsub.s32 32, %v4469_v24  ;;  %v4471_v58 = vshll.u32 %v4462_v14, %v4469_v24  ;;  %v4474_v46 = vsub.s32 4294967266, %v4469_v24  ;;  %v4583_v9 = vadd.s32 %v4581_v33, %v4579_v62 }
 0x44f   : > { %v4551_v59 = vsel %vm4547_vm11, %v4531_v16, %v9250_v48  ;;  %v4596_v39 = vshll.u32 %v4592_v21, 16  ;;  %vm4598_vm8 = vc.u32 %v4590_v28, %v4594_v1  ;;  %v4484_v35 = vsub.s32 4, %v9279_v41 }
 0x450   : > { %v4472_v18 = vshrl.u32 %v4454_v56, %v4470_v44  ;;  %v4475_v6 = vadd.s32 127, %v4474_v46  ;;  %v4599_v34 = vsel %vm4598_vm8, 1, %v9971_v63  ;;  %v4553_v26 = vsel %vm4549_vm14, %v9255_v29, %v4552_v57 }
 0x451   : > { %v4600_v14 = vadd.s32 %v4594_v1, %v4590_v28  ;;  %v4601_v54 = vadd.s32 %v4599_v34, %v4593_v42  ;;  %v4673_v53 = vand.u32 2139095040, %v9292_v27  ;;  %v4575_v48 = vshrl.u32 %v9300_v43, 16 }
 0x452   : > { %v4473_v25 = vor.u32 %v4472_v18, %v4471_v58  ;;  %v4476_v61 = vshll.u32 %v4475_v6, 23  ;;  %v4584_v60 = vadd.s32 %v4583_v9, %v4573_v20  ;;  %v4595_v50 = vshrl.u32 %v9302_v11, 16 }
 0x453   : > { %vm4602_vm9 = vc.u32 %v4600_v14, %v4596_v39  ;;  %v4670_v22 = vand.u32 2147483647, %v9292_v27  ;;  %v4674_v19 = vshrl.u32 %v4673_v53, 23  ;;  %v4485_v29 = vsel %vm4362_vm7, %v4484_v35, %v9279_v41 }
 0x454   : > { %v4477_v17 = vor.u32 4788187, %v4476_v61  ;;  %v4480_v45 = vcvt.s32.f32 %v4473_v25  ;;  %v4603_v31 = vsel %vm4602_vm9, 1, %v9971_v63  ;;  %vm9339_vm10 = vcmp.le.f32.partialorder %v4360_v7, 0.7853982 }
 0x455   : > { %v4597_v43 = vshrl.u32 %v4592_v21, 16  ;;  %v4605_v11 = vadd.s32 %v4603_v31, %v4601_v54  ;;  %v5505_v40 = vadd.s32 4294967169, %v4674_v19  ;;  %v4554_v47 = vsel %vm4548_vm13, %v4551_v59, %v4553_v26 }
 0x456   : > { %v4478_v56 = vand.u32 2147483647, %v4477_v17  ;;  %v4585_v36 = vadd.s32 %v4584_v60, %v4575_v48  ;;  %v4604_v16 = vadd.s32 %v4600_v14, %v4596_v39  ;;  %v4487_v41 = vsel %vm9339_vm10, 0, %v4485_v29 }
 0x457   : > { %v4606_v37 = vadd.s32 %v4605_v11, %v4595_v50  ;;  %v4677_v38 = vand.u32 8388607, %v4670_v22  ;;  %v4680_v7 = vadd.s32 1, %v5505_v40  ;;  %v4608_v21 = vmul.u32 %v9277_v23, %v4554_v47 }
 0x458   : > { %v4481_v28 = vmul.f32 %v4480_v45, %v4478_v56  ;;  %v4504_v62 = vadd.s32 3, %v4487_v41  ;;  %vm4610_vm12 = vc.u32 %v4585_v36, %v4604_v16  ;;  %v4828_v42 = vand.u32 2139095040, %v9306_v52 }
 0x459   : > { %v4607_v1 = vadd.s32 %v4606_v37, %v4597_v43  ;;  %vm4681_vm11 = vcmp.gt.s32.totalorder %v4680_v7, 0  ;;  %v4678_v20 = vor.u32 8388608, %v4677_v38  ;;  %v9355_v58 = vmul.f32 %v7414_v4, %v7877_v15 }
 0x45a   : > { %v4482_v57 = vxor.u32 2147483648, %v4481_v28  ;;  %v4682_v30 = vsel %vm4681_vm11, %v4680_v7, 0  ;;  %v9366_v39 = vand.u32 3, %v4504_v62  ;;  %v4825_v6 = vand.u32 2147483647, %v9306_v52 }
 0x45b   : > { %v4611_v24 = vadd.s32 1, %v4607_v1  ;;  %v4684_v33 = vand.u32 31, %v4682_v30  ;;  %v9369_v35 = vadd.s32 %v4604_v16, %v4585_v36  ;;  %v9371_v15 = vshrl.u32 %v4682_v30, 5 }
 0x45c   : > { %v4483_v44 = vsel %vm4362_vm7, %v4482_v57, %v4481_v28  ;;  %v9373_v34 = vshll.u32 %v4678_v20, 8  ;;  %v4829_v26 = vshrl.u32 %v4828_v42, 23  ;;  %vm4510_vm13 = vcmp.eq.s32.totalorder %v9366_v39, 2 }
 0x45d   : > { %v9360_v23 = vsel %vm9339_vm10, %v9048_v55, %v4483_v44  ;;  %v4612_v46 = vsel %vm4610_vm12, %v4611_v24, %v4607_v1  ;;  %v9362_v9 = vsub.s32 32, %v4684_v33  ;;  %v4690_v25 = vshll.u32 %v9946_v12, %v4684_v33 }
 0x45e   : > { %v4488_v59 = vmul.f32 %v9360_v23, %v9360_v23  ;;  %v4613_v18 = vadd.s32 %v4612_v46, %v4608_v21  ;;  %v4693_v48 = vshll.u32 %v9947_v2, %v4684_v33  ;;  %v4696_v50 = vshll.u32 %v9945_v5, %v4684_v33 }
 0x45f   : > { %v4691_v61 = vshrl.u32 %v9947_v2, %v9362_v9  ;;  %v4694_v60 = vshrl.u32 %v9945_v5, %v9362_v9  ;;  %v4697_v29 = vshrl.u32 %v9955_v8, %v9362_v9  ;;  %v4687_v31 = vshll.u32 %v9953_v51, %v4684_v33 }
 0x460   : > { %v4489_v14 = vmul.f32 -0.001358992, %v4488_v59  ;;  %v4496_v54 = vmul.f32 -0.00019511016, %v4488_v59  ;;  %v4614_v53 = vadd.s32 536870912, %v4613_v18  ;;  %v4688_v49 = vshrl.u32 %v9946_v12, %v9362_v9 }
 0x461   : > { %v4699_v43 = vshll.u32 %v9955_v8, %v4684_v33  ;;  %v4700_v11 = vshrl.u32 %v9956_v13, %v9362_v9  ;;  %v9395_v36 = vand.u32 65535, %v9373_v34  ;;  %vm4507_vm14 = vcmp.eq.s32.totalorder %v9366_v39, 0 }
 0x462   : > { %v4490_v19 = vadd.f32 0.041655596, %v4489_v14  ;;  %v4497_v17 = vadd.f32 0.008332121, %v4496_v54  ;;  %v9382_v45 = vshrl.u32 %v4614_v53, 30  ;;  %v9398_v16 = vor.u32 %v4691_v61, %v4690_v25 }
 0x463   : > { %v4695_v41 = vor.u32 %v4694_v60, %v4693_v48  ;;  %v4698_v37 = vor.u32 %v4697_v29, %v4696_v50  ;;  %v4701_v38 = vor.u32 %v4700_v11, %v4699_v43  ;;  %vm4506_vm15 = vcmp.lt.s32.totalorder %v9366_v39, 2 }
 0x464   : > { %v4491_v40 = vmul.f32 %v4490_v19, %v4488_v59  ;;  %v4498_v56 = vmul.f32 %v4497_v17, %v4488_v59  ;;  %v4616_v47 = vshll.u32 %v9382_v45, 30  ;;  %vm4702_vm0 = vcmp.lt.s32.totalorder %v9371_v15, 1 }
 0x465   : > { %vm4503_vm1 = vweird.f32 %v9048_v55  ;;  %v4689_v21 = vor.u32 %v4688_v49, %v4687_v31  ;;  %vm4704_vm2 = vcmp.lt.s32.totalorder %v9371_v15, 3  ;;  %vm4705_vm3 = vcmp.lt.s32.totalorder %v9371_v15, 4 }
 0x466   : > { %v4492_v7 = vadd.f32 -0.4999988, %v4491_v40  ;;  %v4499_v28 = vadd.f32 -0.16666654, %v4498_v56  ;;  %v9401_v1 = vsub.s32 %v4613_v18, %v4616_v47  ;;  %v5508_v57 = vadd.s32 4294967169, %v4829_v26 }
 0x467   : > { %vm4517_vm5 = vcmp.lt.s32.totalorder %v9090_v3, 0  ;;  %vm4703_vm6 = vcmp.lt.s32.totalorder %v9371_v15, 2  ;;  %v4711_v20 = vsel %vm4705_vm3, %v4698_v37, 920167782  ;;  %v4714_v33 = vsel %vm4702_vm0, %v9398_v16, %v4695_v41 }
 0x468   : > { %v4493_v62 = vmul.f32 %v4492_v7, %v4488_v59  ;;  %v4500_v30 = vmul.f32 %v4499_v28, %v4488_v59  ;;  %vm4618_vm4 = vcmp.lt.s32.totalorder %v9401_v1, 0  ;;  %v4619_v24 = vsub.s32 0, %v9401_v1 }
 0x469   : > { %v4715_v42 = vsel %vm4705_vm3, %v4701_v38, 1326507024  ;;  %v4720_v18 = vshrl.u32 %v9373_v34, 16  ;;  %v4710_v14 = vsel %vm4702_vm0, %v4689_v21, %v9398_v16  ;;  %v9425_v53 = vadd.s32 1, %v5508_v57 }
 0x46a   : > { %v4494_v44 = vadd.f32 1.0, %v4493_v62  ;;  %v4501_v46 = vadd.f32 1.0, %v4500_v30  ;;  %v4620_v59 = vsel %vm4618_vm4, %v4619_v24, %v9401_v1  ;;  %v4716_v54 = vsel %vm4704_vm2, %v4698_v37, %v4715_v42 }
 0x46b   : > { %v4621_v26 = vclz %v4620_v59  ;;  %v4712_v48 = vsel %vm4704_vm2, %v4695_v41, %v4711_v20  ;;  %v4717_v60 = vsel %vm4703_vm6, %v4714_v33, %v4716_v54  ;;  %v9434_v29 = vand.u32 8388607, %v4825_v6 }
 0x46c   : > { %v4502_v25 = vmul.f32 %v4501_v46, %v9360_v23  ;;  %v4511_v61 = vxor.u32 2147483648, %v4494_v44  ;;  %v4721_v19 = vand.u32 65535, %v4717_v60  ;;  %v4722_v17 = vshrl.u32 %v4717_v60, 16 }
 0x46d   : > { %v5503_v50 = vadd.s32 4294967294, %v4621_v26  ;;  %v4639_v23 = vsub.s32 4, %v9382_v45  ;;  %v4686_v43 = vshrl.u32 %v9953_v51, %v9362_v9  ;;  %v4707_v11 = vsel %vm4705_vm3, %v4695_v41, 2102212464 }
 0x46e   : > { %v4508_v31 = vxor.u32 2147483648, %v4502_v25  ;;  %v4512_v49 = vsel %vm4510_vm13, %v4511_v61, %v4502_v25  ;;  %v4713_v40 = vsel %vm4703_vm6, %v4710_v14, %v4712_v48  ;;  %v4724_v56 = vmul.u32 %v4722_v17, %v9395_v36 }
 0x46f   : > { %vm5504_vm7 = vcmp.lt.s32.totalorder %v5503_v50, 0  ;;  %vm4836_vm8 = vcmp.gt.s32.totalorder %v9425_v53, 0  ;;  %vm9451_vm9 = vcmp.le.f32.partialorder %v4515_v0, 0.7853982  ;;  %v4723_v41 = vmul.u32 %v4721_v19, %v9395_v36 }
 0x470   : > { %v4509_v47 = vsel %vm4507_vm14, %v4494_v44, %v4508_v31  ;;  %v4624_v9 = vsel %vm5504_vm7, 0, %v5503_v50  ;;  %v4725_v38 = vmul.u32 %v4721_v19, %v4720_v18  ;;  %v4640_v0 = vsel %vm4517_vm5, %v4639_v23, %v9382_v45 }
 0x471   : > { %v4513_v7 = vsel %vm4506_vm15, %v4509_v47, %v4512_v49  ;;  %v4625_v28 = vsub.s32 32, %v4624_v9  ;;  %v4626_v57 = vshll.u32 %v9401_v1, %v4624_v9  ;;  %v4629_v62 = vsub.s32 4294967266, %v4624_v9 }
 0x472   : > { %v4514_v30 = vsel %vm4503_vm1, nan, %v4513_v7  ;;  %v4743_v24 = vand.u32 65535, %v4713_v40  ;;  %v4744_v20 = vshrl.u32 %v4713_v40, 16  ;;  %v4726_v44 = vmul.u32 %v4722_v17, %v4720_v18 }
 0x473   : > { %v4627_v33 = vshrl.u32 %v9369_v35, %v4625_v28  ;;  %v4630_v42 = vadd.s32 127, %v4629_v62  ;;  %v4727_v46 = vshll.u32 %v4724_v56, 16  ;;  %5300 = vst [vmem:[%s6231_s15 + $0xd0] sm:$0xff] %v4514_v30  ;;  %v4706_v39 = vsel %vm4702_vm0, %v4686_v43, %v4689_v21 }
 0x474   : > { %v4708_v55 = vsel %vm4704_vm2, %v9398_v16, %v4707_v11  ;;  %v4728_v1 = vshrl.u32 %v4724_v56, 16  ;;  %v4729_v59 = vshll.u32 %v4725_v38, 16  ;;  %v4745_v35 = vmul.u32 %v4743_v24, %v9395_v36 }
 0x475   : > { %v4628_v26 = vor.u32 %v4627_v33, %v4626_v57  ;;  %v4631_v14 = vshll.u32 %v4630_v42, 23  ;;  %vm4731_vm10 = vc.u32 %v4723_v41, %v4727_v46  ;;  %v4733_v45 = vadd.s32 %v4727_v46, %v4723_v41 }
 0x476   : > { %v4732_v54 = vsel %vm4731_vm10, 1, %v9971_v63  ;;  %v4746_v25 = vmul.u32 %v4744_v20, %v9395_v36  ;;  %v4747_v61 = vmul.u32 %v4743_v24, %v4720_v18  ;;  %v4748_v16 = vmul.u32 %v4744_v20, %v4720_v18 }
 0x477   : > { %v4632_v48 = vor.u32 4788187, %v4631_v14  ;;  %v4635_v60 = vcvt.s32.f32 %v4628_v26  ;;  %v4734_v21 = vadd.s32 %v4732_v54, %v4726_v44  ;;  %vm4735_vm11 = vc.u32 %v4733_v45, %v4729_v59 }
 0x478   : > { %v4736_v50 = vsel %vm4735_vm11, 1, %v9971_v63  ;;  %v4749_v19 = vshll.u32 %v4746_v25, 16  ;;  %v4751_v17 = vshll.u32 %v4747_v61, 16  ;;  %v4642_v49 = vsel %vm9451_vm9, 0, %v4640_v0 }
 0x479   : > { %v4633_v31 = vand.u32 2147483647, %v4632_v48  ;;  %v4738_v23 = vadd.s32 %v4736_v50, %v4734_v21  ;;  %v4833_v43 = vor.u32 8388608, %v9434_v29  ;;  %v4709_v36 = vsel %vm4703_vm6, %v4706_v39, %v4708_v55 }
 0x47a   : > { %vm4753_vm12 = vc.u32 %v4745_v35, %v4749_v19  ;;  %v4755_v11 = vadd.s32 %v4749_v19, %v4745_v35  ;;  %v4837_v40 = vsel %vm4836_vm8, %v9425_v53, 0  ;;  %v4730_v18 = vshrl.u32 %v4725_v38, 16 }
 0x47b   : > { %v4636_v56 = vmul.f32 %v4635_v60, %v4633_v31  ;;  %v4739_v47 = vadd.s32 %v4738_v23, %v4728_v1  ;;  %v4754_v9 = vsel %vm4753_vm12, 1, %v9971_v63  ;;  %v4750_v41 = vshrl.u32 %v4746_v25, 16 }
 0x47c   : > { %v4756_v7 = vadd.s32 %v4754_v9, %v4748_v16  ;;  %vm4757_vm13 = vc.u32 %v4755_v11, %v4751_v17  ;;  %v4839_v28 = vand.u32 31, %v4837_v40  ;;  %v4659_v29 = vadd.s32 3, %v4642_v49 }
 0x47d   : > { %v4637_v57 = vxor.u32 2147483648, %v4636_v56  ;;  %v4752_v62 = vshrl.u32 %v4747_v61, 16  ;;  %v4758_v15 = vsel %vm4757_vm13, 1, %v9971_v63  ;;  %v4763_v0 = vmul.u32 %v9373_v34, %v4709_v36 }
 0x47e   : > { %v4760_v30 = vadd.s32 %v4758_v15, %v4756_v7  ;;  %v9486_v24 = vshrl.u32 %v4837_v40, 5  ;;  %v9488_v53 = vsub.s32 32, %v4839_v28  ;;  %v9492_v20 = vadd.s32 %v4739_v47, %v4730_v18 }
 0x47f   : > { %v4638_v38 = vsel %vm4517_vm5, %v4637_v57, %v4636_v56  ;;  %v9494_v33 = vadd.s32 %v4755_v11, %v4751_v17  ;;  %v4842_v42 = vshll.u32 %v9953_v51, %v4839_v28  ;;  %v4845_v39 = vshll.u32 %v9946_v12, %v4839_v28 }
 0x480   : > { %v4641_v44 = vsel %vm9451_vm9, %v9090_v3, %v4638_v38  ;;  %v4761_v46 = vadd.s32 %v4760_v30, %v4750_v41  ;;  %v4843_v34 = vshrl.u32 %v9946_v12, %v9488_v53  ;;  %v4846_v1 = vshrl.u32 %v9947_v2, %v9488_v53 }
 0x481   : > { %v4643_v55 = vmul.f32 %v4641_v44, %v4641_v44  ;;  %v4848_v59 = vshll.u32 %v9947_v2, %v4839_v28  ;;  %v4851_v26 = vshll.u32 %v9945_v5, %v4839_v28  ;;  %v4849_v45 = vshrl.u32 %v9945_v5, %v9488_v53 }
 0x482   : > { %v4762_v14 = vadd.s32 %v4761_v46, %v4752_v62  ;;  %v4852_v37 = vshrl.u32 %v9955_v8, %v9488_v53  ;;  %v4854_v54 = vshll.u32 %v9955_v8, %v4839_v28  ;;  %vm4765_vm14 = vc.u32 %v9492_v20, %v9494_v33 }
 0x483   : > { %v4644_v35 = vmul.f32 -0.001358992, %v4643_v55  ;;  %v4651_v25 = vmul.f32 -0.00019511016, %v4643_v55  ;;  %v9514_v61 = vor.u32 %v4843_v34, %v4842_v42  ;;  %v9516_v60 = vor.u32 %v4846_v1, %v4845_v39 }
 0x484   : > { %v4766_v48 = vadd.s32 1, %v4762_v14  ;;  %v4853_v21 = vor.u32 %v4852_v37, %v4851_v26  ;;  %v4855_v50 = vshrl.u32 %v9956_v13, %v9488_v53  ;;  %vm4857_vm15 = vcmp.lt.s32.totalorder %v9486_v24, 1 }
 0x485   : > { %v4645_v16 = vadd.f32 0.041655596, %v4644_v35  ;;  %v4652_v19 = vadd.f32 0.008332121, %v4651_v25  ;;  %vm4860_vm0 = vcmp.lt.s32.totalorder %v9486_v24, 4  ;;  %v9522_v31 = vor.u32 %v4849_v45, %v4848_v59 }
 0x486   : > { %v4767_v17 = vsel %vm4765_vm14, %v4766_v48, %v4762_v14  ;;  %v4856_v49 = vor.u32 %v4855_v50, %v4854_v54  ;;  %v9524_v23 = vshll.u32 %v4833_v43, 8  ;;  %vm4859_vm1 = vcmp.lt.s32.totalorder %v9486_v24, 3 }
 0x487   : > { %v4646_v36 = vmul.f32 %v4645_v16, %v4643_v55  ;;  %v4653_v11 = vmul.f32 %v4652_v19, %v4643_v55  ;;  %v4768_v40 = vadd.s32 %v4767_v17, %v4763_v0  ;;  %v2793_v56 = vmul.f32 %v7414_v4, %v7880_v32 }
 0x488   : > { %vm4858_vm2 = vcmp.lt.s32.totalorder %v9486_v24, 2  ;;  %v4865_v18 = vsel %vm4857_vm15, %v9514_v61, %v9516_v60  ;;  %v4866_v47 = vsel %vm4860_vm0, %v4853_v21, 920167782  ;;  %v4660_v41 = vand.u32 3, %v4659_v29 }
 0x489   : > { %v4647_v43 = vadd.f32 -0.4999988, %v4646_v36  ;;  %v4654_v9 = vadd.f32 -0.16666654, %v4653_v11  ;;  %v4769_v7 = vadd.s32 536870912, %v4768_v40  ;;  %v4867_v28 = vsel %vm4859_vm1, %v9522_v31, %v4866_v47 }
 0x48a   : > { %v4869_v4 = vsel %vm4857_vm15, %v9516_v60, %v9522_v31  ;;  %v4870_v32 = vsel %vm4860_vm0, %v4856_v49, 1326507024  ;;  %v4874_v57 = vand.u32 65535, %v9524_v23  ;;  %v4868_v29 = vsel %vm4858_vm2, %v4865_v18, %v4867_v28 }
 0x48b   : > { %v4648_v62 = vmul.f32 %v4647_v43, %v4643_v55  ;;  %v4655_v15 = vmul.f32 %v4654_v9, %v4643_v55  ;;  %v9546_v30 = vshrl.u32 %v4769_v7, 30  ;;  %v9552_v0 = vadd.f32 %v9355_v58, %v7392_v10 }
 0x48c   : > { %v9555_v38 = vadd.f32 %v2793_v56, %v7392_v10  ;;  %v4871_v42 = vsel %vm4859_vm1, %v4853_v21, %v4870_v32  ;;  %v4899_v46 = vshrl.u32 %v4868_v29, 16  ;;  %vm4658_vm3 = vweird.f32 %v9090_v3 }
 0x48d   : > { %v4649_v34 = vadd.f32 1.0, %v4648_v62  ;;  %v4656_v39 = vadd.f32 1.0, %v4655_v15  ;;  %v4771_v55 = vshll.u32 %v9546_v30, 30  ;;  %vm4665_vm4 = vcmp.eq.s32.totalorder %v4660_v41, 2 }
 0x48e   : > { %v4872_v1 = vsel %vm4858_vm2, %v4869_v4, %v4871_v42  ;;  %v4875_v58 = vshrl.u32 %v9524_v23, 16  ;;  %v4898_v59 = vand.u32 65535, %v4868_v29  ;;  %v9564_v45 = vmul.u32 %v4899_v46, %v4874_v57 }
 0x48f   : > { %v4657_v26 = vmul.f32 %v4656_v39, %v4641_v44  ;;  %v4666_v10 = vxor.u32 2147483648, %v4649_v34  ;;  %v4772_v14 = vsub.s32 %v4768_v40, %v4771_v55  ;;  %vm4661_vm5 = vcmp.lt.s32.totalorder %v4660_v41, 2 }
 0x490   : > { %vm4662_vm6 = vcmp.eq.s32.totalorder %v4660_v41, 0  ;;  %v4876_v37 = vand.u32 65535, %v4872_v1  ;;  %v4877_v54 = vshrl.u32 %v4872_v1, 16  ;;  %v4900_v19 = vmul.u32 %v4898_v59, %v4874_v57 }
 0x491   : > { %v4663_v35 = vxor.u32 2147483648, %v4657_v26  ;;  %v4667_v25 = vsel %vm4665_vm4, %v4666_v10, %v4657_v26  ;;  %vm4773_vm7 = vcmp.lt.s32.totalorder %v4772_v14, 0  ;;  %v4774_v48 = vsub.s32 0, %v4772_v14 }
 0x492   : > { %v4878_v21 = vmul.u32 %v4876_v37, %v4874_v57  ;;  %v4879_v50 = vmul.u32 %v4877_v54, %v4874_v57  ;;  %v4880_v16 = vmul.u32 %v4876_v37, %v4875_v58  ;;  %v9566_v44 = vmul.u32 %v4898_v59, %v4875_v58 }
 0x493   : > { %v4664_v17 = vsel %vm4662_vm6, %v4649_v34, %v4663_v35  ;;  %v4775_v49 = vsel %vm4773_vm7, %v4774_v48, %v4772_v14  ;;  %v4904_v36 = vshll.u32 %v9564_v45, 16  ;;  %v4881_v56 = vmul.u32 %v4877_v54, %v4875_v58 }
 0x494   : > { %v4668_v11 = vsel %vm4661_vm5, %v4664_v17, %v4667_v25  ;;  %v4776_v40 = vclz %v4775_v49  ;;  %v4882_v18 = vshll.u32 %v4879_v50, 16  ;;  %v4764_v43 = vadd.s32 %v9494_v33, %v9492_v20 }
 0x495   : > { %v4669_v47 = vsel %vm4658_vm3, nan, %v4668_v11  ;;  %v4841_v9 = vshrl.u32 %v9953_v51, %v9488_v53  ;;  %v4884_v7 = vshll.u32 %v4880_v16, 16  ;;  %v4903_v32 = vmul.u32 %v4899_v46, %v4875_v58 }
 0x496   : > { %v5506_v28 = vadd.s32 4294967294, %v4776_v40  ;;  %vm4886_vm8 = vc.u32 %v4878_v21, %v4882_v18  ;;  %v4888_v4 = vadd.s32 %v4882_v18, %v4878_v21  ;;  %5301 = vst [vmem:[%s6231_s15 + $0xd8] sm:$0xff] %v4669_v47  ;;  %v4883_v41 = vshrl.u32 %v4879_v50, 16 }
 0x497   : > { %v4887_v57 = vsel %vm4886_vm8, 1, %v9971_v63  ;;  %v4906_v62 = vshll.u32 %v9566_v44, 16  ;;  %vm4908_vm9 = vc.u32 %v4900_v19, %v4904_v36  ;;  %vm4672_vm10 = vcmp.lt.s32.totalorder %v9292_v27, 0 }
 0x498   : > { %vm5507_vm11 = vcmp.lt.s32.totalorder %v5506_v28, 0  ;;  %v4889_v3 = vadd.s32 %v4887_v57, %v4881_v56  ;;  %vm4890_vm12 = vc.u32 %v4888_v4, %v4884_v7  ;;  %v4910_v20 = vadd.s32 %v4904_v36, %v4900_v19 }
 0x499   : > { %v4779_v33 = vsel %vm5507_vm11, 0, %v5506_v28  ;;  %v4862_v53 = vsel %vm4860_vm0, %v9522_v31, 2102212464  ;;  %v4891_v15 = vsel %vm4890_vm12, 1, %v9971_v63  ;;  %v4909_v29 = vsel %vm4908_vm9, 1, %v9971_v63 }
 0x49a   : > { %v4780_v42 = vsub.s32 32, %v4779_v33  ;;  %v4781_v46 = vshll.u32 %v4772_v14, %v4779_v33  ;;  %v4784_v34 = vsub.s32 4294967266, %v4779_v33  ;;  %v4893_v39 = vadd.s32 %v4891_v15, %v4889_v3 }
 0x49b   : > { %v4861_v55 = vsel %vm4857_vm15, %v4841_v9, %v9514_v61  ;;  %v4885_v1 = vshrl.u32 %v4880_v16, 16  ;;  %v4905_v58 = vshrl.u32 %v9564_v45, 16  ;;  %v4911_v59 = vadd.s32 %v4909_v29, %v4903_v32 }
 0x49c   : > { %v4782_v26 = vshrl.u32 %v4764_v43, %v4780_v42  ;;  %v4785_v10 = vadd.s32 127, %v4784_v34  ;;  %v4894_v37 = vadd.s32 %v4893_v39, %v4883_v41  ;;  %vm4912_vm13 = vc.u32 %v4910_v20, %v4906_v62 }
 0x49d   : > { %v4794_v31 = vsub.s32 4, %v9546_v30  ;;  %v4863_v14 = vsel %vm4859_vm1, %v9516_v60, %v4862_v53  ;;  %v4913_v54 = vsel %vm4912_vm13, 1, %v9971_v63  ;;  %v4980_v35 = vand.u32 2147483647, %v9552_v0 }
 0x49e   : > { %v4783_v25 = vor.u32 %v4782_v26, %v4781_v46  ;;  %v4786_v61 = vshll.u32 %v4785_v10, 23  ;;  %v4907_v48 = vshrl.u32 %v9566_v44, 16  ;;  %v4915_v45 = vadd.s32 %v4913_v54, %v4911_v59 }
 0x49f   : > { %v4895_v21 = vadd.s32 %v4894_v37, %v4885_v1  ;;  %v4914_v50 = vadd.s32 %v4910_v20, %v4906_v62  ;;  %v4983_v16 = vand.u32 2139095040, %v9552_v0  ;;  %v5138_v19 = vand.u32 2139095040, %v9555_v38 }
 0x4a0   : > { %v4787_v17 = vor.u32 4788187, %v4786_v61  ;;  %v4790_v49 = vcvt.s32.f32 %v4783_v25  ;;  %v4864_v60 = vsel %vm4858_vm2, %v4861_v55, %v4863_v14  ;;  %v4916_v36 = vadd.s32 %v4915_v45, %v4905_v58 }
 0x4a1   : > { %v4795_v11 = vsel %vm4672_vm10, %v4794_v31, %v9546_v30  ;;  %v4984_v40 = vshrl.u32 %v4983_v16, 23  ;;  %v4987_v44 = vand.u32 8388607, %v4980_v35  ;;  %v5139_v56 = vshrl.u32 %v5138_v19, 23 }
 0x4a2   : > { %vm9607_vm14 = vcmp.le.f32.partialorder %v4670_v22, 0.7853982  ;;  %v4788_v47 = vand.u32 2147483647, %v4787_v17  ;;  %v4917_v43 = vadd.s32 %v4916_v36, %v4907_v48  ;;  %v4918_v24 = vmul.u32 %v9524_v23, %v4864_v60 }
 0x4a3   : > { %vm4920_vm15 = vc.u32 %v4895_v21, %v4914_v50  ;;  %v5511_v9 = vadd.s32 4294967169, %v4984_v40  ;;  %v5514_v7 = vadd.s32 4294967169, %v5139_v56  ;;  %v4797_v30 = vsel %vm9607_vm14, 0, %v4795_v11 }
 0x4a4   : > { %v4791_v28 = vmul.f32 %v4790_v49, %v4788_v47  ;;  %v4921_v4 = vadd.s32 1, %v4917_v43  ;;  %v4988_v32 = vor.u32 8388608, %v4987_v44  ;;  %v4814_v22 = vadd.s32 3, %v4797_v30 }
 0x4a5   : > { %v4990_v41 = vadd.s32 1, %v5511_v9  ;;  %v5145_v20 = vadd.s32 1, %v5514_v7  ;;  %v5135_v53 = vand.u32 2147483647, %v9555_v38  ;;  %v9626_v59 = vadd.s32 %v4914_v50, %v4895_v21 }
 0x4a6   : > { %v4792_v57 = vxor.u32 2147483648, %v4791_v28  ;;  %v4922_v62 = vsel %vm4920_vm15, %v4921_v4, %v4917_v43  ;;  %v9620_v46 = vshll.u32 %v4988_v32, 8  ;;  %v9622_v39 = vand.u32 3, %v4814_v22 }
 0x4a7   : > { %v4923_v3 = vadd.s32 %v4922_v62, %v4918_v24  ;;  %vm4991_vm0 = vcmp.gt.s32.totalorder %v4990_v41, 0  ;;  %vm5146_vm1 = vcmp.gt.s32.totalorder %v5145_v20, 0  ;;  %v9637_v14 = vand.u32 8388607, %v5135_v53 }
 0x4a8   : > { %v4793_v33 = vsel %vm4672_vm10, %v4792_v57, %v4791_v28  ;;  %v4992_v23 = vsel %vm4991_vm0, %v4990_v41, 0  ;;  %v9630_v37 = vand.u32 65535, %v9620_v46  ;;  %v9633_v31 = vshrl.u32 %v9620_v46, 16 }
 0x4a9   : > { %v4796_v15 = vsel %vm9607_vm14, %v9292_v27, %v4793_v33  ;;  %v4924_v29 = vadd.s32 536870912, %v4923_v3  ;;  %v4994_v42 = vand.u32 31, %v4992_v23  ;;  %v9639_v61 = vshrl.u32 %v4992_v23, 5 }
 0x4aa   : > { %v4798_v34 = vmul.f32 %v4796_v15, %v4796_v15  ;;  %v9641_v48 = vsel %vm5146_vm1, %v5145_v20, 0  ;;  %vm4820_vm2 = vcmp.eq.s32.totalorder %v9622_v39, 2  ;;  %vm4817_vm3 = vcmp.eq.s32.totalorder %v9622_v39, 0 }
 0x4ab   : > { %v9624_v55 = vshrl.u32 %v4924_v29, 30  ;;  %v4995_v26 = vsub.s32 32, %v4994_v42  ;;  %v4997_v21 = vshll.u32 %v9953_v51, %v4994_v42  ;;  %v5000_v50 = vshll.u32 %v9946_v12, %v4994_v42 }
 0x4ac   : > { %v4799_v1 = vmul.f32 -0.001358992, %v4798_v34  ;;  %v4806_v58 = vmul.f32 -0.00019511016, %v4798_v34  ;;  %v9649_v16 = vshrl.u32 %v9641_v48, 5  ;;  %v5006_v49 = vshll.u32 %v9945_v5, %v4994_v42 }
 0x4ad   : > { %v4926_v10 = vshll.u32 %v9624_v55, 30  ;;  %v5007_v60 = vshrl.u32 %v9955_v8, %v4995_v26  ;;  %v4998_v11 = vshrl.u32 %v9946_v12, %v4995_v26  ;;  %v5001_v40 = vshrl.u32 %v9947_v2, %v4995_v26 }
 0x4ae   : > { %v4800_v54 = vadd.f32 0.041655596, %v4799_v1  ;;  %v4807_v25 = vadd.f32 0.008332121, %v4806_v58  ;;  %vm4816_vm5 = vcmp.lt.s32.totalorder %v9622_v39, 2  ;;  %vm4827_vm6 = vcmp.lt.s32.totalorder %v9306_v52, 0 }
 0x4af   : > { %v9644_v45 = vsub.s32 %v4923_v3, %v4926_v10  ;;  %v5009_v18 = vshll.u32 %v9955_v8, %v4994_v42  ;;  %v5010_v47 = vshrl.u32 %v9956_v13, %v4995_v26  ;;  %vm4813_vm7 = vweird.f32 %v9292_v27 }
 0x4b0   : > { %v4801_v19 = vmul.f32 %v4800_v54, %v4798_v34  ;;  %v4808_v17 = vmul.f32 %v4807_v25, %v4798_v34  ;;  %v4949_v24 = vsub.s32 4, %v9624_v55  ;;  %v5003_v9 = vshll.u32 %v9947_v2, %v4994_v42 }
 0x4b1   : > { %vm4928_vm4 = vcmp.lt.s32.totalorder %v9644_v45, 0  ;;  %v4929_v36 = vsub.s32 0, %v9644_v45  ;;  %v5004_v7 = vshrl.u32 %v9945_v5, %v4995_v26  ;;  %v5008_v32 = vor.u32 %v5007_v60, %v5006_v49 }
 0x4b2   : > { %v4802_v44 = vadd.f32 -0.4999988, %v4801_v19  ;;  %v4809_v56 = vadd.f32 -0.16666654, %v4808_v17  ;;  %v4999_v41 = vor.u32 %v4998_v11, %v4997_v21  ;;  %v5002_v57 = vor.u32 %v5001_v40, %v5000_v50 }
 0x4b3   : > { %v4930_v43 = vsel %vm4928_vm4, %v4929_v36, %v9644_v45  ;;  %v5011_v62 = vor.u32 %v5010_v47, %v5009_v18  ;;  %vm5015_vm8 = vcmp.lt.s32.totalorder %v9639_v61, 4  ;;  %vm5012_vm9 = vcmp.lt.s32.totalorder %v9639_v61, 1 }
 0x4b4   : > { %v4803_v28 = vmul.f32 %v4802_v44, %v4798_v34  ;;  %v4810_v30 = vmul.f32 %v4809_v56, %v4798_v34  ;;  %v4931_v4 = vclz %v4930_v43  ;;  %vm9671_vm10 = vcmp.le.f32.partialorder %v4825_v6, 0.7853982 }
 0x4b5   : > { %v4996_v23 = vshrl.u32 %v9953_v51, %v4995_v26  ;;  %v5005_v29 = vor.u32 %v5004_v7, %v5003_v9  ;;  %vm5013_vm11 = vcmp.lt.s32.totalorder %v9639_v61, 2  ;;  %vm5014_vm12 = vcmp.lt.s32.totalorder %v9639_v61, 3 }
 0x4b6   : > { %v4804_v22 = vadd.f32 1.0, %v4803_v28  ;;  %v4811_v3 = vadd.f32 1.0, %v4810_v30  ;;  %v5509_v20 = vadd.s32 4294967294, %v4931_v4  ;;  %v5021_v1 = vsel %vm5015_vm8, %v5008_v32, 920167782 }
 0x4b7   : > { %v5017_v6 = vsel %vm5015_vm8, %v5005_v29, 2102212464  ;;  %v5020_v10 = vsel %vm5012_vm9, %v4999_v41, %v5002_v57  ;;  %v5025_v26 = vsel %vm5015_vm8, %v5011_v62, 1326507024  ;;  %v4950_v19 = vsel %vm4827_vm6, %v4949_v24, %v9624_v55 }
 0x4b8   : > { %v4812_v42 = vmul.f32 %v4811_v3, %v4796_v15  ;;  %v4821_v34 = vxor.u32 2147483648, %v4804_v22  ;;  %vm5510_vm13 = vcmp.lt.s32.totalorder %v5509_v20, 0  ;;  %v5022_v17 = vsel %vm5014_vm12, %v5005_v29, %v5021_v1 }
 0x4b9   : > { %v4934_v58 = vsel %vm5510_vm13, 0, %v5509_v20  ;;  %v5024_v49 = vsel %vm5012_vm9, %v5002_v57, %v5005_v29  ;;  %v5026_v11 = vsel %vm5014_vm12, %v5008_v32, %v5025_v26  ;;  %v5018_v44 = vsel %vm5014_vm12, %v5002_v57, %v5017_v6 }
 0x4ba   : > { %v4818_v54 = vxor.u32 2147483648, %v4812_v42  ;;  %v4822_v25 = vsel %vm4820_vm2, %v4821_v34, %v4812_v42  ;;  %v4935_v15 = vsub.s32 32, %v4934_v58  ;;  %v4936_v21 = vshll.u32 %v9644_v45, %v4934_v58 }
 0x4bb   : > { %v4939_v50 = vsub.s32 4294967266, %v4934_v58  ;;  %v5016_v45 = vsel %vm5012_vm9, %v4996_v23, %v4999_v41  ;;  %v5023_v56 = vsel %vm5013_vm11, %v5020_v10, %v5022_v17  ;;  %v5027_v47 = vsel %vm5013_vm11, %v5024_v49, %v5026_v11 }
 0x4bc   : > { %v4819_v60 = vsel %vm4817_vm3, %v4804_v22, %v4818_v54  ;;  %v4937_v36 = vshrl.u32 %v9626_v59, %v4935_v15  ;;  %v9714_v43 = vand.u32 31, %v9641_v48  ;;  %v5031_v39 = vand.u32 65535, %v5027_v47 }
 0x4bd   : > { %v4823_v55 = vsel %vm4816_vm5, %v4819_v60, %v4822_v25  ;;  %v4940_v40 = vadd.s32 127, %v4939_v50  ;;  %v5032_v9 = vshrl.u32 %v5027_v47, 16  ;;  %v5053_v7 = vand.u32 65535, %v5023_v56 }
 0x4be   : > { %v4824_v18 = vsel %vm4813_vm7, nan, %v4823_v55  ;;  %v4938_v59 = vor.u32 %v4937_v36, %v4936_v21  ;;  %v4952_v30 = vsel %vm9671_vm10, 0, %v4950_v19  ;;  %v9721_v27 = vsel %vm5013_vm11, %v5016_v45, %v5018_v44 }
 0x4bf   : > { %v4941_v24 = vshll.u32 %v4940_v40, 23  ;;  %5302 = vst [vmem:[%s6231_s15 + $0xe0] sm:$0xff] %v4824_v18  ;;  %v5054_v4 = vshrl.u32 %v5023_v56, 16  ;;  %v5033_v41 = vmul.u32 %v5031_v39, %v9630_v37  ;;  %v5034_v48 = vmul.u32 %v5032_v9, %v9630_v37 }
 0x4c0   : > { %v4945_v28 = vcvt.s32.f32 %v4938_v59  ;;  %v5035_v57 = vmul.u32 %v5031_v39, %v9633_v31  ;;  %v5055_v62 = vmul.u32 %v5053_v7, %v9630_v37  ;;  %v5057_v3 = vmul.u32 %v5053_v7, %v9633_v31 }
 0x4c1   : > { %v4942_v32 = vor.u32 4788187, %v4941_v24  ;;  %v5056_v22 = vmul.u32 %v5054_v4, %v9630_v37  ;;  %v9730_v20 = vsub.s32 32, %v9714_v43  ;;  %v5036_v23 = vmul.u32 %v5032_v9, %v9633_v31 }
 0x4c2   : > { %v5037_v29 = vshll.u32 %v5034_v48, 16  ;;  %v5039_v42 = vshll.u32 %v5035_v57, 16  ;;  %v9733_v34 = vadd.s32 3, %v4952_v30  ;;  %v5058_v1 = vmul.u32 %v5054_v4, %v9633_v31 }
 0x4c3   : > { %v4943_v61 = vand.u32 2147483647, %v4942_v32  ;;  %v5059_v58 = vshll.u32 %v5056_v22, 16  ;;  %v5073_v6 = vmul.u32 %v9620_v46, %v9721_v27  ;;  %v5061_v26 = vshll.u32 %v5057_v3, 16 }
 0x4c4   : > { %vm5041_vm14 = vc.u32 %v5033_v41, %v5037_v29  ;;  %v5043_v37 = vadd.s32 %v5037_v29, %v5033_v41  ;;  %v5038_v54 = vshrl.u32 %v5034_v48, 16  ;;  %v5060_v17 = vshrl.u32 %v5056_v22, 16 }
 0x4c5   : > { %v4946_v10 = vmul.f32 %v4945_v28, %v4943_v61  ;;  %v5042_v25 = vsel %vm5041_vm14, 1, %v9971_v63  ;;  %vm5063_vm15 = vc.u32 %v5055_v62, %v5059_v58  ;;  %v5065_v15 = vadd.s32 %v5059_v58, %v5055_v62 }
 0x4c6   : > { %v5044_v50 = vadd.s32 %v5042_v25, %v5036_v23  ;;  %vm5045_vm0 = vc.u32 %v5043_v37, %v5039_v42  ;;  %v5064_v19 = vsel %vm5063_vm15, 1, %v9971_v63  ;;  %v5040_v60 = vshrl.u32 %v5035_v57, 16 }
 0x4c7   : > { %v4947_v21 = vxor.u32 2147483648, %v4946_v10  ;;  %v5046_v31 = vsel %vm5045_vm0, 1, %v9971_v63  ;;  %v5066_v49 = vadd.s32 %v5064_v19, %v5058_v1  ;;  %vm5067_vm1 = vc.u32 %v5065_v15, %v5061_v26 }
 0x4c8   : > { %v5048_v36 = vadd.s32 %v5046_v31, %v5044_v50  ;;  %v5068_v45 = vsel %vm5067_vm1, 1, %v9971_v63  ;;  %v5062_v55 = vshrl.u32 %v5057_v3, 16  ;;  %v9747_v40 = vadd.s32 %v5065_v15, %v5061_v26 }
 0x4c9   : > { %v4948_v46 = vsel %vm4827_vm6, %v4947_v21, %v4946_v10  ;;  %v5070_v44 = vadd.s32 %v5068_v45, %v5066_v49  ;;  %v5152_v59 = vshll.u32 %v9953_v51, %v9714_v43  ;;  %v5153_v47 = vshrl.u32 %v9946_v12, %v9730_v20 }
 0x4ca   : > { %v4951_v11 = vsel %vm9671_vm10, %v9306_v52, %v4948_v46  ;;  %v5049_v18 = vadd.s32 %v5048_v36, %v5038_v54  ;;  %v5155_v39 = vshll.u32 %v9946_v12, %v9714_v43  ;;  %v5156_v33 = vshrl.u32 %v9947_v2, %v9730_v20 }
 0x4cb   : > { %v4953_v56 = vmul.f32 %v4951_v11, %v4951_v11  ;;  %v5071_v24 = vadd.s32 %v5070_v44, %v5060_v17  ;;  %v5161_v9 = vshll.u32 %v9945_v5, %v9714_v43  ;;  %v5158_v27 = vshll.u32 %v9947_v2, %v9714_v43 }
 0x4cc   : > { %v9759_v30 = vadd.s32 %v5049_v18, %v5040_v60  ;;  %v5159_v32 = vshrl.u32 %v9945_v5, %v9730_v20  ;;  %v5162_v12 = vshrl.u32 %v9955_v8, %v9730_v20  ;;  %v5164_v41 = vshll.u32 %v9955_v8, %v9714_v43 }
 0x4cd   : > { %v4954_v7 = vmul.f32 -0.001358992, %v4953_v56  ;;  %v4961_v28 = vmul.f32 -0.00019511016, %v4953_v56  ;;  %v5072_v4 = vadd.s32 %v5071_v24, %v5062_v55  ;;  %v9771_v62 = vor.u32 %v5153_v47, %v5152_v59 }
 0x4ce   : > { %vm5075_vm2 = vc.u32 %v9759_v30, %v9747_v40  ;;  %v9773_v3 = vor.u32 %v5156_v33, %v5155_v39  ;;  %v5163_v2 = vor.u32 %v5162_v12, %v5161_v9  ;;  %v5165_v5 = vshrl.u32 %v9956_v13, %v9730_v20 }
 0x4cf   : > { %v4955_v48 = vadd.f32 0.041655596, %v4954_v7  ;;  %v4962_v57 = vadd.f32 0.008332121, %v4961_v28  ;;  %v5076_v22 = vadd.s32 1, %v5072_v4  ;;  %v5143_v29 = vor.u32 8388608, %v9637_v14 }
 0x4d0   : > { %vm5167_vm3 = vcmp.lt.s32.totalorder %v9649_v16, 1  ;;  %v9779_v43 = vor.u32 %v5159_v32, %v5158_v27  ;;  %v5166_v42 = vor.u32 %v5165_v5, %v5164_v41  ;;  %vm5170_vm4 = vcmp.lt.s32.totalorder %v9649_v16, 4 }
 0x4d1   : > { %v4956_v61 = vmul.f32 %v4955_v48, %v4953_v56  ;;  %v4963_v23 = vmul.f32 %v4962_v57, %v4953_v56  ;;  %v5077_v8 = vsel %vm5075_vm2, %v5076_v22, %v5072_v4  ;;  %vm5169_vm5 = vcmp.lt.s32.totalorder %v9649_v16, 3 }
 0x4d2   : > { %v5078_v10 = vadd.s32 %v5077_v8, %v5073_v6  ;;  %v4970_v37 = vand.u32 3, %v9733_v34  ;;  %vm5168_vm6 = vcmp.lt.s32.totalorder %v9649_v16, 2  ;;  %v5175_v13 = vsel %vm5167_vm3, %v9771_v62, %v9773_v3 }
 0x4d3   : > { %v4957_v1 = vadd.f32 -0.4999988, %v4956_v61  ;;  %v4964_v58 = vadd.f32 -0.16666654, %v4963_v23  ;;  %v5176_v14 = vsel %vm5170_vm4, %v5163_v2, 920167782  ;;  %v5179_v34 = vsel %vm5167_vm3, %v9773_v3, %v9779_v43 }
 0x4d4   : > { %v5079_v25 = vadd.s32 536870912, %v5078_v10  ;;  %v5177_v6 = vsel %vm5169_vm5, %v9779_v43, %v5176_v14  ;;  %v5180_v15 = vsel %vm5170_vm4, %v5166_v42, 1326507024  ;;  %vm4971_vm7 = vcmp.lt.s32.totalorder %v4970_v37, 2 }
 0x4d5   : > { %v4958_v26 = vmul.f32 %v4957_v1, %v4953_v56  ;;  %v4965_v54 = vmul.f32 %v4964_v58, %v4953_v56  ;;  %v5178_v31 = vsel %vm5168_vm6, %v5175_v13, %v5177_v6  ;;  %vm4975_vm8 = vcmp.eq.s32.totalorder %v4970_v37, 2 }
 0x4d6   : > { %v9800_v19 = vshrl.u32 %v5079_v25, 30  ;;  %v5181_v17 = vsel %vm5169_vm5, %v5163_v2, %v5180_v15  ;;  %v9806_v49 = vshll.u32 %v5143_v29, 8  ;;  %v5209_v45 = vshrl.u32 %v5178_v31, 16 }
 0x4d7   : > { %v4959_v21 = vadd.f32 1.0, %v4958_v26  ;;  %v4966_v50 = vadd.f32 1.0, %v4965_v54  ;;  %vm4972_vm9 = vcmp.eq.s32.totalorder %v4970_v37, 0  ;;  %v5182_v55 = vsel %vm5168_vm6, %v5179_v34, %v5181_v17 }
 0x4d8   : > { %v5081_v36 = vshll.u32 %v9800_v19, 30  ;;  %v5184_v44 = vand.u32 65535, %v9806_v49  ;;  %v5185_v56 = vshrl.u32 %v9806_v49, 16  ;;  %v5208_v24 = vand.u32 65535, %v5178_v31 }
 0x4d9   : > { %v4967_v46 = vmul.f32 %v4966_v50, %v4951_v11  ;;  %v4976_v60 = vxor.u32 2147483648, %v4959_v21  ;;  %vm4968_vm10 = vweird.f32 %v9306_v52  ;;  %v5186_v39 = vand.u32 65535, %v5182_v55 }
 0x4da   : > { %v5082_v47 = vsub.s32 %v5078_v10, %v5081_v36  ;;  %v5187_v11 = vshrl.u32 %v5182_v55, 16  ;;  %v5211_v7 = vmul.u32 %v5209_v45, %v5184_v44  ;;  %v5210_v48 = vmul.u32 %v5208_v24, %v5184_v44 }
 0x4db   : > { %v4973_v18 = vxor.u32 2147483648, %v4967_v46  ;;  %v4977_v59 = vsel %vm4975_vm8, %v4976_v60, %v4967_v46  ;;  %v5188_v27 = vmul.u32 %v5186_v39, %v5184_v44  ;;  %v5190_v32 = vmul.u32 %v5186_v39, %v5185_v56 }
 0x4dc   : > { %vm5083_vm11 = vcmp.lt.s32.totalorder %v5082_v47, 0  ;;  %v5084_v9 = vsub.s32 0, %v5082_v47  ;;  %v5189_v4 = vmul.u32 %v5187_v11, %v5184_v44  ;;  %v5191_v22 = vmul.u32 %v5187_v11, %v5185_v56 }
 0x4dd   : > { %v4974_v33 = vsel %vm4972_vm9, %v4959_v21, %v4973_v18  ;;  %v5194_v5 = vshll.u32 %v5190_v32, 16  ;;  %v5212_v52 = vmul.u32 %v5208_v24, %v5185_v56  ;;  %v5214_v61 = vshll.u32 %v5211_v7, 16 }
 0x4de   : > { %v4978_v28 = vsel %vm4971_vm7, %v4974_v33, %v4977_v59  ;;  %v5085_v41 = vsel %vm5083_vm11, %v5084_v9, %v5082_v47  ;;  %v5192_v2 = vshll.u32 %v5189_v4, 16  ;;  %v5151_v29 = vshrl.u32 %v9953_v51, %v9730_v20 }
 0x4df   : > { %v4979_v12 = vsel %vm4968_vm10, nan, %v4978_v28  ;;  %v5086_v57 = vclz %v5085_v41  ;;  %v5074_v42 = vadd.s32 %v9747_v40, %v9759_v30  ;;  %v5193_v1 = vshrl.u32 %v5189_v4, 16 }
 0x4e0   : > { %5303 = vst [vmem:[%s6231_s15 + $0xe8] sm:$0xff] %v4979_v12  ;;  %vm5196_vm12 = vc.u32 %v5188_v27, %v5192_v2  ;;  %v5198_v8 = vadd.s32 %v5192_v2, %v5188_v27  ;;  %vm5218_vm13 = vc.u32 %v5210_v48, %v5214_v61  ;;  %v5213_v37 = vmul.u32 %v5209_v45, %v5185_v56 }
 0x4e1   : > { %v5512_v23 = vadd.s32 4294967294, %v5086_v57  ;;  %v5197_v58 = vsel %vm5196_vm12, 1, %v9971_v63  ;;  %v5216_v26 = vshll.u32 %v5212_v52, 16  ;;  %v5219_v54 = vsel %vm5218_vm13, 1, %v9971_v63 }
 0x4e2   : > { %v5199_v10 = vadd.s32 %v5197_v58, %v5191_v22  ;;  %vm5200_vm15 = vc.u32 %v5198_v8, %v5194_v5  ;;  %v5172_v40 = vsel %vm5170_vm4, %v9779_v43, 2102212464  ;;  %v5195_v30 = vshrl.u32 %v5190_v32, 16 }
 0x4e3   : > { %vm5513_vm14 = vcmp.lt.s32.totalorder %v5512_v23, 0  ;;  %v5201_v14 = vsel %vm5200_vm15, 1, %v9971_v63  ;;  %v5220_v34 = vadd.s32 %v5214_v61, %v5210_v48  ;;  %v5221_v31 = vadd.s32 %v5219_v54, %v5213_v37 }
 0x4e4   : > { %v5089_v13 = vsel %vm5513_vm14, 0, %v5512_v23  ;;  %v5203_v6 = vadd.s32 %v5201_v14, %v5199_v10  ;;  %v5171_v17 = vsel %vm5167_vm3, %v5151_v29, %v9771_v62  ;;  %v5215_v46 = vshrl.u32 %v5211_v7, 16 }
 0x4e5   : > { %v5090_v51 = vsub.s32 32, %v5089_v13  ;;  %v5091_v20 = vshll.u32 %v5082_v47, %v5089_v13  ;;  %v5094_v25 = vsub.s32 4294967266, %v5089_v13  ;;  %vm5222_vm0 = vc.u32 %v5220_v34, %v5216_v26 }
 0x4e6   : > { %v5204_v50 = vadd.s32 %v5203_v6, %v5193_v1  ;;  %v5173_v45 = vsel %vm5169_vm5, %v9773_v3, %v5172_v40  ;;  %v5223_v43 = vsel %vm5222_vm0, 1, %v9971_v63  ;;  %v5217_v55 = vshrl.u32 %v5212_v52, 16 }
 0x4e7   : > { %v5092_v15 = vshrl.u32 %v5074_v42, %v5090_v51  ;;  %v5095_v21 = vadd.s32 127, %v5094_v25  ;;  %v5225_v44 = vadd.s32 %v5223_v43, %v5221_v31  ;;  %v5224_v47 = vadd.s32 %v5220_v34, %v5216_v26 }
 0x4e8   : > { %v5205_v59 = vadd.s32 %v5204_v50, %v5195_v30  ;;  %v5174_v24 = vsel %vm5168_vm6, %v5171_v17, %v5173_v45  ;;  %vm4982_vm2 = vcmp.lt.s32.totalorder %v9552_v0, 0  ;;  %v5104_v63 = vsub.s32 4, %v9800_v19 }
 0x4e9   : > { %v5093_v60 = vor.u32 %v5092_v15, %v5091_v20  ;;  %v5096_v36 = vshll.u32 %v5095_v21, 23  ;;  %v5226_v62 = vadd.s32 %v5225_v44, %v5215_v46  ;;  %v5228_v9 = vmul.u32 %v9806_v49, %v5174_v24 }
 0x4ea   : > { %vm5230_vm1 = vc.u32 %v5205_v59, %v5224_v47  ;;  %vm9840_vm3 = vcmp.le.f32.partialorder %v4980_v35, 0.7853982  ;;  %v5105_v32 = vsel %vm4982_vm2, %v5104_v63, %v9800_v19  ;;  %v5229_v6 = vadd.s32 %v5224_v47, %v5205_v59 }
 0x4eb   : > { %v5097_v56 = vor.u32 4788187, %v5096_v36  ;;  %v5100_v18 = vcvt.s32.f32 %v5093_v60  ;;  %v5227_v11 = vadd.s32 %v5226_v62, %v5217_v55  ;;  %v5107_v48 = vsel %vm9840_vm3, 0, %v5105_v32 }
 0x4ec   : > { %v5124_v61 = vadd.s32 3, %v5107_v48  ;;  %vm5123_vm9 = vweird.f32 %v9552_v0  ;;  %vm5137_vm10 = vcmp.lt.s32.totalorder %v9555_v38, 0  ;;  %vm5136_vm11 = vcmp.le.f32.partialorder %v5135_v53, 0.7853982 }
 0x4ed   : > { %v5098_v39 = vand.u32 2147483647, %v5097_v56  ;;  %v5231_v3 = vadd.s32 1, %v5227_v11  ;;  %vm5278_vm15 = vweird.f32 %v9555_v38 }
 0x4ee   : > { %v5125_v58 = vand.u32 3, %v5124_v61 }
 0x4ef   : > { %v5101_v33 = vmul.f32 %v5100_v18, %v5098_v39  ;;  %v5232_v28 = vsel %vm5230_vm1, %v5231_v3, %v5227_v11 }
 0x4f0   : > { %v5233_v4 = vadd.s32 %v5232_v28, %v5228_v9  ;;  %vm5130_vm5 = vcmp.eq.s32.totalorder %v5125_v58, 2  ;;  %vm5127_vm6 = vcmp.eq.s32.totalorder %v5125_v58, 0  ;;  %vm5126_vm8 = vcmp.lt.s32.totalorder %v5125_v58, 2 }
 0x4f1   : > { %v5102_v16 = vxor.u32 2147483648, %v5101_v33 }
 0x4f2   : > { %v5234_v41 = vadd.s32 536870912, %v5233_v4 }
 0x4f3   : > { %v5103_v27 = vsel %vm4982_vm2, %v5102_v16, %v5101_v33 }
 0x4f4   : > { %v5106_v49 = vsel %vm9840_vm3, %v9552_v0, %v5103_v27  ;;  %v5235_v22 = vshrl.u32 %v5234_v41, 30 }
 0x4f5   : > { %v5108_v12 = vmul.f32 %v5106_v49, %v5106_v49 }
 0x4f6   : > { %v5236_v52 = vshll.u32 %v5235_v22, 30  ;;  %v5259_v59 = vsub.s32 4, %v5235_v22 }
 0x4f7   : > { %v5109_v57 = vmul.f32 -0.001358992, %v5108_v12  ;;  %v5116_v35 = vmul.f32 -0.00019511016, %v5108_v12 }
 0x4f8   : > { %v5237_v8 = vsub.s32 %v5233_v4, %v5236_v52  ;;  %v5260_v24 = vsel %vm5137_vm10, %v5259_v59, %v5235_v22 }
 0x4f9   : > { %v5110_v2 = vadd.f32 0.041655596, %v5109_v57  ;;  %v5117_v5 = vadd.f32 0.008332121, %v5116_v35  ;;  %v5262_v11 = vsel %vm5136_vm11, 0, %v5260_v24 }
 0x4fa   : > { %vm5238_vm4 = vcmp.lt.s32.totalorder %v5237_v8, 0  ;;  %v5239_v1 = vsub.s32 0, %v5237_v8  ;;  %v5279_v7 = vadd.s32 3, %v5262_v11 }
 0x4fb   : > { %v5111_v23 = vmul.f32 %v5110_v2, %v5108_v12  ;;  %v5118_v29 = vmul.f32 %v5117_v5, %v5108_v12 }
 0x4fc   : > { %v5240_v13 = vsel %vm5238_vm4, %v5239_v1, %v5237_v8  ;;  %v5280_v32 = vand.u32 3, %v5279_v7 }
 0x4fd   : > { %v5112_v19 = vadd.f32 -0.4999988, %v5111_v23  ;;  %v5119_v42 = vadd.f32 -0.16666654, %v5118_v29  ;;  %v5241_v14 = vclz %v5240_v13 }
 0x4fe   : > { %vm5285_vm12 = vcmp.eq.s32.totalorder %v5280_v32, 2  ;;  %vm5282_vm13 = vcmp.eq.s32.totalorder %v5280_v32, 0  ;;  %vm5281_vm14 = vcmp.lt.s32.totalorder %v5280_v32, 2 }
 0x4ff   : > { %v5113_v10 = vmul.f32 %v5112_v19, %v5108_v12  ;;  %v5120_v37 = vmul.f32 %v5119_v42, %v5108_v12  ;;  %v5515_v51 = vadd.s32 4294967294, %v5241_v14 }
 0x501   : > { %v5114_v26 = vadd.f32 1.0, %v5113_v10  ;;  %v5121_v54 = vadd.f32 1.0, %v5120_v37  ;;  %vm5516_vm7 = vcmp.lt.s32.totalorder %v5515_v51, 0 }
 0x502   : > { %v5244_v34 = vsel %vm5516_vm7, 0, %v5515_v51 }
 0x503   : > { %v5122_v20 = vmul.f32 %v5121_v54, %v5106_v49  ;;  %v5131_v25 = vxor.u32 2147483648, %v5114_v26  ;;  %v5245_v15 = vsub.s32 32, %v5244_v34  ;;  %v5246_v21 = vshll.u32 %v5237_v8, %v5244_v34 }
 0x504   : > { %v5249_v50 = vsub.s32 4294967266, %v5244_v34 }
 0x505   : > { %v5128_v40 = vxor.u32 2147483648, %v5122_v20  ;;  %v5132_v30 = vsel %vm5130_vm5, %v5131_v25, %v5122_v20  ;;  %v5247_v46 = vshrl.u32 %v5229_v6, %v5245_v15 }
 0x506   : > { %v5250_v60 = vadd.s32 127, %v5249_v50 }
 0x507   : > { %v5129_v31 = vsel %vm5127_vm6, %v5114_v26, %v5128_v40  ;;  %v5248_v45 = vor.u32 %v5247_v46, %v5246_v21 }
 0x508   : > { %v5133_v17 = vsel %vm5126_vm8, %v5129_v31, %v5132_v30  ;;  %v5251_v43 = vshll.u32 %v5250_v60, 23 }
 0x509   : > { %v5134_v36 = vsel %vm5123_vm9, nan, %v5133_v17  ;;  %v5255_v44 = vcvt.s32.f32 %v5248_v45 }
 0x50a   : > { %5304 = vst [vmem:[%s6231_s15 + $0xf0] sm:$0xff] %v5134_v36  ;;  %v5252_v55 = vor.u32 4788187, %v5251_v43 }
 0x50c   : > { %v5253_v56 = vand.u32 2147483647, %v5252_v55 }
 0x50e   : > { %v5256_v18 = vmul.f32 %v5255_v44, %v5253_v56 }
 0x510   : > { %v5257_v0 = vxor.u32 2147483648, %v5256_v18 }
 0x512   : > { %v5258_v47 = vsel %vm5137_vm10, %v5257_v0, %v5256_v18 }
 0x513   : > { %v5261_v62 = vsel %vm5136_vm11, %v9555_v38, %v5258_v47 }
 0x514   : > { %v5263_v39 = vmul.f32 %v5261_v62, %v5261_v62 }
 0x516   : > { %v5264_v33 = vmul.f32 -0.001358992, %v5263_v39  ;;  %v5271_v9 = vmul.f32 -0.00019511016, %v5263_v39 }
 0x518   : > { %v5265_v63 = vadd.f32 0.041655596, %v5264_v33  ;;  %v5272_v3 = vadd.f32 0.008332121, %v5271_v9 }
 0x51a   : > { %v5266_v16 = vmul.f32 %v5265_v63, %v5263_v39  ;;  %v5273_v28 = vmul.f32 %v5272_v3, %v5263_v39 }
 0x51c   : > { %v5267_v27 = vadd.f32 -0.4999988, %v5266_v16  ;;  %v5274_v4 = vadd.f32 -0.16666654, %v5273_v28 }
 0x51e   : > { %v5268_v53 = vmul.f32 %v5267_v27, %v5263_v39  ;;  %v5275_v49 = vmul.f32 %v5274_v4, %v5263_v39 }
 0x520   : > { %v5269_v12 = vadd.f32 1.0, %v5268_v53  ;;  %v5276_v41 = vadd.f32 1.0, %v5275_v49 }
 0x522   : > { %v5277_v48 = vmul.f32 %v5276_v41, %v5261_v62  ;;  %v5286_v57 = vxor.u32 2147483648, %v5269_v12 }
 0x524   : > { %v5283_v35 = vxor.u32 2147483648, %v5277_v48  ;;  %v5287_v22 = vsel %vm5285_vm12, %v5286_v57, %v5277_v48 }
 0x526   : > { %v5284_v2 = vsel %vm5282_vm13, %v5269_v12, %v5283_v35 }
 0x527   : > { %v5288_v5 = vsel %vm5281_vm14, %v5284_v2, %v5287_v22 }
 0x528   : > { %v5289_v52 = vsel %vm5278_vm15, nan, %v5288_v5 }
 0x529   : > { %5305 = vst [vmem:[%s6231_s15 + $0xf8] sm:$0xff] %v5289_v52 }
 0x52a   : > { %5669 = shalt.err (!%p5666_p13)
}
 0x52b   : > { %s5733_s3 = smov 256   ;;  %s5734_s4 = smov 16  }
 0x52c   : > { %5526 = dma.vmem_to_hbm [thread:$0]  (%p5796_p9), %s5322_s23, 4096, %s5324_s24, %s5307_s9, %s5733_s3, %s5733_s3, %s5734_s4  }
 0x52d PF: > { %s5338_s5 = sand.u32 1, %s5704_s6   ;;  %p5533_p0 = pnand %p5414_p12, %p5803_p11 }
 0x52e   : > { %s5339_s12 = scalar_lea.sflag [#allocation4], %s5338_s5 }
 0x52f   : > { %p5534_p1 = pneg %p5533_p0 }
 0x531   : > { %5699 = dma.done.wait (%p5534_p1), %s5339_s12, 4096  }
 0x532   : > { %5701 = vsyncadd (%p5534_p1), %s5339_s12, 4294963200  ;;  %s17_s11 = sadd.s32 1, %s5724_s11   ;;  %s10046_s6 = smov %s5708_s7 }
 0x533   : > { %p14_p2 = scmp.ge.s32.totalorder %s17_s11, 4   ;;  %s10047_s7 = smov %s5712_s8 }
 0x534   : > { %s10048_s8 = smov %s5801_s20  ;;  %s10049_s9 = smov %s5720_s10 }
 0x535   : > { %s10050_s10 = smov %s10052_s14  ;;  %16 = sbr.rel (!%p14_p2) target bundleno = 6 (0x6), region = 69 }
 0x53a   :  { %5345 = vsyncpa [#allocation3], 1 }
 0x53b   :  { %5347 = vsyncpa [#allocation3 + $0x1], 1 }
 0x53c   :  { %5348 = vsyncpa [#allocation4], 1 }
 0x53d   :  { %5350 = vsyncpa [#allocation4 + $0x1], 1 }

</bundles_post_ra>
